<compile_context>
chip_gen: v7x
topology: tpu7x:2x2x1
jax: 0.10.0
libtpu: 0.0.40
codegen_flags: <defaults>
</compile_context>

<pallas_src>
import functools

import jax
import jax.numpy as jnp
from jax.experimental import pallas as pl
from jax.experimental.pallas import tpu as pltpu


def dncnn_kernel(xpad_ref, w0_ref, wmid_ref, bmid_ref, wlast_ref, o_ref,
                 act_ref, *, H, W, features, num_mid, cout, cpad):
    """One grid step = full DnCNN forward for one image.

    xpad_ref:  (1, H+2, W+2, 1)            f32   zero-padded input image
    w0_ref:    (9, F)                      f32   layer-0 per-tap weight rows
    wmid_ref:  (num_mid, 9, F, F)          bf16  per-tap weights, BN folded
    bmid_ref:  (num_mid, F)                f32   folded BN shift
    wlast_ref: (9, cpad, F)                bf16  transposed last-layer weights
    o_ref:     (1, cout, H*W)              f32   lane-dense output
    act_ref:   (H+2, W+2, F)               f32   VMEM scratch (padded act.)
    """
    F = features
    HW = H * W
    TAPS = [(dy, dx) for dy in range(3) for dx in range(3)]

    # Zero only the 1-pixel border (4 thin slabs), not the whole scratch: the
    # interior is fully rewritten by layer 0.  Done every step so each
    # TensorCore's private scratch is initialized under "parallel" sharding.
    act_ref[0:1, :, :] = jnp.zeros((1, W + 2, F), jnp.float32)
    act_ref[H + 1:H + 2, :, :] = jnp.zeros((1, W + 2, F), jnp.float32)
    act_ref[:, 0:1, :] = jnp.zeros((H + 2, 1, F), jnp.float32)
    act_ref[:, W + 1:W + 2, :] = jnp.zeros((H + 2, 1, F), jnp.float32)

    # ---- layer 0: conv(1 -> F) + ReLU as 9 broadcast VPU multiply-adds ----
    # (kills the lane-sparse K=9 im2col matmul; Cin == 1 so each tap is a
    #  scalar image plane times a per-feature weight row)
    xp = xpad_ref[0]                                     # (H+2, W+2, 1) f32
    a = jnp.zeros((H, W, F), jnp.float32)
    for t, (dy, dx) in enumerate(TAPS):
        a = a + xp[dy:dy + H, dx:dx + W, :] * w0_ref[t]
    act_ref[1:H + 1, 1:W + 1, :] = jnp.maximum(a, 0.0)

    def tap(dy, dx):
        # Shifted (HW, F) bf16 view of the padded activation; the zero border
        # is the conv padding.  No 9x-wide im2col slab is ever materialized.
        return act_ref[dy:dy + H, dx:dx + W, :].reshape(HW, F).astype(
            jnp.bfloat16)

    # ---- mid layers: conv + folded-BN bias + ReLU as 9 accumulated K=F dots -
    # TODO(synk): for deep DnCNN (num_of_layers=17 -> num_mid=15) switch this
    # static unroll to lax.fori_loop with dynamic wmid_ref[li] indexing.
    for li in range(num_mid):
        acc = jnp.zeros((HW, F), jnp.float32)
        for t, (dy, dx) in enumerate(TAPS):
            acc = acc + jnp.dot(tap(dy, dx), wmid_ref[li, t],
                                preferred_element_type=jnp.float32)
        a = jnp.maximum(acc + bmid_ref[li], 0.0)
        # TODO(synk): bf16 / interior-aligned scratch (review item) would halve
        # activation bytes; kept f32 so this +1-offset store is a plain
        # unpacked masked store.
        act_ref[1:H + 1, 1:W + 1, :] = a.reshape(H, W, F)

    # ---- last layer: conv(F -> Cout), no BN/ReLU, computed transposed so the
    #      output tile is lane-dense (Cout, HW) and fills all MXU columns. ----
    yt = jnp.zeros((cpad, HW), jnp.float32)
    for t, (dy, dx) in enumerate(TAPS):
        yt = yt + jax.lax.dot_general(
            wlast_ref[t], tap(dy, dx),
            dimension_numbers=(((1,), (1,)), ((), ())),   # contract over F
            preferred_element_type=jnp.float32)
    o_ref[0] = yt[:cout]


def dncnn_forward(x_nchw, layer_params):
    """Fused DnCNN forward.  layer_params[i] = (w_flat (9*Cin,Cout), scale, bias)."""
    N, C, H, W = x_nchw.shape
    features = layer_params[0][0].shape[1]
    num_mid = len(layer_params) - 2
    cout = layer_params[-1][0].shape[1]
    cpad = max(8, ((cout + 7) // 8) * 8)      # pad the tiny Cout matmul M-dim
    HW = H * W
    assert C == 1, "fused layer-0 VPU path assumes a single input channel"
    # TODO(synk): large images (e.g. 180x180) need a spatial row-strip grid
    # axis with per-layer halo (or recompute) so the fused pipeline fits
    # per-generation VMEM (64 MiB on v7x); one grid step currently processes a
    # whole image.

    # NCHW -> padded NHWC; the trailing singleton keeps the in-kernel tap
    # broadcasts reshape-free.  Padding once here replaces any layer-0 im2col.
    x = jnp.transpose(x_nchw, (0, 2, 3, 1)).astype(jnp.float32)
    xpad = jnp.pad(x, ((0, 0), (1, 1), (1, 1), (0, 0)))       # (N,H+2,W+2,1)

    # Fold BN (eval-mode) scale into the conv weights; bias is the folded shift
    # (standard DnCNN convs have bias=False, so no conv bias is dropped).
    w0 = (layer_params[0][0] * layer_params[0][1][None, :]).astype(jnp.float32)
    wmid = jnp.stack([
        (w * s[None, :]).reshape(9, features, features)
        for (w, s, _) in layer_params[1:-1]]).astype(jnp.bfloat16)
    bmid = jnp.stack([b for (_, _, b) in layer_params[1:-1]]
                     ).astype(jnp.float32)                    # (num_mid, F)
    wl, sl, _ = layer_params[-1]
    wlast_t = jnp.transpose((wl * sl[None, :]).reshape(9, features, cout),
                            (0, 2, 1))                        # (9, Cout, F)
    wlast_t = jnp.pad(wlast_t, ((0, 0), (0, cpad - cout), (0, 0))
                      ).astype(jnp.bfloat16)

    kern = functools.partial(dncnn_kernel, H=H, W=W, features=features,
                             num_mid=num_mid, cout=cout, cpad=cpad)
    out = pl.pallas_call(
        kern,
        out_shape=jax.ShapeDtypeStruct((N, cout, HW), jnp.float32),
        grid=(N,),
        in_specs=[
            pl.BlockSpec((1, H + 2, W + 2, 1), lambda n: (n, 0, 0, 0)),
            pl.BlockSpec((9, features), lambda n: (0, 0)),
            pl.BlockSpec((num_mid, 9, features, features),
                         lambda n: (0, 0, 0, 0)),
            pl.BlockSpec((num_mid, features), lambda n: (0, 0)),
            pl.BlockSpec((9, cpad, features), lambda n: (0, 0, 0)),
        ],
        out_specs=pl.BlockSpec((1, cout, HW), lambda n: (n, 0, 0)),
        scratch_shapes=[pltpu.VMEM((H + 2, W + 2, features), jnp.float32)],
        compiler_params=pltpu.CompilerParams(
            dimension_semantics=("parallel",),
            # Tiny at 16x16; raise per generation (<= ~48 MiB on v7x's 64 MiB
            # physical VMEM, up to ~100 MiB on v5e/v6e) once strips grow.
            vmem_limit_bytes=32 * 1024 * 1024),
    )(xpad, w0, wmid, bmid, wlast_t)

    # (N, Cout, HW) is already channel-major; reshape straight to NCHW.
    return out.reshape(N, cout, H, W)


def dncnn_reference(x_nchw, layer_params):
    """Plain-JAX reference using the same f32-layer-0 / bf16-MXU math."""
    N, C, H, W = x_nchw.shape
    n_layers = len(layer_params)
    TAPS = [(dy, dx) for dy in range(3) for dx in range(3)]

    a = jnp.transpose(x_nchw, (0, 2, 3, 1)).astype(jnp.float32)   # NHWC
    for idx, (w, scale, bias) in enumerate(layer_params):
        cin, cf = a.shape[-1], w.shape[1]
        wf = (w * scale[None, :]).astype(jnp.float32).reshape(9, cin, cf)
        mm_dtype = jnp.float32 if idx == 0 else jnp.bfloat16
        ap = jnp.pad(a, ((0, 0), (1, 1), (1, 1), (0, 0)))
        y = jnp.zeros((N, H, W, cf), jnp.float32)
        for t, (dy, dx) in enumerate(TAPS):
            y = y + jnp.einsum(
                "nhwc,cf->nhwf",
                ap[:, dy:dy + H, dx:dx + W, :].astype(mm_dtype),
                wf[t].astype(mm_dtype),
                preferred_element_type=jnp.float32)
        y = y + bias[None, None, None, :]
        a = jnp.maximum(y, 0.0) if idx < n_layers - 1 else y
    return jnp.transpose(a, (0, 3, 1, 2))


def make_params(key, channels=1, num_of_layers=5, features=64, eps=1e-5):
    """Deterministic synthetic parameters matching DnCNN.__init__ shapes."""
    def conv_w(k, cin, cout):
        # torch Conv2d weight (cout,cin,3,3) -> (ky,kx,cin,cout) -> (9*cin,cout)
        w = jax.random.normal(k, (cout, cin, 3, 3), jnp.float32) * 0.05
        return jnp.transpose(w, (2, 3, 1, 0)).reshape(9 * cin, cout)

    keys = jax.random.split(key, 5 * num_of_layers)
    params = []

    # layer 0: conv(channels -> features), no BN (identity scale/shift)
    params.append((conv_w(keys[0], channels, features),
                   jnp.ones((features,), jnp.float32),
                   jnp.zeros((features,), jnp.float32)))

    # middle layers: conv(features -> features) + BatchNorm2d(features), eval
    # TODO(synk): BatchNorm2d is applied in eval mode (running stats folded);
    # PyTorch training-mode batch statistics are not reproduced.
    for li in range(1, num_of_layers - 1):
        kw, kg, kb, km, kv = keys[5 * li: 5 * li + 5]
        w = conv_w(kw, features, features)
        gamma = 1.0 + 0.1 * jax.random.normal(kg, (features,), jnp.float32)
        beta = 0.1 * jax.random.normal(kb, (features,), jnp.float32)
        running_mean = 0.1 * jax.random.normal(km, (features,), jnp.float32)
        running_var = jnp.abs(
            1.0 + 0.1 * jax.random.normal(kv, (features,), jnp.float32))
        scale = gamma / jnp.sqrt(running_var + eps)
        bias = beta - running_mean * scale
        params.append((w, scale, bias))

    # last layer: conv(features -> channels), no BN, no ReLU
    params.append((conv_w(keys[-1], features, channels),
                   jnp.ones((channels,), jnp.float32),
                   jnp.zeros((channels,), jnp.float32)))
    return params


if __name__ == "__main__":
    key = jax.random.PRNGKey(0)
    k_param, k_x = jax.random.split(key)

    channels, num_of_layers = 1, 5
    params = make_params(k_param, channels=channels,
                         num_of_layers=num_of_layers, features=64)

    # PyTorch-style NCHW input: (batch=2, channels=1, 16, 16)
    x = jax.random.normal(k_x, (2, channels, 16, 16), jnp.float32)

    out = jax.block_until_ready(jax.jit(dncnn_forward)(x, params))
    assert out.shape == (2, channels, 16, 16)
    assert bool(jnp.all(jnp.isfinite(out)))

    # Cross-check against a plain-JAX implementation of the same math.
    ref = dncnn_reference(x, params)
    assert jnp.allclose(out, ref, rtol=5e-2, atol=5e-3), \
        float(jnp.max(jnp.abs(out - ref)))
    print("KERNEL_OK")
</pallas_src>

<mosaic_0001>
module attributes {stable_mosaic.version = 11 : i64} {
  func.func @dncnn_kernel(%arg0: i32, %arg1: memref<1x18x18x1xf32, #tpu.memory_space<vmem>>, %arg2: memref<9x64xf32, #tpu.memory_space<vmem>>, %arg3: memref<3x9x64x64xbf16, #tpu.memory_space<vmem>>, %arg4: memref<3x64xf32, #tpu.memory_space<vmem>>, %arg5: memref<9x8x64xbf16, #tpu.memory_space<vmem>>, %arg6: memref<1x1x256xf32, #tpu.memory_space<vmem>>, %arg7: memref<18x18x64xf32, #tpu.memory_space<vmem>>) attributes {dimension_semantics = [#tpu.dimension_semantics<parallel>], iteration_bounds = array<i64: 2>, scalar_prefetch = 0 : i64, scratch_operands = 1 : i64, tpu.core_type = #tpu.core_type<tc>, window_params = [{transform_indices = @transform_0, window_bounds = array<i64: 1, 18, 18, 1>}, {pipeline_mode = #tpu.pipeline_mode<synchronous>, transform_indices = @transform_1, window_bounds = array<i64: 9, 64>}, {pipeline_mode = #tpu.pipeline_mode<synchronous>, transform_indices = @transform_2, window_bounds = array<i64: 3, 9, 64, 64>}, {pipeline_mode = #tpu.pipeline_mode<synchronous>, transform_indices = @transform_3, window_bounds = array<i64: 3, 64>}, {pipeline_mode = #tpu.pipeline_mode<synchronous>, transform_indices = @transform_4, window_bounds = array<i64: 9, 8, 64>}, {transform_indices = @transform_5, window_bounds = array<i64: 1, 1, 256>}]} {
    %cst = arith.constant 0.000000e+00 : f32
    %0 = vector.broadcast %cst : f32 to vector<1x18x64xf32>
    %c0 = arith.constant 0 : index
    %c0_0 = arith.constant 0 : index
    %c0_1 = arith.constant 0 : index
    %1 = vector.load %arg7[%c0, %c0_0, %c0_1] : memref<18x18x64xf32, #tpu.memory_space<vmem>>, vector<1x18x64xf32>
    tpu.vector_store %arg7[%c0, %c0_0, %c0_1], %0 {strides = array<i32>} : memref<18x18x64xf32, #tpu.memory_space<vmem>>, vector<1x18x64xf32>,
    %cst_2 = arith.constant 0.000000e+00 : f32
    %2 = vector.broadcast %cst_2 : f32 to vector<1x18x64xf32>
    %c17 = arith.constant 17 : index
    %c0_3 = arith.constant 0 : index
    %c0_4 = arith.constant 0 : index
    %3 = vector.load %arg7[%c17, %c0_3, %c0_4] : memref<18x18x64xf32, #tpu.memory_space<vmem>>, vector<1x18x64xf32>
    tpu.vector_store %arg7[%c17, %c0_3, %c0_4], %2 {strides = array<i32>} : memref<18x18x64xf32, #tpu.memory_space<vmem>>, vector<1x18x64xf32>,
    %cst_5 = arith.constant 0.000000e+00 : f32
    %4 = vector.broadcast %cst_5 : f32 to vector<18x1x64xf32>
    %c0_6 = arith.constant 0 : index
    %c0_7 = arith.constant 0 : index
    %c0_8 = arith.constant 0 : index
    %5 = vector.load %arg7[%c0_6, %c0_7, %c0_8] : memref<18x18x64xf32, #tpu.memory_space<vmem>>, vector<18x1x64xf32>
    tpu.vector_store %arg7[%c0_6, %c0_7, %c0_8], %4 {strides = array<i32>} : memref<18x18x64xf32, #tpu.memory_space<vmem>>, vector<18x1x64xf32>,
    %cst_9 = arith.constant 0.000000e+00 : f32
    %6 = vector.broadcast %cst_9 : f32 to vector<18x1x64xf32>
    %c0_10 = arith.constant 0 : index
    %c17_11 = arith.constant 17 : index
    %c0_12 = arith.constant 0 : index
    %7 = vector.load %arg7[%c0_10, %c17_11, %c0_12] : memref<18x18x64xf32, #tpu.memory_space<vmem>>, vector<18x1x64xf32>
    tpu.vector_store %arg7[%c0_10, %c17_11, %c0_12], %6 {strides = array<i32>} : memref<18x18x64xf32, #tpu.memory_space<vmem>>, vector<18x1x64xf32>,
    %c0_13 = arith.constant 0 : index
    %c0_14 = arith.constant 0 : index
    %c0_15 = arith.constant 0 : index
    %c0_16 = arith.constant 0 : index
    %8 = vector.load %arg1[%c0_13, %c0_14, %c0_15, %c0_16] : memref<1x18x18x1xf32, #tpu.memory_space<vmem>>, vector<1x18x18x1xf32>
    %9 = vector.shape_cast %8 : vector<1x18x18x1xf32> to vector<18x18x1xf32>
    %cst_17 = arith.constant 0.000000e+00 : f32
    %10 = vector.broadcast %cst_17 : f32 to vector<16x16x64xf32>
    %11 = vector.extract_strided_slice %9 {offsets = [0, 0, 0], sizes = [16, 16, 1], strides = [1, 1, 1]} : vector<18x18x1xf32> to vector<16x16x1xf32>
    %c0_18 = arith.constant 0 : index
    %c0_19 = arith.constant 0 : index
    %12 = vector.load %arg2[%c0_18, %c0_19] : memref<9x64xf32, #tpu.memory_space<vmem>>, vector<1x64xf32>
    %13 = vector.shape_cast %12 : vector<1x64xf32> to vector<64xf32>
    %14 = vector.shape_cast %13 : vector<64xf32> to vector<1x1x64xf32>
    %15 = vector.broadcast %11 : vector<16x16x1xf32> to vector<16x16x64xf32>
    %16 = vector.broadcast %14 : vector<1x1x64xf32> to vector<16x16x64xf32>
    %17 = arith.mulf %15, %16 : vector<16x16x64xf32>
    %18 = arith.addf %10, %17 : vector<16x16x64xf32>
    %19 = vector.extract_strided_slice %9 {offsets = [0, 1, 0], sizes = [16, 16, 1], strides = [1, 1, 1]} : vector<18x18x1xf32> to vector<16x16x1xf32>
    %c1 = arith.constant 1 : index
    %c0_20 = arith.constant 0 : index
    %20 = vector.load %arg2[%c1, %c0_20] : memref<9x64xf32, #tpu.memory_space<vmem>>, vector<1x64xf32>
    %21 = vector.shape_cast %20 : vector<1x64xf32> to vector<64xf32>
    %22 = vector.shape_cast %21 : vector<64xf32> to vector<1x1x64xf32>
    %23 = vector.broadcast %19 : vector<16x16x1xf32> to vector<16x16x64xf32>
    %24 = vector.broadcast %22 : vector<1x1x64xf32> to vector<16x16x64xf32>
    %25 = arith.mulf %23, %24 : vector<16x16x64xf32>
    %26 = arith.addf %18, %25 : vector<16x16x64xf32>
    %27 = vector.extract_strided_slice %9 {offsets = [0, 2, 0], sizes = [16, 16, 1], strides = [1, 1, 1]} : vector<18x18x1xf32> to vector<16x16x1xf32>
    %c2 = arith.constant 2 : index
    %c0_21 = arith.constant 0 : index
    %28 = vector.load %arg2[%c2, %c0_21] : memref<9x64xf32, #tpu.memory_space<vmem>>, vector<1x64xf32>
    %29 = vector.shape_cast %28 : vector<1x64xf32> to vector<64xf32>
    %30 = vector.shape_cast %29 : vector<64xf32> to vector<1x1x64xf32>
    %31 = vector.broadcast %27 : vector<16x16x1xf32> to vector<16x16x64xf32>
    %32 = vector.broadcast %30 : vector<1x1x64xf32> to vector<16x16x64xf32>
    %33 = arith.mulf %31, %32 : vector<16x16x64xf32>
    %34 = arith.addf %26, %33 : vector<16x16x64xf32>
    %35 = vector.extract_strided_slice %9 {offsets = [1, 0, 0], sizes = [16, 16, 1], strides = [1, 1, 1]} : vector<18x18x1xf32> to vector<16x16x1xf32>
    %c3 = arith.constant 3 : index
    %c0_22 = arith.constant 0 : index
    %36 = vector.load %arg2[%c3, %c0_22] : memref<9x64xf32, #tpu.memory_space<vmem>>, vector<1x64xf32>
    %37 = vector.shape_cast %36 : vector<1x64xf32> to vector<64xf32>
    %38 = vector.shape_cast %37 : vector<64xf32> to vector<1x1x64xf32>
    %39 = vector.broadcast %35 : vector<16x16x1xf32> to vector<16x16x64xf32>
    %40 = vector.broadcast %38 : vector<1x1x64xf32> to vector<16x16x64xf32>
    %41 = arith.mulf %39, %40 : vector<16x16x64xf32>
    %42 = arith.addf %34, %41 : vector<16x16x64xf32>
    %43 = vector.extract_strided_slice %9 {offsets = [1, 1, 0], sizes = [16, 16, 1], strides = [1, 1, 1]} : vector<18x18x1xf32> to vector<16x16x1xf32>
    %c4 = arith.constant 4 : index
    %c0_23 = arith.constant 0 : index
    %44 = vector.load %arg2[%c4, %c0_23] : memref<9x64xf32, #tpu.memory_space<vmem>>, vector<1x64xf32>
    %45 = vector.shape_cast %44 : vector<1x64xf32> to vector<64xf32>
    %46 = vector.shape_cast %45 : vector<64xf32> to vector<1x1x64xf32>
    %47 = vector.broadcast %43 : vector<16x16x1xf32> to vector<16x16x64xf32>
    %48 = vector.broadcast %46 : vector<1x1x64xf32> to vector<16x16x64xf32>
    %49 = arith.mulf %47, %48 : vector<16x16x64xf32>
    %50 = arith.addf %42, %49 : vector<16x16x64xf32>
    %51 = vector.extract_strided_slice %9 {offsets = [1, 2, 0], sizes = [16, 16, 1], strides = [1, 1, 1]} : vector<18x18x1xf32> to vector<16x16x1xf32>
    %c5 = arith.constant 5 : index
    %c0_24 = arith.constant 0 : index
    %52 = vector.load %arg2[%c5, %c0_24] : memref<9x64xf32, #tpu.memory_space<vmem>>, vector<1x64xf32>
    %53 = vector.shape_cast %52 : vector<1x64xf32> to vector<64xf32>
    %54 = vector.shape_cast %53 : vector<64xf32> to vector<1x1x64xf32>
    %55 = vector.broadcast %51 : vector<16x16x1xf32> to vector<16x16x64xf32>
    %56 = vector.broadcast %54 : vector<1x1x64xf32> to vector<16x16x64xf32>
    %57 = arith.mulf %55, %56 : vector<16x16x64xf32>
    %58 = arith.addf %50, %57 : vector<16x16x64xf32>
    %59 = vector.extract_strided_slice %9 {offsets = [2, 0, 0], sizes = [16, 16, 1], strides = [1, 1, 1]} : vector<18x18x1xf32> to vector<16x16x1xf32>
    %c6 = arith.constant 6 : index
    %c0_25 = arith.constant 0 : index
    %60 = vector.load %arg2[%c6, %c0_25] : memref<9x64xf32, #tpu.memory_space<vmem>>, vector<1x64xf32>
    %61 = vector.shape_cast %60 : vector<1x64xf32> to vector<64xf32>
    %62 = vector.shape_cast %61 : vector<64xf32> to vector<1x1x64xf32>
    %63 = vector.broadcast %59 : vector<16x16x1xf32> to vector<16x16x64xf32>
    %64 = vector.broadcast %62 : vector<1x1x64xf32> to vector<16x16x64xf32>
    %65 = arith.mulf %63, %64 : vector<16x16x64xf32>
    %66 = arith.addf %58, %65 : vector<16x16x64xf32>
    %67 = vector.extract_strided_slice %9 {offsets = [2, 1, 0], sizes = [16, 16, 1], strides = [1, 1, 1]} : vector<18x18x1xf32> to vector<16x16x1xf32>
    %c7 = arith.constant 7 : index
    %c0_26 = arith.constant 0 : index
    %68 = vector.load %arg2[%c7, %c0_26] : memref<9x64xf32, #tpu.memory_space<vmem>>, vector<1x64xf32>
    %69 = vector.shape_cast %68 : vector<1x64xf32> to vector<64xf32>
    %70 = vector.shape_cast %69 : vector<64xf32> to vector<1x1x64xf32>
    %71 = vector.broadcast %67 : vector<16x16x1xf32> to vector<16x16x64xf32>
    %72 = vector.broadcast %70 : vector<1x1x64xf32> to vector<16x16x64xf32>
    %73 = arith.mulf %71, %72 : vector<16x16x64xf32>
    %74 = arith.addf %66, %73 : vector<16x16x64xf32>
    %75 = vector.extract_strided_slice %9 {offsets = [2, 2, 0], sizes = [16, 16, 1], strides = [1, 1, 1]} : vector<18x18x1xf32> to vector<16x16x1xf32>
    %c8 = arith.constant 8 : index
    %c0_27 = arith.constant 0 : index
    %76 = vector.load %arg2[%c8, %c0_27] : memref<9x64xf32, #tpu.memory_space<vmem>>, vector<1x64xf32>
    %77 = vector.shape_cast %76 : vector<1x64xf32> to vector<64xf32>
    %78 = vector.shape_cast %77 : vector<64xf32> to vector<1x1x64xf32>
    %79 = vector.broadcast %75 : vector<16x16x1xf32> to vector<16x16x64xf32>
    %80 = vector.broadcast %78 : vector<1x1x64xf32> to vector<16x16x64xf32>
    %81 = arith.mulf %79, %80 : vector<16x16x64xf32>
    %82 = arith.addf %74, %81 : vector<16x16x64xf32>
    %cst_28 = arith.constant 0.000000e+00 : f32
    %83 = vector.broadcast %cst_28 : f32 to vector<16x16x64xf32>
    %84 = arith.maximumf %82, %83 : vector<16x16x64xf32>
    %c1_29 = arith.constant 1 : index
    %c1_30 = arith.constant 1 : index
    %c0_31 = arith.constant 0 : index
    %85 = vector.load %arg7[%c1_29, %c1_30, %c0_31] : memref<18x18x64xf32, #tpu.memory_space<vmem>>, vector<16x16x64xf32>
    tpu.vector_store %arg7[%c1_29, %c1_30, %c0_31], %84 {strides = array<i32>} : memref<18x18x64xf32, #tpu.memory_space<vmem>>, vector<16x16x64xf32>,
    %cst_32 = arith.constant 0.000000e+00 : f32
    %86 = vector.broadcast %cst_32 : f32 to vector<256x64xf32>
    %c0_33 = arith.constant 0 : index
    %c0_34 = arith.constant 0 : index
    %c0_35 = arith.constant 0 : index
    %87 = vector.load %arg7[%c0_33, %c0_34, %c0_35] : memref<18x18x64xf32, #tpu.memory_space<vmem>>, vector<16x16x64xf32>
    %88 = vector.shape_cast %87 : vector<16x16x64xf32> to vector<256x64xf32>
    %89 = arith.truncf %88 : vector<256x64xf32> to vector<256x64xbf16>
    %c0_36 = arith.constant 0 : index
    %c0_37 = arith.constant 0 : index
    %c0_38 = arith.constant 0 : index
    %c0_39 = arith.constant 0 : index
    %90 = vector.load %arg3[%c0_36, %c0_37, %c0_38, %c0_39] : memref<3x9x64x64xbf16, #tpu.memory_space<vmem>>, vector<1x1x64x64xbf16>
    %91 = vector.shape_cast %90 : vector<1x1x64x64xbf16> to vector<64x64xbf16>
    %cst_40 = arith.constant dense<0.000000e+00> : vector<256x64xf32>
    %92 = tpu.matmul %89, %91, %cst_40 {dimension_numbers = #tpu.dot_dimension_numbers<[1], [0], [0], [1], [0, 0, 1, 1], [], []>} : vector<256x64xbf16>, vector<64x64xbf16>, vector<256x64xf32> -> vector<256x64xf32>
    %93 = arith.addf %86, %92 : vector<256x64xf32>
    %c0_41 = arith.constant 0 : index
    %c1_42 = arith.constant 1 : index
    %c0_43 = arith.constant 0 : index
    %94 = vector.load %arg7[%c0_41, %c1_42, %c0_43] : memref<18x18x64xf32, #tpu.memory_space<vmem>>, vector<16x16x64xf32>
    %95 = vector.shape_cast %94 : vector<16x16x64xf32> to vector<256x64xf32>
    %96 = arith.truncf %95 : vector<256x64xf32> to vector<256x64xbf16>
    %c0_44 = arith.constant 0 : index
    %c1_45 = arith.constant 1 : index
    %c0_46 = arith.constant 0 : index
    %c0_47 = arith.constant 0 : index
    %97 = vector.load %arg3[%c0_44, %c1_45, %c0_46, %c0_47] : memref<3x9x64x64xbf16, #tpu.memory_space<vmem>>, vector<1x1x64x64xbf16>
    %98 = vector.shape_cast %97 : vector<1x1x64x64xbf16> to vector<64x64xbf16>
    %cst_48 = arith.constant dense<0.000000e+00> : vector<256x64xf32>
    %99 = tpu.matmul %96, %98, %cst_48 {dimension_numbers = #tpu.dot_dimension_numbers<[1], [0], [0], [1], [0, 0, 1, 1], [], []>} : vector<256x64xbf16>, vector<64x64xbf16>, vector<256x64xf32> -> vector<256x64xf32>
    %100 = arith.addf %93, %99 : vector<256x64xf32>
    %c0_49 = arith.constant 0 : index
    %c2_50 = arith.constant 2 : index
    %c0_51 = arith.constant 0 : index
    %101 = vector.load %arg7[%c0_49, %c2_50, %c0_51] : memref<18x18x64xf32, #tpu.memory_space<vmem>>, vector<16x16x64xf32>
    %102 = vector.shape_cast %101 : vector<16x16x64xf32> to vector<256x64xf32>
    %103 = arith.truncf %102 : vector<256x64xf32> to vector<256x64xbf16>
    %c0_52 = arith.constant 0 : index
    %c2_53 = arith.constant 2 : index
    %c0_54 = arith.constant 0 : index
    %c0_55 = arith.constant 0 : index
    %104 = vector.load %arg3[%c0_52, %c2_53, %c0_54, %c0_55] : memref<3x9x64x64xbf16, #tpu.memory_space<vmem>>, vector<1x1x64x64xbf16>
    %105 = vector.shape_cast %104 : vector<1x1x64x64xbf16> to vector<64x64xbf16>
    %cst_56 = arith.constant dense<0.000000e+00> : vector<256x64xf32>
    %106 = tpu.matmul %103, %105, %cst_56 {dimension_numbers = #tpu.dot_dimension_numbers<[1], [0], [0], [1], [0, 0, 1, 1], [], []>} : vector<256x64xbf16>, vector<64x64xbf16>, vector<256x64xf32> -> vector<256x64xf32>
    %107 = arith.addf %100, %106 : vector<256x64xf32>
    %c1_57 = arith.constant 1 : index
    %c0_58 = arith.constant 0 : index
    %c0_59 = arith.constant 0 : index
    %108 = vector.load %arg7[%c1_57, %c0_58, %c0_59] : memref<18x18x64xf32, #tpu.memory_space<vmem>>, vector<16x16x64xf32>
    %109 = vector.shape_cast %108 : vector<16x16x64xf32> to vector<256x64xf32>
    %110 = arith.truncf %109 : vector<256x64xf32> to vector<256x64xbf16>
    %c0_60 = arith.constant 0 : index
    %c3_61 = arith.constant 3 : index
    %c0_62 = arith.constant 0 : index
    %c0_63 = arith.constant 0 : index
    %111 = vector.load %arg3[%c0_60, %c3_61, %c0_62, %c0_63] : memref<3x9x64x64xbf16, #tpu.memory_space<vmem>>, vector<1x1x64x64xbf16>
    %112 = vector.shape_cast %111 : vector<1x1x64x64xbf16> to vector<64x64xbf16>
    %cst_64 = arith.constant dense<0.000000e+00> : vector<256x64xf32>
    %113 = tpu.matmul %110, %112, %cst_64 {dimension_numbers = #tpu.dot_dimension_numbers<[1], [0], [0], [1], [0, 0, 1, 1], [], []>} : vector<256x64xbf16>, vector<64x64xbf16>, vector<256x64xf32> -> vector<256x64xf32>
    %114 = arith.addf %107, %113 : vector<256x64xf32>
    %c1_65 = arith.constant 1 : index
    %c1_66 = arith.constant 1 : index
    %c0_67 = arith.constant 0 : index
    %115 = vector.load %arg7[%c1_65, %c1_66, %c0_67] : memref<18x18x64xf32, #tpu.memory_space<vmem>>, vector<16x16x64xf32>
    %116 = vector.shape_cast %115 : vector<16x16x64xf32> to vector<256x64xf32>
    %117 = arith.truncf %116 : vector<256x64xf32> to vector<256x64xbf16>
    %c0_68 = arith.constant 0 : index
    %c4_69 = arith.constant 4 : index
    %c0_70 = arith.constant 0 : index
    %c0_71 = arith.constant 0 : index
    %118 = vector.load %arg3[%c0_68, %c4_69, %c0_70, %c0_71] : memref<3x9x64x64xbf16, #tpu.memory_space<vmem>>, vector<1x1x64x64xbf16>
    %119 = vector.shape_cast %118 : vector<1x1x64x64xbf16> to vector<64x64xbf16>
    %cst_72 = arith.constant dense<0.000000e+00> : vector<256x64xf32>
    %120 = tpu.matmul %117, %119, %cst_72 {dimension_numbers = #tpu.dot_dimension_numbers<[1], [0], [0], [1], [0, 0, 1, 1], [], []>} : vector<256x64xbf16>, vector<64x64xbf16>, vector<256x64xf32> -> vector<256x64xf32>
    %121 = arith.addf %114, %120 : vector<256x64xf32>
    %c1_73 = arith.constant 1 : index
    %c2_74 = arith.constant 2 : index
    %c0_75 = arith.constant 0 : index
    %122 = vector.load %arg7[%c1_73, %c2_74, %c0_75] : memref<18x18x64xf32, #tpu.memory_space<vmem>>, vector<16x16x64xf32>
    %123 = vector.shape_cast %122 : vector<16x16x64xf32> to vector<256x64xf32>
    %124 = arith.truncf %123 : vector<256x64xf32> to vector<256x64xbf16>
    %c0_76 = arith.constant 0 : index
    %c5_77 = arith.constant 5 : index
    %c0_78 = arith.constant 0 : index
    %c0_79 = arith.constant 0 : index
    %125 = vector.load %arg3[%c0_76, %c5_77, %c0_78, %c0_79] : memref<3x9x64x64xbf16, #tpu.memory_space<vmem>>, vector<1x1x64x64xbf16>
    %126 = vector.shape_cast %125 : vector<1x1x64x64xbf16> to vector<64x64xbf16>
    %cst_80 = arith.constant dense<0.000000e+00> : vector<256x64xf32>
    %127 = tpu.matmul %124, %126, %cst_80 {dimension_numbers = #tpu.dot_dimension_numbers<[1], [0], [0], [1], [0, 0, 1, 1], [], []>} : vector<256x64xbf16>, vector<64x64xbf16>, vector<256x64xf32> -> vector<256x64xf32>
    %128 = arith.addf %121, %127 : vector<256x64xf32>
    %c2_81 = arith.constant 2 : index
    %c0_82 = arith.constant 0 : index
    %c0_83 = arith.constant 0 : index
    %129 = vector.load %arg7[%c2_81, %c0_82, %c0_83] : memref<18x18x64xf32, #tpu.memory_space<vmem>>, vector<16x16x64xf32>
    %130 = vector.shape_cast %129 : vector<16x16x64xf32> to vector<256x64xf32>
    %131 = arith.truncf %130 : vector<256x64xf32> to vector<256x64xbf16>
    %c0_84 = arith.constant 0 : index
    %c6_85 = arith.constant 6 : index
    %c0_86 = arith.constant 0 : index
    %c0_87 = arith.constant 0 : index
    %132 = vector.load %arg3[%c0_84, %c6_85, %c0_86, %c0_87] : memref<3x9x64x64xbf16, #tpu.memory_space<vmem>>, vector<1x1x64x64xbf16>
    %133 = vector.shape_cast %132 : vector<1x1x64x64xbf16> to vector<64x64xbf16>
    %cst_88 = arith.constant dense<0.000000e+00> : vector<256x64xf32>
    %134 = tpu.matmul %131, %133, %cst_88 {dimension_numbers = #tpu.dot_dimension_numbers<[1], [0], [0], [1], [0, 0, 1, 1], [], []>} : vector<256x64xbf16>, vector<64x64xbf16>, vector<256x64xf32> -> vector<256x64xf32>
    %135 = arith.addf %128, %134 : vector<256x64xf32>
    %c2_89 = arith.constant 2 : index
    %c1_90 = arith.constant 1 : index
    %c0_91 = arith.constant 0 : index
    %136 = vector.load %arg7[%c2_89, %c1_90, %c0_91] : memref<18x18x64xf32, #tpu.memory_space<vmem>>, vector<16x16x64xf32>
    %137 = vector.shape_cast %136 : vector<16x16x64xf32> to vector<256x64xf32>
    %138 = arith.truncf %137 : vector<256x64xf32> to vector<256x64xbf16>
    %c0_92 = arith.constant 0 : index
    %c7_93 = arith.constant 7 : index
    %c0_94 = arith.constant 0 : index
    %c0_95 = arith.constant 0 : index
    %139 = vector.load %arg3[%c0_92, %c7_93, %c0_94, %c0_95] : memref<3x9x64x64xbf16, #tpu.memory_space<vmem>>, vector<1x1x64x64xbf16>
    %140 = vector.shape_cast %139 : vector<1x1x64x64xbf16> to vector<64x64xbf16>
    %cst_96 = arith.constant dense<0.000000e+00> : vector<256x64xf32>
    %141 = tpu.matmul %138, %140, %cst_96 {dimension_numbers = #tpu.dot_dimension_numbers<[1], [0], [0], [1], [0, 0, 1, 1], [], []>} : vector<256x64xbf16>, vector<64x64xbf16>, vector<256x64xf32> -> vector<256x64xf32>
    %142 = arith.addf %135, %141 : vector<256x64xf32>
    %c2_97 = arith.constant 2 : index
    %c2_98 = arith.constant 2 : index
    %c0_99 = arith.constant 0 : index
    %143 = vector.load %arg7[%c2_97, %c2_98, %c0_99] : memref<18x18x64xf32, #tpu.memory_space<vmem>>, vector<16x16x64xf32>
    %144 = vector.shape_cast %143 : vector<16x16x64xf32> to vector<256x64xf32>
    %145 = arith.truncf %144 : vector<256x64xf32> to vector<256x64xbf16>
    %c0_100 = arith.constant 0 : index
    %c8_101 = arith.constant 8 : index
    %c0_102 = arith.constant 0 : index
    %c0_103 = arith.constant 0 : index
    %146 = vector.load %arg3[%c0_100, %c8_101, %c0_102, %c0_103] : memref<3x9x64x64xbf16, #tpu.memory_space<vmem>>, vector<1x1x64x64xbf16>
    %147 = vector.shape_cast %146 : vector<1x1x64x64xbf16> to vector<64x64xbf16>
    %cst_104 = arith.constant dense<0.000000e+00> : vector<256x64xf32>
    %148 = tpu.matmul %145, %147, %cst_104 {dimension_numbers = #tpu.dot_dimension_numbers<[1], [0], [0], [1], [0, 0, 1, 1], [], []>} : vector<256x64xbf16>, vector<64x64xbf16>, vector<256x64xf32> -> vector<256x64xf32>
    %149 = arith.addf %142, %148 : vector<256x64xf32>
    %c0_105 = arith.constant 0 : index
    %c0_106 = arith.constant 0 : index
    %150 = vector.load %arg4[%c0_105, %c0_106] : memref<3x64xf32, #tpu.memory_space<vmem>>, vector<1x64xf32>
    %151 = vector.shape_cast %150 : vector<1x64xf32> to vector<64xf32>
    %152 = vector.shape_cast %151 : vector<64xf32> to vector<1x64xf32>
    %153 = vector.broadcast %152 : vector<1x64xf32> to vector<256x64xf32>
    %154 = arith.addf %149, %153 : vector<256x64xf32>
    %cst_107 = arith.constant 0.000000e+00 : f32
    %155 = vector.broadcast %cst_107 : f32 to vector<256x64xf32>
    %156 = arith.maximumf %154, %155 : vector<256x64xf32>
    %157 = vector.shape_cast %156 : vector<256x64xf32> to vector<16x16x64xf32>
    %c1_108 = arith.constant 1 : index
    %c1_109 = arith.constant 1 : index
    %c0_110 = arith.constant 0 : index
    %158 = vector.load %arg7[%c1_108, %c1_109, %c0_110] : memref<18x18x64xf32, #tpu.memory_space<vmem>>, vector<16x16x64xf32>
    tpu.vector_store %arg7[%c1_108, %c1_109, %c0_110], %157 {strides = array<i32>} : memref<18x18x64xf32, #tpu.memory_space<vmem>>, vector<16x16x64xf32>,
    %cst_111 = arith.constant 0.000000e+00 : f32
    %159 = vector.broadcast %cst_111 : f32 to vector<256x64xf32>
    %c0_112 = arith.constant 0 : index
    %c0_113 = arith.constant 0 : index
    %c0_114 = arith.constant 0 : index
    %160 = vector.load %arg7[%c0_112, %c0_113, %c0_114] : memref<18x18x64xf32, #tpu.memory_space<vmem>>, vector<16x16x64xf32>
    %161 = vector.shape_cast %160 : vector<16x16x64xf32> to vector<256x64xf32>
    %162 = arith.truncf %161 : vector<256x64xf32> to vector<256x64xbf16>
    %c1_115 = arith.constant 1 : index
    %c0_116 = arith.constant 0 : index
    %c0_117 = arith.constant 0 : index
    %c0_118 = arith.constant 0 : index
    %163 = vector.load %arg3[%c1_115, %c0_116, %c0_117, %c0_118] : memref<3x9x64x64xbf16, #tpu.memory_space<vmem>>, vector<1x1x64x64xbf16>
    %164 = vector.shape_cast %163 : vector<1x1x64x64xbf16> to vector<64x64xbf16>
    %cst_119 = arith.constant dense<0.000000e+00> : vector<256x64xf32>
    %165 = tpu.matmul %162, %164, %cst_119 {dimension_numbers = #tpu.dot_dimension_numbers<[1], [0], [0], [1], [0, 0, 1, 1], [], []>} : vector<256x64xbf16>, vector<64x64xbf16>, vector<256x64xf32> -> vector<256x64xf32>
    %166 = arith.addf %159, %165 : vector<256x64xf32>
    %c0_120 = arith.constant 0 : index
    %c1_121 = arith.constant 1 : index
    %c0_122 = arith.constant 0 : index
    %167 = vector.load %arg7[%c0_120, %c1_121, %c0_122] : memref<18x18x64xf32, #tpu.memory_space<vmem>>, vector<16x16x64xf32>
    %168 = vector.shape_cast %167 : vector<16x16x64xf32> to vector<256x64xf32>
    %169 = arith.truncf %168 : vector<256x64xf32> to vector<256x64xbf16>
    %c1_123 = arith.constant 1 : index
    %c1_124 = arith.constant 1 : index
    %c0_125 = arith.constant 0 : index
    %c0_126 = arith.constant 0 : index
    %170 = vector.load %arg3[%c1_123, %c1_124, %c0_125, %c0_126] : memref<3x9x64x64xbf16, #tpu.memory_space<vmem>>, vector<1x1x64x64xbf16>
    %171 = vector.shape_cast %170 : vector<1x1x64x64xbf16> to vector<64x64xbf16>
    %cst_127 = arith.constant dense<0.000000e+00> : vector<256x64xf32>
    %172 = tpu.matmul %169, %171, %cst_127 {dimension_numbers = #tpu.dot_dimension_numbers<[1], [0], [0], [1], [0, 0, 1, 1], [], []>} : vector<256x64xbf16>, vector<64x64xbf16>, vector<256x64xf32> -> vector<256x64xf32>
    %173 = arith.addf %166, %172 : vector<256x64xf32>
    %c0_128 = arith.constant 0 : index
    %c2_129 = arith.constant 2 : index
    %c0_130 = arith.constant 0 : index
    %174 = vector.load %arg7[%c0_128, %c2_129, %c0_130] : memref<18x18x64xf32, #tpu.memory_space<vmem>>, vector<16x16x64xf32>
    %175 = vector.shape_cast %174 : vector<16x16x64xf32> to vector<256x64xf32>
    %176 = arith.truncf %175 : vector<256x64xf32> to vector<256x64xbf16>
    %c1_131 = arith.constant 1 : index
    %c2_132 = arith.constant 2 : index
    %c0_133 = arith.constant 0 : index
    %c0_134 = arith.constant 0 : index
    %177 = vector.load %arg3[%c1_131, %c2_132, %c0_133, %c0_134] : memref<3x9x64x64xbf16, #tpu.memory_space<vmem>>, vector<1x1x64x64xbf16>
    %178 = vector.shape_cast %177 : vector<1x1x64x64xbf16> to vector<64x64xbf16>
    %cst_135 = arith.constant dense<0.000000e+00> : vector<256x64xf32>
    %179 = tpu.matmul %176, %178, %cst_135 {dimension_numbers = #tpu.dot_dimension_numbers<[1], [0], [0], [1], [0, 0, 1, 1], [], []>} : vector<256x64xbf16>, vector<64x64xbf16>, vector<256x64xf32> -> vector<256x64xf32>
    %180 = arith.addf %173, %179 : vector<256x64xf32>
    %c1_136 = arith.constant 1 : index
    %c0_137 = arith.constant 0 : index
    %c0_138 = arith.constant 0 : index
    %181 = vector.load %arg7[%c1_136, %c0_137, %c0_138] : memref<18x18x64xf32, #tpu.memory_space<vmem>>, vector<16x16x64xf32>
    %182 = vector.shape_cast %181 : vector<16x16x64xf32> to vector<256x64xf32>
    %183 = arith.truncf %182 : vector<256x64xf32> to vector<256x64xbf16>
    %c1_139 = arith.constant 1 : index
    %c3_140 = arith.constant 3 : index
    %c0_141 = arith.constant 0 : index
    %c0_142 = arith.constant 0 : index
    %184 = vector.load %arg3[%c1_139, %c3_140, %c0_141, %c0_142] : memref<3x9x64x64xbf16, #tpu.memory_space<vmem>>, vector<1x1x64x64xbf16>
    %185 = vector.shape_cast %184 : vector<1x1x64x64xbf16> to vector<64x64xbf16>
    %cst_143 = arith.constant dense<0.000000e+00> : vector<256x64xf32>
    %186 = tpu.matmul %183, %185, %cst_143 {dimension_numbers = #tpu.dot_dimension_numbers<[1], [0], [0], [1], [0, 0, 1, 1], [], []>} : vector<256x64xbf16>, vector<64x64xbf16>, vector<256x64xf32> -> vector<256x64xf32>
    %187 = arith.addf %180, %186 : vector<256x64xf32>
    %c1_144 = arith.constant 1 : index
    %c1_145 = arith.constant 1 : index
    %c0_146 = arith.constant 0 : index
    %188 = vector.load %arg7[%c1_144, %c1_145, %c0_146] : memref<18x18x64xf32, #tpu.memory_space<vmem>>, vector<16x16x64xf32>
    %189 = vector.shape_cast %188 : vector<16x16x64xf32> to vector<256x64xf32>
    %190 = arith.truncf %189 : vector<256x64xf32> to vector<256x64xbf16>
    %c1_147 = arith.constant 1 : index
    %c4_148 = arith.constant 4 : index
    %c0_149 = arith.constant 0 : index
    %c0_150 = arith.constant 0 : index
    %191 = vector.load %arg3[%c1_147, %c4_148, %c0_149, %c0_150] : memref<3x9x64x64xbf16, #tpu.memory_space<vmem>>, vector<1x1x64x64xbf16>
    %192 = vector.shape_cast %191 : vector<1x1x64x64xbf16> to vector<64x64xbf16>
    %cst_151 = arith.constant dense<0.000000e+00> : vector<256x64xf32>
    %193 = tpu.matmul %190, %192, %cst_151 {dimension_numbers = #tpu.dot_dimension_numbers<[1], [0], [0], [1], [0, 0, 1, 1], [], []>} : vector<256x64xbf16>, vector<64x64xbf16>, vector<256x64xf32> -> vector<256x64xf32>
    %194 = arith.addf %187, %193 : vector<256x64xf32>
    %c1_152 = arith.constant 1 : index
    %c2_153 = arith.constant 2 : index
    %c0_154 = arith.constant 0 : index
    %195 = vector.load %arg7[%c1_152, %c2_153, %c0_154] : memref<18x18x64xf32, #tpu.memory_space<vmem>>, vector<16x16x64xf32>
    %196 = vector.shape_cast %195 : vector<16x16x64xf32> to vector<256x64xf32>
    %197 = arith.truncf %196 : vector<256x64xf32> to vector<256x64xbf16>
    %c1_155 = arith.constant 1 : index
    %c5_156 = arith.constant 5 : index
    %c0_157 = arith.constant 0 : index
    %c0_158 = arith.constant 0 : index
    %198 = vector.load %arg3[%c1_155, %c5_156, %c0_157, %c0_158] : memref<3x9x64x64xbf16, #tpu.memory_space<vmem>>, vector<1x1x64x64xbf16>
    %199 = vector.shape_cast %198 : vector<1x1x64x64xbf16> to vector<64x64xbf16>
    %cst_159 = arith.constant dense<0.000000e+00> : vector<256x64xf32>
    %200 = tpu.matmul %197, %199, %cst_159 {dimension_numbers = #tpu.dot_dimension_numbers<[1], [0], [0], [1], [0, 0, 1, 1], [], []>} : vector<256x64xbf16>, vector<64x64xbf16>, vector<256x64xf32> -> vector<256x64xf32>
    %201 = arith.addf %194, %200 : vector<256x64xf32>
    %c2_160 = arith.constant 2 : index
    %c0_161 = arith.constant 0 : index
    %c0_162 = arith.constant 0 : index
    %202 = vector.load %arg7[%c2_160, %c0_161, %c0_162] : memref<18x18x64xf32, #tpu.memory_space<vmem>>, vector<16x16x64xf32>
    %203 = vector.shape_cast %202 : vector<16x16x64xf32> to vector<256x64xf32>
    %204 = arith.truncf %203 : vector<256x64xf32> to vector<256x64xbf16>
    %c1_163 = arith.constant 1 : index
    %c6_164 = arith.constant 6 : index
    %c0_165 = arith.constant 0 : index
    %c0_166 = arith.constant 0 : index
    %205 = vector.load %arg3[%c1_163, %c6_164, %c0_165, %c0_166] : memref<3x9x64x64xbf16, #tpu.memory_space<vmem>>, vector<1x1x64x64xbf16>
    %206 = vector.shape_cast %205 : vector<1x1x64x64xbf16> to vector<64x64xbf16>
    %cst_167 = arith.constant dense<0.000000e+00> : vector<256x64xf32>
    %207 = tpu.matmul %204, %206, %cst_167 {dimension_numbers = #tpu.dot_dimension_numbers<[1], [0], [0], [1], [0, 0, 1, 1], [], []>} : vector<256x64xbf16>, vector<64x64xbf16>, vector<256x64xf32> -> vector<256x64xf32>
    %208 = arith.addf %201, %207 : vector<256x64xf32>
    %c2_168 = arith.constant 2 : index
    %c1_169 = arith.constant 1 : index
    %c0_170 = arith.constant 0 : index
    %209 = vector.load %arg7[%c2_168, %c1_169, %c0_170] : memref<18x18x64xf32, #tpu.memory_space<vmem>>, vector<16x16x64xf32>
    %210 = vector.shape_cast %209 : vector<16x16x64xf32> to vector<256x64xf32>
    %211 = arith.truncf %210 : vector<256x64xf32> to vector<256x64xbf16>
    %c1_171 = arith.constant 1 : index
    %c7_172 = arith.constant 7 : index
    %c0_173 = arith.constant 0 : index
    %c0_174 = arith.constant 0 : index
    %212 = vector.load %arg3[%c1_171, %c7_172, %c0_173, %c0_174] : memref<3x9x64x64xbf16, #tpu.memory_space<vmem>>, vector<1x1x64x64xbf16>
    %213 = vector.shape_cast %212 : vector<1x1x64x64xbf16> to vector<64x64xbf16>
    %cst_175 = arith.constant dense<0.000000e+00> : vector<256x64xf32>
    %214 = tpu.matmul %211, %213, %cst_175 {dimension_numbers = #tpu.dot_dimension_numbers<[1], [0], [0], [1], [0, 0, 1, 1], [], []>} : vector<256x64xbf16>, vector<64x64xbf16>, vector<256x64xf32> -> vector<256x64xf32>
    %215 = arith.addf %208, %214 : vector<256x64xf32>
    %c2_176 = arith.constant 2 : index
    %c2_177 = arith.constant 2 : index
    %c0_178 = arith.constant 0 : index
    %216 = vector.load %arg7[%c2_176, %c2_177, %c0_178] : memref<18x18x64xf32, #tpu.memory_space<vmem>>, vector<16x16x64xf32>
    %217 = vector.shape_cast %216 : vector<16x16x64xf32> to vector<256x64xf32>
    %218 = arith.truncf %217 : vector<256x64xf32> to vector<256x64xbf16>
    %c1_179 = arith.constant 1 : index
    %c8_180 = arith.constant 8 : index
    %c0_181 = arith.constant 0 : index
    %c0_182 = arith.constant 0 : index
    %219 = vector.load %arg3[%c1_179, %c8_180, %c0_181, %c0_182] : memref<3x9x64x64xbf16, #tpu.memory_space<vmem>>, vector<1x1x64x64xbf16>
    %220 = vector.shape_cast %219 : vector<1x1x64x64xbf16> to vector<64x64xbf16>
    %cst_183 = arith.constant dense<0.000000e+00> : vector<256x64xf32>
    %221 = tpu.matmul %218, %220, %cst_183 {dimension_numbers = #tpu.dot_dimension_numbers<[1], [0], [0], [1], [0, 0, 1, 1], [], []>} : vector<256x64xbf16>, vector<64x64xbf16>, vector<256x64xf32> -> vector<256x64xf32>
    %222 = arith.addf %215, %221 : vector<256x64xf32>
    %c1_184 = arith.constant 1 : index
    %c0_185 = arith.constant 0 : index
    %223 = vector.load %arg4[%c1_184, %c0_185] : memref<3x64xf32, #tpu.memory_space<vmem>>, vector<1x64xf32>
    %224 = vector.shape_cast %223 : vector<1x64xf32> to vector<64xf32>
    %225 = vector.shape_cast %224 : vector<64xf32> to vector<1x64xf32>
    %226 = vector.broadcast %225 : vector<1x64xf32> to vector<256x64xf32>
    %227 = arith.addf %222, %226 : vector<256x64xf32>
    %cst_186 = arith.constant 0.000000e+00 : f32
    %228 = vector.broadcast %cst_186 : f32 to vector<256x64xf32>
    %229 = arith.maximumf %227, %228 : vector<256x64xf32>
    %230 = vector.shape_cast %229 : vector<256x64xf32> to vector<16x16x64xf32>
    %c1_187 = arith.constant 1 : index
    %c1_188 = arith.constant 1 : index
    %c0_189 = arith.constant 0 : index
    %231 = vector.load %arg7[%c1_187, %c1_188, %c0_189] : memref<18x18x64xf32, #tpu.memory_space<vmem>>, vector<16x16x64xf32>
    tpu.vector_store %arg7[%c1_187, %c1_188, %c0_189], %230 {strides = array<i32>} : memref<18x18x64xf32, #tpu.memory_space<vmem>>, vector<16x16x64xf32>,
    %cst_190 = arith.constant 0.000000e+00 : f32
    %232 = vector.broadcast %cst_190 : f32 to vector<256x64xf32>
    %c0_191 = arith.constant 0 : index
    %c0_192 = arith.constant 0 : index
    %c0_193 = arith.constant 0 : index
    %233 = vector.load %arg7[%c0_191, %c0_192, %c0_193] : memref<18x18x64xf32, #tpu.memory_space<vmem>>, vector<16x16x64xf32>
    %234 = vector.shape_cast %233 : vector<16x16x64xf32> to vector<256x64xf32>
    %235 = arith.truncf %234 : vector<256x64xf32> to vector<256x64xbf16>
    %c2_194 = arith.constant 2 : index
    %c0_195 = arith.constant 0 : index
    %c0_196 = arith.constant 0 : index
    %c0_197 = arith.constant 0 : index
    %236 = vector.load %arg3[%c2_194, %c0_195, %c0_196, %c0_197] : memref<3x9x64x64xbf16, #tpu.memory_space<vmem>>, vector<1x1x64x64xbf16>
    %237 = vector.shape_cast %236 : vector<1x1x64x64xbf16> to vector<64x64xbf16>
    %cst_198 = arith.constant dense<0.000000e+00> : vector<256x64xf32>
    %238 = tpu.matmul %235, %237, %cst_198 {dimension_numbers = #tpu.dot_dimension_numbers<[1], [0], [0], [1], [0, 0, 1, 1], [], []>} : vector<256x64xbf16>, vector<64x64xbf16>, vector<256x64xf32> -> vector<256x64xf32>
    %239 = arith.addf %232, %238 : vector<256x64xf32>
    %c0_199 = arith.constant 0 : index
    %c1_200 = arith.constant 1 : index
    %c0_201 = arith.constant 0 : index
    %240 = vector.load %arg7[%c0_199, %c1_200, %c0_201] : memref<18x18x64xf32, #tpu.memory_space<vmem>>, vector<16x16x64xf32>
    %241 = vector.shape_cast %240 : vector<16x16x64xf32> to vector<256x64xf32>
    %242 = arith.truncf %241 : vector<256x64xf32> to vector<256x64xbf16>
    %c2_202 = arith.constant 2 : index
    %c1_203 = arith.constant 1 : index
    %c0_204 = arith.constant 0 : index
    %c0_205 = arith.constant 0 : index
    %243 = vector.load %arg3[%c2_202, %c1_203, %c0_204, %c0_205] : memref<3x9x64x64xbf16, #tpu.memory_space<vmem>>, vector<1x1x64x64xbf16>
    %244 = vector.shape_cast %243 : vector<1x1x64x64xbf16> to vector<64x64xbf16>
    %cst_206 = arith.constant dense<0.000000e+00> : vector<256x64xf32>
    %245 = tpu.matmul %242, %244, %cst_206 {dimension_numbers = #tpu.dot_dimension_numbers<[1], [0], [0], [1], [0, 0, 1, 1], [], []>} : vector<256x64xbf16>, vector<64x64xbf16>, vector<256x64xf32> -> vector<256x64xf32>
    %246 = arith.addf %239, %245 : vector<256x64xf32>
    %c0_207 = arith.constant 0 : index
    %c2_208 = arith.constant 2 : index
    %c0_209 = arith.constant 0 : index
    %247 = vector.load %arg7[%c0_207, %c2_208, %c0_209] : memref<18x18x64xf32, #tpu.memory_space<vmem>>, vector<16x16x64xf32>
    %248 = vector.shape_cast %247 : vector<16x16x64xf32> to vector<256x64xf32>
    %249 = arith.truncf %248 : vector<256x64xf32> to vector<256x64xbf16>
    %c2_210 = arith.constant 2 : index
    %c2_211 = arith.constant 2 : index
    %c0_212 = arith.constant 0 : index
    %c0_213 = arith.constant 0 : index
    %250 = vector.load %arg3[%c2_210, %c2_211, %c0_212, %c0_213] : memref<3x9x64x64xbf16, #tpu.memory_space<vmem>>, vector<1x1x64x64xbf16>
    %251 = vector.shape_cast %250 : vector<1x1x64x64xbf16> to vector<64x64xbf16>
    %cst_214 = arith.constant dense<0.000000e+00> : vector<256x64xf32>
    %252 = tpu.matmul %249, %251, %cst_214 {dimension_numbers = #tpu.dot_dimension_numbers<[1], [0], [0], [1], [0, 0, 1, 1], [], []>} : vector<256x64xbf16>, vector<64x64xbf16>, vector<256x64xf32> -> vector<256x64xf32>
    %253 = arith.addf %246, %252 : vector<256x64xf32>
    %c1_215 = arith.constant 1 : index
    %c0_216 = arith.constant 0 : index
    %c0_217 = arith.constant 0 : index
    %254 = vector.load %arg7[%c1_215, %c0_216, %c0_217] : memref<18x18x64xf32, #tpu.memory_space<vmem>>, vector<16x16x64xf32>
    %255 = vector.shape_cast %254 : vector<16x16x64xf32> to vector<256x64xf32>
    %256 = arith.truncf %255 : vector<256x64xf32> to vector<256x64xbf16>
    %c2_218 = arith.constant 2 : index
    %c3_219 = arith.constant 3 : index
    %c0_220 = arith.constant 0 : index
    %c0_221 = arith.constant 0 : index
    %257 = vector.load %arg3[%c2_218, %c3_219, %c0_220, %c0_221] : memref<3x9x64x64xbf16, #tpu.memory_space<vmem>>, vector<1x1x64x64xbf16>
    %258 = vector.shape_cast %257 : vector<1x1x64x64xbf16> to vector<64x64xbf16>
    %cst_222 = arith.constant dense<0.000000e+00> : vector<256x64xf32>
    %259 = tpu.matmul %256, %258, %cst_222 {dimension_numbers = #tpu.dot_dimension_numbers<[1], [0], [0], [1], [0, 0, 1, 1], [], []>} : vector<256x64xbf16>, vector<64x64xbf16>, vector<256x64xf32> -> vector<256x64xf32>
    %260 = arith.addf %253, %259 : vector<256x64xf32>
    %c1_223 = arith.constant 1 : index
    %c1_224 = arith.constant 1 : index
    %c0_225 = arith.constant 0 : index
    %261 = vector.load %arg7[%c1_223, %c1_224, %c0_225] : memref<18x18x64xf32, #tpu.memory_space<vmem>>, vector<16x16x64xf32>
    %262 = vector.shape_cast %261 : vector<16x16x64xf32> to vector<256x64xf32>
    %263 = arith.truncf %262 : vector<256x64xf32> to vector<256x64xbf16>
    %c2_226 = arith.constant 2 : index
    %c4_227 = arith.constant 4 : index
    %c0_228 = arith.constant 0 : index
    %c0_229 = arith.constant 0 : index
    %264 = vector.load %arg3[%c2_226, %c4_227, %c0_228, %c0_229] : memref<3x9x64x64xbf16, #tpu.memory_space<vmem>>, vector<1x1x64x64xbf16>
    %265 = vector.shape_cast %264 : vector<1x1x64x64xbf16> to vector<64x64xbf16>
    %cst_230 = arith.constant dense<0.000000e+00> : vector<256x64xf32>
    %266 = tpu.matmul %263, %265, %cst_230 {dimension_numbers = #tpu.dot_dimension_numbers<[1], [0], [0], [1], [0, 0, 1, 1], [], []>} : vector<256x64xbf16>, vector<64x64xbf16>, vector<256x64xf32> -> vector<256x64xf32>
    %267 = arith.addf %260, %266 : vector<256x64xf32>
    %c1_231 = arith.constant 1 : index
    %c2_232 = arith.constant 2 : index
    %c0_233 = arith.constant 0 : index
    %268 = vector.load %arg7[%c1_231, %c2_232, %c0_233] : memref<18x18x64xf32, #tpu.memory_space<vmem>>, vector<16x16x64xf32>
    %269 = vector.shape_cast %268 : vector<16x16x64xf32> to vector<256x64xf32>
    %270 = arith.truncf %269 : vector<256x64xf32> to vector<256x64xbf16>
    %c2_234 = arith.constant 2 : index
    %c5_235 = arith.constant 5 : index
    %c0_236 = arith.constant 0 : index
    %c0_237 = arith.constant 0 : index
    %271 = vector.load %arg3[%c2_234, %c5_235, %c0_236, %c0_237] : memref<3x9x64x64xbf16, #tpu.memory_space<vmem>>, vector<1x1x64x64xbf16>
    %272 = vector.shape_cast %271 : vector<1x1x64x64xbf16> to vector<64x64xbf16>
    %cst_238 = arith.constant dense<0.000000e+00> : vector<256x64xf32>
    %273 = tpu.matmul %270, %272, %cst_238 {dimension_numbers = #tpu.dot_dimension_numbers<[1], [0], [0], [1], [0, 0, 1, 1], [], []>} : vector<256x64xbf16>, vector<64x64xbf16>, vector<256x64xf32> -> vector<256x64xf32>
    %274 = arith.addf %267, %273 : vector<256x64xf32>
    %c2_239 = arith.constant 2 : index
    %c0_240 = arith.constant 0 : index
    %c0_241 = arith.constant 0 : index
    %275 = vector.load %arg7[%c2_239, %c0_240, %c0_241] : memref<18x18x64xf32, #tpu.memory_space<vmem>>, vector<16x16x64xf32>
    %276 = vector.shape_cast %275 : vector<16x16x64xf32> to vector<256x64xf32>
    %277 = arith.truncf %276 : vector<256x64xf32> to vector<256x64xbf16>
    %c2_242 = arith.constant 2 : index
    %c6_243 = arith.constant 6 : index
    %c0_244 = arith.constant 0 : index
    %c0_245 = arith.constant 0 : index
    %278 = vector.load %arg3[%c2_242, %c6_243, %c0_244, %c0_245] : memref<3x9x64x64xbf16, #tpu.memory_space<vmem>>, vector<1x1x64x64xbf16>
    %279 = vector.shape_cast %278 : vector<1x1x64x64xbf16> to vector<64x64xbf16>
    %cst_246 = arith.constant dense<0.000000e+00> : vector<256x64xf32>
    %280 = tpu.matmul %277, %279, %cst_246 {dimension_numbers = #tpu.dot_dimension_numbers<[1], [0], [0], [1], [0, 0, 1, 1], [], []>} : vector<256x64xbf16>, vector<64x64xbf16>, vector<256x64xf32> -> vector<256x64xf32>
    %281 = arith.addf %274, %280 : vector<256x64xf32>
    %c2_247 = arith.constant 2 : index
    %c1_248 = arith.constant 1 : index
    %c0_249 = arith.constant 0 : index
    %282 = vector.load %arg7[%c2_247, %c1_248, %c0_249] : memref<18x18x64xf32, #tpu.memory_space<vmem>>, vector<16x16x64xf32>
    %283 = vector.shape_cast %282 : vector<16x16x64xf32> to vector<256x64xf32>
    %284 = arith.truncf %283 : vector<256x64xf32> to vector<256x64xbf16>
    %c2_250 = arith.constant 2 : index
    %c7_251 = arith.constant 7 : index
    %c0_252 = arith.constant 0 : index
    %c0_253 = arith.constant 0 : index
    %285 = vector.load %arg3[%c2_250, %c7_251, %c0_252, %c0_253] : memref<3x9x64x64xbf16, #tpu.memory_space<vmem>>, vector<1x1x64x64xbf16>
    %286 = vector.shape_cast %285 : vector<1x1x64x64xbf16> to vector<64x64xbf16>
    %cst_254 = arith.constant dense<0.000000e+00> : vector<256x64xf32>
    %287 = tpu.matmul %284, %286, %cst_254 {dimension_numbers = #tpu.dot_dimension_numbers<[1], [0], [0], [1], [0, 0, 1, 1], [], []>} : vector<256x64xbf16>, vector<64x64xbf16>, vector<256x64xf32> -> vector<256x64xf32>
    %288 = arith.addf %281, %287 : vector<256x64xf32>
    %c2_255 = arith.constant 2 : index
    %c2_256 = arith.constant 2 : index
    %c0_257 = arith.constant 0 : index
    %289 = vector.load %arg7[%c2_255, %c2_256, %c0_257] : memref<18x18x64xf32, #tpu.memory_space<vmem>>, vector<16x16x64xf32>
    %290 = vector.shape_cast %289 : vector<16x16x64xf32> to vector<256x64xf32>
    %291 = arith.truncf %290 : vector<256x64xf32> to vector<256x64xbf16>
    %c2_258 = arith.constant 2 : index
    %c8_259 = arith.constant 8 : index
    %c0_260 = arith.constant 0 : index
    %c0_261 = arith.constant 0 : index
    %292 = vector.load %arg3[%c2_258, %c8_259, %c0_260, %c0_261] : memref<3x9x64x64xbf16, #tpu.memory_space<vmem>>, vector<1x1x64x64xbf16>
    %293 = vector.shape_cast %292 : vector<1x1x64x64xbf16> to vector<64x64xbf16>
    %cst_262 = arith.constant dense<0.000000e+00> : vector<256x64xf32>
    %294 = tpu.matmul %291, %293, %cst_262 {dimension_numbers = #tpu.dot_dimension_numbers<[1], [0], [0], [1], [0, 0, 1, 1], [], []>} : vector<256x64xbf16>, vector<64x64xbf16>, vector<256x64xf32> -> vector<256x64xf32>
    %295 = arith.addf %288, %294 : vector<256x64xf32>
    %c2_263 = arith.constant 2 : index
    %c0_264 = arith.constant 0 : index
    %296 = vector.load %arg4[%c2_263, %c0_264] : memref<3x64xf32, #tpu.memory_space<vmem>>, vector<1x64xf32>
    %297 = vector.shape_cast %296 : vector<1x64xf32> to vector<64xf32>
    %298 = vector.shape_cast %297 : vector<64xf32> to vector<1x64xf32>
    %299 = vector.broadcast %298 : vector<1x64xf32> to vector<256x64xf32>
    %300 = arith.addf %295, %299 : vector<256x64xf32>
    %cst_265 = arith.constant 0.000000e+00 : f32
    %301 = vector.broadcast %cst_265 : f32 to vector<256x64xf32>
    %302 = arith.maximumf %300, %301 : vector<256x64xf32>
    %303 = vector.shape_cast %302 : vector<256x64xf32> to vector<16x16x64xf32>
    %c1_266 = arith.constant 1 : index
    %c1_267 = arith.constant 1 : index
    %c0_268 = arith.constant 0 : index
    %304 = vector.load %arg7[%c1_266, %c1_267, %c0_268] : memref<18x18x64xf32, #tpu.memory_space<vmem>>, vector<16x16x64xf32>
    tpu.vector_store %arg7[%c1_266, %c1_267, %c0_268], %303 {strides = array<i32>} : memref<18x18x64xf32, #tpu.memory_space<vmem>>, vector<16x16x64xf32>,
    %cst_269 = arith.constant 0.000000e+00 : f32
    %305 = vector.broadcast %cst_269 : f32 to vector<8x256xf32>
    %c0_270 = arith.constant 0 : index
    %c0_271 = arith.constant 0 : index
    %c0_272 = arith.constant 0 : index
    %306 = vector.load %arg5[%c0_270, %c0_271, %c0_272] : memref<9x8x64xbf16, #tpu.memory_space<vmem>>, vector<1x8x64xbf16>
    %307 = vector.shape_cast %306 : vector<1x8x64xbf16> to vector<8x64xbf16>
    %c0_273 = arith.constant 0 : index
    %c0_274 = arith.constant 0 : index
    %c0_275 = arith.constant 0 : index
    %308 = vector.load %arg7[%c0_273, %c0_274, %c0_275] : memref<18x18x64xf32, #tpu.memory_space<vmem>>, vector<16x16x64xf32>
    %309 = vector.shape_cast %308 : vector<16x16x64xf32> to vector<256x64xf32>
    %310 = arith.truncf %309 : vector<256x64xf32> to vector<256x64xbf16>
    %cst_276 = arith.constant dense<0.000000e+00> : vector<8x256xf32>
    %311 = tpu.matmul %307, %310, %cst_276 {dimension_numbers = #tpu.dot_dimension_numbers<[1], [1], [0], [0], [0, 0, 1, 0], [], []>} : vector<8x64xbf16>, vector<256x64xbf16>, vector<8x256xf32> -> vector<8x256xf32>
    %312 = arith.addf %305, %311 : vector<8x256xf32>
    %c1_277 = arith.constant 1 : index
    %c0_278 = arith.constant 0 : index
    %c0_279 = arith.constant 0 : index
    %313 = vector.load %arg5[%c1_277, %c0_278, %c0_279] : memref<9x8x64xbf16, #tpu.memory_space<vmem>>, vector<1x8x64xbf16>
    %314 = vector.shape_cast %313 : vector<1x8x64xbf16> to vector<8x64xbf16>
    %c0_280 = arith.constant 0 : index
    %c1_281 = arith.constant 1 : index
    %c0_282 = arith.constant 0 : index
    %315 = vector.load %arg7[%c0_280, %c1_281, %c0_282] : memref<18x18x64xf32, #tpu.memory_space<vmem>>, vector<16x16x64xf32>
    %316 = vector.shape_cast %315 : vector<16x16x64xf32> to vector<256x64xf32>
    %317 = arith.truncf %316 : vector<256x64xf32> to vector<256x64xbf16>
    %cst_283 = arith.constant dense<0.000000e+00> : vector<8x256xf32>
    %318 = tpu.matmul %314, %317, %cst_283 {dimension_numbers = #tpu.dot_dimension_numbers<[1], [1], [0], [0], [0, 0, 1, 0], [], []>} : vector<8x64xbf16>, vector<256x64xbf16>, vector<8x256xf32> -> vector<8x256xf32>
    %319 = arith.addf %312, %318 : vector<8x256xf32>
    %c2_284 = arith.constant 2 : index
    %c0_285 = arith.constant 0 : index
    %c0_286 = arith.constant 0 : index
    %320 = vector.load %arg5[%c2_284, %c0_285, %c0_286] : memref<9x8x64xbf16, #tpu.memory_space<vmem>>, vector<1x8x64xbf16>
    %321 = vector.shape_cast %320 : vector<1x8x64xbf16> to vector<8x64xbf16>
    %c0_287 = arith.constant 0 : index
    %c2_288 = arith.constant 2 : index
    %c0_289 = arith.constant 0 : index
    %322 = vector.load %arg7[%c0_287, %c2_288, %c0_289] : memref<18x18x64xf32, #tpu.memory_space<vmem>>, vector<16x16x64xf32>
    %323 = vector.shape_cast %322 : vector<16x16x64xf32> to vector<256x64xf32>
    %324 = arith.truncf %323 : vector<256x64xf32> to vector<256x64xbf16>
    %cst_290 = arith.constant dense<0.000000e+00> : vector<8x256xf32>
    %325 = tpu.matmul %321, %324, %cst_290 {dimension_numbers = #tpu.dot_dimension_numbers<[1], [1], [0], [0], [0, 0, 1, 0], [], []>} : vector<8x64xbf16>, vector<256x64xbf16>, vector<8x256xf32> -> vector<8x256xf32>
    %326 = arith.addf %319, %325 : vector<8x256xf32>
    %c3_291 = arith.constant 3 : index
    %c0_292 = arith.constant 0 : index
    %c0_293 = arith.constant 0 : index
    %327 = vector.load %arg5[%c3_291, %c0_292, %c0_293] : memref<9x8x64xbf16, #tpu.memory_space<vmem>>, vector<1x8x64xbf16>
    %328 = vector.shape_cast %327 : vector<1x8x64xbf16> to vector<8x64xbf16>
    %c1_294 = arith.constant 1 : index
    %c0_295 = arith.constant 0 : index
    %c0_296 = arith.constant 0 : index
    %329 = vector.load %arg7[%c1_294, %c0_295, %c0_296] : memref<18x18x64xf32, #tpu.memory_space<vmem>>, vector<16x16x64xf32>
    %330 = vector.shape_cast %329 : vector<16x16x64xf32> to vector<256x64xf32>
    %331 = arith.truncf %330 : vector<256x64xf32> to vector<256x64xbf16>
    %cst_297 = arith.constant dense<0.000000e+00> : vector<8x256xf32>
    %332 = tpu.matmul %328, %331, %cst_297 {dimension_numbers = #tpu.dot_dimension_numbers<[1], [1], [0], [0], [0, 0, 1, 0], [], []>} : vector<8x64xbf16>, vector<256x64xbf16>, vector<8x256xf32> -> vector<8x256xf32>
    %333 = arith.addf %326, %332 : vector<8x256xf32>
    %c4_298 = arith.constant 4 : index
    %c0_299 = arith.constant 0 : index
    %c0_300 = arith.constant 0 : index
    %334 = vector.load %arg5[%c4_298, %c0_299, %c0_300] : memref<9x8x64xbf16, #tpu.memory_space<vmem>>, vector<1x8x64xbf16>
    %335 = vector.shape_cast %334 : vector<1x8x64xbf16> to vector<8x64xbf16>
    %c1_301 = arith.constant 1 : index
    %c1_302 = arith.constant 1 : index
    %c0_303 = arith.constant 0 : index
    %336 = vector.load %arg7[%c1_301, %c1_302, %c0_303] : memref<18x18x64xf32, #tpu.memory_space<vmem>>, vector<16x16x64xf32>
    %337 = vector.shape_cast %336 : vector<16x16x64xf32> to vector<256x64xf32>
    %338 = arith.truncf %337 : vector<256x64xf32> to vector<256x64xbf16>
    %cst_304 = arith.constant dense<0.000000e+00> : vector<8x256xf32>
    %339 = tpu.matmul %335, %338, %cst_304 {dimension_numbers = #tpu.dot_dimension_numbers<[1], [1], [0], [0], [0, 0, 1, 0], [], []>} : vector<8x64xbf16>, vector<256x64xbf16>, vector<8x256xf32> -> vector<8x256xf32>
    %340 = arith.addf %333, %339 : vector<8x256xf32>
    %c5_305 = arith.constant 5 : index
    %c0_306 = arith.constant 0 : index
    %c0_307 = arith.constant 0 : index
    %341 = vector.load %arg5[%c5_305, %c0_306, %c0_307] : memref<9x8x64xbf16, #tpu.memory_space<vmem>>, vector<1x8x64xbf16>
    %342 = vector.shape_cast %341 : vector<1x8x64xbf16> to vector<8x64xbf16>
    %c1_308 = arith.constant 1 : index
    %c2_309 = arith.constant 2 : index
    %c0_310 = arith.constant 0 : index
    %343 = vector.load %arg7[%c1_308, %c2_309, %c0_310] : memref<18x18x64xf32, #tpu.memory_space<vmem>>, vector<16x16x64xf32>
    %344 = vector.shape_cast %343 : vector<16x16x64xf32> to vector<256x64xf32>
    %345 = arith.truncf %344 : vector<256x64xf32> to vector<256x64xbf16>
    %cst_311 = arith.constant dense<0.000000e+00> : vector<8x256xf32>
    %346 = tpu.matmul %342, %345, %cst_311 {dimension_numbers = #tpu.dot_dimension_numbers<[1], [1], [0], [0], [0, 0, 1, 0], [], []>} : vector<8x64xbf16>, vector<256x64xbf16>, vector<8x256xf32> -> vector<8x256xf32>
    %347 = arith.addf %340, %346 : vector<8x256xf32>
    %c6_312 = arith.constant 6 : index
    %c0_313 = arith.constant 0 : index
    %c0_314 = arith.constant 0 : index
    %348 = vector.load %arg5[%c6_312, %c0_313, %c0_314] : memref<9x8x64xbf16, #tpu.memory_space<vmem>>, vector<1x8x64xbf16>
    %349 = vector.shape_cast %348 : vector<1x8x64xbf16> to vector<8x64xbf16>
    %c2_315 = arith.constant 2 : index
    %c0_316 = arith.constant 0 : index
    %c0_317 = arith.constant 0 : index
    %350 = vector.load %arg7[%c2_315, %c0_316, %c0_317] : memref<18x18x64xf32, #tpu.memory_space<vmem>>, vector<16x16x64xf32>
    %351 = vector.shape_cast %350 : vector<16x16x64xf32> to vector<256x64xf32>
    %352 = arith.truncf %351 : vector<256x64xf32> to vector<256x64xbf16>
    %cst_318 = arith.constant dense<0.000000e+00> : vector<8x256xf32>
    %353 = tpu.matmul %349, %352, %cst_318 {dimension_numbers = #tpu.dot_dimension_numbers<[1], [1], [0], [0], [0, 0, 1, 0], [], []>} : vector<8x64xbf16>, vector<256x64xbf16>, vector<8x256xf32> -> vector<8x256xf32>
    %354 = arith.addf %347, %353 : vector<8x256xf32>
    %c7_319 = arith.constant 7 : index
    %c0_320 = arith.constant 0 : index
    %c0_321 = arith.constant 0 : index
    %355 = vector.load %arg5[%c7_319, %c0_320, %c0_321] : memref<9x8x64xbf16, #tpu.memory_space<vmem>>, vector<1x8x64xbf16>
    %356 = vector.shape_cast %355 : vector<1x8x64xbf16> to vector<8x64xbf16>
    %c2_322 = arith.constant 2 : index
    %c1_323 = arith.constant 1 : index
    %c0_324 = arith.constant 0 : index
    %357 = vector.load %arg7[%c2_322, %c1_323, %c0_324] : memref<18x18x64xf32, #tpu.memory_space<vmem>>, vector<16x16x64xf32>
    %358 = vector.shape_cast %357 : vector<16x16x64xf32> to vector<256x64xf32>
    %359 = arith.truncf %358 : vector<256x64xf32> to vector<256x64xbf16>
    %cst_325 = arith.constant dense<0.000000e+00> : vector<8x256xf32>
    %360 = tpu.matmul %356, %359, %cst_325 {dimension_numbers = #tpu.dot_dimension_numbers<[1], [1], [0], [0], [0, 0, 1, 0], [], []>} : vector<8x64xbf16>, vector<256x64xbf16>, vector<8x256xf32> -> vector<8x256xf32>
    %361 = arith.addf %354, %360 : vector<8x256xf32>
    %c8_326 = arith.constant 8 : index
    %c0_327 = arith.constant 0 : index
    %c0_328 = arith.constant 0 : index
    %362 = vector.load %arg5[%c8_326, %c0_327, %c0_328] : memref<9x8x64xbf16, #tpu.memory_space<vmem>>, vector<1x8x64xbf16>
    %363 = vector.shape_cast %362 : vector<1x8x64xbf16> to vector<8x64xbf16>
    %c2_329 = arith.constant 2 : index
    %c2_330 = arith.constant 2 : index
    %c0_331 = arith.constant 0 : index
    %364 = vector.load %arg7[%c2_329, %c2_330, %c0_331] : memref<18x18x64xf32, #tpu.memory_space<vmem>>, vector<16x16x64xf32>
    %365 = vector.shape_cast %364 : vector<16x16x64xf32> to vector<256x64xf32>
    %366 = arith.truncf %365 : vector<256x64xf32> to vector<256x64xbf16>
    %cst_332 = arith.constant dense<0.000000e+00> : vector<8x256xf32>
    %367 = tpu.matmul %363, %366, %cst_332 {dimension_numbers = #tpu.dot_dimension_numbers<[1], [1], [0], [0], [0, 0, 1, 0], [], []>} : vector<8x64xbf16>, vector<256x64xbf16>, vector<8x256xf32> -> vector<8x256xf32>
    %368 = arith.addf %361, %367 : vector<8x256xf32>
    %369 = vector.extract_strided_slice %368 {offsets = [0, 0], sizes = [1, 256], strides = [1, 1]} : vector<8x256xf32> to vector<1x256xf32>
    %c0_333 = arith.constant 0 : index
    %c0_334 = arith.constant 0 : index
    %c0_335 = arith.constant 0 : index
    %370 = vector.load %arg6[%c0_333, %c0_334, %c0_335] : memref<1x1x256xf32, #tpu.memory_space<vmem>>, vector<1x1x256xf32>
    %371 = vector.shape_cast %370 : vector<1x1x256xf32> to vector<1x256xf32>
    %372 = vector.shape_cast %369 : vector<1x256xf32> to vector<1x1x256xf32>
    tpu.vector_store %arg6[%c0_333, %c0_334, %c0_335], %372 {strides = array<i32>} : memref<1x1x256xf32, #tpu.memory_space<vmem>>, vector<1x1x256xf32>,
    return
  }
  func.func @transform_0(%arg0: i32) -> (i32, i32, i32, i32) {
    %c0_i32 = arith.constant 0 : i32
    %c0_i32_0 = arith.constant 0 : i32
    %c0_i32_1 = arith.constant 0 : i32
    %c0_i32_2 = arith.constant 0 : i32
    return %arg0, %c0_i32, %c0_i32_0, %c0_i32_1 : i32, i32, i32, i32
  }
  func.func @transform_1(%arg0: i32) -> (i32, i32) {
    %c0_i32 = arith.constant 0 : i32
    %c0_i32_0 = arith.constant 0 : i32
    %c0_i32_1 = arith.constant 0 : i32
    return %c0_i32, %c0_i32_0 : i32, i32
  }
  func.func @transform_2(%arg0: i32) -> (i32, i32, i32, i32) {
    %c0_i32 = arith.constant 0 : i32
    %c0_i32_0 = arith.constant 0 : i32
    %c0_i32_1 = arith.constant 0 : i32
    %c0_i32_2 = arith.constant 0 : i32
    %c0_i32_3 = arith.constant 0 : i32
    return %c0_i32, %c0_i32_0, %c0_i32_1, %c0_i32_2 : i32, i32, i32, i32
  }
  func.func @transform_3(%arg0: i32) -> (i32, i32) {
    %c0_i32 = arith.constant 0 : i32
    %c0_i32_0 = arith.constant 0 : i32
    %c0_i32_1 = arith.constant 0 : i32
    return %c0_i32, %c0_i32_0 : i32, i32
  }
  func.func @transform_4(%arg0: i32) -> (i32, i32, i32) {
    %c0_i32 = arith.constant 0 : i32
    %c0_i32_0 = arith.constant 0 : i32
    %c0_i32_1 = arith.constant 0 : i32
    %c0_i32_2 = arith.constant 0 : i32
    return %c0_i32, %c0_i32_0, %c0_i32_1 : i32, i32, i32
  }
  func.func @transform_5(%arg0: i32) -> (i32, i32, i32) {
    %c0_i32 = arith.constant 0 : i32
    %c0_i32_0 = arith.constant 0 : i32
    %c0_i32_1 = arith.constant 0 : i32
    return %arg0, %c0_i32, %c0_i32_0 : i32, i32, i32
  }
}

</mosaic_0001>

<bundles_post_ra>
// kernel: dncnn_forward.1
= control target key start
LH: loop header
LB: loop body
LE: loop exit
PB: predicated region body
PF: predicated region fallthrough
CT: control target
= control target key end

     0   :  { %s16140_s18 = smov 0   ;;  %s19975_s0 = inlined_call_operand.vmem [shape: f32[2,18,18,1], index: 0, kind: input, shape index: {}]   ;;  %s19976_s1 = inlined_call_operand.vmem [shape: f32[9,64], index: 1, kind: input, shape index: {}]   ;;  %s19977_s2 = inlined_call_operand.vmem [shape: bf16[3,9,64,64], index: 2, kind: input, shape index: {}]   ;;  %s19978_s3 = inlined_call_operand.vmem [shape: f32[3,64], index: 3, kind: input, shape index: {}]   ;;  %s19979_s4 = inlined_call_operand.vmem [shape: bf16[9,8,64], index: 4, kind: input, shape index: {}]   ;;  %s19980_s5 = inlined_call_operand.vmem [shape: f32[2,1,256], index: 5, kind: output, shape index: {}]  }
   0x1 LB: > { %s12510_s19 = sadd.s32 4294967295, %s16105_s18   ;;  %p12514_p0 = scmp.ge.s32.totalorder %s16105_s18, 1  ;;  %s16105_s18 = sphi %s16140_s18, %s15_s18  }
   0x2   : > { %p187_p1 = scmp.lt.s32.totalorder %s16105_s18, 3 }
   0x4   : > { %p188_p2 = pnand %p12514_p0, %p187_p1 }
   0x5   : > { %p214_p3 = scmp.lt.s32.totalorder (!%p188_p2), %s12510_s19, 1  ;;  %v16107_v0 = vmov (!%p188_p2), 0   ;;  %v15972_v27 = vld [vmem:[%s19977_s2 + $0x20] sm:$0xff] (!%p188_p2)   ;;  %v15973_v34 = vld [vmem:[%s19977_s2 + $0x28] sm:$0xff] (!%p188_p2)   ;;  %vm224_vm0 = vcmask (!%p188_p2), 523264   ;;  %v15974_v43 = vld [vmem:[%s19977_s2 + $0x30] sm:$0xff] (!%p188_p2)  }
   0x6   : > { %191 = sbr.rel (%p188_p2) target bundleno = 3401 (0xd49), region = 40  ;;  %15971 = vset.pattern.permute.xlu1 (!%p188_p2), %v16107_v0  ;;  %15970 = vset.pattern.permute.xlu0 (!%p188_p2), %v16107_v0  ;;  %vm227_vm1 = vcmask (!%p188_p2), 517120   ;;  %v15975_v48 = vld [vmem:[%s19977_s2 + $0x38] sm:$0xff] (!%p188_p2)   ;;  %v16108_v49 = vmov (!%p188_p2), 0.0   ;;  %v16236_v63 = vld [vmem:[%s19976_s1 + $0x1] ss:$0 sm:$0xff] (!%p188_p2) }
   0x7   : > { %13998 = vmatprep.subr.bf16.mxu0 (!%p188_p2), %v15972_v27  ;;  %15078 = vmatprep.subr.bf16.mxu1 (!%p188_p2), %v15972_v27  ;;  %225 = vst.msk [vmem:[#allocation2] sm:$0xff] (!%p188_p2), %vm224_vm0, %v16108_v49  ;;  %226 = vst.msk [vmem:[#allocation2 + $0x8] sm:$0xff] (!%p188_p2), %vm224_vm0, %v16108_v49  ;;  %vm734_vm2 = vcmask (!%p188_p2), 1046528   ;;  %vm980_vm3 = vcmask (!%p188_p2), 1045504   ;;  %vm233_vm4 = vcmask (!%p188_p2), 516096  }
   0x8   : > { %13999 = vmatpush3.bf16.msra.mxu0 (!%p188_p2), %v15972_v27  ;;  %15082 = vmatpush3.bf16.msra.mxu1 (!%p188_p2), %v15972_v27  ;;  %228 = vst.msk [vmem:[#allocation2 + $0x10] sm:$0x3] (!%p188_p2), %vm227_vm1, %v16108_v49  ;;  %232 = vst.msk [vmem:[#allocation2 + $0x1a8] sm:$0x3] (!%p188_p2), %vm227_vm1, %v16108_v49 }
   0x9   : > { %14000 = vmatprep.subr.bf16.mxu0 (!%p188_p2), %v15973_v34  ;;  %15079 = vmatprep.subr.bf16.mxu1 (!%p188_p2), %v15973_v34  ;;  %230 = vst.msk [vmem:[#allocation2 + $0x198] sm:$0xff] (!%p188_p2), %vm224_vm0, %v16108_v49  ;;  %231 = vst.msk [vmem:[#allocation2 + $0x1a0] sm:$0xff] (!%p188_p2), %vm224_vm0, %v16108_v49 }
   0xa   : > { %234 = vst.msk [vmem:[#allocation2] sm:$0x1] (!%p188_p2), %vm233_vm4, %v16108_v49  ;;  %235 = vst.msk [vmem:[#allocation2 + $0x18] sm:$0x1] (!%p188_p2), %vm233_vm4, %v16108_v49 }
   0xb   : > { %236 = vst.msk [vmem:[#allocation2 + $0x30] sm:$0x1] (!%p188_p2), %vm233_vm4, %v16108_v49  ;;  %237 = vst.msk [vmem:[#allocation2 + $0x48] sm:$0x1] (!%p188_p2), %vm233_vm4, %v16108_v49 }
   0xc   : > { %14001 = vmatpush3.bf16.msra.mxu0 (!%p188_p2), %v15973_v34  ;;  %15083 = vmatpush3.bf16.msra.mxu1 (!%p188_p2), %v15973_v34  ;;  %238 = vst.msk [vmem:[#allocation2 + $0x60] sm:$0x1] (!%p188_p2), %vm233_vm4, %v16108_v49  ;;  %239 = vst.msk [vmem:[#allocation2 + $0x78] sm:$0x1] (!%p188_p2), %vm233_vm4, %v16108_v49 }
   0xd   : > { %s19982_s19 = smov (!%p214_p3, %s12510_s19), 1  ;;  %14002 = vmatprep.subr.bf16.mxu0 %v15974_v43  ;;  %15080 = vmatprep.subr.bf16.mxu1 %v15974_v43  ;;  %240 = vst.msk [vmem:[#allocation2 + $0x90] sm:$0x1] %vm233_vm4, %v16108_v49  ;;  %241 = vst.msk [vmem:[#allocation2 + $0xa8] sm:$0x1] %vm233_vm4, %v16108_v49 }
   0xe   : > { %s15958_s20 = smul.u32 432, %s19982_s19  ;;  %v2394_v54 = vld [vmem:[#allocation2 + $0x1] sm:$0xff]  ;;  %242 = vst.msk [vmem:[#allocation2 + $0xc0] sm:$0x1] %vm233_vm4, %v16108_v49  ;;  %243 = vst.msk [vmem:[#allocation2 + $0xd8] sm:$0x1] %vm233_vm4, %v16108_v49 }
   0xf   : > { %v2395_v55 = vld [vmem:[#allocation2 + $0x9] sm:$0xff]  ;;  %244 = vst.msk [vmem:[#allocation2 + $0xf0] sm:$0x1] %vm233_vm4, %v16108_v49  ;;  %245 = vst.msk [vmem:[#allocation2 + $0x108] sm:$0x1] %vm233_vm4, %v16108_v49  ;;  %s12516_s21 = sshll.u32 %s19982_s19, 1 }
  0x10   : > { %s16154_s23 = scalar_lea.vmem %s19975_s0, %s15958_s20  ;;  %14003 = vmatpush3.bf16.msra.mxu0 %v15974_v43  ;;  %15084 = vmatpush3.bf16.msra.mxu1 %v15974_v43  ;;  %v2426_v56 = vpack.c.bf16 %v2395_v55, %v2394_v54  ;;  %246 = vst.msk [vmem:[#allocation2 + $0x120] sm:$0x1] %vm233_vm4, %v16108_v49  ;;  %247 = vst.msk [vmem:[#allocation2 + $0x138] sm:$0x1] %vm233_vm4, %v16108_v49  ;;  %s222_s24 = scalar_lea.vmem %s19980_s5, %s12516_s21 }
  0x11   : > { %v272_v1 = vld [vmem:[%s16154_s23 + $0x10] sm:$0x3]  ;;  %v270_v2 = vld [vmem:[%s16154_s23] sm:$0xff]  ;;  %v273_v3 = vld [vmem:[%s16154_s23 + $0x18] sm:$0xff]  ;;  %14004 = vmatprep.subr.bf16.mxu0 %v15975_v48  ;;  %15081 = vmatprep.subr.bf16.mxu1 %v15975_v48  ;;  %248 = vst.msk [vmem:[#allocation2 + $0x150] sm:$0x1] %vm233_vm4, %v16108_v49 }
  0x12   : > { %556 = vperm.xlu1 %15971, %v272_v1   ;;  %327 = vperm.xlu0 %15970, %v270_v2   ;;  %v271_v4 = vld [vmem:[%s16154_s23 + $0x8] sm:$0xff]  ;;  %v274_v6 = vld [vmem:[%s16154_s23 + $0x20] sm:$0xff]  ;;  %v277_v7 = vld [vmem:[%s16154_s23 + $0x38] sm:$0xff]  ;;  %249 = vst.msk [vmem:[#allocation2 + $0x168] sm:$0x1] %vm233_vm4, %v16108_v49 }
  0x13   : > { %v275_v5 = vld [vmem:[%s16154_s23 + $0x28] sm:$0x3]  ;;  %v276_v8 = vld [vmem:[%s16154_s23 + $0x30] sm:$0xff]  ;;  %v278_v10 = vld [vmem:[%s16154_s23 + $0x40] sm:$0x3]  ;;  %14006 = vmatprep.mubr.msk.bf16.mxu0 %vm224_vm0, %v2426_v56 }
  0x14   : > { %v279_v9 = vld [vmem:[%s16154_s23 + $0x48] sm:$0xff]  ;;  %v281_v11 = vld [vmem:[%s16154_s23 + $0x58] sm:$0x3]  ;;  %v280_v12 = vld [vmem:[%s16154_s23 + $0x50] sm:$0xff]  ;;  %14005 = vmatpush3.bf16.msra.mxu0 %v15975_v48  ;;  %15085 = vmatpush3.bf16.msra.mxu1 %v15975_v48  ;;  %250 = vst.msk [vmem:[#allocation2 + $0x180] sm:$0x1] %vm233_vm4, %v16108_v49 }
  0x15   : > { %v283_v13 = vld [vmem:[%s16154_s23 + $0x68] sm:$0xff]  ;;  %v282_v14 = vld [vmem:[%s16154_s23 + $0x60] sm:$0xff]  ;;  %v285_v15 = vld [vmem:[%s16154_s23 + $0x78] sm:$0xff]  ;;  %251 = vst.msk [vmem:[#allocation2 + $0x198] sm:$0x1] %vm233_vm4, %v16108_v49 }
  0x16   : > { %337 = vperm.xlu1 %15971, %v273_v3   ;;  %332 = vperm.xlu0 %15970, %v271_v4   ;;  %v284_v16 = vld [vmem:[%s16154_s23 + $0x70] sm:$0x3]  ;;  %v287_v17 = vld [vmem:[%s16154_s23 + $0x88] sm:$0x3]  ;;  %v286_v18 = vld [vmem:[%s16154_s23 + $0x80] sm:$0xff] }
  0x17   : > { %v289_v19 = vld [vmem:[%s16154_s23 + $0x98] sm:$0xff]  ;;  %v288_v20 = vld [vmem:[%s16154_s23 + $0x90] sm:$0xff]  ;;  %v291_v21 = vld [vmem:[%s16154_s23 + $0xa8] sm:$0xff]  ;;  %252 = vst.msk [vmem:[#allocation2 + $0x11] sm:$0x1] %vm233_vm4, %v16108_v49 }
  0x18   : > { %v290_v22 = vld [vmem:[%s16154_s23 + $0xa0] sm:$0x3]  ;;  %v293_v23 = vld [vmem:[%s16154_s23 + $0xb8] sm:$0x3]  ;;  %v292_v24 = vld [vmem:[%s16154_s23 + $0xb0] sm:$0xff] }
  0x19   : > { %v295_v25 = vld [vmem:[%s16154_s23 + $0xc8] sm:$0xff]  ;;  %v294_v26 = vld [vmem:[%s16154_s23 + $0xc0] sm:$0xff]  ;;  %v297_v28 = vld [vmem:[%s16154_s23 + $0xd8] sm:$0xff]  ;;  %253 = vst.msk [vmem:[#allocation2 + $0x29] sm:$0x1] %vm233_vm4, %v16108_v49 }
  0x1a   : > { %561 = vperm.xlu1 %15971, %v275_v5   ;;  %342 = vperm.xlu0 %15970, %v274_v6   ;;  %v296_v29 = vld [vmem:[%s16154_s23 + $0xd0] sm:$0x3]  ;;  %v299_v30 = vld [vmem:[%s16154_s23 + $0xe8] sm:$0x3]  ;;  %v298_v31 = vld [vmem:[%s16154_s23 + $0xe0] sm:$0xff] }
  0x1b   : > { %v301_v32 = vld [vmem:[%s16154_s23 + $0xf8] sm:$0xff]  ;;  %v300_v33 = vld [vmem:[%s16154_s23 + $0xf0] sm:$0xff]  ;;  %v303_v35 = vld [vmem:[%s16154_s23 + $0x108] sm:$0xff]  ;;  %254 = vst.msk [vmem:[#allocation2 + $0x41] sm:$0x1] %vm233_vm4, %v16108_v49 }
  0x1c   : > { %v302_v36 = vld [vmem:[%s16154_s23 + $0x100] sm:$0x3]  ;;  %v305_v37 = vld [vmem:[%s16154_s23 + $0x118] sm:$0x3]  ;;  %v304_v38 = vld [vmem:[%s16154_s23 + $0x110] sm:$0xff] }
  0x1d   : > { %v307_v39 = vld [vmem:[%s16154_s23 + $0x128] sm:$0xff]  ;;  %v306_v40 = vld [vmem:[%s16154_s23 + $0x120] sm:$0xff]  ;;  %v309_v41 = vld [vmem:[%s16154_s23 + $0x138] sm:$0xff]  ;;  %255 = vst.msk [vmem:[#allocation2 + $0x59] sm:$0x1] %vm233_vm4, %v16108_v49 }
  0x1e   : > { %352 = vperm.xlu1 %15971, %v277_v7   ;;  %347 = vperm.xlu0 %15970, %v276_v8   ;;  %v308_v42 = vld [vmem:[%s16154_s23 + $0x130] sm:$0x3]  ;;  %v311_v44 = vld [vmem:[%s16154_s23 + $0x148] sm:$0x3]  ;;  %v310_v45 = vld [vmem:[%s16154_s23 + $0x140] sm:$0xff] }
  0x1f   : > { %v313_v46 = vld [vmem:[%s16154_s23 + $0x158] sm:$0xff]  ;;  %v312_v47 = vld [vmem:[%s16154_s23 + $0x150] sm:$0xff]  ;;  %v315_v50 = vld [vmem:[%s16154_s23 + $0x168] sm:$0xff]  ;;  %256 = vst.msk [vmem:[#allocation2 + $0x71] sm:$0x1] %vm233_vm4, %v16108_v49 }
  0x20   : > { %v314_v51 = vld [vmem:[%s16154_s23 + $0x160] sm:$0x3]  ;;  %v317_v52 = vld [vmem:[%s16154_s23 + $0x178] sm:$0x3]  ;;  %v316_v53 = vld [vmem:[%s16154_s23 + $0x170] sm:$0xff] }
  0x21   : > { %v319_v57 = vld [vmem:[%s16154_s23 + $0x188] sm:$0xff]  ;;  %v318_v58 = vld [vmem:[%s16154_s23 + $0x180] sm:$0xff]  ;;  %v321_v59 = vld [vmem:[%s16154_s23 + $0x198] sm:$0xff]  ;;  %257 = vst.msk [vmem:[#allocation2 + $0x89] sm:$0x1] %vm233_vm4, %v16108_v49 }
  0x22   : > { %357 = vperm.xlu1 %15971, %v279_v9   ;;  %566 = vperm.xlu0 %15970, %v278_v10   ;;  %v320_v60 = vld [vmem:[%s16154_s23 + $0x190] sm:$0x3]  ;;  %v323_v61 = vld [vmem:[%s16154_s23 + $0x1a8] sm:$0x3]  ;;  %v322_v62 = vld [vmem:[%s16154_s23 + $0x1a0] sm:$0xff] }
  0x23   : > { %v16241_v2 = vld [vmem:[%s19976_s1 + $0x2] ss:$0 sm:$0xff]  ;;  %v16247_v4 = vld [vmem:[%s19976_s1] ss:$0 sm:$0xff]  ;;  %v16255_v8 = vld [vmem:[%s19976_s1 + $0x4] ss:$0 sm:$0xff] }
  0x24   : > { %258 = vst.msk [vmem:[#allocation2 + $0xa1] sm:$0x1] %vm233_vm4, %v16108_v49  ;;  %259 = vst.msk [vmem:[#allocation2 + $0xb9] sm:$0x1] %vm233_vm4, %v16108_v49 }
  0x25   : > { %260 = vst.msk [vmem:[#allocation2 + $0xd1] sm:$0x1] %vm233_vm4, %v16108_v49  ;;  %261 = vst.msk [vmem:[#allocation2 + $0xe9] sm:$0x1] %vm233_vm4, %v16108_v49 }
  0x26   : > { %571 = vperm.xlu1 %15971, %v281_v11   ;;  %362 = vperm.xlu0 %15970, %v280_v12   ;;  %v16261_v12 = vld [vmem:[%s19976_s1 + $0x3] ss:$0 sm:$0xff]  ;;  %262 = vst.msk [vmem:[#allocation2 + $0x101] sm:$0x1] %vm233_vm4, %v16108_v49  ;;  %263 = vst.msk [vmem:[#allocation2 + $0x119] sm:$0x1] %vm233_vm4, %v16108_v49 }
  0x27   : > { %264 = vst.msk [vmem:[#allocation2 + $0x131] sm:$0x1] %vm233_vm4, %v16108_v49  ;;  %265 = vst.msk [vmem:[#allocation2 + $0x149] sm:$0x1] %vm233_vm4, %v16108_v49 }
  0x28   : > { %266 = vst.msk [vmem:[#allocation2 + $0x161] sm:$0x1] %vm233_vm4, %v16108_v49  ;;  %267 = vst.msk [vmem:[#allocation2 + $0x179] sm:$0x1] %vm233_vm4, %v16108_v49 }
  0x29   : > { %268 = vst.msk [vmem:[#allocation2 + $0x191] sm:$0x1] %vm233_vm4, %v16108_v49  ;;  %269 = vst.msk [vmem:[#allocation2 + $0x1a9] sm:$0x1] %vm233_vm4, %v16108_v49 }
  0x2a   : > { %372 = vperm.xlu1 %15971, %v283_v13   ;;  %367 = vperm.xlu0 %15970, %v282_v14   ;;  %v16266_v14 = vld [vmem:[%s19976_s1 + $0x5] ss:$0 sm:$0xff] }
  0x2e   : > { %377 = vperm.xlu1 %15971, %v285_v15   ;;  %576 = vperm.xlu0 %15970, %v284_v16  }
  0x32   : > { %581 = vperm.xlu1 %15971, %v287_v17   ;;  %382 = vperm.xlu0 %15970, %v286_v18  }
  0x36   : > { %392 = vperm.xlu1 %15971, %v289_v19   ;;  %387 = vperm.xlu0 %15970, %v288_v20  }
  0x3a   : > { %397 = vperm.xlu1 %15971, %v291_v21   ;;  %586 = vperm.xlu0 %15970, %v290_v22  }
  0x3e   : > { %591 = vperm.xlu1 %15971, %v293_v23   ;;  %402 = vperm.xlu0 %15970, %v292_v24  }
  0x42   : > { %412 = vperm.xlu1 %15971, %v295_v25   ;;  %407 = vperm.xlu0 %15970, %v294_v26  }
  0x46   : > { %417 = vperm.xlu1 %15971, %v297_v28   ;;  %596 = vperm.xlu0 %15970, %v296_v29  }
  0x4a   : > { %601 = vperm.xlu1 %15971, %v299_v30   ;;  %422 = vperm.xlu0 %15970, %v298_v31  }
  0x4e   : > { %432 = vperm.xlu1 %15971, %v301_v32   ;;  %427 = vperm.xlu0 %15970, %v300_v33  }
  0x52   : > { %437 = vperm.xlu1 %15971, %v303_v35   ;;  %606 = vperm.xlu0 %15970, %v302_v36  }
  0x56   : > { %611 = vperm.xlu1 %15971, %v305_v37   ;;  %442 = vperm.xlu0 %15970, %v304_v38  }
  0x5a   : > { %452 = vperm.xlu1 %15971, %v307_v39   ;;  %447 = vperm.xlu0 %15970, %v306_v40  }
  0x5e   : > { %457 = vperm.xlu1 %15971, %v309_v41   ;;  %616 = vperm.xlu0 %15970, %v308_v42  }
  0x62   : > { %621 = vperm.xlu1 %15971, %v311_v44   ;;  %462 = vperm.xlu0 %15970, %v310_v45  }
  0x66   : > { %472 = vperm.xlu1 %15971, %v313_v46   ;;  %467 = vperm.xlu0 %15970, %v312_v47  }
  0x6a   : > { %477 = vperm.xlu1 %15971, %v315_v50   ;;  %626 = vperm.xlu0 %15970, %v314_v51  }
  0x6e   : > { %631 = vperm.xlu1 %15971, %v317_v52   ;;  %482 = vperm.xlu0 %15970, %v316_v53  }
  0x72   : > { %1133 = vperm.xlu1 %15971, %v319_v57   ;;  %1128 = vperm.xlu0 %15970, %v318_v58  }
  0x76   : > { %1702 = vperm.xlu1 %15971, %v321_v59   ;;  %1207 = vperm.xlu0 %15970, %v320_v60  }
  0x7a   : > { %1781 = vperm.xlu1 %15971, %v323_v61   ;;  %1707 = vperm.xlu0 %15970, %v322_v62  }
  0x91   : > { %v557_v0 = vpop.permute.xlu1 %556  ;;  %v328_v1 = vpop.permute.xlu0 %327 }
  0x92   : > { %v640_v3 = vmul.f32 %v16236_v63, %v557_v0  ;;  %v886_v5 = vmul.f32 %v16241_v2, %v557_v0  ;;  %v638_v6 = vmul.f32 %v16236_v63, %v328_v1  ;;  %v884_v7 = vmul.f32 %v16241_v2, %v328_v1 }
  0x93   : > { %v489_v11 = vmul.f32 %v16247_v4, %v328_v1 }
  0x94   : > { %v738_v13 = vrot.slane %v640_v3, 1  ;;  %v984_v18 = vrot.slane %v886_v5, 2  ;;  %v735_v19 = vrot.slane %v638_v6, 1  ;;  %v981_v22 = vrot.slane %v884_v7, 2 }
  0x95   : > { %v338_v9 = vpop.permute.xlu1 %337  ;;  %v333_v10 = vpop.permute.xlu0 %332 }
  0x96   : > { %v641_v15 = vmul.f32 %v16236_v63, %v338_v9  ;;  %v887_v16 = vmul.f32 %v16241_v2, %v338_v9  ;;  %v639_v17 = vmul.f32 %v16236_v63, %v333_v10  ;;  %v1214_v20 = vmul.f32 %v16255_v8, %v338_v9 }
  0x97   : > { %v885_v21 = vmul.f32 %v16241_v2, %v333_v10  ;;  %v491_v23 = vmul.f32 %v16247_v4, %v338_v9  ;;  %v1140_v24 = vmul.f32 %v16261_v12, %v338_v9  ;;  %v1459_v27 = vmul.f32 %v16266_v14, %v338_v9 }
  0x98   : > { %v736_v25 = vrot.slane %v639_v17, 1  ;;  %v490_v28 = vmul.f32 %v16247_v4, %v333_v10  ;;  %v740_v32 = vrot.slane %v641_v15, 1  ;;  %v986_v33 = vrot.slane %v887_v16, 2  ;;  %v16302_v17 = vld [vmem:[%s19976_s1 + $0x7] ss:$0 sm:$0xff] }
  0x99   : > { %v562_v26 = vpop.permute.xlu1 %561  ;;  %v982_v29 = vrot.slane %v885_v21, 2  ;;  %v343_v31 = vpop.permute.xlu0 %342  ;;  %v1310_v36 = vrot.slane %v1214_v20, 1  ;;  %v1555_v59 = vrot.slane %v1459_v27, 2 }
  0x9a   : > { %v643_v30 = vmul.f32 %v16236_v63, %v562_v26  ;;  %v737_v34 = vsel %vm734_vm2, %v735_v19, %v736_v25  ;;  %v739_v35 = vsel %vm734_vm2, %v736_v25, %v738_v13  ;;  %v1216_v39 = vmul.f32 %v16255_v8, %v562_v26 }
  0x9b   : > { %v847_v37 = vadd.f32 %v737_v34, %v489_v11  ;;  %v848_v38 = vadd.f32 %v739_v35, %v490_v28  ;;  %v983_v40 = vsel %vm980_vm3, %v981_v22, %v982_v29  ;;  %v985_v41 = vsel %vm980_vm3, %v982_v29, %v984_v18  ;;  %v16307_v18 = vld [vmem:[%s19976_s1 + $0x8] ss:$0 sm:$0xff] }
  0x9c   : > { %v743_v42 = vrot.slane %v643_v30, 1  ;;  %v889_v43 = vmul.f32 %v16241_v2, %v562_v26  ;;  %v642_v46 = vmul.f32 %v16236_v63, %v343_v31  ;;  %v888_v47 = vmul.f32 %v16241_v2, %v343_v31 }
  0x9d   : > { %v1093_v44 = vadd.f32 %v983_v40, %v847_v37  ;;  %v1094_v45 = vadd.f32 %v985_v41, %v848_v38  ;;  %v1461_v48 = vmul.f32 %v16266_v14, %v562_v26  ;;  %v1141_v50 = vmul.f32 %v16261_v12, %v343_v31  ;;  %v16290_v53 = vpop.permute.xlu1 %352  ;;  %v348_v58 = vpop.permute.xlu0 %347  ;;  %v16315_v26 = vld [vmem:[%s19976_s1 + $0x6] ss:$0 sm:$0xff] }
  0x9e   : > { %v1215_v51 = vmul.f32 %v16255_v8, %v343_v31  ;;  %v1460_v52 = vmul.f32 %v16266_v14, %v343_v31  ;;  %v1313_v55 = vrot.slane %v1216_v39, 1  ;;  %v741_v56 = vrot.slane %v642_v46, 1 }
  0x9f   : > { %v1172_v54 = vadd.f32 %v1140_v24, %v1093_v44  ;;  %v987_v57 = vrot.slane %v888_v47, 2  ;;  %v1173_v60 = vadd.f32 %v1141_v50, %v1094_v45  ;;  %v989_v0 = vrot.slane %v889_v43, 2 }
  0xa0   : > { %v1311_v61 = vrot.slane %v1215_v51, 1  ;;  %v1556_v62 = vrot.slane %v1460_v52, 2  ;;  %v492_v1 = vmul.f32 %v16247_v4, %v343_v31  ;;  %v742_v3 = vsel %vm734_vm2, %v740_v32, %v741_v56 }
  0xa1   : > { %v744_v5 = vsel %vm734_vm2, %v741_v56, %v743_v42  ;;  %v1558_v6 = vrot.slane %v1461_v48, 2  ;;  %v849_v7 = vadd.f32 %v742_v3, %v491_v23  ;;  %v644_v10 = vmul.f32 %v16236_v63, %v348_v58  ;;  %v358_v23 = vpop.permute.xlu1 %357 }
  0xa2   : > { %v1312_v9 = vsel %vm734_vm2, %v1310_v36, %v1311_v61  ;;  %v850_v11 = vadd.f32 %v744_v5, %v492_v1  ;;  %v988_v13 = vsel %vm980_vm3, %v986_v33, %v987_v57  ;;  %v1314_v15 = vsel %vm734_vm2, %v1311_v61, %v1313_v55 }
  0xa3   : > { %v1422_v16 = vadd.f32 %v1312_v9, %v1172_v54  ;;  %v1095_v19 = vadd.f32 %v988_v13, %v849_v7  ;;  %v1423_v20 = vadd.f32 %v1314_v15, %v1173_v60  ;;  %v1557_v21 = vsel %vm980_vm3, %v1555_v59, %v1556_v62  ;;  %v567_v7 = vpop.permute.xlu0 %566 }
  0xa4   : > { %v890_v22 = vmul.f32 %v16241_v2, %v348_v58  ;;  %v990_v24 = vsel %vm980_vm3, %v987_v57, %v989_v0  ;;  %v493_v27 = vmul.f32 %v16247_v4, %v348_v58  ;;  %v1217_v28 = vmul.f32 %v16255_v8, %v348_v58  ;;  %v16361_v0 = vld [vmem:[%s19977_s2] sm:$0xff]  }
  0xa5   : > { %v1667_v25 = vadd.f32 %v1557_v21, %v1422_v16  ;;  %v1142_v29 = vmul.f32 %v16261_v12, %v348_v58  ;;  %v1462_v30 = vmul.f32 %v16266_v14, %v348_v58  ;;  %v1788_v31 = vmul.f32 %v16302_v17, %v348_v58  ;;  %14038 = vmatprep.subr.bf16.mxu0 %v16361_v0 }
  0xa6   : > { %v2033_v32 = vmul.f32 %v16307_v18, %v348_v58  ;;  %v1096_v33 = vadd.f32 %v990_v24, %v850_v11  ;;  %v1559_v34 = vsel %vm980_vm3, %v1556_v62, %v1558_v6  ;;  %v745_v35 = vrot.slane %v644_v10, 1 }
  0xa7   : > { %v16325_v36 = vmul.f32 %v16236_v63, %v358_v23  ;;  %v1668_v37 = vadd.f32 %v1559_v34, %v1423_v20  ;;  %v991_v38 = vrot.slane %v890_v22, 2  ;;  %v1174_v39 = vadd.f32 %v1142_v29, %v1095_v19 }
  0xa8   : > { %v1714_v40 = vmul.f32 %v16315_v26, %v348_v58  ;;  %v1315_v41 = vrot.slane %v1217_v28, 1  ;;  %v1560_v42 = vrot.slane %v1462_v30, 2  ;;  %v16329_v43 = vmul.f32 %v16247_v4, %v358_v23 }
  0xa9   : > { %v16332_v44 = vmul.f32 %v16241_v2, %v358_v23  ;;  %v1884_v46 = vrot.slane %v1788_v31, 1  ;;  %v2129_v47 = vrot.slane %v2033_v32, 2  ;;  %v16335_v48 = vmul.f32 %v16255_v8, %v358_v23 }
  0xaa   : > { %v1746_v45 = vadd.f32 %v1714_v40, %v1667_v25  ;;  %v750_v50 = vrot.slane %v16325_v36, 1  ;;  %v1144_v51 = vmul.f32 %v16261_v12, %v358_v23  ;;  %v16340_v52 = vmul.f32 %v16266_v14, %v358_v23 }
  0xab   : > { %v645_v54 = vmul.f32 %v16236_v63, %v16290_v53  ;;  %v1716_v55 = vmul.f32 %v16315_v26, %v358_v23  ;;  %v16346_v56 = vmul.f32 %v16302_v17, %v358_v23  ;;  %v16349_v57 = vmul.f32 %v16307_v18, %v358_v23 }
  0xac   : > { %v891_v58 = vmul.f32 %v16241_v2, %v16290_v53  ;;  %v996_v59 = vrot.slane %v16332_v44, 2  ;;  %v1218_v61 = vmul.f32 %v16255_v8, %v16290_v53  ;;  %v1463_v62 = vmul.f32 %v16266_v14, %v16290_v53 }
  0xad   : > { %v746_v60 = vrot.slane %v645_v54, 1  ;;  %v1320_v1 = vrot.slane %v16335_v48, 1  ;;  %v1789_v5 = vmul.f32 %v16302_v17, %v16290_v53  ;;  %v2034_v6 = vmul.f32 %v16307_v18, %v16290_v53 }
  0xae   : > { %v992_v3 = vrot.slane %v891_v58, 2  ;;  %v494_v9 = vmul.f32 %v16247_v4, %v16290_v53  ;;  %v1143_v11 = vmul.f32 %v16261_v12, %v16290_v53  ;;  %v1316_v13 = vrot.slane %v1218_v61, 1  ;;  %v572_v61 = vpop.permute.xlu1 %571 }
  0xaf   : > { %v747_v10 = vsel %vm734_vm2, %v745_v35, %v746_v60  ;;  %v1561_v16 = vrot.slane %v1463_v62, 2  ;;  %v1715_v19 = vmul.f32 %v16315_v26, %v16290_v53  ;;  %v1885_v20 = vrot.slane %v1789_v5, 1 }
  0xb0   : > { %v851_v15 = vadd.f32 %v747_v10, %v493_v27  ;;  %v1175_v21 = vadd.f32 %v1143_v11, %v1096_v33  ;;  %v1317_v22 = vsel %vm734_vm2, %v1315_v41, %v1316_v13  ;;  %v2130_v23 = vrot.slane %v2034_v6, 2 }
  0xb1   : > { %v646_v24 = vmul.f32 %v16236_v63, %v567_v7  ;;  %v993_v25 = vsel %vm980_vm3, %v991_v38, %v992_v3  ;;  %v1424_v28 = vadd.f32 %v1317_v22, %v1174_v39  ;;  %v1886_v29 = vsel %vm734_vm2, %v1884_v46, %v1885_v20 }
  0xb2   : > { %v892_v30 = vmul.f32 %v16241_v2, %v567_v7  ;;  %v1747_v31 = vadd.f32 %v1715_v19, %v1668_v37  ;;  %v1996_v27 = vadd.f32 %v1886_v29, %v1746_v45  ;;  %v1219_v34 = vmul.f32 %v16255_v8, %v567_v7 }
  0xb3   : > { %v748_v32 = vrot.slane %v646_v24, 1  ;;  %v1097_v53 = vadd.f32 %v993_v25, %v851_v15  ;;  %v1562_v33 = vsel %vm980_vm3, %v1560_v42, %v1561_v16  ;;  %v2131_v35 = vsel %vm980_vm3, %v2129_v47, %v2130_v23 }
  0xb4   : > { %v1464_v40 = vmul.f32 %v16266_v14, %v567_v7  ;;  %v2241_v41 = vadd.f32 %v2131_v35, %v1996_v27  ;;  %v1318_v39 = vrot.slane %v1219_v34, 1  ;;  %v1790_v46 = vmul.f32 %v16302_v17, %v567_v7 }
  0xb5   : > { %v749_v38 = vsel %vm734_vm2, %v746_v60, %v748_v32  ;;  %v1669_v54 = vadd.f32 %v1562_v33, %v1424_v28  ;;  %v994_v37 = vrot.slane %v892_v30, 2  ;;  %v2035_v42 = vmul.f32 %v16307_v18, %v567_v7 }
  0xb6   : > { %v852_v58 = vadd.f32 %v749_v38, %v494_v9  ;;  %v1563_v45 = vrot.slane %v1464_v40, 2  ;;  %v2273_v62 = vmax.f32 %v2241_v41, 0.0  ;;  %v1319_v5 = vsel %vm734_vm2, %v1316_v13, %v1318_v39 }
  0xb7   : > { %v1887_v6 = vrot.slane %v1790_v46, 1  ;;  %v1565_v47 = vrot.slane %v16340_v52, 2  ;;  %v1889_v10 = vrot.slane %v16346_v56, 1  ;;  %v2134_v60 = vrot.slane %v16349_v57, 2  ;;  %v363_v56 = vpop.permute.xlu0 %362 }
  0xb8   : > { %v1425_v11 = vadd.f32 %v1319_v5, %v1175_v21  ;;  %v1176_v15 = vadd.f32 %v1144_v51, %v1097_v53  ;;  %2306 = vst.msk [vmem:[#allocation2 + $0x19] sm:$0xff] %vm224_vm0, %v2273_v62  ;;  %v2132_v19 = vrot.slane %v2035_v42, 2  ;;  %v16395_v22 = vmul.f32 %v16236_v63, %v572_v61 }
  0xb9   : > { %v1888_v9 = vsel %vm734_vm2, %v1885_v20, %v1887_v6  ;;  %v1748_v13 = vadd.f32 %v1716_v55, %v1669_v54  ;;  %v995_v24 = vsel %vm980_vm3, %v992_v3, %v994_v37  ;;  %v16399_v52 = vmul.f32 %v16241_v2, %v572_v61 }
  0xba   : > { %v1997_v7 = vadd.f32 %v1888_v9, %v1747_v31  ;;  %v16401_v25 = vadd.f32 %v995_v24, %v852_v58  ;;  %v1564_v51 = vsel %vm980_vm3, %v1561_v16, %v1563_v45  ;;  %v2133_v57 = vsel %vm980_vm3, %v2130_v23, %v2132_v19 }
  0xbb   : > { %v1793_v20 = vmul.f32 %v16302_v17, %v572_v61  ;;  %v1670_v21 = vadd.f32 %v1564_v51, %v1425_v11  ;;  %v16407_v29 = vmul.f32 %v16255_v8, %v572_v61  ;;  %v2038_v55 = vmul.f32 %v16307_v18, %v572_v61  ;;  %v368_v36 = vpop.permute.xlu0 %367 }
  0xbc   : > { %v2242_v28 = vadd.f32 %v2133_v57, %v1997_v7  ;;  %v753_v3 = vrot.slane %v16395_v22, 1  ;;  %v16412_v30 = vmul.f32 %v16266_v14, %v572_v61  ;;  %v16415_v31 = vmul.f32 %v16236_v63, %v363_v56  ;;  %v16440_v61 = vpop.permute.xlu1 %372 }
  0xbd   : > { %v16418_v16 = vmul.f32 %v16241_v2, %v363_v56  ;;  %v999_v27 = vrot.slane %v16399_v52, 2  ;;  %v16422_v32 = vmul.f32 %v16255_v8, %v363_v56  ;;  %v16425_v34 = vmul.f32 %v16266_v14, %v363_v56 }
  0xbe   : > { %v2274_v23 = vmax.f32 %v2242_v28, 0.0  ;;  %v1892_v53 = vrot.slane %v1793_v20, 1  ;;  %v751_v33 = vrot.slane %v16415_v31, 1  ;;  %v1717_v35 = vmul.f32 %v16315_v26, %v363_v56 }
  0xbf   : > { %v1792_v40 = vmul.f32 %v16302_v17, %v363_v56  ;;  %v2137_v41 = vrot.slane %v2038_v55, 2  ;;  %v997_v38 = vrot.slane %v16418_v16, 2  ;;  %v1321_v39 = vrot.slane %v16422_v32, 1 }
  0xc0   : > { %2307 = vst.msk [vmem:[#allocation2 + $0x21] sm:$0xff] %vm224_vm0, %v2274_v23  ;;  %v2037_v46 = vmul.f32 %v16307_v18, %v363_v56  ;;  %v752_v54 = vsel %vm734_vm2, %v750_v50, %v751_v33  ;;  %v1566_v58 = vrot.slane %v16425_v34, 2  ;;  %v1749_v37 = vadd.f32 %v1717_v35, %v1670_v21  ;;  %v378_v55 = vpop.permute.xlu1 %377 }
  0xc1   : > { %v1890_v45 = vrot.slane %v1792_v40, 1  ;;  %v1323_v62 = vrot.slane %v16407_v29, 1  ;;  %v1322_v5 = vsel %vm734_vm2, %v1320_v1, %v1321_v39  ;;  %v853_v42 = vadd.f32 %v752_v54, %v16329_v43 }
  0xc2   : > { %v2135_v6 = vrot.slane %v2037_v46, 2  ;;  %v1568_v50 = vrot.slane %v16412_v30, 2  ;;  %v1426_v19 = vadd.f32 %v1322_v5, %v1176_v15  ;;  %v496_v24 = vmul.f32 %v16247_v4, %v363_v56 }
  0xc3   : > { %v1891_v11 = vsel %vm734_vm2, %v1889_v10, %v1890_v45  ;;  %v1893_v9 = vsel %vm734_vm2, %v1890_v45, %v1892_v53  ;;  %v998_v48 = vsel %vm980_vm3, %v996_v59, %v997_v38  ;;  %v1567_v10 = vsel %vm980_vm3, %v1565_v47, %v1566_v58 }
  0xc4   : > { %v1998_v7 = vadd.f32 %v1891_v11, %v1748_v13  ;;  %v1999_v51 = vadd.f32 %v1893_v9, %v1749_v37  ;;  %v2136_v43 = vsel %vm980_vm3, %v2134_v60, %v2135_v6  ;;  %v2138_v1 = vsel %vm980_vm3, %v2135_v6, %v2137_v41 }
  0xc5   : > { %v650_v15 = vmul.f32 %v16236_v63, %v368_v36  ;;  %v1099_v13 = vadd.f32 %v998_v48, %v853_v42  ;;  %v896_v21 = vmul.f32 %v16241_v2, %v368_v36  ;;  %v1145_v28 = vmul.f32 %v16261_v12, %v363_v56 }
  0xc6   : > { %v2243_v57 = vadd.f32 %v2136_v43, %v1998_v7  ;;  %v2244_v20 = vadd.f32 %v2138_v1, %v1999_v51  ;;  %v1671_v44 = vadd.f32 %v1567_v10, %v1426_v19  ;;  %v1223_v59 = vmul.f32 %v16255_v8, %v368_v36 }
  0xc7   : > { %v16468_v60 = vmul.f32 %v16266_v14, %v368_v36  ;;  %v1146_v47 = vmul.f32 %v16261_v12, %v368_v36  ;;  %v16472_v35 = vmul.f32 %v16302_v17, %v368_v36  ;;  %v497_v40 = vmul.f32 %v16247_v4, %v368_v36 }
  0xc8   : > { %v2275_v23 = vmax.f32 %v2243_v57, 0.0  ;;  %v2276_v53 = vmax.f32 %v2244_v20, 0.0  ;;  %v755_v41 = vrot.slane %v650_v15, 1  ;;  %v1718_v46 = vmul.f32 %v16315_v26, %v368_v36 }
  0xc9   : > { %v16477_v56 = vmul.f32 %v16307_v18, %v368_v36  ;;  %v1001_v54 = vrot.slane %v896_v21, 2  ;;  %v1178_v37 = vadd.f32 %v1146_v47, %v1099_v13  ;;  %v16482_v45 = vmul.f32 %v16236_v63, %v378_v55 }
  0xca   : > { %2308 = vst.msk [vmem:[#allocation2 + $0x31] sm:$0xff] %vm224_vm0, %v2275_v23  ;;  %2309 = vst.msk [vmem:[#allocation2 + $0x39] sm:$0xff] %vm224_vm0, %v2276_v53  ;;  %v16485_v5 = vmul.f32 %v16241_v2, %v378_v55  ;;  %v1325_v6 = vrot.slane %v1223_v59, 1  ;;  %v1570_v42 = vrot.slane %v16468_v60, 2  ;;  %v1750_v11 = vadd.f32 %v1718_v46, %v1671_v44 }
  0xcb   : > { %v16489_v9 = vmul.f32 %v16255_v8, %v378_v55  ;;  %v1894_v36 = vrot.slane %v16472_v35, 1  ;;  %v2139_v19 = vrot.slane %v16477_v56, 2  ;;  %v16494_v7 = vmul.f32 %v16247_v4, %v378_v55 }
  0xcc   : > { %v16497_v51 = vmul.f32 %v16261_v12, %v378_v55  ;;  %v760_v48 = vrot.slane %v16482_v45, 1  ;;  %v16501_v43 = vmul.f32 %v16266_v14, %v378_v55  ;;  %v16504_v1 = vmul.f32 %v16315_v26, %v378_v55 }
  0xcd   : > { %v651_v10 = vmul.f32 %v16236_v63, %v16440_v61  ;;  %v1006_v15 = vrot.slane %v16485_v5, 2  ;;  %v16510_v57 = vmul.f32 %v16302_v17, %v378_v55  ;;  %v754_v20 = vsel %vm734_vm2, %v751_v33, %v753_v3 }
  0xce   : > { %v16519_v13 = vmul.f32 %v16241_v2, %v16440_v61  ;;  %v1330_v21 = vrot.slane %v16489_v9, 1  ;;  %v16523_v44 = vmul.f32 %v16307_v18, %v378_v55  ;;  %v854_v60 = vadd.f32 %v754_v20, %v496_v24 }
  0xcf   : > { %v756_v59 = vrot.slane %v651_v10, 1  ;;  %v1000_v22 = vsel %vm980_vm3, %v997_v38, %v999_v27  ;;  %v1177_v3 = vadd.f32 %v1145_v28, %v16401_v25  ;;  %v1224_v33 = vmul.f32 %v16255_v8, %v16440_v61  ;;  %v577_v28 = vpop.permute.xlu0 %576 }
  0xd0   : > { %v1002_v31 = vrot.slane %v16519_v13, 2  ;;  %v1100_v53 = vadd.f32 %v1000_v22, %v854_v60  ;;  %v1324_v52 = vsel %vm734_vm2, %v1321_v39, %v1323_v62  ;;  %v1469_v16 = vmul.f32 %v16266_v14, %v16440_v61 }
  0xd1   : > { %v757_v23 = vsel %vm734_vm2, %v755_v41, %v756_v59  ;;  %v1575_v27 = vrot.slane %v16501_v43, 2  ;;  %v498_v25 = vmul.f32 %v16247_v4, %v16440_v61  ;;  %v1326_v38 = vrot.slane %v1224_v33, 1 }
  0xd2   : > { %v1427_v24 = vadd.f32 %v1324_v52, %v1177_v3  ;;  %v855_v55 = vadd.f32 %v757_v23, %v497_v40  ;;  %v1147_v47 = vmul.f32 %v16261_v12, %v16440_v61  ;;  %v1569_v29 = vsel %vm980_vm3, %v1566_v58, %v1568_v50  ;;  %v582_v52 = vpop.permute.xlu1 %581 }
  0xd3   : > { %v1795_v32 = vmul.f32 %v16302_v17, %v16440_v61  ;;  %v1003_v39 = vsel %vm980_vm3, %v1001_v54, %v1002_v31  ;;  %v1571_v62 = vrot.slane %v1469_v16, 2  ;;  %v2040_v41 = vmul.f32 %v16307_v18, %v16440_v61 }
  0xd4   : > { %v1672_v35 = vadd.f32 %v1569_v29, %v1427_v24  ;;  %v1179_v40 = vadd.f32 %v1147_v47, %v1100_v53  ;;  %v1327_v46 = vsel %vm734_vm2, %v1325_v6, %v1326_v38  ;;  %v652_v30 = vmul.f32 %v16236_v63, %v577_v28 }
  0xd5   : > { %v1895_v56 = vrot.slane %v1795_v32, 1  ;;  %v1428_v10 = vadd.f32 %v1327_v46, %v1178_v37  ;;  %v1719_v34 = vmul.f32 %v16315_v26, %v16440_v61  ;;  %v2140_v58 = vrot.slane %v2040_v41, 2 }
  0xd6   : > { %v898_v50 = vmul.f32 %v16241_v2, %v577_v28  ;;  %v1101_v20 = vadd.f32 %v1003_v39, %v855_v55  ;;  %v758_v13 = vrot.slane %v652_v30, 1  ;;  %v1225_v60 = vmul.f32 %v16255_v8, %v577_v28 }
  0xd7   : > { %v1896_v54 = vsel %vm734_vm2, %v1894_v36, %v1895_v56  ;;  %v1572_v22 = vsel %vm980_vm3, %v1570_v42, %v1571_v62  ;;  %v1751_v3 = vadd.f32 %v1719_v34, %v1672_v35  ;;  %v1470_v33 = vmul.f32 %v16266_v14, %v577_v28 }
  0xd8   : > { %v2000_v6 = vadd.f32 %v1896_v54, %v1750_v11  ;;  %v2141_v37 = vsel %vm980_vm3, %v2139_v19, %v2140_v58  ;;  %v759_v23 = vsel %vm734_vm2, %v756_v59, %v758_v13  ;;  %v1328_v61 = vrot.slane %v1225_v60, 1 }
  0xd9   : > { %v1796_v53 = vmul.f32 %v16302_v17, %v577_v28  ;;  %v1673_v16 = vadd.f32 %v1572_v22, %v1428_v10  ;;  %v856_v36 = vadd.f32 %v759_v23, %v498_v25  ;;  %v1004_v55 = vrot.slane %v898_v50, 2 }
  0xda   : > { %v2245_v24 = vadd.f32 %v2141_v37, %v2000_v6  ;;  %v1329_v47 = vsel %vm734_vm2, %v1326_v38, %v1328_v61  ;;  %v1573_v29 = vrot.slane %v1470_v33, 2  ;;  %v2041_v11 = vmul.f32 %v16307_v18, %v577_v28  ;;  %v383_v28 = vpop.permute.xlu0 %382 }
  0xdb   : > { %v1897_v42 = vrot.slane %v1796_v53, 1  ;;  %v1899_v32 = vrot.slane %v16510_v57, 1  ;;  %v2144_v19 = vrot.slane %v16523_v44, 2  ;;  %v16574_v59 = vmul.f32 %v16236_v63, %v582_v52 }
  0xdc   : > { %v2277_v39 = vmax.f32 %v2245_v24, 0.0  ;;  %v1429_v35 = vadd.f32 %v1329_v47, %v1179_v40  ;;  %v2142_v46 = vrot.slane %v2041_v11, 2  ;;  %v16578_v25 = vmul.f32 %v16241_v2, %v582_v52 }
  0xdd   : > { %v1898_v41 = vsel %vm734_vm2, %v1895_v56, %v1897_v42  ;;  %v1180_v38 = vadd.f32 %v16497_v51, %v1101_v20  ;;  %v1752_v30 = vadd.f32 %v16504_v1, %v1673_v16  ;;  %v1005_v57 = vsel %vm980_vm3, %v1002_v31, %v1004_v55 }
  0xde   : > { %2310 = vst.msk [vmem:[#allocation2 + $0x49] sm:$0xff] %vm224_vm0, %v2277_v39  ;;  %v2001_v44 = vadd.f32 %v1898_v41, %v1751_v3  ;;  %v16584_v10 = vadd.f32 %v1005_v57, %v856_v36  ;;  %v1574_v40 = vsel %vm980_vm3, %v1571_v62, %v1573_v29  ;;  %v2143_v56 = vsel %vm980_vm3, %v2140_v58, %v2142_v46  ;;  %v16623_v29 = vpop.permute.xlu1 %392  ;;  %v388_v41 = vpop.permute.xlu0 %387 }
  0xdf   : > { %v1799_v34 = vmul.f32 %v16302_v17, %v582_v52  ;;  %v763_v54 = vrot.slane %v16574_v59, 1  ;;  %v16591_v51 = vmul.f32 %v16255_v8, %v582_v52  ;;  %v16594_v1 = vmul.f32 %v16266_v14, %v582_v52 }
  0xe0   : > { %v2246_v50 = vadd.f32 %v2143_v56, %v2001_v44  ;;  %v1674_v31 = vadd.f32 %v1574_v40, %v1429_v35  ;;  %v1009_v20 = vrot.slane %v16578_v25, 2  ;;  %v2044_v13 = vmul.f32 %v16307_v18, %v582_v52 }
  0xe1   : > { %v16599_v62 = vmul.f32 %v16236_v63, %v383_v28  ;;  %v1902_v60 = vrot.slane %v1799_v34, 1  ;;  %v16602_v22 = vmul.f32 %v16241_v2, %v383_v28  ;;  %v16605_v3 = vmul.f32 %v16255_v8, %v383_v28 }
  0xe2   : > { %v2278_v58 = vmax.f32 %v2246_v50, 0.0  ;;  %v16609_v33 = vmul.f32 %v16266_v14, %v383_v28  ;;  %v1721_v37 = vmul.f32 %v16315_v26, %v383_v28  ;;  %v1798_v23 = vmul.f32 %v16302_v17, %v383_v28  ;;  %v398_v5 = vpop.permute.xlu1 %397 }
  0xe3   : > { %v761_v6 = vrot.slane %v16599_v62, 1  ;;  %v1333_v61 = vrot.slane %v16591_v51, 1  ;;  %v1578_v53 = vrot.slane %v16594_v1, 2  ;;  %v1331_v52 = vrot.slane %v16605_v3, 1 }
  0xe4   : > { %2311 = vst.msk [vmem:[#allocation2 + $0x51] sm:$0xff] %vm224_vm0, %v2278_v58  ;;  %v2043_v16 = vmul.f32 %v16307_v18, %v383_v28  ;;  %v2147_v24 = vrot.slane %v2044_v13, 2  ;;  %v1753_v55 = vadd.f32 %v1721_v37, %v1674_v31  ;;  %v1900_v47 = vrot.slane %v1798_v23, 1  ;;  %v2397_v37 = vld [vmem:[#allocation2 + $0x21] sm:$0xff] }
  0xe5   : > { %v762_v36 = vsel %vm734_vm2, %v760_v48, %v761_v6  ;;  %v16626_v42 = vmul.f32 %v16247_v4, %v383_v28  ;;  %v1007_v11 = vrot.slane %v16602_v22, 2  ;;  %v1332_v39 = vsel %vm734_vm2, %v1330_v21, %v1331_v52 }
  0xe6   : > { %v2145_v35 = vrot.slane %v2043_v16, 2  ;;  %v1576_v45 = vrot.slane %v16609_v33, 2  ;;  %v1901_v48 = vsel %vm734_vm2, %v1899_v32, %v1900_v47  ;;  %v1903_v46 = vsel %vm734_vm2, %v1900_v47, %v1902_v60  ;;  %v2396_v60 = vld [vmem:[#allocation2 + $0x19] sm:$0xff] }
  0xe7   : > { %v857_v57 = vadd.f32 %v762_v36, %v16494_v7  ;;  %v1149_v44 = vmul.f32 %v16261_v12, %v383_v28  ;;  %v2002_v40 = vadd.f32 %v1901_v48, %v1752_v30  ;;  %v2003_v56 = vadd.f32 %v1903_v46, %v1753_v55  ;;  %v15977_v46 = vld [vmem:[%s19977_s2 + $0x8] sm:$0xff]  }
  0xe8   : > { %v1430_v34 = vadd.f32 %v1332_v39, %v1180_v38  ;;  %v2146_v50 = vsel %vm980_vm3, %v2144_v19, %v2145_v35  ;;  %v2148_v9 = vsel %vm980_vm3, %v2145_v35, %v2147_v24  ;;  %v16642_v21 = vmul.f32 %v16236_v63, %v388_v41 }
  0xe9   : > { %v16645_v31 = vmul.f32 %v16241_v2, %v388_v41  ;;  %v2247_v32 = vadd.f32 %v2146_v50, %v2002_v40  ;;  %v2248_v13 = vadd.f32 %v2148_v9, %v2003_v56  ;;  %v1008_v7 = vsel %vm980_vm3, %v1006_v15, %v1007_v11 }
  0xea   : > { %v501_v38 = vmul.f32 %v16247_v4, %v388_v41  ;;  %v1103_v30 = vadd.f32 %v1008_v7, %v857_v57  ;;  %v1577_v19 = vsel %vm980_vm3, %v1575_v27, %v1576_v45  ;;  %v16659_v28 = vmul.f32 %v16255_v8, %v388_v41 }
  0xeb   : > { %v16662_v58 = vmul.f32 %v16266_v14, %v388_v41  ;;  %v2279_v23 = vmax.f32 %v2247_v32, 0.0  ;;  %v2280_v15 = vmax.f32 %v2248_v13, 0.0  ;;  %v1675_v16 = vadd.f32 %v1577_v19, %v1430_v34 }
  0xec   : > { %v16665_v24 = vmul.f32 %v16302_v17, %v388_v41  ;;  %v765_v36 = vrot.slane %v16642_v21, 1  ;;  %v1011_v43 = vrot.slane %v16645_v31, 2  ;;  %v1150_v27 = vmul.f32 %v16261_v12, %v388_v41 }
  0xed   : > { %v16671_v55 = vmul.f32 %v16307_v18, %v388_v41  ;;  %2312 = vst.msk [vmem:[#allocation2 + $0x61] sm:$0xff] %vm224_vm0, %v2279_v23  ;;  %2313 = vst.msk [vmem:[#allocation2 + $0x69] sm:$0xff] %vm224_vm0, %v2280_v15  ;;  %v1722_v47 = vmul.f32 %v16315_v26, %v388_v41  ;;  %v2427_v39 = vpack.c.bf16 %v2397_v37, %v2396_v60  ;;  %v1335_v40 = vrot.slane %v16659_v28, 1 }
  0xee   : > { %v16677_v35 = vmul.f32 %v16236_v63, %v398_v5  ;;  %v16680_v48 = vmul.f32 %v16241_v2, %v398_v5  ;;  %v1182_v57 = vadd.f32 %v1150_v27, %v1103_v30  ;;  %v1580_v56 = vrot.slane %v16662_v58, 2 }
  0xef   : > { %v16688_v34 = vmul.f32 %v16255_v8, %v398_v5  ;;  %v1754_v41 = vadd.f32 %v1722_v47, %v1675_v16  ;;  %v1904_v50 = vrot.slane %v16665_v24, 1  ;;  %v2149_v9 = vrot.slane %v16671_v55, 2  ;;  %14007 = vmatmul.mubr.msk.bf16.vlgmr.msra.gmra.mrb[0].mxu0 %vm224_vm0, %v2427_v39 }
  0xf0   : > { %v16694_v21 = vmul.f32 %v16247_v4, %v398_v5  ;;  %v770_v31 = vrot.slane %v16677_v35, 1  ;;  %v1016_v32 = vrot.slane %v16680_v48, 2  ;;  %v16699_v13 = vmul.f32 %v16261_v12, %v398_v5  ;;  %14039 = vmatpush3.bf16.msra.mxu0 %v16361_v0  ;;  %v15978_v0 = vld [vmem:[%s19977_s2 + $0x10] sm:$0xff]   ;;  %v16860_v35 = vld [vmem:[%s19976_s1] ss:$0 sm:$0xff] }
  0xf1   : > { %v16702_v7 = vmul.f32 %v16266_v14, %v398_v5  ;;  %v16706_v30 = vmul.f32 %v16315_v26, %v398_v5  ;;  %v657_v19 = vmul.f32 %v16236_v63, %v16623_v29  ;;  %v764_v28 = vsel %vm734_vm2, %v761_v6, %v763_v54  ;;  %14040 = vmatprep.subr.bf16.mxu0 %v15977_v46  ;;  %v16897_v48 = vld [vmem:[%s19976_s1 + $0x4] ss:$0 sm:$0xff] }
  0xf2   : > { %v16717_v58 = vmul.f32 %v16241_v2, %v16623_v29  ;;  %v1340_v60 = vrot.slane %v16688_v34, 1  ;;  %v16724_v37 = vmul.f32 %v16302_v17, %v398_v5  ;;  %v16727_v59 = vmul.f32 %v16307_v18, %v398_v5 }
  0xf3   : > { %v858_v62 = vadd.f32 %v764_v28, %v16626_v42  ;;  %v766_v54 = vrot.slane %v657_v19, 1  ;;  %v1010_v6 = vsel %vm980_vm3, %v1007_v11, %v1009_v20  ;;  %v1181_v23 = vadd.f32 %v1149_v44, %v16584_v10  ;;  %v587_v44 = vpop.permute.xlu0 %586 }
  0xf4   : > { %v1230_v15 = vmul.f32 %v16255_v8, %v16623_v29  ;;  %v1012_v16 = vrot.slane %v16717_v58, 2  ;;  %v1334_v42 = vsel %vm734_vm2, %v1331_v52, %v1333_v61  ;;  %v16746_v25 = vmul.f32 %v16266_v14, %v16623_v29  ;;  %14041 = vmatpush3.bf16.msra.mxu0 %v15977_v46 }
  0xf5   : > { %v1104_v24 = vadd.f32 %v1010_v6, %v858_v62  ;;  %v502_v10 = vmul.f32 %v16247_v4, %v16623_v29  ;;  %v767_v20 = vsel %vm734_vm2, %v765_v36, %v766_v54  ;;  %v1431_v11 = vadd.f32 %v1334_v42, %v1181_v23  ;;  %14042 = vmatprep.subr.bf16.mxu0 %v15978_v0 }
  0xf6   : > { %v1336_v22 = vrot.slane %v1230_v15, 1  ;;  %v859_v5 = vadd.f32 %v767_v20, %v501_v38  ;;  %v1151_v51 = vmul.f32 %v16261_v12, %v16623_v29  ;;  %v1579_v3 = vsel %vm980_vm3, %v1576_v45, %v1578_v53 }
  0xf7   : > { %v1581_v61 = vrot.slane %v16746_v25, 2  ;;  %v1676_v52 = vadd.f32 %v1579_v3, %v1431_v11  ;;  %v1801_v36 = vmul.f32 %v16302_v17, %v16623_v29  ;;  %v2046_v38 = vmul.f32 %v16307_v18, %v16623_v29 }
  0xf8   : > { %v1337_v4 = vsel %vm734_vm2, %v1335_v40, %v1336_v22  ;;  %v1013_v12 = vsel %vm980_vm3, %v1011_v43, %v1012_v16  ;;  %v1183_v1 = vadd.f32 %v1151_v51, %v1104_v24  ;;  %v658_v33 = vmul.f32 %v16236_v63, %v587_v44  ;;  %14043 = vmatpush3.bf16.msra.mxu0 %v15978_v0  ;;  %v592_v0 = vpop.permute.xlu1 %591 }
  0xf9   : > { %v1432_v27 = vadd.f32 %v1337_v4, %v1182_v57  ;;  %v1723_v53 = vmul.f32 %v16315_v26, %v16623_v29  ;;  %v1905_v45 = vrot.slane %v1801_v36, 1  ;;  %v2150_v55 = vrot.slane %v2046_v38, 2 }
  0xfa   : > { %v904_v47 = vmul.f32 %v16241_v2, %v587_v44  ;;  %v1105_v39 = vadd.f32 %v1013_v12, %v859_v5  ;;  %v1582_v46 = vsel %vm980_vm3, %v1580_v56, %v1581_v61  ;;  %v768_v40 = vrot.slane %v658_v33, 1  ;;  %v15979_v56 = vld [vmem:[%s19977_s2 + $0x18] sm:$0xff]   ;;  %v403_v12 = vpop.permute.xlu0 %402 }
  0xfb   : > { %v1231_v19 = vmul.f32 %v16255_v8, %v587_v44  ;;  %v1677_v28 = vadd.f32 %v1582_v46, %v1432_v27  ;;  %v1755_v43 = vadd.f32 %v1723_v53, %v1676_v52  ;;  %v1906_v57 = vsel %vm734_vm2, %v1904_v50, %v1905_v45  ;;  %14044 = vmatprep.subr.bf16.mxu0 %v15979_v56 }
  0xfc   : > { %v1476_v62 = vmul.f32 %v16266_v14, %v587_v44  ;;  %v2004_v6 = vadd.f32 %v1906_v57, %v1754_v41  ;;  %v2151_v29 = vsel %vm980_vm3, %v2149_v9, %v2150_v55  ;;  %v769_v23 = vsel %vm734_vm2, %v766_v54, %v768_v40  ;;  %14045 = vmatpush3.bf16.msra.mxu0 %v15979_v56 }
  0xfd   : > { %v1338_v15 = vrot.slane %v1231_v19, 1  ;;  %v860_v24 = vadd.f32 %v769_v23, %v502_v10  ;;  %v1014_v42 = vrot.slane %v904_v47, 2  ;;  %v1802_v20 = vmul.f32 %v16302_v17, %v587_v44  ;;  %v16825_v19 = vld [vmem:[%s19976_s1 + $0x2] ss:$0 sm:$0xff] }
  0xfe   : > { %v1583_v25 = vrot.slane %v1476_v62, 2  ;;  %v2249_v11 = vadd.f32 %v2151_v29, %v2004_v6  ;;  %v2047_v5 = vmul.f32 %v16307_v18, %v587_v44  ;;  %v16784_v41 = vmul.f32 %v16236_v63, %v592_v0 }
  0xff   : > { %v1339_v50 = vsel %vm734_vm2, %v1336_v22, %v1338_v15  ;;  %v1585_v9 = vrot.slane %v16702_v7, 2  ;;  %v1909_v54 = vrot.slane %v16724_v37, 1  ;;  %v1907_v3 = vrot.slane %v1802_v20, 1  ;;  %v2399_v22 = vld [vmem:[#allocation2 + $0x39] sm:$0xff] }
 0x100   : > { %v1433_v51 = vadd.f32 %v1339_v50, %v1183_v1  ;;  %v2154_v10 = vrot.slane %v16727_v59, 2  ;;  %v1184_v4 = vadd.f32 %v16699_v13, %v1105_v39  ;;  %v2281_v52 = vmax.f32 %v2249_v11, 0.0 }
 0x101   : > { %v2152_v36 = vrot.slane %v2047_v5, 2  ;;  %v1756_v44 = vadd.f32 %v16706_v30, %v1677_v28  ;;  %v1015_v63 = vsel %vm980_vm3, %v1012_v16, %v1014_v42  ;;  %v1908_v38 = vsel %vm734_vm2, %v1905_v45, %v1907_v3  ;;  %v2398_v30 = vld [vmem:[#allocation2 + $0x31] sm:$0xff]  ;;  %v16854_v5 = vpop.permute.xlu1 %412 }
 0x102   : > { %v16796_v37 = vmul.f32 %v16241_v2, %v592_v0  ;;  %2314 = vst.msk [vmem:[#allocation2 + $0x79] sm:$0xff] %vm224_vm0, %v2281_v52  ;;  %v16799_v1 = vadd.f32 %v1015_v63, %v860_v24  ;;  %v1584_v13 = vsel %vm980_vm3, %v1581_v61, %v1583_v25  ;;  %v2005_v27 = vadd.f32 %v1908_v38, %v1755_v43  ;;  %v16812_v61 = vld [vmem:[%s19976_s1 + $0x1] ss:$0 sm:$0xff] }
 0x103   : > { %v773_v33 = vrot.slane %v16784_v41, 1  ;;  %v1678_v53 = vadd.f32 %v1584_v13, %v1433_v51  ;;  %v2153_v58 = vsel %vm980_vm3, %v2150_v55, %v2152_v36  ;;  %v1805_v16 = vmul.f32 %v16302_v17, %v592_v0  ;;  %v408_v51 = vpop.permute.xlu0 %407 }
 0x104   : > { %v2428_v45 = vpack.c.bf16 %v2399_v22, %v2398_v30  ;;  %v2250_v47 = vadd.f32 %v2153_v58, %v2005_v27  ;;  %v16806_v2 = vmul.f32 %v16255_v8, %v592_v0  ;;  %v2050_v39 = vmul.f32 %v16307_v18, %v592_v0 }
 0x105   : > { %v16815_v46 = vmul.f32 %v16812_v61, %v403_v12  ;;  %v1019_v40 = vrot.slane %v16796_v37, 2  ;;  %v16819_v55 = vmul.f32 %v16266_v14, %v592_v0  ;;  %v16828_v28 = vmul.f32 %v16825_v19, %v403_v12 }
 0x106   : > { %14010 = vmatprep.mubr.msk.bf16.mxu0 %vm224_vm0, %v2428_v45  ;;  %v16831_v43 = vmul.f32 %v16255_v8, %v403_v12  ;;  %v2282_v57 = vmax.f32 %v2250_v47, 0.0  ;;  %v16835_v6 = vmul.f32 %v16266_v14, %v403_v12  ;;  %v1725_v0 = vmul.f32 %v16315_v26, %v403_v12  ;;  %v16903_v47 = vld [vmem:[%s19976_s1 + $0x5] ss:$0 sm:$0xff] }
 0x107   : > { %v771_v62 = vrot.slane %v16815_v46, 1  ;;  %v1912_v29 = vrot.slane %v1805_v16, 1  ;;  %v1804_v15 = vmul.f32 %v16302_v17, %v403_v12  ;;  %v2049_v56 = vmul.f32 %v16307_v18, %v403_v12 }
 0x108   : > { %v1341_v23 = vrot.slane %v16831_v43, 1  ;;  %2315 = vst.msk [vmem:[#allocation2 + $0x81] sm:$0xff] %vm224_vm0, %v2282_v57  ;;  %v1343_v8 = vrot.slane %v16806_v2, 1  ;;  %v2157_v24 = vrot.slane %v2050_v39, 2  ;;  %v1757_v42 = vadd.f32 %v1725_v0, %v1678_v53 }
 0x109   : > { %v772_v14 = vsel %vm734_vm2, %v770_v31, %v771_v62  ;;  %v1017_v25 = vrot.slane %v16828_v28, 2  ;;  %v1910_v11 = vrot.slane %v1804_v15, 1  ;;  %v2155_v50 = vrot.slane %v2049_v56, 2  ;;  %v2400_v56 = vld [vmem:[#allocation2 + $0x49] sm:$0xff] }
 0x10a   : > { %v1342_v20 = vsel %vm734_vm2, %v1340_v60, %v1341_v23  ;;  %v1588_v3 = vrot.slane %v16819_v55, 2  ;;  %v504_v31 = vmul.f32 %v16860_v35, %v403_v12  ;;  %v1586_v52 = vrot.slane %v16835_v6, 2  ;;  %v16868_v60 = vld [vmem:[%s19976_s1 + $0x3] ss:$0 sm:$0xff]  ;;  %v17017_v6 = vld [vmem:[%s19976_s1 + $0x6] ss:$0 sm:$0xff] }
 0x10b   : > { %v861_v34 = vadd.f32 %v772_v14, %v16694_v21  ;;  %v1153_v36 = vmul.f32 %v16868_v60, %v403_v12  ;;  %v1911_v22 = vsel %vm734_vm2, %v1909_v54, %v1910_v11  ;;  %v1913_v63 = vsel %vm734_vm2, %v1910_v11, %v1912_v29 }
 0x10c   : > { %v1434_v38 = vadd.f32 %v1342_v20, %v1184_v4  ;;  %v2006_v13 = vadd.f32 %v1911_v22, %v1756_v44  ;;  %v2007_v27 = vadd.f32 %v1913_v63, %v1757_v42  ;;  %v16874_v30 = vmul.f32 %v16860_v35, %v408_v51 }
 0x10d   : > { %v662_v53 = vmul.f32 %v16812_v61, %v408_v51  ;;  %v2156_v21 = vsel %vm980_vm3, %v2154_v10, %v2155_v50  ;;  %v2158_v58 = vsel %vm980_vm3, %v2155_v50, %v2157_v24  ;;  %v1018_v54 = vsel %vm980_vm3, %v1016_v32, %v1017_v25  ;;  %v2401_v10 = vld [vmem:[#allocation2 + $0x51] sm:$0xff] }
 0x10e   : > { %v16887_v4 = vmul.f32 %v16825_v19, %v408_v51  ;;  %v2251_v44 = vadd.f32 %v2156_v21, %v2006_v13  ;;  %v2252_v12 = vadd.f32 %v2158_v58, %v2007_v27  ;;  %v1107_v16 = vadd.f32 %v1018_v54, %v861_v34  ;;  %v16948_v54 = vld [vmem:[%s19976_s1 + $0x7] ss:$0 sm:$0xff] }
 0x10f   : > { %v1587_v59 = vsel %vm980_vm3, %v1585_v9, %v1586_v52  ;;  %v1235_v32 = vmul.f32 %v16897_v48, %v408_v51  ;;  %v16906_v39 = vmul.f32 %v16903_v47, %v408_v51  ;;  %v16909_v7 = vmul.f32 %v16302_v17, %v408_v51  ;;  %v418_v9 = vpop.permute.xlu1 %417 }
 0x110   : > { %v1679_v45 = vadd.f32 %v1587_v59, %v1434_v38  ;;  %v2283_v57 = vmax.f32 %v2251_v44, 0.0  ;;  %v2284_v0 = vmax.f32 %v2252_v12, 0.0  ;;  %v775_v29 = vrot.slane %v662_v53, 1 }
 0x111   : > { %v1154_v15 = vmul.f32 %v16868_v60, %v408_v51  ;;  %v1021_v24 = vrot.slane %v16887_v4, 2  ;;  %v1726_v14 = vmul.f32 %v16315_v26, %v408_v51  ;;  %v16915_v42 = vmul.f32 %v16307_v18, %v408_v51 }
 0x112   : > { %v2429_v20 = vpack.c.bf16 %v2401_v10, %v2400_v56  ;;  %2316 = vst.msk [vmem:[#allocation2 + $0x91] sm:$0xff] %vm224_vm0, %v2283_v57  ;;  %2317 = vst.msk [vmem:[#allocation2 + $0x99] sm:$0xff] %vm224_vm0, %v2284_v0  ;;  %v16920_v11 = vmul.f32 %v16812_v61, %v418_v9  ;;  %v16923_v50 = vmul.f32 %v16825_v19, %v418_v9  ;;  %v1345_v22 = vrot.slane %v1235_v32, 1 }
 0x113   : > { %v1186_v17 = vadd.f32 %v1154_v15, %v1107_v16  ;;  %v16926_v34 = vmul.f32 %v16897_v48, %v418_v9  ;;  %v1590_v63 = vrot.slane %v16906_v39, 2  ;;  %v1758_v18 = vadd.f32 %v1726_v14, %v1679_v45 }
 0x114   : > { %v1914_v51 = vrot.slane %v16909_v7, 1  ;;  %14011 = vmatmul.mubr.msk.bf16.gmra.mrb[4].mxu0 %vm224_vm0, %v2429_v20  ;;  %v2159_v38 = vrot.slane %v16915_v42, 2  ;;  %v16933_v13 = vmul.f32 %v16860_v35, %v418_v9  ;;  %v16936_v27 = vmul.f32 %v16868_v60, %v418_v9 }
 0x115   : > { %v16939_v53 = vmul.f32 %v16903_v47, %v418_v9  ;;  %v780_v21 = vrot.slane %v16920_v11, 1  ;;  %v16943_v58 = vmul.f32 %v16315_v26, %v418_v9  ;;  %v16951_v4 = vmul.f32 %v16948_v54, %v418_v9 }
 0x116   : > { %v663_v44 = vmul.f32 %v16812_v61, %v16854_v5  ;;  %v1026_v12 = vrot.slane %v16923_v50, 2  ;;  %v1350_v16 = vrot.slane %v16926_v34, 1  ;;  %v774_v26 = vsel %vm734_vm2, %v771_v62, %v773_v33 }
 0x117   : > { %v16964_v59 = vmul.f32 %v16825_v19, %v16854_v5  ;;  %v862_v45 = vadd.f32 %v774_v26, %v504_v31  ;;  %v1020_v32 = vsel %vm980_vm3, %v1017_v25, %v1019_v40  ;;  %v1185_v39 = vadd.f32 %v1153_v36, %v16799_v1  ;;  %v16987_v40 = vld [vmem:[%s19976_s1 + $0x8] ss:$0 sm:$0xff]  ;;  %v597_v31 = vpop.permute.xlu0 %596 }
 0x118   : > { %v776_v10 = vrot.slane %v663_v44, 1  ;;  %v1236_v46 = vmul.f32 %v16897_v48, %v16854_v5  ;;  %v1344_v33 = vsel %vm734_vm2, %v1341_v23, %v1343_v8  ;;  %v16982_v37 = vmul.f32 %v16903_v47, %v16854_v5 }
 0x119   : > { %v1022_v41 = vrot.slane %v16964_v59, 2  ;;  %v16990_v1 = vmul.f32 %v16987_v40, %v418_v9  ;;  %v1108_v62 = vadd.f32 %v1020_v32, %v862_v45  ;;  %v1435_v2 = vadd.f32 %v1344_v33, %v1185_v39 }
 0x11a   : > { %v777_v28 = vsel %vm734_vm2, %v775_v29, %v776_v10  ;;  %v1595_v43 = vrot.slane %v16939_v53, 2  ;;  %v506_v23 = vmul.f32 %v16860_v35, %v16854_v5  ;;  %v1155_v8 = vmul.f32 %v16868_v60, %v16854_v5 }
 0x11b   : > { %v1346_v25 = vrot.slane %v1236_v46, 1  ;;  %v863_v36 = vadd.f32 %v777_v28, %v16874_v30  ;;  %v1023_v7 = vsel %vm980_vm3, %v1021_v24, %v1022_v41  ;;  %v1589_v9 = vsel %vm980_vm3, %v1586_v52, %v1588_v3 }
 0x11c   : > { %v1807_v57 = vmul.f32 %v16948_v54, %v16854_v5  ;;  %v1591_v29 = vrot.slane %v16982_v37, 2  ;;  %v1680_v15 = vadd.f32 %v1589_v9, %v1435_v2  ;;  %v2052_v30 = vmul.f32 %v16987_v40, %v16854_v5 }
 0x11d   : > { %v1347_v0 = vsel %vm734_vm2, %v1345_v22, %v1346_v25  ;;  %v1187_v56 = vadd.f32 %v1155_v8, %v1108_v62  ;;  %v664_v55 = vmul.f32 %v16812_v61, %v597_v31  ;;  %v1727_v3 = vmul.f32 %v17017_v6, %v16854_v5 }
 0x11e   : > { %v1436_v14 = vadd.f32 %v1347_v0, %v1186_v17  ;;  %v1915_v24 = vrot.slane %v1807_v57, 1  ;;  %v2160_v52 = vrot.slane %v2052_v30, 2  ;;  %v910_v42 = vmul.f32 %v16825_v19, %v597_v31  ;;  %v15980_v17 = vld [vmem:[%s19977_s2 + $0x40] sm:$0xff]  }
 0x11f   : > { %v1237_v20 = vmul.f32 %v16897_v48, %v597_v31  ;;  %v1109_v22 = vadd.f32 %v1023_v7, %v863_v36  ;;  %v778_v26 = vrot.slane %v664_v55, 1  ;;  %v1482_v45 = vmul.f32 %v16903_v47, %v597_v31  ;;  %14078 = vmatprep.subr.bf16.mxu0 %v15980_v17  ;;  %v602_v7 = vpop.permute.xlu1 %601  ;;  %v2402_v17 = vld [vmem:[#allocation2 + $0x61] sm:$0xff] }
 0x120   : > { %v1916_v44 = vsel %vm734_vm2, %v1914_v51, %v1915_v24  ;;  %v1592_v32 = vsel %vm980_vm3, %v1590_v63, %v1591_v29  ;;  %v1759_v39 = vadd.f32 %v1727_v3, %v1680_v15  ;;  %v2161_v37 = vsel %vm980_vm3, %v2159_v38, %v2160_v52 }
 0x121   : > { %v2008_v46 = vadd.f32 %v1916_v44, %v1758_v18  ;;  %v1348_v5 = vrot.slane %v1237_v20, 1  ;;  %v1681_v33 = vadd.f32 %v1592_v32, %v1436_v14  ;;  %v779_v28 = vsel %vm734_vm2, %v776_v10, %v778_v26 }
 0x122   : > { %v1808_v62 = vmul.f32 %v16948_v54, %v597_v31  ;;  %v1024_v8 = vrot.slane %v910_v42, 2  ;;  %v1593_v36 = vrot.slane %v1482_v45, 2  ;;  %v864_v9 = vadd.f32 %v779_v28, %v506_v23  ;;  %v2403_v23 = vld [vmem:[#allocation2 + $0x69] sm:$0xff] }
 0x123   : > { %v2253_v2 = vadd.f32 %v2161_v37, %v2008_v46  ;;  %v1349_v51 = vsel %vm734_vm2, %v1346_v25, %v1348_v5  ;;  %v2053_v18 = vmul.f32 %v16987_v40, %v597_v31  ;;  %v1919_v0 = vrot.slane %v16951_v4, 1  ;;  %v423_v31 = vpop.permute.xlu0 %422 }
 0x124   : > { %v1437_v57 = vadd.f32 %v1349_v51, %v1187_v56  ;;  %v1917_v63 = vrot.slane %v1808_v62, 1  ;;  %v2164_v15 = vrot.slane %v16990_v1, 2  ;;  %v1188_v38 = vadd.f32 %v16936_v27, %v1109_v22 }
 0x125   : > { %v2285_v10 = vmax.f32 %v2253_v2, 0.0  ;;  %v2162_v14 = vrot.slane %v2053_v18, 2  ;;  %v17039_v55 = vmul.f32 %v16812_v61, %v602_v7  ;;  %v17042_v25 = vmul.f32 %v16825_v19, %v602_v7 }
 0x126   : > { %v1918_v30 = vsel %vm734_vm2, %v1915_v24, %v1917_v63  ;;  %v1760_v56 = vadd.f32 %v16943_v58, %v1681_v33  ;;  %v1025_v4 = vsel %vm980_vm3, %v1022_v41, %v1024_v8  ;;  %v1594_v27 = vsel %vm980_vm3, %v1591_v29, %v1593_v36  ;;  %v17089_v63 = vpop.permute.xlu1 %432 }
 0x127   : > { %2318 = vst.msk [vmem:[#allocation2 + $0xa9] sm:$0xff] %vm224_vm0, %v2285_v10  ;;  %v2009_v1 = vadd.f32 %v1918_v30, %v1759_v39  ;;  %v17050_v24 = vadd.f32 %v1025_v4, %v864_v9  ;;  %v1682_v3 = vadd.f32 %v1594_v27, %v1437_v57  ;;  %v2163_v42 = vsel %vm980_vm3, %v2160_v52, %v2162_v14 }
 0x128   : > { %v1811_v20 = vmul.f32 %v16948_v54, %v602_v7  ;;  %v17055_v58 = vmul.f32 %v16897_v48, %v602_v7  ;;  %v17058_v59 = vmul.f32 %v16903_v47, %v602_v7  ;;  %v2430_v41 = vpack.c.bf16 %v2403_v23, %v2402_v17  ;;  %v428_v23 = vpop.permute.xlu0 %427 }
 0x129   : > { %v2254_v22 = vadd.f32 %v2163_v42, %v2009_v1  ;;  %v783_v29 = vrot.slane %v17039_v55, 1  ;;  %v1029_v44 = vrot.slane %v17042_v25, 2  ;;  %v2056_v26 = vmul.f32 %v16987_v40, %v602_v7 }
 0x12a   : > { %v17064_v45 = vmul.f32 %v16812_v61, %v423_v31  ;;  %v1922_v32 = vrot.slane %v1811_v20, 1  ;;  %14014 = vmatprep.mubr.msk.bf16.mxu0 %vm224_vm0, %v2430_v41  ;;  %v17068_v39 = vmul.f32 %v16825_v19, %v423_v31  ;;  %v17071_v46 = vmul.f32 %v16897_v48, %v423_v31 }
 0x12b   : > { %v2286_v52 = vmax.f32 %v2254_v22, 0.0  ;;  %v17075_v33 = vmul.f32 %v16903_v47, %v423_v31  ;;  %v1729_v37 = vmul.f32 %v17017_v6, %v423_v31  ;;  %v1810_v28 = vmul.f32 %v16948_v54, %v423_v31 }
 0x12c   : > { %v781_v5 = vrot.slane %v17064_v45, 1  ;;  %v1353_v62 = vrot.slane %v17055_v58, 1  ;;  %v1598_v2 = vrot.slane %v17058_v59, 2  ;;  %v1351_v8 = vrot.slane %v17071_v46, 1 }
 0x12d   : > { %2319 = vst.msk [vmem:[#allocation2 + $0xb1] sm:$0xff] %vm224_vm0, %v2286_v52  ;;  %v2055_v51 = vmul.f32 %v16987_v40, %v423_v31  ;;  %v2167_v36 = vrot.slane %v2056_v26, 2  ;;  %v1761_v9 = vadd.f32 %v1729_v37, %v1682_v3  ;;  %v1920_v57 = vrot.slane %v1810_v28, 1  ;;  %v2405_v52 = vld [vmem:[#allocation2 + $0x81] sm:$0xff] }
 0x12e   : > { %v782_v7 = vsel %vm734_vm2, %v780_v21, %v781_v5  ;;  %v508_v18 = vmul.f32 %v16860_v35, %v423_v31  ;;  %v1027_v10 = vrot.slane %v17068_v39, 2  ;;  %v1352_v30 = vsel %vm734_vm2, %v1350_v16, %v1351_v8 }
 0x12f   : > { %v2165_v14 = vrot.slane %v2055_v51, 2  ;;  %v1596_v11 = vrot.slane %v17075_v33, 2  ;;  %v1921_v21 = vsel %vm734_vm2, %v1919_v0, %v1920_v57  ;;  %v1923_v4 = vsel %vm734_vm2, %v1920_v57, %v1922_v32  ;;  %v438_v32 = vpop.permute.xlu1 %437 }
 0x130   : > { %v865_v27 = vadd.f32 %v782_v7, %v16933_v13  ;;  %v1157_v1 = vmul.f32 %v16868_v60, %v423_v31  ;;  %v2010_v3 = vadd.f32 %v1921_v21, %v1760_v56  ;;  %v2011_v42 = vadd.f32 %v1923_v4, %v1761_v9  ;;  %v2404_v7 = vld [vmem:[#allocation2 + $0x79] sm:$0xff] }
 0x131   : > { %v1438_v20 = vadd.f32 %v1352_v30, %v1188_v38  ;;  %v2166_v17 = vsel %vm980_vm3, %v2164_v15, %v2165_v14  ;;  %v2168_v34 = vsel %vm980_vm3, %v2165_v14, %v2167_v36  ;;  %v668_v16 = vmul.f32 %v16812_v61, %v428_v23 }
 0x132   : > { %v17107_v22 = vmul.f32 %v16825_v19, %v428_v23  ;;  %v2255_v41 = vadd.f32 %v2166_v17, %v2010_v3  ;;  %v2256_v0 = vadd.f32 %v2168_v34, %v2011_v42  ;;  %v1028_v13 = vsel %vm980_vm3, %v1026_v12, %v1027_v10 }
 0x133   : > { %v509_v56 = vmul.f32 %v16860_v35, %v428_v23  ;;  %v1111_v38 = vadd.f32 %v1028_v13, %v865_v27  ;;  %v1597_v15 = vsel %vm980_vm3, %v1595_v43, %v1596_v11  ;;  %v1241_v31 = vmul.f32 %v16897_v48, %v428_v23 }
 0x134   : > { %v17122_v26 = vmul.f32 %v16903_v47, %v428_v23  ;;  %v2287_v37 = vmax.f32 %v2255_v41, 0.0  ;;  %v2288_v50 = vmax.f32 %v2256_v0, 0.0  ;;  %v1683_v28 = vadd.f32 %v1597_v15, %v1438_v20 }
 0x135   : > { %v17125_v12 = vmul.f32 %v16948_v54, %v428_v23  ;;  %v785_v51 = vrot.slane %v668_v16, 1  ;;  %v1031_v36 = vrot.slane %v17107_v22, 2  ;;  %v1158_v53 = vmul.f32 %v16868_v60, %v428_v23 }
 0x136   : > { %v17130_v43 = vmul.f32 %v16987_v40, %v428_v23  ;;  %2320 = vst.msk [vmem:[#allocation2 + $0xc1] sm:$0xff] %vm224_vm0, %v2287_v37  ;;  %2321 = vst.msk [vmem:[#allocation2 + $0xc9] sm:$0xff] %vm224_vm0, %v2288_v50  ;;  %v1730_v9 = vmul.f32 %v17017_v6, %v428_v23  ;;  %v2431_v57 = vpack.c.bf16 %v2405_v52, %v2404_v7  ;;  %v1355_v4 = vrot.slane %v1241_v31, 1 }
 0x137   : > { %v17136_v30 = vmul.f32 %v16812_v61, %v438_v32  ;;  %v17139_v14 = vmul.f32 %v16825_v19, %v438_v32  ;;  %v1190_v21 = vadd.f32 %v1158_v53, %v1111_v38  ;;  %v1600_v27 = vrot.slane %v17122_v26, 2 }
 0x138   : > { %v17143_v3 = vmul.f32 %v16897_v48, %v438_v32  ;;  %v1762_v42 = vadd.f32 %v1730_v9, %v1683_v28  ;;  %v1924_v20 = vrot.slane %v17125_v12, 1  ;;  %v2169_v17 = vrot.slane %v17130_v43, 2  ;;  %14015 = vmatmul.mubr.msk.bf16.gmra.mrb[8].mxu0 %vm224_vm0, %v2431_v57 }
 0x139   : > { %v17149_v23 = vmul.f32 %v16860_v35, %v438_v32  ;;  %v790_v34 = vrot.slane %v17136_v30, 1  ;;  %v1036_v16 = vrot.slane %v17139_v14, 2  ;;  %v17154_v22 = vmul.f32 %v16868_v60, %v438_v32 }
 0x13a   : > { %v17157_v41 = vmul.f32 %v16903_v47, %v438_v32  ;;  %v17160_v0 = vmul.f32 %v17017_v6, %v438_v32  ;;  %v669_v13 = vmul.f32 %v16812_v61, %v17089_v63  ;;  %v784_v38 = vsel %vm734_vm2, %v781_v5, %v783_v29 }
 0x13b   : > { %v17171_v15 = vmul.f32 %v16825_v19, %v17089_v63  ;;  %v1360_v31 = vrot.slane %v17143_v3, 1  ;;  %v17175_v26 = vmul.f32 %v16948_v54, %v438_v32  ;;  %v17178_v52 = vmul.f32 %v16987_v40, %v438_v32 }
 0x13c   : > { %v866_v37 = vadd.f32 %v784_v38, %v508_v18  ;;  %v786_v50 = vrot.slane %v669_v13, 1  ;;  %v1030_v55 = vsel %vm980_vm3, %v1027_v10, %v1029_v44  ;;  %v1189_v29 = vadd.f32 %v1157_v1, %v17050_v24  ;;  %v607_v1 = vpop.permute.xlu0 %606 }
 0x13d   : > { %v1242_v45 = vmul.f32 %v16897_v48, %v17089_v63  ;;  %v1032_v5 = vrot.slane %v17171_v15, 2  ;;  %v1354_v18 = vsel %vm734_vm2, %v1351_v8, %v1353_v62  ;;  %v1487_v25 = vmul.f32 %v16903_v47, %v17089_v63 }
 0x13e   : > { %v1112_v28 = vadd.f32 %v1030_v55, %v866_v37  ;;  %v510_v44 = vmul.f32 %v16860_v35, %v17089_v63  ;;  %v787_v24 = vsel %vm734_vm2, %v785_v51, %v786_v50  ;;  %v1439_v10 = vadd.f32 %v1354_v18, %v1189_v29  ;;  %v612_v55 = vpop.permute.xlu1 %611 }
 0x13f   : > { %v1356_v39 = vrot.slane %v1242_v45, 1  ;;  %v867_v32 = vadd.f32 %v787_v24, %v509_v56  ;;  %v1159_v12 = vmul.f32 %v16868_v60, %v17089_v63  ;;  %v1599_v58 = vsel %vm980_vm3, %v1596_v11, %v1598_v2 }
 0x140   : > { %v1601_v46 = vrot.slane %v1487_v25, 2  ;;  %v1684_v8 = vadd.f32 %v1599_v58, %v1439_v10  ;;  %v1813_v51 = vmul.f32 %v16948_v54, %v17089_v63  ;;  %v2058_v53 = vmul.f32 %v16987_v40, %v17089_v63 }
 0x141   : > { %v1357_v62 = vsel %vm734_vm2, %v1355_v4, %v1356_v39  ;;  %v1033_v56 = vsel %vm980_vm3, %v1031_v36, %v1032_v5  ;;  %v1191_v43 = vadd.f32 %v1159_v12, %v1112_v28  ;;  %v670_v59 = vmul.f32 %v16812_v61, %v607_v1 }
 0x142   : > { %v1440_v7 = vadd.f32 %v1357_v62, %v1190_v21  ;;  %v1731_v33 = vmul.f32 %v17017_v6, %v17089_v63  ;;  %v1925_v2 = vrot.slane %v1813_v51, 1  ;;  %v2170_v11 = vrot.slane %v2058_v53, 2  ;;  %v2407_v53 = vld [vmem:[#allocation2 + $0x99] sm:$0xff] }
 0x143   : > { %v916_v9 = vmul.f32 %v16825_v19, %v607_v1  ;;  %v1113_v57 = vadd.f32 %v1033_v56, %v867_v32  ;;  %v1602_v4 = vsel %vm980_vm3, %v1600_v27, %v1601_v46  ;;  %v788_v13 = vrot.slane %v670_v59, 1  ;;  %v443_v59 = vpop.permute.xlu0 %442 }
 0x144   : > { %v1243_v38 = vmul.f32 %v16897_v48, %v607_v1  ;;  %v1685_v15 = vadd.f32 %v1602_v4, %v1440_v7  ;;  %v1763_v37 = vadd.f32 %v1731_v33, %v1684_v8  ;;  %v1926_v36 = vsel %vm734_vm2, %v1924_v20, %v1925_v2  ;;  %v2406_v33 = vld [vmem:[#allocation2 + $0x91] sm:$0xff] }
 0x145   : > { %v1488_v21 = vmul.f32 %v16903_v47, %v607_v1  ;;  %v2012_v29 = vadd.f32 %v1926_v36, %v1762_v42  ;;  %v2171_v63 = vsel %vm980_vm3, %v2169_v17, %v2170_v11  ;;  %v789_v45 = vsel %vm734_vm2, %v786_v50, %v788_v13 }
 0x146   : > { %v1358_v28 = vrot.slane %v1243_v38, 1  ;;  %v868_v18 = vadd.f32 %v789_v45, %v510_v44  ;;  %v1034_v25 = vrot.slane %v916_v9, 2  ;;  %v1814_v27 = vmul.f32 %v16948_v54, %v607_v1 }
 0x147   : > { %v1603_v24 = vrot.slane %v1488_v21, 2  ;;  %v2257_v10 = vadd.f32 %v2171_v63, %v2012_v29  ;;  %v2059_v12 = vmul.f32 %v16987_v40, %v607_v1  ;;  %v17226_v20 = vmul.f32 %v16812_v61, %v612_v55 }
 0x148   : > { %v1359_v32 = vsel %vm734_vm2, %v1356_v39, %v1358_v28  ;;  %v1605_v42 = vrot.slane %v17157_v41, 2  ;;  %v1929_v17 = vrot.slane %v17175_v26, 1  ;;  %v1927_v50 = vrot.slane %v1814_v27, 1 }
 0x149   : > { %v1441_v58 = vadd.f32 %v1359_v32, %v1191_v43  ;;  %v2174_v44 = vrot.slane %v17178_v52, 2  ;;  %v1192_v62 = vadd.f32 %v17154_v22, %v1113_v57  ;;  %v2289_v8 = vmax.f32 %v2257_v10, 0.0 }
 0x14a   : > { %v2172_v51 = vrot.slane %v2059_v12, 2  ;;  %v1764_v39 = vadd.f32 %v17160_v0, %v1685_v15  ;;  %v1035_v1 = vsel %vm980_vm3, %v1032_v5, %v1034_v25  ;;  %v1928_v56 = vsel %vm734_vm2, %v1925_v2, %v1927_v50 }
 0x14b   : > { %v17236_v7 = vmul.f32 %v16825_v19, %v612_v55  ;;  %2322 = vst.msk [vmem:[#allocation2 + $0xd9] sm:$0xff] %vm224_vm0, %v2289_v8  ;;  %v17239_v26 = vadd.f32 %v1035_v1, %v868_v18  ;;  %v1604_v52 = vsel %vm980_vm3, %v1601_v46, %v1603_v24  ;;  %v2013_v22 = vadd.f32 %v1928_v56, %v1763_v37  ;;  %v17284_v8 = vpop.permute.xlu1 %452 }
 0x14c   : > { %v793_v43 = vrot.slane %v17226_v20, 1  ;;  %v1686_v9 = vadd.f32 %v1604_v52, %v1441_v58  ;;  %v2173_v0 = vsel %vm980_vm3, %v2170_v11, %v2172_v51  ;;  %v1817_v5 = vmul.f32 %v16948_v54, %v612_v55  ;;  %v448_v51 = vpop.permute.xlu0 %447 }
 0x14d   : > { %v2432_v2 = vpack.c.bf16 %v2407_v53, %v2406_v33  ;;  %v2258_v57 = vadd.f32 %v2173_v0, %v2013_v22  ;;  %v17246_v4 = vmul.f32 %v16897_v48, %v612_v55  ;;  %v2062_v13 = vmul.f32 %v16987_v40, %v612_v55 }
 0x14e   : > { %v17250_v38 = vmul.f32 %v16812_v61, %v443_v59  ;;  %v1039_v46 = vrot.slane %v17236_v7, 2  ;;  %v17254_v15 = vmul.f32 %v16903_v47, %v612_v55  ;;  %v17258_v11 = vmul.f32 %v16825_v19, %v443_v59 }
 0x14f   : > { %14018 = vmatprep.mubr.msk.bf16.mxu0 %vm224_vm0, %v2432_v2  ;;  %v17261_v37 = vmul.f32 %v16897_v48, %v443_v59  ;;  %v2290_v36 = vmax.f32 %v2258_v57, 0.0  ;;  %v17265_v29 = vmul.f32 %v16903_v47, %v443_v59  ;;  %v1733_v63 = vmul.f32 %v17017_v6, %v443_v59  ;;  %v2409_v57 = vld [vmem:[#allocation2 + $0xb1] sm:$0xff] }
 0x150   : > { %v791_v21 = vrot.slane %v17250_v38, 1  ;;  %v1932_v45 = vrot.slane %v1817_v5, 1  ;;  %v1816_v28 = vmul.f32 %v16948_v54, %v443_v59  ;;  %v2061_v18 = vmul.f32 %v16987_v40, %v443_v59 }
 0x151   : > { %v1361_v55 = vrot.slane %v17261_v37, 1  ;;  %2323 = vst.msk [vmem:[#allocation2 + $0xe1] sm:$0xff] %vm224_vm0, %v2290_v36  ;;  %v1363_v25 = vrot.slane %v17246_v4, 1  ;;  %v2177_v24 = vrot.slane %v2062_v13, 2  ;;  %v1765_v10 = vadd.f32 %v1733_v63, %v1686_v9  ;;  %v458_v63 = vpop.permute.xlu1 %457 }
 0x152   : > { %v792_v27 = vsel %vm734_vm2, %v790_v34, %v791_v21  ;;  %v1037_v32 = vrot.slane %v17258_v11, 2  ;;  %v1930_v58 = vrot.slane %v1816_v28, 1  ;;  %v2175_v50 = vrot.slane %v2061_v18, 2 }
 0x153   : > { %v1362_v12 = vsel %vm734_vm2, %v1360_v31, %v1361_v55  ;;  %v1608_v53 = vrot.slane %v17254_v15, 2  ;;  %v512_v30 = vmul.f32 %v16860_v35, %v443_v59  ;;  %v1606_v34 = vrot.slane %v17265_v29, 2 }
 0x154   : > { %v869_v1 = vadd.f32 %v792_v27, %v17149_v23  ;;  %v1161_v56 = vmul.f32 %v16868_v60, %v443_v59  ;;  %v1931_v52 = vsel %vm734_vm2, %v1929_v17, %v1930_v58  ;;  %v1933_v3 = vsel %vm734_vm2, %v1930_v58, %v1932_v45  ;;  %v2408_v27 = vld [vmem:[#allocation2 + $0xa9] sm:$0xff] }
 0x155   : > { %v1442_v31 = vadd.f32 %v1362_v12, %v1192_v62  ;;  %v2014_v22 = vadd.f32 %v1931_v52, %v1764_v39  ;;  %v2015_v33 = vadd.f32 %v1933_v3, %v1765_v10  ;;  %v17294_v9 = vmul.f32 %v16860_v35, %v448_v51 }
 0x156   : > { %v674_v0 = vmul.f32 %v16812_v61, %v448_v51  ;;  %v2176_v5 = vsel %vm980_vm3, %v2174_v44, %v2175_v50  ;;  %v2178_v2 = vsel %vm980_vm3, %v2175_v50, %v2177_v24  ;;  %v1038_v23 = vsel %vm980_vm3, %v1036_v16, %v1037_v32 }
 0x157   : > { %v17305_v17 = vmul.f32 %v16825_v19, %v448_v51  ;;  %v2259_v62 = vadd.f32 %v2176_v5, %v2014_v22  ;;  %v2260_v39 = vadd.f32 %v2178_v2, %v2015_v33  ;;  %v1115_v59 = vadd.f32 %v1038_v23, %v869_v1 }
 0x158   : > { %v1607_v44 = vsel %vm980_vm3, %v1605_v42, %v1606_v34  ;;  %v1247_v36 = vmul.f32 %v16897_v48, %v448_v51  ;;  %v17314_v14 = vmul.f32 %v16903_v47, %v448_v51  ;;  %v17317_v16 = vmul.f32 %v16948_v54, %v448_v51 }
 0x159   : > { %v1687_v13 = vadd.f32 %v1607_v44, %v1442_v31  ;;  %v2291_v45 = vmax.f32 %v2259_v62, 0.0  ;;  %v2292_v28 = vmax.f32 %v2260_v39, 0.0  ;;  %v795_v18 = vrot.slane %v674_v0, 1 }
 0x15a   : > { %v1162_v24 = vmul.f32 %v16868_v60, %v448_v51  ;;  %v1041_v41 = vrot.slane %v17305_v17, 2  ;;  %v1734_v42 = vmul.f32 %v17017_v6, %v448_v51  ;;  %v17323_v10 = vmul.f32 %v16987_v40, %v448_v51 }
 0x15b   : > { %v2433_v12 = vpack.c.bf16 %v2409_v57, %v2408_v27  ;;  %2324 = vst.msk [vmem:[#allocation2 + $0xf1] sm:$0xff] %vm224_vm0, %v2291_v45  ;;  %2325 = vst.msk [vmem:[#allocation2 + $0xf9] sm:$0xff] %vm224_vm0, %v2292_v28  ;;  %v17328_v50 = vmul.f32 %v16812_v61, %v458_v63  ;;  %v17331_v1 = vmul.f32 %v16825_v19, %v458_v63  ;;  %v1365_v3 = vrot.slane %v1247_v36, 1 }
 0x15c   : > { %v1194_v58 = vadd.f32 %v1162_v24, %v1115_v59  ;;  %v17334_v52 = vmul.f32 %v16897_v48, %v458_v63  ;;  %v1610_v31 = vrot.slane %v17314_v14, 2  ;;  %v1766_v51 = vadd.f32 %v1734_v42, %v1687_v13 }
 0x15d   : > { %v1934_v22 = vrot.slane %v17317_v16, 1  ;;  %14019 = vmatmul.mubr.msk.bf16.gmra.mrb[12].mxu0 %vm224_vm0, %v2433_v12  ;;  %v2179_v33 = vrot.slane %v17323_v10, 2  ;;  %v17341_v0 = vmul.f32 %v16860_v35, %v458_v63  ;;  %v17344_v5 = vmul.f32 %v16868_v60, %v458_v63 }
 0x15e   : > { %v17347_v2 = vmul.f32 %v16903_v47, %v458_v63  ;;  %v800_v23 = vrot.slane %v17328_v50, 1  ;;  %v17351_v17 = vmul.f32 %v17017_v6, %v458_v63  ;;  %v17354_v62 = vmul.f32 %v16948_v54, %v458_v63 }
 0x15f   : > { %v675_v39 = vmul.f32 %v16812_v61, %v17284_v8  ;;  %v1046_v59 = vrot.slane %v17331_v1, 2  ;;  %v1370_v44 = vrot.slane %v17334_v52, 1  ;;  %v794_v57 = vsel %vm734_vm2, %v791_v21, %v793_v43  ;;  %v17505_v1 = vld [vmem:[%s19976_s1 + $0x2] ss:$0 sm:$0xff] }
 0x160   : > { %v17367_v13 = vmul.f32 %v16825_v19, %v17284_v8  ;;  %v870_v14 = vadd.f32 %v794_v57, %v512_v30  ;;  %v1040_v16 = vsel %vm980_vm3, %v1037_v32, %v1039_v46  ;;  %v1193_v45 = vadd.f32 %v1161_v56, %v17239_v26 }
 0x161   : > { %v796_v36 = vrot.slane %v675_v39, 1  ;;  %v1248_v38 = vmul.f32 %v16897_v48, %v17284_v8  ;;  %v1364_v43 = vsel %vm734_vm2, %v1361_v55, %v1363_v25  ;;  %v1493_v7 = vmul.f32 %v16903_v47, %v17284_v8  ;;  %v617_v55 = vpop.permute.xlu0 %616 }
 0x162   : > { %v1042_v20 = vrot.slane %v17367_v13, 2  ;;  %v17386_v11 = vmul.f32 %v16987_v40, %v458_v63  ;;  %v1116_v26 = vadd.f32 %v1040_v16, %v870_v14  ;;  %v1443_v21 = vadd.f32 %v1364_v43, %v1193_v45 }
 0x163   : > { %v797_v46 = vsel %vm734_vm2, %v795_v18, %v796_v36  ;;  %v1615_v32 = vrot.slane %v17347_v2, 2  ;;  %v514_v30 = vmul.f32 %v16860_v35, %v17284_v8  ;;  %v1163_v4 = vmul.f32 %v16868_v60, %v17284_v8 }
 0x164   : > { %v1366_v37 = vrot.slane %v1248_v38, 1  ;;  %v871_v25 = vadd.f32 %v797_v46, %v17294_v9  ;;  %v1043_v56 = vsel %vm980_vm3, %v1041_v41, %v1042_v20  ;;  %v1609_v63 = vsel %vm980_vm3, %v1606_v34, %v1608_v53  ;;  %v622_v46 = vpop.permute.xlu1 %621 }
 0x165   : > { %v1819_v28 = vmul.f32 %v16948_v54, %v17284_v8  ;;  %v1611_v24 = vrot.slane %v1493_v7, 2  ;;  %v1688_v27 = vadd.f32 %v1609_v63, %v1443_v21  ;;  %v2064_v42 = vmul.f32 %v16987_v40, %v17284_v8 }
 0x166   : > { %v1367_v18 = vsel %vm734_vm2, %v1365_v3, %v1366_v37  ;;  %v1195_v10 = vadd.f32 %v1163_v4, %v1116_v26  ;;  %v676_v41 = vmul.f32 %v16812_v61, %v617_v55  ;;  %v1735_v15 = vmul.f32 %v17017_v6, %v17284_v8 }
 0x167   : > { %v1444_v9 = vadd.f32 %v1367_v18, %v1194_v58  ;;  %v1935_v12 = vrot.slane %v1819_v28, 1  ;;  %v2180_v29 = vrot.slane %v2064_v42, 2  ;;  %v922_v53 = vmul.f32 %v16825_v19, %v617_v55 }
 0x168   : > { %v1249_v34 = vmul.f32 %v16897_v48, %v617_v55  ;;  %v1117_v39 = vadd.f32 %v1043_v56, %v871_v25  ;;  %v798_v57 = vrot.slane %v676_v41, 1  ;;  %v1494_v13 = vmul.f32 %v16903_v47, %v617_v55 }
 0x169   : > { %v1936_v3 = vsel %vm734_vm2, %v1934_v22, %v1935_v12  ;;  %v1612_v14 = vsel %vm980_vm3, %v1610_v31, %v1611_v24  ;;  %v1767_v58 = vadd.f32 %v1735_v15, %v1688_v27  ;;  %v2181_v43 = vsel %vm980_vm3, %v2179_v33, %v2180_v29 }
 0x16a   : > { %v2016_v16 = vadd.f32 %v1936_v3, %v1766_v51  ;;  %v1368_v45 = vrot.slane %v1249_v34, 1  ;;  %v1689_v38 = vadd.f32 %v1612_v14, %v1444_v9  ;;  %v799_v8 = vsel %vm734_vm2, %v796_v36, %v798_v57  ;;  %v463_v9 = vpop.permute.xlu0 %462 }
 0x16b   : > { %v1820_v7 = vmul.f32 %v16948_v54, %v617_v55  ;;  %v1044_v21 = vrot.slane %v922_v53, 2  ;;  %v1613_v4 = vrot.slane %v1494_v13, 2  ;;  %v872_v25 = vadd.f32 %v799_v8, %v514_v30  ;;  %v2411_v30 = vld [vmem:[#allocation2 + $0xc9] sm:$0xff]  ;;  %v2410_v53 = vld [vmem:[#allocation2 + $0xc1] sm:$0xff] }
 0x16c   : > { %v2261_v26 = vadd.f32 %v2181_v43, %v2016_v16  ;;  %v1369_v22 = vsel %vm734_vm2, %v1366_v37, %v1368_v45  ;;  %v2065_v31 = vmul.f32 %v16987_v40, %v617_v55  ;;  %v1939_v51 = vrot.slane %v17354_v62, 1 }
 0x16d   : > { %v1445_v56 = vadd.f32 %v1369_v22, %v1195_v10  ;;  %v1937_v63 = vrot.slane %v1820_v7, 1  ;;  %v2184_v28 = vrot.slane %v17386_v11, 2  ;;  %v17422_v36 = vmul.f32 %v16812_v61, %v622_v46 }
 0x16e   : > { %v2293_v33 = vmax.f32 %v2261_v26, 0.0  ;;  %v1196_v18 = vadd.f32 %v17344_v5, %v1117_v39  ;;  %v2182_v42 = vrot.slane %v2065_v31, 2  ;;  %v17427_v37 = vmul.f32 %v16825_v19, %v622_v46  ;;  %v17476_v31 = vpop.permute.xlu1 %472 }
 0x16f   : > { %v1938_v27 = vsel %vm734_vm2, %v1935_v12, %v1937_v63  ;;  %v1768_v10 = vadd.f32 %v17351_v17, %v1689_v38  ;;  %v1045_v62 = vsel %vm980_vm3, %v1042_v20, %v1044_v21  ;;  %v1614_v11 = vsel %vm980_vm3, %v1611_v24, %v1613_v4 }
 0x170   : > { %2326 = vst.msk [vmem:[#allocation2 + $0x109] sm:$0xff] %vm224_vm0, %v2293_v33  ;;  %v2017_v55 = vadd.f32 %v1938_v27, %v1767_v58  ;;  %v17433_v41 = vadd.f32 %v1045_v62, %v872_v25  ;;  %v1690_v5 = vadd.f32 %v1614_v11, %v1445_v56  ;;  %v2183_v12 = vsel %vm980_vm3, %v2180_v29, %v2182_v42  ;;  %v468_v27 = vpop.permute.xlu0 %467 }
 0x171   : > { %v1823_v15 = vmul.f32 %v16948_v54, %v622_v46  ;;  %v803_v39 = vrot.slane %v17422_v36, 1  ;;  %v17439_v17 = vmul.f32 %v16897_v48, %v622_v46  ;;  %v2434_v3 = vpack.c.bf16 %v2411_v30, %v2410_v53 }
 0x172   : > { %v2262_v34 = vadd.f32 %v2183_v12, %v2017_v55  ;;  %v1049_v20 = vrot.slane %v17427_v37, 2  ;;  %v2068_v24 = vmul.f32 %v16987_v40, %v622_v46  ;;  %v17444_v57 = vmul.f32 %v16812_v61, %v463_v9 }
 0x173   : > { %v17447_v13 = vmul.f32 %v16825_v19, %v463_v9  ;;  %v17450_v14 = vmul.f32 %v16903_v47, %v622_v46  ;;  %14022 = vmatprep.mubr.msk.bf16.mxu0 %vm224_vm0, %v2434_v3  ;;  %v17454_v58 = vmul.f32 %v16897_v48, %v463_v9  ;;  %v17457_v16 = vmul.f32 %v16903_v47, %v463_v9 }
 0x174   : > { %v2294_v29 = vmax.f32 %v2262_v34, 0.0  ;;  %v1942_v45 = vrot.slane %v1823_v15, 1  ;;  %v801_v38 = vrot.slane %v17444_v57, 1  ;;  %v1737_v61 = vmul.f32 %v17017_v6, %v463_v9  ;;  %v2413_v34 = vld [vmem:[#allocation2 + $0xe1] sm:$0xff] }
 0x175   : > { %v1822_v19 = vmul.f32 %v16948_v54, %v463_v9  ;;  %v1047_v43 = vrot.slane %v17447_v13, 2  ;;  %v1371_v8 = vrot.slane %v17454_v58, 1  ;;  %v1616_v7 = vrot.slane %v17457_v16, 2 }
 0x176   : > { %2327 = vst.msk [vmem:[#allocation2 + $0x111] sm:$0xff] %vm224_vm0, %v2294_v29  ;;  %v2067_v46 = vmul.f32 %v16987_v40, %v463_v9  ;;  %v2187_v26 = vrot.slane %v2068_v24, 2  ;;  %v802_v21 = vsel %vm734_vm2, %v800_v23, %v801_v38  ;;  %v1769_v22 = vadd.f32 %v1737_v61, %v1690_v5 }
 0x177   : > { %v1940_v4 = vrot.slane %v1822_v19, 1  ;;  %v1373_v25 = vrot.slane %v17439_v17, 1  ;;  %v1372_v56 = vsel %vm734_vm2, %v1370_v44, %v1371_v8  ;;  %v873_v33 = vadd.f32 %v802_v21, %v17341_v0  ;;  %v2412_v19 = vld [vmem:[#allocation2 + $0xd9] sm:$0xff] }
 0x178   : > { %v2185_v63 = vrot.slane %v2067_v46, 2  ;;  %v1618_v50 = vrot.slane %v17450_v14, 2  ;;  %v1446_v30 = vadd.f32 %v1372_v56, %v1196_v18  ;;  %v1048_v52 = vsel %vm980_vm3, %v1046_v59, %v1047_v43  ;;  %v17497_v18 = vld [vmem:[%s19976_s1 + $0x1] ss:$0 sm:$0xff] }
 0x179   : > { %v1941_v23 = vsel %vm734_vm2, %v1939_v51, %v1940_v4  ;;  %v1943_v42 = vsel %vm734_vm2, %v1940_v4, %v1942_v45  ;;  %v1617_v0 = vsel %vm980_vm3, %v1615_v32, %v1616_v7  ;;  %v17508_v2 = vmul.f32 %v17505_v1, %v468_v27  ;;  %v17520_v45 = vpop.permute.xlu1 %477 }
 0x17a   : > { %v2018_v62 = vadd.f32 %v1941_v23, %v1768_v10  ;;  %v2019_v11 = vadd.f32 %v1943_v42, %v1769_v22  ;;  %v2186_v44 = vsel %vm980_vm3, %v2184_v28, %v2185_v63  ;;  %v2188_v51 = vsel %vm980_vm3, %v2185_v63, %v2187_v26 }
 0x17b   : > { %v17500_v10 = vmul.f32 %v17497_v18, %v468_v27  ;;  %v1119_v28 = vadd.f32 %v1048_v52, %v873_v33  ;;  %v17511_v55 = vmul.f32 %v16897_v48, %v468_v27  ;;  %v516_v5 = vmul.f32 %v16860_v35, %v463_v9  ;;  %v17525_v48 = vld [vmem:[%s19976_s1] ss:$0 sm:$0xff]  ;;  %v17573_v52 = vld [vmem:[%s19976_s1 + $0x4] ss:$0 sm:$0xff] }
 0x17c   : > { %v2263_v59 = vadd.f32 %v2186_v44, %v2018_v62  ;;  %v2264_v32 = vadd.f32 %v2188_v51, %v2019_v11  ;;  %v1165_v12 = vmul.f32 %v16868_v60, %v463_v9  ;;  %v1691_v15 = vadd.f32 %v1617_v0, %v1446_v30  ;;  %v627_v44 = vpop.permute.xlu0 %626 }
 0x17d   : > { %v17516_v53 = vmul.f32 %v16903_v47, %v468_v27  ;;  %v1166_v57 = vmul.f32 %v16868_v60, %v468_v27  ;;  %v1824_v29 = vmul.f32 %v16948_v54, %v468_v27  ;;  %v17528_v35 = vmul.f32 %v17525_v48, %v468_v27 }
 0x17e   : > { %v2295_v3 = vmax.f32 %v2263_v59, 0.0  ;;  %v2296_v24 = vmax.f32 %v2264_v32, 0.0  ;;  %v805_v47 = vrot.slane %v17500_v10, 1  ;;  %v1051_v9 = vrot.slane %v17508_v2, 2  ;;  %v17587_v59 = vld [vmem:[%s19976_s1 + $0x5] ss:$0 sm:$0xff] }
 0x17f   : > { %v2069_v61 = vmul.f32 %v16987_v40, %v468_v27  ;;  %v1198_v60 = vadd.f32 %v1166_v57, %v1119_v28  ;;  %v1375_v46 = vrot.slane %v17511_v55, 1  ;;  %v1738_v26 = vmul.f32 %v17017_v6, %v468_v27  ;;  %v17599_v32 = vld [vmem:[%s19976_s1 + $0x3] ss:$0 sm:$0xff] }
 0x180   : > { %2328 = vst.msk [vmem:[#allocation2 + $0x121] sm:$0xff] %vm224_vm0, %v2295_v3  ;;  %2329 = vst.msk [vmem:[#allocation2 + $0x129] sm:$0xff] %vm224_vm0, %v2296_v24  ;;  %v2435_v21 = vpack.c.bf16 %v2413_v34, %v2412_v19  ;;  %v1620_v22 = vrot.slane %v17516_v53, 2  ;;  %v17540_v4 = vmul.f32 %v16948_v54, %v17520_v45  ;;  %v17544_v56 = vmul.f32 %v17497_v18, %v17476_v31 }
 0x181   : > { %v804_v63 = vsel %vm734_vm2, %v801_v38, %v803_v39  ;;  %v1770_v33 = vadd.f32 %v1738_v26, %v1691_v15  ;;  %v1944_v23 = vrot.slane %v1824_v29, 1  ;;  %v17552_v27 = vmul.f32 %v17017_v6, %v17520_v45 }
 0x182   : > { %14023 = vmatmul.mubr.msk.bf16.gmra.mrb[16].mxu0 %vm224_vm0, %v2435_v21  ;;  %v874_v42 = vadd.f32 %v804_v63, %v516_v5  ;;  %v2189_v30 = vrot.slane %v2069_v61, 2  ;;  %v17556_v62 = vmul.f32 %v16987_v40, %v17520_v45  ;;  %v17560_v11 = vmul.f32 %v17505_v1, %v17476_v31 }
 0x183   : > { %v1197_v36 = vadd.f32 %v1165_v12, %v17433_v41  ;;  %v518_v39 = vmul.f32 %v17525_v48, %v17476_v31  ;;  %v1050_v38 = vsel %vm980_vm3, %v1047_v43, %v1049_v20  ;;  %v1254_v0 = vmul.f32 %v17573_v52, %v17476_v31 }
 0x184   : > { %v1374_v41 = vsel %vm734_vm2, %v1371_v8, %v1373_v25  ;;  %v1949_v37 = vrot.slane %v17540_v4, 1  ;;  %v806_v13 = vrot.slane %v17544_v56, 1  ;;  %v1120_v20 = vadd.f32 %v1050_v38, %v874_v42  ;;  %v632_v42 = vpop.permute.xlu1 %631 }
 0x185   : > { %v1447_v43 = vadd.f32 %v1374_v41, %v1197_v36  ;;  %v1376_v51 = vrot.slane %v1254_v0, 1  ;;  %v1499_v17 = vmul.f32 %v17587_v59, %v17476_v31  ;;  %v1825_v58 = vmul.f32 %v16948_v54, %v17476_v31  ;;  %v17632_v0 = vld [vmem:[%s19976_s1 + $0x8] ss:$0 sm:$0xff] }
 0x186   : > { %v2070_v8 = vmul.f32 %v16987_v40, %v17476_v31  ;;  %v1052_v25 = vrot.slane %v17560_v11, 2  ;;  %v1167_v28 = vmul.f32 %v17599_v32, %v17476_v31  ;;  %v682_v55 = vmul.f32 %v17497_v18, %v627_v44 }
 0x187   : > { %v928_v5 = vmul.f32 %v17505_v1, %v627_v44  ;;  %v1619_v54 = vsel %vm980_vm3, %v1616_v7, %v1618_v50  ;;  %v1945_v40 = vrot.slane %v1825_v58, 1  ;;  %v1255_v15 = vmul.f32 %v17573_v52, %v627_v44  ;;  %v2415_v58 = vld [vmem:[#allocation2 + $0xf9] sm:$0xff] }
 0x188   : > { %v2190_v12 = vrot.slane %v2070_v8, 2  ;;  %v1199_v53 = vadd.f32 %v1167_v28, %v1120_v20  ;;  %v1692_v34 = vadd.f32 %v1619_v54, %v1447_v43  ;;  %v1739_v3 = vmul.f32 %v17017_v6, %v17476_v31  ;;  %v17624_v31 = vld [vmem:[%s19976_s1 + $0x7] ss:$0 sm:$0xff] }
 0x189   : > { %v808_v24 = vrot.slane %v682_v55, 1  ;;  %v1377_v57 = vsel %vm734_vm2, %v1375_v46, %v1376_v51  ;;  %v1621_v29 = vrot.slane %v1499_v17, 2  ;;  %v1946_v61 = vsel %vm734_vm2, %v1944_v23, %v1945_v40 }
 0x18a   : > { %v1378_v14 = vrot.slane %v1255_v15, 1  ;;  %v1448_v19 = vadd.f32 %v1377_v57, %v1198_v60  ;;  %v2020_v16 = vadd.f32 %v1946_v61, %v1770_v33  ;;  %v1054_v26 = vrot.slane %v928_v5, 2  ;;  %v17647_v5 = vpop.permute.xlu0 %482  ;;  %v17669_v61 = vld [vmem:[%s19976_s1 + $0x6] ss:$0 sm:$0xff] }
 0x18b   : > { %v1500_v7 = vmul.f32 %v17587_v59, %v627_v44  ;;  %v2191_v50 = vsel %vm980_vm3, %v2189_v30, %v2190_v12  ;;  %v809_v21 = vsel %vm734_vm2, %v806_v13, %v808_v24  ;;  %v1826_v46 = vmul.f32 %v17624_v31, %v627_v44 }
 0x18c   : > { %v1379_v6 = vsel %vm734_vm2, %v1376_v51, %v1378_v14  ;;  %v1771_v60 = vadd.f32 %v1739_v3, %v1692_v34  ;;  %v2265_v63 = vadd.f32 %v2191_v50, %v2020_v16  ;;  %v2194_v30 = vrot.slane %v17556_v62, 2 }
 0x18d   : > { %v1449_v33 = vadd.f32 %v1379_v6, %v1199_v53  ;;  %v1623_v23 = vrot.slane %v1500_v7, 2  ;;  %v1622_v36 = vsel %vm980_vm3, %v1620_v22, %v1621_v29  ;;  %v1947_v38 = vrot.slane %v1826_v46, 1  ;;  %v2414_v53 = vld [vmem:[#allocation2 + $0xf1] sm:$0xff] }
 0x18e   : > { %v2071_v41 = vmul.f32 %v17632_v0, %v627_v44  ;;  %v1693_v20 = vadd.f32 %v1622_v36, %v1448_v19  ;;  %v2297_v43 = vmax.f32 %v2265_v63, 0.0  ;;  %v17635_v51 = vadd.f32 %v809_v21, %v518_v39 }
 0x18f   : > { %v17640_v17 = vsel %vm980_vm3, %v1052_v25, %v1054_v26  ;;  %v1624_v22 = vsel %vm980_vm3, %v1621_v29, %v1623_v23  ;;  %v1948_v8 = vsel %vm734_vm2, %v1945_v40, %v1947_v38  ;;  %v17645_v55 = vmul.f32 %v17497_v18, %v632_v42 }
 0x190   : > { %v2192_v28 = vrot.slane %v2071_v41, 2  ;;  %2330 = vst.msk [vmem:[#allocation2 + $0x139] sm:$0xff] %vm224_vm0, %v2297_v43  ;;  %v1694_v39 = vadd.f32 %v1624_v22, %v1449_v33  ;;  %v2021_v44 = vadd.f32 %v1948_v8, %v1771_v60  ;;  %v17651_v54 = vmul.f32 %v17505_v1, %v632_v42  ;;  %v2339_v8 = vld [vmem:[#allocation2 + $0x8] sm:$0xff] }
 0x191   : > { %v17654_v15 = vmul.f32 %v17573_v52, %v632_v42  ;;  %v17658_v40 = vmul.f32 %v17624_v31, %v632_v42  ;;  %v17661_v3 = vmul.f32 %v17632_v0, %v632_v42  ;;  %v2436_v24 = vpack.c.bf16 %v2415_v58, %v2414_v53  ;;  %v2340_v53 = vld [vmem:[#allocation2 + $0x18] sm:$0xff] }
 0x192   : > { %v2193_v34 = vsel %vm980_vm3, %v2190_v12, %v2192_v28  ;;  %v17664_v29 = vmul.f32 %v17587_v59, %v632_v42  ;;  %v1741_v14 = vmul.f32 %v17669_v61, %v17647_v5  ;;  %v1828_v12 = vmul.f32 %v17624_v31, %v17647_v5  ;;  %v2341_v28 = vld [vmem:[#allocation2 + $0x20] sm:$0xff] }
 0x193   : > { %v2266_v57 = vadd.f32 %v2193_v34, %v2021_v44  ;;  %v1772_v19 = vadd.f32 %v17552_v27, %v1693_v20  ;;  %v1952_v16 = vrot.slane %v17658_v40, 1  ;;  %14026 = vmatprep.mubr.msk.bf16.mxu1 %vm224_vm0, %v2436_v24  ;;  %v2073_v26 = vmul.f32 %v17632_v0, %v17647_v5  ;;  %v17753_v27 = vpop.permute.xlu1 %1133  ;;  %v2343_v34 = vld [vmem:[#allocation2 + $0x38] sm:$0xff] }
 0x194   : > { %v2197_v50 = vrot.slane %v17661_v3, 2  ;;  %v1773_v21 = vadd.f32 %v1741_v14, %v1694_v39  ;;  %v1950_v6 = vrot.slane %v1828_v12, 1  ;;  %v17757_v46 = vadd.f32 %v17640_v17, %v17635_v51  ;;  %v2342_v14 = vld [vmem:[#allocation2 + $0x30] sm:$0xff] }
 0x195   : > { %v2298_v7 = vmax.f32 %v2266_v57, 0.0  ;;  %v813_v60 = vrot.slane %v17645_v55, 1  ;;  %v1059_v63 = vrot.slane %v17651_v54, 2  ;;  %v2195_v33 = vrot.slane %v2073_v26, 2  ;;  %v2417_v26 = vld [vmem:[#allocation2 + $0x111] sm:$0xff] }
 0x196   : > { %v1383_v23 = vrot.slane %v17654_v15, 1  ;;  %v1628_v42 = vrot.slane %v17664_v29, 2  ;;  %v1951_v49 = vsel %vm734_vm2, %v1949_v37, %v1950_v6  ;;  %v1953_v36 = vsel %vm734_vm2, %v1950_v6, %v1952_v16  ;;  %v2348_v54 = vld [vmem:[#allocation2 + $0x78] sm:$0xff] }
 0x197   : > { %2331 = vst.msk [vmem:[#allocation2 + $0x141] sm:$0xff] %vm224_vm0, %v2298_v7  ;;  %v2022_v38 = vadd.f32 %v1951_v49, %v1772_v19  ;;  %v2023_v41 = vadd.f32 %v1953_v36, %v1773_v21  ;;  %v17770_v20 = vmul.f32 %v17573_v52, %v17753_v27  ;;  %v17774_v43 = vmul.f32 %v17587_v59, %v17753_v27  ;;  %v15981_v7 = vld [vmem:[%s19977_s2 + $0x48] sm:$0xff]  }
 0x198   : > { %v2196_v51 = vsel %vm980_vm3, %v2194_v30, %v2195_v33  ;;  %v2198_v4 = vsel %vm980_vm3, %v2195_v33, %v2197_v50  ;;  %v17782_v37 = vmul.f32 %v17624_v31, %v17753_v27  ;;  %v807_v17 = vsel %vm734_vm2, %v805_v47, %v806_v13 }
 0x199   : > { %v2267_v58 = vadd.f32 %v2196_v51, %v2022_v38  ;;  %v2268_v22 = vadd.f32 %v2198_v4, %v2023_v41  ;;  %v17791_v62 = vmul.f32 %v17669_v61, %v17753_v27  ;;  %v875_v30 = vadd.f32 %v807_v17, %v17528_v35  ;;  %v2338_v35 = vld [vmem:[#allocation2] sm:$0xff]  ;;  %v2416_v51 = vld [vmem:[#allocation2 + $0x109] sm:$0xff] }
 0x19a   : > { %v1053_v56 = vsel %vm980_vm3, %v1051_v9, %v1052_v25  ;;  %v1256_v10 = vmul.f32 %v17573_v52, %v17520_v45  ;;  %v17803_v47 = vmul.f32 %v17573_v52, %v17647_v5  ;;  %v1501_v13 = vmul.f32 %v17587_v59, %v17520_v45  ;;  %v1129_v9 = vpop.permute.xlu0 %1128  ;;  %v16098_v4 = vld [vmem:[%s19977_s2 + $0x40] sm:$0xff]  }
 0x19b   : > { %v2299_v39 = vmax.f32 %v2267_v58, 0.0  ;;  %v2300_v44 = vmax.f32 %v2268_v22, 0.0  ;;  %v1121_v11 = vadd.f32 %v1053_v56, %v875_v30  ;;  %v17809_v2 = vmul.f32 %v17587_v59, %v17647_v5 }
 0x19c   : > { %v2370_v25 = vpack.c.bf16 %v2339_v8, %v2338_v35  ;;  %v1955_v40 = vrot.slane %v17782_v37, 1  ;;  %v17814_v3 = vmul.f32 %v17632_v0, %v17753_v27  ;;  %v1168_v24 = vmul.f32 %v17599_v32, %v17520_v45 }
 0x19d   : > { %2332 = vst.msk [vmem:[#allocation2 + $0x151] sm:$0xff] %vm224_vm0, %v2299_v39  ;;  %2333 = vst.msk [vmem:[#allocation2 + $0x159] sm:$0xff] %vm224_vm0, %v2300_v44  ;;  %v17820_v57 = vpack.c.bf16 %v2341_v28, %v2340_v53  ;;  %v1380_v12 = vrot.slane %v1256_v10, 1  ;;  %v1381_v19 = vrot.slane %v17803_v47, 1  ;;  %v1626_v16 = vrot.slane %v17809_v2, 2  ;;  %v2419_v47 = vld [vmem:[#allocation2 + $0x129] sm:$0xff] }
 0x19e   : > { %14046 = vmatprep.mubr.msk.bf16.mxu0 %vm224_vm0, %v2370_v25  ;;  %v17828_v50 = vpack.c.bf16 %v2343_v34, %v2342_v14  ;;  %v1200_v21 = vadd.f32 %v1168_v24, %v1121_v11  ;;  %v1625_v6 = vrot.slane %v1501_v13, 2  ;;  %v1259_v33 = vmul.f32 %v17573_v52, %v1129_v9  ;;  %v15982_v13 = vld [vmem:[%s19977_s2 + $0x50] sm:$0xff]   ;;  %v2418_v2 = vld [vmem:[#allocation2 + $0x121] sm:$0xff] }
 0x19f   : > { %14047 = vmatmul.mubr.msk.bf16.vlgmr.msra.gmra.mrb[0].mxu0 %vm224_vm0, %v17820_v57  ;;  %v1382_v49 = vsel %vm734_vm2, %v1380_v12, %v1381_v19  ;;  %v1504_v36 = vmul.f32 %v17587_v59, %v1129_v9  ;;  %v1830_v38 = vmul.f32 %v17624_v31, %v1129_v9  ;;  %v2075_v41 = vmul.f32 %v17632_v0, %v1129_v9 }
 0x1a0   : > { %14079 = vmatpush3.bf16.msra.mxu0 %v16098_v4  ;;  %14050 = vmatprep.mubr.msk.bf16.mxu0 %vm224_vm0, %v17828_v50  ;;  %v2200_v17 = vrot.slane %v17814_v3, 2  ;;  %v1450_v58 = vadd.f32 %v1382_v49, %v1200_v21  ;;  %v1742_v22 = vmul.f32 %v17669_v61, %v1129_v9  ;;  %v17846_v8 = vpack.c.bf16 %v2417_v26, %v2416_v51  ;;  %v1703_v26 = vpop.permute.xlu1 %1702  ;;  %v1208_v51 = vpop.permute.xlu0 %1207 }
 0x1a1   : > { %v1627_v30 = vsel %vm980_vm3, %v1625_v6, %v1626_v16  ;;  %v1954_v28 = vrot.slane %v1830_v38, 1  ;;  %v2199_v56 = vrot.slane %v2075_v41, 2  ;;  %v683_v10 = vmul.f32 %v17497_v18, %v17520_v45  ;;  %14080 = vmatprep.subr.bf16.mxu0 %v15981_v7 }
 0x1a2   : > { %v1695_v39 = vadd.f32 %v1627_v30, %v1450_v58  ;;  %14027 = vmatmul.mubr.msk.bf16.vlgmr.msra.gmra.mrb[0].mxu1 %vm224_vm0, %v17846_v8  ;;  %v929_v44 = vmul.f32 %v17505_v1, %v17520_v45  ;;  %v17862_v35 = vmul.f32 %v17497_v18, %v17647_v5  ;;  %v17866_v53 = vmul.f32 %v17505_v1, %v17647_v5  ;;  %v2345_v30 = vld [vmem:[#allocation2 + $0x50] sm:$0xff] }
 0x1a3   : > { %v1386_v34 = vrot.slane %v17770_v20, 1  ;;  %v1631_v11 = vrot.slane %v17774_v43, 2  ;;  %v1385_v25 = vrot.slane %v1259_v33, 1  ;;  %v1630_v24 = vrot.slane %v1504_v36, 2  ;;  %v15983_v36 = vld [vmem:[%s19977_s2 + $0x58] sm:$0xff]  }
 0x1a4   : > { %v1774_v14 = vadd.f32 %v1742_v22, %v1695_v39  ;;  %v810_v12 = vrot.slane %v683_v10, 1  ;;  %v811_v21 = vrot.slane %v17862_v35, 1  ;;  %v1057_v6 = vrot.slane %v17866_v53, 2  ;;  %14081 = vmatpush3.bf16.msra.mxu0 %v15981_v7  ;;  %v1782_v29 = vpop.permute.xlu1 %1781 }
 0x1a5   : > { %v1170_v18 = vmul.f32 %v17599_v32, %v1129_v9  ;;  %v1956_v1 = vsel %vm734_vm2, %v1954_v28, %v1955_v40  ;;  %v2201_v49 = vsel %vm980_vm3, %v2199_v56, %v2200_v17  ;;  %v519_v33 = vmul.f32 %v17525_v48, %v17520_v45  ;;  %14082 = vmatprep.subr.bf16.mxu0 %v15982_v13 }
 0x1a6   : > { %v2024_v38 = vadd.f32 %v1956_v1, %v1774_v14  ;;  %v1056_v7 = vrot.slane %v929_v44, 2  ;;  %v812_v9 = vsel %vm734_vm2, %v810_v12, %v811_v21  ;;  %v1169_v41 = vmul.f32 %v17599_v32, %v17647_v5  ;;  %v2344_v12 = vld [vmem:[#allocation2 + $0x48] sm:$0xff] }
 0x1a7   : > { %v877_v4 = vadd.f32 %v812_v9, %v519_v33  ;;  %v1387_v45 = vsel %vm734_vm2, %v1385_v25, %v1386_v34  ;;  %v1632_v58 = vsel %vm980_vm3, %v1630_v24, %v1631_v11  ;;  %v17896_v22 = vmul.f32 %v17624_v31, %v1703_v26  ;;  %v2347_v1 = vld [vmem:[#allocation2 + $0x68] sm:$0xff] }
 0x1a8   : > { %v2269_v28 = vadd.f32 %v2201_v49, %v2024_v38  ;;  %v1058_v56 = vsel %vm980_vm3, %v1056_v7, %v1057_v6  ;;  %v1201_v10 = vadd.f32 %v1169_v41, %v17757_v46  ;;  %v1384_v39 = vsel %vm734_vm2, %v1381_v19, %v1383_v23  ;;  %14083 = vmatpush3.bf16.msra.mxu0 %v15982_v13  ;;  %v17918_v23 = vld [vmem:[%s19977_s2 + $0x60] sm:$0xff]  }
 0x1a9   : > { %v1123_v44 = vadd.f32 %v1058_v56, %v877_v4  ;;  %v1261_v25 = vmul.f32 %v17573_v52, %v1208_v51  ;;  %v1832_v24 = vmul.f32 %v17624_v31, %v1208_v51  ;;  %v2077_v14 = vmul.f32 %v17632_v0, %v1208_v51  ;;  %14084 = vmatprep.subr.bf16.mxu0 %v15983_v36  ;;  %v2346_v7 = vld [vmem:[#allocation2 + $0x60] sm:$0xff]  ;;  %v1708_v56 = vpop.permute.xlu0 %1707 }
 0x1aa   : > { %v2301_v49 = vmax.f32 %v2269_v28, 0.0  ;;  %v1451_v33 = vadd.f32 %v1384_v39, %v1201_v10  ;;  %v17911_v46 = vmul.f32 %v17587_v59, %v1208_v51  ;;  %v17913_v15 = vpack.c.bf16 %v2345_v30, %v2344_v12  ;;  %v2423_v39 = vld [vmem:[#allocation2 + $0x159] sm:$0xff] }
 0x1ab   : > { %v1202_v52 = vadd.f32 %v1170_v18, %v1123_v44  ;;  %v1629_v19 = vsel %vm980_vm3, %v1626_v16, %v1628_v42  ;;  %v1957_v13 = vrot.slane %v1832_v24, 1  ;;  %v2202_v38 = vrot.slane %v2077_v14, 2  ;;  %v2420_v44 = vld [vmem:[#allocation2 + $0x139] sm:$0xff] }
 0x1ac   : > { %2334 = vst.msk [vmem:[#allocation2 + $0x169] sm:$0xff] %vm224_vm0, %v2301_v49  ;;  %v1744_v59 = vmul.f32 %v17669_v61, %v1703_v26  ;;  %v17928_v9 = vmul.f32 %v17632_v0, %v1703_v26  ;;  %v1696_v41 = vadd.f32 %v1629_v19, %v1451_v33  ;;  %14051 = vmatmul.mubr.msk.bf16.gmra.mrb[4].mxu0 %vm224_vm0, %v17913_v15  ;;  %v1388_v42 = vrot.slane %v1261_v25, 1 }
 0x1ad   : > { %v17932_v18 = vpack.c.bf16 %v2347_v1, %v2346_v7  ;;  %v1452_v51 = vadd.f32 %v1387_v45, %v1202_v52  ;;  %v1958_v16 = vsel %vm734_vm2, %v1955_v40, %v1957_v13  ;;  %v17937_v4 = vpack.c.bf16 %v2419_v47, %v2418_v2  ;;  %14085 = vmatpush3.bf16.msra.mxu0 %v15983_v36 }
 0x1ae   : > { %v1959_v26 = vrot.slane %v17896_v22, 1  ;;  %v1775_v30 = vadd.f32 %v17791_v62, %v1696_v41  ;;  %v1633_v28 = vrot.slane %v17911_v46, 2  ;;  %v520_v45 = vmul.f32 %v17525_v48, %v17647_v5  ;;  %14118 = vmatprep.subr.bf16.mxu0 %v17918_v23  ;;  %v2421_v48 = vld [vmem:[#allocation2 + $0x141] sm:$0xff] }
 0x1af   : > { %14054 = vmatprep.mubr.msk.bf16.mxu0 %vm224_vm0, %v17932_v18  ;;  %v1697_v37 = vadd.f32 %v1632_v58, %v1452_v51  ;;  %v2203_v40 = vsel %vm980_vm3, %v2200_v17, %v2202_v38  ;;  %v1835_v36 = vmul.f32 %v17624_v31, %v1782_v29  ;;  %14030 = vmatprep.mubr.msk.bf16.mxu1 %vm224_vm0, %v17937_v4  ;;  %v2349_v5 = vld [vmem:[#allocation2 + $0x80] sm:$0xff]  ;;  %v2351_v58 = vld [vmem:[#allocation2 + $0x98] sm:$0xff]  ;;  %v2204_v1 = vrot.slane %v17928_v9, 2  ;;  %v2355_v9 = vld [vmem:[#allocation2 + $0xc8] sm:$0xff] }
 0x1b0   : > { %v814_v62 = vsel %vm734_vm2, %v811_v21, %v813_v60  ;;  %v2025_v22 = vadd.f32 %v1958_v16, %v1775_v30  ;;  %v1060_v3 = vsel %vm980_vm3, %v1057_v6, %v1059_v63  ;;  %v1171_v17 = vmul.f32 %v17599_v32, %v17753_v27  ;;  %v2350_v32 = vld [vmem:[#allocation2 + $0x90] sm:$0xff]  ;;  %v2354_v16 = vld [vmem:[#allocation2 + $0xc0] sm:$0xff] }
 0x1b1   : > { %v878_v10 = vadd.f32 %v814_v62, %v520_v45  ;;  %v1776_v55 = vadd.f32 %v1744_v59, %v1697_v37  ;;  %v1389_v60 = vsel %vm734_vm2, %v1386_v34, %v1388_v42  ;;  %v1834_v35 = vmul.f32 %v17624_v31, %v1708_v56  ;;  %v2422_v27 = vld [vmem:[#allocation2 + $0x151] sm:$0xff]  ;;  %v2357_v37 = vld [vmem:[#allocation2 + $0xe0] sm:$0xff] }
 0x1b2   : > { %v2079_v21 = vmul.f32 %v17632_v0, %v1708_v56  ;;  %v2270_v25 = vadd.f32 %v2203_v40, %v2025_v22  ;;  %v17970_v24 = vpack.c.bf16 %v2421_v48, %v2420_v44  ;;  %v17972_v63 = vpack.c.bf16 %v2349_v5, %v2348_v54  ;;  %v2356_v62 = vld [vmem:[#allocation2 + $0xd8] sm:$0xff]  ;;  %v2358_v5 = vld [vmem:[#allocation2 + $0xf0] sm:$0xff] }
 0x1b3   : > { %v1124_v53 = vadd.f32 %v1060_v3, %v878_v10  ;;  %v1960_v6 = vrot.slane %v1834_v35, 1  ;;  %v17974_v12 = vpack.c.bf16 %v2351_v58, %v2350_v32  ;;  %v17976_v20 = vpack.c.bf16 %v2423_v39, %v2422_v27  ;;  %v2424_v30 = vld [vmem:[#allocation2 + $0x169] sm:$0xff]  ;;  %v2362_v39 = vld [vmem:[#allocation2 + $0x120] sm:$0xff]  ;;  %v2367_v35 = vld [vmem:[#allocation2 + $0x158] sm:$0xff] }
 0x1b4   : > { %v2205_v14 = vrot.slane %v2079_v21, 2  ;;  %v2302_v34 = vmax.f32 %v2270_v25, 0.0  ;;  %14031 = vmatmul.mubr.msk.bf16.gmra.mrb[4].mxu1 %vm224_vm0, %v17970_v24  ;;  %14055 = vmatmul.mubr.msk.bf16.gmra.mrb[8].mxu0 %vm224_vm0, %v17972_v63  ;;  %v2080_v49 = vmul.f32 %v17632_v0, %v1782_v29  ;;  %v1962_v52 = vrot.slane %v1835_v36, 1  ;;  %v2353_v0 = vld [vmem:[#allocation2 + $0xb0] sm:$0xff]  ;;  %v2352_v29 = vld [vmem:[#allocation2 + $0xa8] sm:$0xff]  ;;  %v2359_v36 = vld [vmem:[#allocation2 + $0xf8] sm:$0xff] }
 0x1b5   : > { %v1203_v31 = vadd.f32 %v1171_v17, %v1124_v53  ;;  %v1961_v33 = vsel %vm734_vm2, %v1959_v26, %v1960_v6  ;;  %14058 = vmatprep.mubr.msk.bf16.mxu0 %vm224_vm0, %v17974_v12  ;;  %14034 = vmatprep.mubr.msk.bf16.mxu1 %vm224_vm0, %v17976_v20  ;;  %v1634_v19 = vsel %vm980_vm3, %v1631_v11, %v1633_v28  ;;  %v2361_v10 = vld [vmem:[#allocation2 + $0x110] sm:$0xff]  ;;  %v2363_v3 = vld [vmem:[#allocation2 + $0x128] sm:$0xff]  ;;  %v2364_v21 = vld [vmem:[#allocation2 + $0x138] sm:$0xff] }
 0x1b6   : > { %2335 = vst.msk [vmem:[#allocation2 + $0x171] sm:$0xff] %vm224_vm0, %v2302_v34  ;;  %v2026_v47 = vadd.f32 %v1961_v33, %v1776_v55  ;;  %v2206_v13 = vsel %vm980_vm3, %v2204_v1, %v2205_v14  ;;  %v1745_v7 = vmul.f32 %v17669_v61, %v1708_v56  ;;  %v2207_v41 = vrot.slane %v2080_v49, 2  ;;  %v2360_v17 = vld [vmem:[#allocation2 + $0x108] sm:$0xff]  ;;  %v2366_v54 = vld [vmem:[#allocation2 + $0x150] sm:$0xff]  ;;  %v2922_v33 = vld [vmem:[#allocation2 + $0x3a] sm:$0xff] }
 0x1b7   : > { %v1453_v46 = vadd.f32 %v1389_v60, %v1203_v31  ;;  %v17995_v42 = vpack.c.bf16 %v2353_v0, %v2352_v29  ;;  %v1963_v26 = vsel %vm734_vm2, %v1960_v6, %v1962_v52  ;;  %v17998_v43 = vpack.c.bf16 %v2355_v9, %v2354_v16  ;;  %v2365_v60 = vld [vmem:[#allocation2 + $0x140] sm:$0xff]  ;;  %v2918_v32 = vld [vmem:[#allocation2 + $0xa] sm:$0xff]  ;;  %v2921_v49 = vld [vmem:[#allocation2 + $0x32] sm:$0xff] }
 0x1b8   : > { %v2271_v59 = vadd.f32 %v2206_v13, %v2026_v47  ;;  %v2208_v61 = vsel %vm980_vm3, %v2205_v14, %v2207_v41  ;;  %v18011_v48 = vpack.c.bf16 %v2357_v37, %v2356_v62  ;;  %v18013_v22 = vpack.c.bf16 %v2359_v36, %v2358_v5  ;;  %v2917_v53 = vld [vmem:[#allocation2 + $0x2] sm:$0xff]  ;;  %v2919_v31 = vld [vmem:[#allocation2 + $0x1a] sm:$0xff]  ;;  %v2923_v13 = vld [vmem:[#allocation2 + $0x4a] sm:$0xff] }
 0x1b9   : > { %v1698_v38 = vadd.f32 %v1634_v19, %v1453_v46  ;;  %v18019_v58 = vpack.c.bf16 %v2361_v10, %v2360_v17  ;;  %v18021_v55 = vpack.c.bf16 %v2363_v3, %v2362_v39  ;;  %v18027_v44 = vpack.c.bf16 %v2365_v60, %v2364_v21  ;;  %v2368_v6 = vld [vmem:[#allocation2 + $0x168] sm:$0xff]  ;;  %v15986_v19 = vld [vmem:[%s19977_s2 + $0x70] sm:$0xff]   ;;  %v15988_v41 = vld [vmem:[%s19977_s2 + $0x80] sm:$0xff]  }
 0x1ba   : > { %v2303_v51 = vmax.f32 %v2271_v59, 0.0  ;;  %v18029_v25 = vpack.c.bf16 %v2367_v35, %v2366_v54  ;;  %v2949_v14 = vpack.c.bf16 %v2918_v32, %v2917_v53  ;;  %v2920_v1 = vld [vmem:[#allocation2 + $0x22] sm:$0xff]  ;;  %v18045_v52 = vpack.c.bf16 %v2922_v33, %v2921_v49  ;;  %v2924_v0 = vld [vmem:[#allocation2 + $0x52] sm:$0xff]  ;;  %v2927_v29 = vld [vmem:[#allocation2 + $0x7a] sm:$0xff] }
 0x1bb   : > { %v1777_v2 = vadd.f32 %v1745_v7, %v1698_v38  ;;  %v18040_v46 = vpack.c.bf16 %v2920_v1, %v2919_v31  ;;  %v15985_v47 = vld [vmem:[%s19977_s2 + $0x68] sm:$0xff]   ;;  %v18055_v59 = vpack.c.bf16 %v2924_v0, %v2923_v13  ;;  %v2930_v16 = vld [vmem:[#allocation2 + $0x9a] sm:$0xff]  ;;  %v2937_v5 = vld [vmem:[#allocation2 + $0xf2] sm:$0xff] }
 0x1bc   : > { %2336 = vst.msk [vmem:[#allocation2 + $0x181] sm:$0xff] %vm224_vm0, %v2303_v51  ;;  %14059 = vmatmul.mubr.msk.bf16.gmra.mrb[12].mxu0 %vm224_vm0, %v17995_v42  ;;  %v2925_v38 = vld [vmem:[#allocation2 + $0x62] sm:$0xff]  ;;  %v2926_v7 = vld [vmem:[#allocation2 + $0x6a] sm:$0xff]  ;;  %v2929_v51 = vld [vmem:[#allocation2 + $0x92] sm:$0xff] }
 0x1bd   : > { %v2027_v11 = vadd.f32 %v1963_v26, %v1777_v2  ;;  %14062 = vmatprep.mubr.msk.bf16.mxu0 %vm224_vm0, %v17998_v43  ;;  %v2425_v28 = vld [vmem:[#allocation2 + $0x171] sm:$0xff]  ;;  %v18060_v9 = vpack.c.bf16 %v2926_v7, %v2925_v38  ;;  %v2928_v2 = vld [vmem:[#allocation2 + $0x82] sm:$0xff]  ;;  %v2935_v36 = vld [vmem:[#allocation2 + $0xda] sm:$0xff] }
 0x1be   : > { %v18006_v56 = vpack.c.bf16 %v2425_v28, %v2424_v30  ;;  %v2369_v27 = vld [vmem:[#allocation2 + $0x170] sm:$0xff]  ;;  %v18069_v26 = vpack.c.bf16 %v2928_v2, %v2927_v29  ;;  %v2933_v28 = vld [vmem:[#allocation2 + $0xc2] sm:$0xff]  ;;  %v2938_v10 = vld [vmem:[#allocation2 + $0xfa] sm:$0xff] }
 0x1bf   : > { %v2272_v45 = vadd.f32 %v2208_v61, %v2027_v11  ;;  %v18035_v34 = vpack.c.bf16 %v2369_v27, %v2368_v6  ;;  %v18071_v11 = vpack.c.bf16 %v2930_v16, %v2929_v51  ;;  %v2931_v61 = vld [vmem:[#allocation2 + $0xaa] sm:$0xff]  ;;  %v2932_v30 = vld [vmem:[#allocation2 + $0xb2] sm:$0xff]  ;;  %v2936_v62 = vld [vmem:[#allocation2 + $0xe2] sm:$0xff]  ;;  %v18087_v17 = vpack.c.bf16 %v2938_v10, %v2937_v5 }
 0x1c0   : > { %14035 = vmatmul.mubr.msk.bf16.gmra.mrb[8].mxu1 %vm224_vm0, %v18006_v56  ;;  %v18077_v37 = vpack.c.bf16 %v2932_v30, %v2931_v61  ;;  %v18085_v3 = vpack.c.bf16 %v2936_v62, %v2935_v36  ;;  %v2939_v39 = vld [vmem:[#allocation2 + $0x10a] sm:$0xff]  ;;  %v2940_v60 = vld [vmem:[#allocation2 + $0x112] sm:$0xff]  ;;  %v2941_v35 = vld [vmem:[#allocation2 + $0x122] sm:$0xff] }
 0x1c1   : > { %v2304_v40 = vmax.f32 %v2272_v45, 0.0  ;;  %v2934_v45 = vld [vmem:[#allocation2 + $0xca] sm:$0xff]  ;;  %v18093_v54 = vpack.c.bf16 %v2940_v60, %v2939_v39  ;;  %v2943_v32 = vld [vmem:[#allocation2 + $0x13a] sm:$0xff]  ;;  %v2944_v27 = vld [vmem:[#allocation2 + $0x142] sm:$0xff] }
 0x1c2   : > { %v2942_v21 = vld [vmem:[#allocation2 + $0x12a] sm:$0xff]  ;;  %v2945_v6 = vld [vmem:[#allocation2 + $0x152] sm:$0xff]  ;;  %v18101_v31 = vpack.c.bf16 %v2944_v27, %v2943_v32  ;;  %v3562_v7 = vld [vmem:[#allocation2 + $0x21] sm:$0xff] }
 0x1c3   : > { %2337 = vst.msk [vmem:[#allocation2 + $0x189] sm:$0xff] %vm224_vm0, %v2304_v40  ;;  %v18079_v40 = vpack.c.bf16 %v2934_v45, %v2933_v28  ;;  %v18095_v53 = vpack.c.bf16 %v2942_v21, %v2941_v35  ;;  %v2947_v49 = vld [vmem:[#allocation2 + $0x16a] sm:$0xff]  ;;  %v2948_v33 = vld [vmem:[#allocation2 + $0x172] sm:$0xff]  ;;  %v3570_v5 = vld [vmem:[#allocation2 + $0x81] sm:$0xff] }
 0x1c4   : > { %14063 = vmatmul.mubr.msk.bf16.gmra.mrb[16].mxu0 %vm224_vm0, %v18011_v48  ;;  %v15990_v13 = vld [vmem:[%s19977_s2 + $0x90] sm:$0xff]   ;;  %v3561_v38 = vld [vmem:[#allocation2 + $0x19] sm:$0xff]  ;;  %v15993_v28 = vld [vmem:[%s19977_s2 + $0xa8] sm:$0xff]  }
 0x1c5   : > { %14066 = vmatprep.mubr.msk.bf16.mxu0 %vm224_vm0, %v18013_v22  ;;  %v3593_v29 = vpack.c.bf16 %v3562_v7, %v3561_v38  ;;  %v3564_v2 = vld [vmem:[#allocation2 + $0x39] sm:$0xff]  ;;  %v3566_v51 = vld [vmem:[#allocation2 + $0x51] sm:$0xff]  ;;  %v3565_v30 = vld [vmem:[#allocation2 + $0x49] sm:$0xff] }
 0x1c6   : > { %v3563_v16 = vld [vmem:[#allocation2 + $0x31] sm:$0xff]  ;;  %v18165_v45 = vpack.c.bf16 %v3566_v51, %v3565_v30  ;;  %v3568_v62 = vld [vmem:[#allocation2 + $0x69] sm:$0xff]  ;;  %v3567_v10 = vld [vmem:[#allocation2 + $0x61] sm:$0xff] }
 0x1c7   : > { %v18160_v61 = vpack.c.bf16 %v3564_v2, %v3563_v16  ;;  %v15994_v36 = vld [vmem:[%s19977_s2 + $0xb0] sm:$0xff]   ;;  %v18174_v39 = vpack.c.bf16 %v3568_v62, %v3567_v10  ;;  %v3569_v60 = vld [vmem:[#allocation2 + $0x79] sm:$0xff]  ;;  %v3578_v38 = vld [vmem:[#allocation2 + $0xe1] sm:$0xff] }
 0x1c8   : > { %v15995_v35 = vld [vmem:[%s19977_s2 + $0xb8] sm:$0xff]   ;;  %v18179_v21 = vpack.c.bf16 %v3570_v5, %v3569_v60  ;;  %v15996_v32 = vld [vmem:[%s19977_s2 + $0xc0] sm:$0xff]  }
 0x1c9   : > { %v3572_v27 = vld [vmem:[#allocation2 + $0x99] sm:$0xff]  ;;  %v3579_v30 = vld [vmem:[#allocation2 + $0xf1] sm:$0xff] }
 0x1ca   : > { %v3270_v0 = vld [vmem:[#allocation2 + $0x188] sm:$0xff]  ;;  %v3577_v2 = vld [vmem:[#allocation2 + $0xd9] sm:$0xff] }
 0x1cb   : > { %v18206_v51 = vpack.c.bf16 %v3578_v38, %v3577_v2  ;;  %v3580_v16 = vld [vmem:[#allocation2 + $0xf9] sm:$0xff] }
 0x1cc   : > { %14067 = vmatmul.mubr.msk.bf16.gmra.mrb[20].mxu0 %vm224_vm0, %v18019_v58 }
 0x1cd   : > { %14070 = vmatprep.mubr.msk.bf16.mxu0 %vm224_vm0, %v18021_v55 }
 0x1d4   : > { %14071 = vmatmul.mubr.msk.bf16.gmra.mrb[24].mxu0 %vm224_vm0, %v18027_v44 }
 0x1d5   : > { %14074 = vmatprep.mubr.msk.bf16.mxu0 %vm224_vm0, %v18029_v25 }
 0x1dc   : > { %14075 = vmatmul.mubr.msk.bf16.gmra.mrb[28].mxu0 %vm224_vm0, %v18035_v34 }
 0x1dd   : > { %14086 = vmatprep.mubr.msk.bf16.mxu0 %vm224_vm0, %v2949_v14  ;;  %v2946_v14 = vld [vmem:[#allocation2 + $0x15a] sm:$0xff] }
 0x1de   : > { %v18103_v1 = vpack.c.bf16 %v2946_v14, %v2945_v6  ;;  %v3574_v6 = vld [vmem:[#allocation2 + $0xb1] sm:$0xff] }
 0x1df   : > { %v3571_v14 = vld [vmem:[#allocation2 + $0x91] sm:$0xff] }
 0x1e4   : > { %14087 = vmatmul.mubr.msk.bf16.vlgmr.msra.gmra.mrb[0].mxu0 %vm224_vm0, %v18040_v46 }
 0x1e5   : > { %14119 = vmatpush3.bf16.msra.mxu0 %v17918_v23  ;;  %14090 = vmatprep.mubr.msk.bf16.mxu0 %vm224_vm0, %v18045_v52  ;;  %v15987_v23 = vld [vmem:[%s19977_s2 + $0x78] sm:$0xff]  }
 0x1e6   : > { %14120 = vmatprep.subr.bf16.mxu0 %v15985_v47 }
 0x1e9   : > { %14121 = vmatpush3.bf16.msra.mxu0 %v15985_v47  ;;  %v18109_v47 = vpack.c.bf16 %v2948_v33, %v2947_v49  ;;  %v18188_v49 = vpack.c.bf16 %v3572_v27, %v3571_v14  ;;  %v3573_v33 = vld [vmem:[#allocation2 + $0xa9] sm:$0xff]  ;;  %v3591_v14 = vld [vmem:[#allocation2 + $0x181] sm:$0xff] }
 0x1ea   : > { %14122 = vmatprep.subr.bf16.mxu0 %v15986_v19 }
 0x1ec   : > { %14091 = vmatmul.mubr.msk.bf16.gmra.mrb[4].mxu0 %vm224_vm0, %v18055_v59 }
 0x1ed   : > { %14094 = vmatprep.mubr.msk.bf16.mxu0 %vm224_vm0, %v18060_v9  ;;  %14123 = vmatpush3.bf16.msra.mxu0 %v15986_v19  ;;  %v15989_v19 = vld [vmem:[%s19977_s2 + $0x88] sm:$0xff]  }
 0x1ee   : > { %14124 = vmatprep.subr.bf16.mxu0 %v15987_v23 }
 0x1f1   : > { %14125 = vmatpush3.bf16.msra.mxu0 %v15987_v23  ;;  %v3269_v23 = vld [vmem:[#allocation2 + $0x180] sm:$0xff] }
 0x1f2   : > { %14158 = vmatprep.subr.bf16.mxu0 %v15988_v41 }
 0x1f4   : > { %14095 = vmatmul.mubr.msk.bf16.gmra.mrb[8].mxu0 %vm224_vm0, %v18069_v26 }
 0x1f5   : > { %14098 = vmatprep.mubr.msk.bf16.mxu0 %vm224_vm0, %v18071_v11 }
 0x1fc   : > { %14099 = vmatmul.mubr.msk.bf16.gmra.mrb[12].mxu0 %vm224_vm0, %v18077_v37 }
 0x1fd   : > { %14102 = vmatprep.mubr.msk.bf16.mxu0 %vm224_vm0, %v18079_v40 }
 0x204   : > { %14103 = vmatmul.mubr.msk.bf16.gmra.mrb[16].mxu0 %vm224_vm0, %v18085_v3 }
 0x205   : > { %14106 = vmatprep.mubr.msk.bf16.mxu0 %vm224_vm0, %v18087_v17 }
 0x20c   : > { %14107 = vmatmul.mubr.msk.bf16.gmra.mrb[20].mxu0 %vm224_vm0, %v18093_v54 }
 0x20d   : > { %14110 = vmatprep.mubr.msk.bf16.mxu0 %vm224_vm0, %v18095_v53 }
 0x214   : > { %14111 = vmatmul.mubr.msk.bf16.gmra.mrb[24].mxu0 %vm224_vm0, %v18101_v31 }
 0x215   : > { %14114 = vmatprep.mubr.msk.bf16.mxu0 %vm224_vm0, %v18103_v1 }
 0x21c   : > { %14115 = vmatmul.mubr.msk.bf16.gmra.mrb[28].mxu0 %vm224_vm0, %v18109_v47 }
 0x21d   : > { %14126 = vmatprep.mubr.msk.bf16.mxu0 %vm224_vm0, %v17820_v57  ;;  %v15991_v57 = vld [vmem:[%s19977_s2 + $0x98] sm:$0xff]  }
 0x224   : > { %14127 = vmatmul.mubr.msk.bf16.vlgmr.msra.gmra.mrb[0].mxu0 %vm224_vm0, %v17828_v50  ;;  %v15992_v50 = vld [vmem:[%s19977_s2 + $0xa0] sm:$0xff]  }
 0x225   : > { %14159 = vmatpush3.bf16.msra.mxu0 %v15988_v41  ;;  %14130 = vmatprep.mubr.msk.bf16.mxu0 %vm224_vm0, %v17913_v15  ;;  %v18155_v41 = vpack.c.bf16 %v3270_v0, %v3269_v23  ;;  %v3575_v23 = vld [vmem:[#allocation2 + $0xc1] sm:$0xff] }
 0x226   : > { %14160 = vmatprep.subr.bf16.mxu0 %v15989_v19 }
 0x229   : > { %14161 = vmatpush3.bf16.msra.mxu0 %v15989_v19  ;;  %v18190_v19 = vpack.c.bf16 %v3574_v6, %v3573_v33  ;;  %v3592_v6 = vld [vmem:[#allocation2 + $0x189] sm:$0xff] }
 0x22a   : > { %14162 = vmatprep.subr.bf16.mxu0 %v15990_v13  ;;  %v3914_v33 = vld [vmem:[#allocation2 + $0x18a] sm:$0xff] }
 0x22c   : > { %14131 = vmatmul.mubr.msk.bf16.gmra.mrb[4].mxu0 %vm224_vm0, %v17932_v18 }
 0x22d   : > { %14134 = vmatprep.mubr.msk.bf16.mxu0 %vm224_vm0, %v17972_v63  ;;  %14163 = vmatpush3.bf16.msra.mxu0 %v15990_v13 }
 0x22e   : > { %14164 = vmatprep.subr.bf16.mxu0 %v15991_v57 }
 0x231   : > { %14165 = vmatpush3.bf16.msra.mxu0 %v15991_v57 }
 0x232   : > { %14198 = vmatprep.subr.bf16.mxu0 %v15992_v50 }
 0x234   : > { %14135 = vmatmul.mubr.msk.bf16.gmra.mrb[8].mxu0 %vm224_vm0, %v17974_v12 }
 0x235   : > { %14138 = vmatprep.mubr.msk.bf16.mxu0 %vm224_vm0, %v17995_v42 }
 0x23c   : > { %14139 = vmatmul.mubr.msk.bf16.gmra.mrb[12].mxu0 %vm224_vm0, %v17998_v43 }
 0x23d   : > { %14142 = vmatprep.mubr.msk.bf16.mxu0 %vm224_vm0, %v18011_v48 }
 0x244   : > { %14143 = vmatmul.mubr.msk.bf16.gmra.mrb[16].mxu0 %vm224_vm0, %v18013_v22 }
 0x245   : > { %14146 = vmatprep.mubr.msk.bf16.mxu0 %vm224_vm0, %v18019_v58 }
 0x24c   : > { %14147 = vmatmul.mubr.msk.bf16.gmra.mrb[20].mxu0 %vm224_vm0, %v18021_v55 }
 0x24d   : > { %14150 = vmatprep.mubr.msk.bf16.mxu0 %vm224_vm0, %v18027_v44 }
 0x254   : > { %14151 = vmatmul.mubr.msk.bf16.gmra.mrb[24].mxu0 %vm224_vm0, %v18029_v25 }
 0x255   : > { %14154 = vmatprep.mubr.msk.bf16.mxu0 %vm224_vm0, %v18035_v34 }
 0x25c   : > { %14155 = vmatmul.mubr.msk.bf16.gmra.mrb[28].mxu0 %vm224_vm0, %v18155_v41 }
 0x25d   : > { %14166 = vmatprep.mubr.msk.bf16.mxu0 %vm224_vm0, %v3593_v29 }
 0x264   : > { %14167 = vmatmul.mubr.msk.bf16.vlgmr.msra.gmra.mrb[0].mxu0 %vm224_vm0, %v18160_v61 }
 0x265   : > { %14199 = vmatpush3.bf16.msra.mxu0 %v15992_v50  ;;  %14170 = vmatprep.mubr.msk.bf16.mxu0 %vm224_vm0, %v18165_v45  ;;  %v3576_v50 = vld [vmem:[#allocation2 + $0xc9] sm:$0xff] }
 0x266   : > { %14200 = vmatprep.subr.bf16.mxu0 %v15993_v28  ;;  %v18204_v29 = vpack.c.bf16 %v3576_v50, %v3575_v23  ;;  %v4207_v50 = vld [vmem:[#allocation2 + $0x38] sm:$0xff]  ;;  %v4206_v23 = vld [vmem:[#allocation2 + $0x30] sm:$0xff] }
 0x267   : > { %v4238_v2 = vpack.c.bf16 %v4207_v50, %v4206_v23 }
 0x269   : > { %14201 = vmatpush3.bf16.msra.mxu0 %v15993_v28  ;;  %v18212_v28 = vpack.c.bf16 %v3580_v16, %v3579_v30  ;;  %v16001_v16 = vld [vmem:[%s19977_s2 + $0xe8] sm:$0xff]   ;;  %v16002_v30 = vld [vmem:[%s19977_s2 + $0xf0] sm:$0xff]  }
 0x26a   : > { %14202 = vmatprep.subr.bf16.mxu0 %v15994_v36 }
 0x26c   : > { %14171 = vmatmul.mubr.msk.bf16.gmra.mrb[4].mxu0 %vm224_vm0, %v18174_v39 }
 0x26d   : > { %14174 = vmatprep.mubr.msk.bf16.mxu0 %vm224_vm0, %v18179_v21  ;;  %14203 = vmatpush3.bf16.msra.mxu0 %v15994_v36 }
 0x26e   : > { %14204 = vmatprep.subr.bf16.mxu0 %v15995_v35 }
 0x271   : > { %14205 = vmatpush3.bf16.msra.mxu0 %v15995_v35 }
 0x272   : > { %14238 = vmatprep.subr.bf16.mxu0 %v15996_v32 }
 0x274   : > { %14175 = vmatmul.mubr.msk.bf16.gmra.mrb[8].mxu0 %vm224_vm0, %v18188_v49 }
 0x275   : > { %14178 = vmatprep.mubr.msk.bf16.mxu0 %vm224_vm0, %v18190_v19  ;;  %v18196_v13 = vpop.f32.mrb[0].mxu1 }
 0x276   : > { %v18198_v57 = vpop.f32.mrb[1].mxu1 }
 0x277   : > { %v18200_v0 = vpop.f32.mrb[2].mxu1 }
 0x278   : > { %v18202_v7 = vpop.f32.mrb[3].mxu1 }
 0x27c   : > { %14179 = vmatmul.mubr.msk.bf16.gmra.mrb[12].mxu0 %vm224_vm0, %v18204_v29 }
 0x27d   : > { %14182 = vmatprep.mubr.msk.bf16.mxu0 %vm224_vm0, %v18206_v51 }
 0x284   : > { %14183 = vmatmul.mubr.msk.bf16.gmra.mrb[16].mxu0 %vm224_vm0, %v18212_v28 }
 0x285   : > { %14186 = vmatprep.mubr.msk.bf16.mxu0 %vm224_vm0, %v17846_v8 }
 0x287   : > { %v18218_v36 = vpop.f32.mrb[4].mxu1 }
 0x288   : > { %v18220_v62 = vpop.f32.mrb[5].mxu1 }
 0x289   : > { %v18222_v5 = vpop.f32.mrb[6].mxu1 }
 0x28a   : > { %v18224_v10 = vpop.f32.mrb[7].mxu1 }
 0x28c   : > { %14187 = vmatmul.mubr.msk.bf16.gmra.mrb[20].mxu0 %vm224_vm0, %v17937_v4  ;;  %v18242_v4 = vpack.c.bf16 %v3592_v6, %v3591_v14  ;;  %v16003_v6 = vld [vmem:[%s19977_s2 + $0xf8] sm:$0xff]  }
 0x28d   : > { %14190 = vmatprep.mubr.msk.bf16.mxu0 %vm224_vm0, %v17970_v24  ;;  %v15997_v24 = vld [vmem:[%s19977_s2 + $0xc8] sm:$0xff]   ;;  %v4558_v14 = vld [vmem:[#allocation2 + $0x199] sm:$0xff] }
 0x293   : > { %v18230_v60 = vpop.f32.mrb[8].mxu1 }
 0x294   : > { %v18232_v35 = vpop.f32.mrb[9].mxu1  ;;  %14191 = vmatmul.mubr.msk.bf16.gmra.mrb[24].mxu0 %vm224_vm0, %v17976_v20  ;;  %v15998_v20 = vld [vmem:[%s19977_s2 + $0xd0] sm:$0xff]  }
 0x295   : > { %v18236_v8 = vpop.f32.mrb[10].mxu1  ;;  %14194 = vmatprep.mubr.msk.bf16.mxu0 %vm224_vm0, %v18006_v56  ;;  %v15999_v56 = vld [vmem:[%s19977_s2 + $0xd8] sm:$0xff]  }
 0x296   : > { %v18240_v27 = vpop.f32.mrb[11].mxu1 }
 0x29c   : > { %14195 = vmatmul.mubr.msk.bf16.gmra.mrb[28].mxu0 %vm224_vm0, %v18242_v4 }
 0x29d   : > { %14206 = vmatprep.mubr.msk.bf16.mxu0 %vm224_vm0, %v18040_v46  ;;  %v16000_v46 = vld [vmem:[%s19977_s2 + $0xe0] sm:$0xff]  }
 0x2a4   : > { %14207 = vmatmul.mubr.msk.bf16.vlgmr.msra.gmra.mrb[0].mxu0 %vm224_vm0, %v18045_v52 }
 0x2a5   : > { %14239 = vmatpush3.bf16.msra.mxu0 %v15996_v32  ;;  %14210 = vmatprep.mubr.msk.bf16.mxu0 %vm224_vm0, %v18055_v59  ;;  %v3913_v32 = vld [vmem:[#allocation2 + $0x182] sm:$0xff] }
 0x2a6   : > { %14240 = vmatprep.subr.bf16.mxu0 %v15997_v24  ;;  %v18288_v38 = vpack.c.bf16 %v3914_v33, %v3913_v32 }
 0x2a9   : > { %14241 = vmatpush3.bf16.msra.mxu0 %v15997_v24  ;;  %v4559_v24 = vld [vmem:[#allocation2 + $0x1a1] sm:$0xff] }
 0x2aa   : > { %14242 = vmatprep.subr.bf16.mxu0 %v15998_v20 }
 0x2ac   : > { %14211 = vmatmul.mubr.msk.bf16.gmra.mrb[4].mxu0 %vm224_vm0, %v18060_v9 }
 0x2ad   : > { %14214 = vmatprep.mubr.msk.bf16.mxu0 %vm224_vm0, %v18069_v26  ;;  %14243 = vmatpush3.bf16.msra.mxu0 %v15998_v20  ;;  %v4575_v20 = vpack.c.bf16 %v4559_v24, %v4558_v14 }
 0x2ae   : > { %14244 = vmatprep.subr.bf16.mxu0 %v15999_v56 }
 0x2b1   : > { %14245 = vmatpush3.bf16.msra.mxu0 %v15999_v56 }
 0x2b2   : > { %14278 = vmatprep.subr.bf16.mxu0 %v16000_v46 }
 0x2b4   : > { %14215 = vmatmul.mubr.msk.bf16.gmra.mrb[8].mxu0 %vm224_vm0, %v18071_v11 }
 0x2b5   : > { %14218 = vmatprep.mubr.msk.bf16.mxu0 %vm224_vm0, %v18077_v37 }
 0x2bc   : > { %14219 = vmatmul.mubr.msk.bf16.gmra.mrb[12].mxu0 %vm224_vm0, %v18079_v40 }
 0x2bd   : > { %14222 = vmatprep.mubr.msk.bf16.mxu0 %vm224_vm0, %v18085_v3 }
 0x2c4   : > { %14223 = vmatmul.mubr.msk.bf16.gmra.mrb[16].mxu0 %vm224_vm0, %v18087_v17 }
 0x2c5   : > { %14226 = vmatprep.mubr.msk.bf16.mxu0 %vm224_vm0, %v18093_v54 }
 0x2cc   : > { %14227 = vmatmul.mubr.msk.bf16.gmra.mrb[20].mxu0 %vm224_vm0, %v18095_v53 }
 0x2cd   : > { %14230 = vmatprep.mubr.msk.bf16.mxu0 %vm224_vm0, %v18101_v31 }
 0x2d4   : > { %14231 = vmatmul.mubr.msk.bf16.gmra.mrb[24].mxu0 %vm224_vm0, %v18103_v1 }
 0x2d5   : > { %14234 = vmatprep.mubr.msk.bf16.mxu0 %vm224_vm0, %v18109_v47 }
 0x2dc   : > { %14235 = vmatmul.mubr.msk.bf16.gmra.mrb[28].mxu0 %vm224_vm0, %v18288_v38 }
 0x2dd   : > { %14246 = vmatprep.mubr.msk.bf16.mxu0 %vm224_vm0, %v4238_v2 }
 0x2e4   : > { %14247 = vmatmul.mubr.msk.bf16.vlgmr.msra.gmra.mrb[0].mxu0 %vm224_vm0, %v17913_v15  ;;  %v16004_v15 = vld [vmem:[%s19977_s2 + $0x100] sm:$0xff]  }
 0x2e5   : > { %14279 = vmatpush3.bf16.msra.mxu0 %v16000_v46  ;;  %14250 = vmatprep.mubr.msk.bf16.mxu0 %vm224_vm0, %v17932_v18  ;;  %v4236_v18 = vld [vmem:[#allocation2 + $0x198] sm:$0xff] }
 0x2e6   : > { %14280 = vmatprep.subr.bf16.mxu0 %v16001_v16 }
 0x2e9   : > { %14281 = vmatpush3.bf16.msra.mxu0 %v16001_v16 }
 0x2ea   : > { %14282 = vmatprep.subr.bf16.mxu0 %v16002_v30 }
 0x2ec   : > { %14251 = vmatmul.mubr.msk.bf16.gmra.mrb[4].mxu0 %vm224_vm0, %v17972_v63  ;;  %v4237_v63 = vld [vmem:[#allocation2 + $0x1a0] sm:$0xff] }
 0x2ed   : > { %14254 = vmatprep.mubr.msk.bf16.mxu0 %vm224_vm0, %v17974_v12  ;;  %14283 = vmatpush3.bf16.msra.mxu0 %v16002_v30  ;;  %v4253_v12 = vpack.c.bf16 %v4237_v63, %v4236_v18 }
 0x2ee   : > { %14284 = vmatprep.subr.bf16.mxu0 %v16003_v6 }
 0x2f1   : > { %14285 = vmatpush3.bf16.msra.mxu0 %v16003_v6 }
 0x2f2   : > { %14318 = vmatprep.subr.bf16.mxu0 %v16004_v15 }
 0x2f4   : > { %14255 = vmatmul.mubr.msk.bf16.gmra.mrb[8].mxu0 %vm224_vm0, %v17995_v42  ;;  %v16008_v42 = vld [vmem:[%s19977_s2 + $0x140] sm:$0xff]  }
 0x2f5   : > { %14258 = vmatprep.mubr.msk.bf16.mxu0 %vm224_vm0, %v17998_v43  ;;  %14358 = vmatprep.subr.bf16.mxu1 %v16008_v42  ;;  %v16005_v43 = vld [vmem:[%s19977_s2 + $0x108] sm:$0xff]  }
 0x2f6   : > { %14359 = vmatpush3.bf16.msra.mxu1 %v16008_v42 }
 0x2fc   : > { %14259 = vmatmul.mubr.msk.bf16.gmra.mrb[12].mxu0 %vm224_vm0, %v18011_v48  ;;  %v16006_v48 = vld [vmem:[%s19977_s2 + $0x110] sm:$0xff]  }
 0x2fd   : > { %14262 = vmatprep.mubr.msk.bf16.mxu0 %vm224_vm0, %v18013_v22  ;;  %v16007_v22 = vld [vmem:[%s19977_s2 + $0x118] sm:$0xff]  }
 0x304   : > { %14263 = vmatmul.mubr.msk.bf16.gmra.mrb[16].mxu0 %vm224_vm0, %v18019_v58  ;;  %v4547_v58 = vld [vmem:[#allocation2 + $0x111] sm:$0xff] }
 0x305   : > { %14266 = vmatprep.mubr.msk.bf16.mxu0 %vm224_vm0, %v18021_v55  ;;  %v4549_v55 = vld [vmem:[#allocation2 + $0x129] sm:$0xff] }
 0x30c   : > { %14267 = vmatmul.mubr.msk.bf16.gmra.mrb[20].mxu0 %vm224_vm0, %v18027_v44  ;;  %v4546_v44 = vld [vmem:[#allocation2 + $0x109] sm:$0xff] }
 0x30d   : > { %14270 = vmatprep.mubr.msk.bf16.mxu0 %vm224_vm0, %v18029_v25  ;;  %v4569_v25 = vpack.c.bf16 %v4547_v58, %v4546_v44 }
 0x314   : > { %14271 = vmatmul.mubr.msk.bf16.gmra.mrb[24].mxu0 %vm224_vm0, %v18035_v34  ;;  %v4548_v34 = vld [vmem:[#allocation2 + $0x121] sm:$0xff] }
 0x315   : > { %14274 = vmatprep.mubr.msk.bf16.mxu0 %vm224_vm0, %v18155_v41  ;;  %v4570_v41 = vpack.c.bf16 %v4549_v55, %v4548_v34 }
 0x31c   : > { %14275 = vmatmul.mubr.msk.bf16.gmra.mrb[28].mxu0 %vm224_vm0, %v4253_v12 }
 0x31d   : > { %14286 = vmatprep.mubr.msk.bf16.mxu0 %vm224_vm0, %v18160_v61  ;;  %v4551_v61 = vld [vmem:[#allocation2 + $0x141] sm:$0xff] }
 0x324   : > { %14287 = vmatmul.mubr.msk.bf16.vlgmr.msra.gmra.mrb[0].mxu0 %vm224_vm0, %v18165_v45  ;;  %v4553_v45 = vld [vmem:[#allocation2 + $0x159] sm:$0xff] }
 0x325   : > { %14319 = vmatpush3.bf16.msra.mxu0 %v16004_v15  ;;  %14290 = vmatprep.mubr.msk.bf16.mxu0 %vm224_vm0, %v18174_v39  ;;  %v4550_v39 = vld [vmem:[#allocation2 + $0x139] sm:$0xff] }
 0x326   : > { %14320 = vmatprep.subr.bf16.mxu0 %v16005_v43 }
 0x329   : > { %14321 = vmatpush3.bf16.msra.mxu0 %v16005_v43 }
 0x32a   : > { %14322 = vmatprep.subr.bf16.mxu0 %v16006_v48 }
 0x32c   : > { %14291 = vmatmul.mubr.msk.bf16.gmra.mrb[4].mxu0 %vm224_vm0, %v18179_v21  ;;  %v4571_v21 = vpack.c.bf16 %v4551_v61, %v4550_v39 }
 0x32d   : > { %14294 = vmatprep.mubr.msk.bf16.mxu0 %vm224_vm0, %v18188_v49  ;;  %14323 = vmatpush3.bf16.msra.mxu0 %v16006_v48  ;;  %v4552_v49 = vld [vmem:[#allocation2 + $0x151] sm:$0xff] }
 0x32e   : > { %14324 = vmatprep.subr.bf16.mxu0 %v16007_v22 }
 0x331   : > { %14325 = vmatpush3.bf16.msra.mxu0 %v16007_v22 }
 0x334   : > { %14295 = vmatmul.mubr.msk.bf16.gmra.mrb[8].mxu0 %vm224_vm0, %v18190_v19  ;;  %v4572_v19 = vpack.c.bf16 %v4553_v45, %v4552_v49  ;;  %v16013_v45 = vld [vmem:[%s19977_s2 + $0x128] sm:$0xff]  }
 0x335   : > { %14298 = vmatprep.mubr.msk.bf16.mxu0 %vm224_vm0, %v18204_v29  ;;  %v4555_v29 = vld [vmem:[#allocation2 + $0x171] sm:$0xff] }
 0x33c   : > { %14299 = vmatmul.mubr.msk.bf16.gmra.mrb[12].mxu0 %vm224_vm0, %v18206_v51  ;;  %v4554_v51 = vld [vmem:[#allocation2 + $0x169] sm:$0xff] }
 0x33d   : > { %14302 = vmatprep.mubr.msk.bf16.mxu0 %vm224_vm0, %v18212_v28  ;;  %v4573_v28 = vpack.c.bf16 %v4555_v29, %v4554_v51 }
 0x344   : > { %14303 = vmatmul.mubr.msk.bf16.gmra.mrb[16].mxu0 %vm224_vm0, %v4569_v25 }
 0x345   : > { %14306 = vmatprep.mubr.msk.bf16.mxu0 %vm224_vm0, %v4570_v41 }
 0x34c   : > { %14307 = vmatmul.mubr.msk.bf16.gmra.mrb[20].mxu0 %vm224_vm0, %v4571_v21 }
 0x34d   : > { %14310 = vmatprep.mubr.msk.bf16.mxu0 %vm224_vm0, %v4572_v19 }
 0x354   : > { %14311 = vmatmul.mubr.msk.bf16.gmra.mrb[24].mxu0 %vm224_vm0, %v4573_v28 }
 0x355   : > { %14314 = vmatprep.mubr.msk.bf16.mxu0 %vm224_vm0, %v18242_v4 }
 0x35c   : > { %14315 = vmatmul.mubr.msk.bf16.gmra.mrb[28].mxu0 %vm224_vm0, %v4575_v20 }
 0x35d   : > { %14326 = vmatprep.mubr.msk.bf16.mxu0 %vm224_vm0, %v18045_v52  ;;  %v4880_v52 = vld [vmem:[#allocation2 + $0x19a] sm:$0xff] }
 0x364   : > { %14327 = vmatmul.mubr.msk.bf16.vlgmr.msra.gmra.mrb[0].mxu0 %vm224_vm0, %v18055_v59  ;;  %v4881_v59 = vld [vmem:[#allocation2 + $0x1a2] sm:$0xff] }
 0x365   : > { %14330 = vmatprep.mubr.msk.bf16.mxu0 %vm224_vm0, %v18060_v9  ;;  %v4897_v9 = vpack.c.bf16 %v4881_v59, %v4880_v52  ;;  %v16014_v52 = vld [vmem:[%s19977_s2 + $0x130] sm:$0xff]  }
 0x36c   : > { %14331 = vmatmul.mubr.msk.bf16.gmra.mrb[4].mxu0 %vm224_vm0, %v18069_v26  ;;  %v16009_v26 = vld [vmem:[%s19977_s2 + $0x148] sm:$0xff]  }
 0x36d   : > { %14334 = vmatprep.mubr.msk.bf16.mxu0 %vm224_vm0, %v18071_v11  ;;  %14360 = vmatprep.subr.bf16.mxu1 %v16009_v26  ;;  %v16010_v11 = vld [vmem:[%s19977_s2 + $0x150] sm:$0xff]  }
 0x36e   : > { %14361 = vmatpush3.bf16.msra.mxu1 %v16009_v26 }
 0x36f   : > { %14362 = vmatprep.subr.bf16.mxu1 %v16010_v11 }
 0x372   : > { %14363 = vmatpush3.bf16.msra.mxu1 %v16010_v11 }
 0x374   : > { %14335 = vmatmul.mubr.msk.bf16.gmra.mrb[8].mxu0 %vm224_vm0, %v18077_v37  ;;  %v16011_v37 = vld [vmem:[%s19977_s2 + $0x158] sm:$0xff]  }
 0x375   : > { %14338 = vmatprep.mubr.msk.bf16.mxu0 %vm224_vm0, %v18079_v40  ;;  %14364 = vmatprep.subr.bf16.mxu1 %v16011_v37  ;;  %v5330_v40 = vld [vmem:[#allocation2 + $0x1] sm:$0xff] }
 0x376   : > { %14365 = vmatpush3.bf16.msra.mxu1 %v16011_v37 }
 0x37c   : > { %14339 = vmatmul.mubr.msk.bf16.gmra.mrb[12].mxu0 %vm224_vm0, %v18085_v3  ;;  %v5331_v3 = vld [vmem:[#allocation2 + $0x9] sm:$0xff] }
 0x37d   : > { %14342 = vmatprep.mubr.msk.bf16.mxu0 %vm224_vm0, %v18087_v17  ;;  %v5362_v17 = vpack.c.bf16 %v5331_v3, %v5330_v40 }
 0x37f   : > { %14366 = vmatprep.mubr.msk.bf16.mxu1 %vm224_vm0, %v5362_v17 }
 0x384   : > { %14343 = vmatmul.mubr.msk.bf16.gmra.mrb[16].mxu0 %vm224_vm0, %v18093_v54  ;;  %v16012_v54 = vld [vmem:[%s19977_s2 + $0x120] sm:$0xff]  }
 0x385   : > { %14346 = vmatprep.mubr.msk.bf16.mxu0 %vm224_vm0, %v18095_v53  ;;  %14398 = vmatprep.subr.bf16.mxu1 %v16012_v54  ;;  %v18419_v53 = vld [vmem:[%s19978_s3] ss:$0 sm:$0xff] }
 0x38c   : > { %14347 = vmatmul.mubr.msk.bf16.gmra.mrb[20].mxu0 %vm224_vm0, %v18101_v31 }
 0x38d   : > { %14350 = vmatprep.mubr.msk.bf16.mxu0 %vm224_vm0, %v18103_v1 }
 0x394   : > { %14351 = vmatmul.mubr.msk.bf16.gmra.mrb[24].mxu0 %vm224_vm0, %v18109_v47 }
 0x395   : > { %14354 = vmatprep.mubr.msk.bf16.mxu0 %vm224_vm0, %v18288_v38 }
 0x39c   : > { %14355 = vmatmul.mubr.msk.bf16.gmra.mrb[28].mxu0 %vm224_vm0, %v4897_v9 }
 0x437   : > { %v14328_v31 = vpop.f32.mrb[0].mxu0 }
 0x438   : > { %v5179_v1 = vadd.f32 %v14328_v31, %v18419_v53  ;;  %v5013_v47 = vpop.f32.mrb[1].mxu0 }
 0x439   : > { %v5177_v4 = vadd.f32 %v18419_v53, %v5013_v47  ;;  %v14329_v56 = vpop.f32.mrb[2].mxu0 }
 0x43a   : > { %v5211_v46 = vmax.f32 %v5179_v1, 0.0  ;;  %v5180_v32 = vadd.f32 %v14329_v56, %v18419_v53  ;;  %v5016_v33 = vpop.f32.mrb[3].mxu0 }
 0x43b   : > { %v5209_v50 = vmax.f32 %v5177_v4, 0.0  ;;  %v5178_v38 = vadd.f32 %v18419_v53, %v5016_v33 }
 0x43c   : > { %5243 = vst.msk [vmem:[#allocation2 + $0x31] sm:$0xff] %vm224_vm0, %v5211_v46  ;;  %v5212_v23 = vmax.f32 %v5180_v32, 0.0 }
 0x43d   : > { %5241 = vst.msk [vmem:[#allocation2 + $0x19] sm:$0xff] %vm224_vm0, %v5209_v50  ;;  %v5210_v2 = vmax.f32 %v5178_v38, 0.0 }
 0x43e   : > { %5244 = vst.msk [vmem:[#allocation2 + $0x39] sm:$0xff] %vm224_vm0, %v5212_v23  ;;  %v18477_v23 = vld [vmem:[%s19977_s2 + $0x160] sm:$0xff]  }
 0x43f   : > { %5242 = vst.msk [vmem:[#allocation2 + $0x21] sm:$0xff] %vm224_vm0, %v5210_v2  ;;  %v14332_v16 = vpop.f32.mrb[4].mxu0 }
 0x440   : > { %v5183_v30 = vadd.f32 %v14332_v16, %v18419_v53  ;;  %v5029_v6 = vpop.f32.mrb[5].mxu0 }
 0x441   : > { %v5181_v15 = vadd.f32 %v18419_v53, %v5029_v6  ;;  %v14333_v18 = vpop.f32.mrb[6].mxu0 }
 0x442   : > { %v5215_v63 = vmax.f32 %v5183_v30, 0.0  ;;  %v5184_v12 = vadd.f32 %v14333_v18, %v18419_v53  ;;  %v5032_v42 = vpop.f32.mrb[7].mxu0 }
 0x443   : > { %v5213_v43 = vmax.f32 %v5181_v15, 0.0  ;;  %v5182_v48 = vadd.f32 %v18419_v53, %v5032_v42  ;;  %v5334_v61 = vld [vmem:[#allocation2 + $0x31] sm:$0xff] }
 0x444   : > { %5247 = vst.msk [vmem:[#allocation2 + $0x61] sm:$0xff] %vm224_vm0, %v5215_v63  ;;  %v5216_v22 = vmax.f32 %v5184_v12, 0.0  ;;  %v5332_v44 = vld [vmem:[#allocation2 + $0x19] sm:$0xff] }
 0x445   : > { %5245 = vst.msk [vmem:[#allocation2 + $0x49] sm:$0xff] %vm224_vm0, %v5213_v43  ;;  %v5214_v58 = vmax.f32 %v5182_v48, 0.0  ;;  %v5335_v55 = vld [vmem:[#allocation2 + $0x39] sm:$0xff] }
 0x446   : > { %5248 = vst.msk [vmem:[#allocation2 + $0x69] sm:$0xff] %vm224_vm0, %v5216_v22  ;;  %v5333_v25 = vld [vmem:[#allocation2 + $0x21] sm:$0xff]  ;;  %v18443_v49 = vpack.c.bf16 %v5335_v55, %v5334_v61 }
 0x447   : > { %5246 = vst.msk [vmem:[#allocation2 + $0x51] sm:$0xff] %vm224_vm0, %v5214_v58  ;;  %v14336_v34 = vpop.f32.mrb[8].mxu0  ;;  %v18437_v41 = vpack.c.bf16 %v5333_v25, %v5332_v44 }
 0x448   : > { %v5187_v39 = vadd.f32 %v14336_v34, %v18419_v53  ;;  %v5045_v21 = vpop.f32.mrb[9].mxu0 }
 0x449   : > { %v5185_v19 = vadd.f32 %v18419_v53, %v5045_v21  ;;  %v14337_v29 = vpop.f32.mrb[10].mxu0  ;;  %14367 = vmatmul.mubr.msk.bf16.vlgmr.msra.gmra.mrb[12].mxu1 %vm224_vm0, %v18437_v41 }
 0x44a   : > { %v5219_v51 = vmax.f32 %v5187_v39, 0.0  ;;  %v5188_v28 = vadd.f32 %v14337_v29, %v18419_v53  ;;  %v5048_v14 = vpop.f32.mrb[11].mxu0  ;;  %14370 = vmatprep.mubr.msk.bf16.mxu1 %vm224_vm0, %v18443_v49  ;;  %14399 = vmatpush3.bf16.msra.mxu1 %v16012_v54  ;;  %v16015_v54 = vld [vmem:[%s19977_s2 + $0x138] sm:$0xff]  }
 0x44b   : > { %v5217_v24 = vmax.f32 %v5185_v19, 0.0  ;;  %v5186_v20 = vadd.f32 %v18419_v53, %v5048_v14  ;;  %14400 = vmatprep.subr.bf16.mxu1 %v16013_v45  ;;  %v5338_v17 = vld [vmem:[#allocation2 + $0x61] sm:$0xff] }
 0x44c   : > { %5251 = vst.msk [vmem:[#allocation2 + $0x91] sm:$0xff] %vm224_vm0, %v5219_v51  ;;  %v5220_v59 = vmax.f32 %v5188_v28, 0.0  ;;  %v5336_v11 = vld [vmem:[#allocation2 + $0x49] sm:$0xff] }
 0x44d   : > { %5249 = vst.msk [vmem:[#allocation2 + $0x79] sm:$0xff] %vm224_vm0, %v5217_v24  ;;  %v5218_v9 = vmax.f32 %v5186_v20, 0.0  ;;  %v5339_v26 = vld [vmem:[#allocation2 + $0x69] sm:$0xff] }
 0x44e   : > { %5252 = vst.msk [vmem:[#allocation2 + $0x99] sm:$0xff] %vm224_vm0, %v5220_v59  ;;  %v5337_v37 = vld [vmem:[#allocation2 + $0x51] sm:$0xff]  ;;  %14401 = vmatpush3.bf16.msra.mxu1 %v16013_v45  ;;  %v18465_v47 = vpack.c.bf16 %v5339_v26, %v5338_v17 }
 0x44f   : > { %5250 = vst.msk [vmem:[#allocation2 + $0x81] sm:$0xff] %vm224_vm0, %v5218_v9  ;;  %v14340_v40 = vpop.f32.mrb[12].mxu0  ;;  %v18459_v3 = vpack.c.bf16 %v5337_v37, %v5336_v11  ;;  %14402 = vmatprep.subr.bf16.mxu1 %v16014_v52 }
 0x450   : > { %v5191_v31 = vadd.f32 %v14340_v40, %v18419_v53  ;;  %v5061_v1 = vpop.f32.mrb[13].mxu0 }
 0x451   : > { %v5189_v4 = vadd.f32 %v18419_v53, %v5061_v1  ;;  %v14341_v56 = vpop.f32.mrb[14].mxu0  ;;  %14371 = vmatmul.mubr.msk.bf16.gmra.mrb[16].mxu1 %vm224_vm0, %v18459_v3 }
 0x452   : > { %v5223_v46 = vmax.f32 %v5191_v31, 0.0  ;;  %v5192_v32 = vadd.f32 %v14341_v56, %v18419_v53  ;;  %v5064_v33 = vpop.f32.mrb[15].mxu0  ;;  %14374 = vmatprep.mubr.msk.bf16.mxu1 %vm224_vm0, %v18465_v47  ;;  %14403 = vmatpush3.bf16.msra.mxu1 %v16014_v52 }
 0x453   : > { %v5221_v50 = vmax.f32 %v5189_v4, 0.0  ;;  %v5190_v38 = vadd.f32 %v18419_v53, %v5064_v33  ;;  %14404 = vmatprep.subr.bf16.mxu1 %v16015_v54  ;;  %v5342_v12 = vld [vmem:[#allocation2 + $0x91] sm:$0xff] }
 0x454   : > { %5255 = vst.msk [vmem:[#allocation2 + $0xc1] sm:$0xff] %vm224_vm0, %v5223_v46  ;;  %v5224_v2 = vmax.f32 %v5192_v32, 0.0  ;;  %v5340_v6 = vld [vmem:[#allocation2 + $0x79] sm:$0xff] }
 0x455   : > { %5253 = vst.msk [vmem:[#allocation2 + $0xa9] sm:$0xff] %vm224_vm0, %v5221_v50  ;;  %v5222_v16 = vmax.f32 %v5190_v38, 0.0  ;;  %v5343_v30 = vld [vmem:[#allocation2 + $0x99] sm:$0xff] }
 0x456   : > { %5256 = vst.msk [vmem:[#allocation2 + $0xc9] sm:$0xff] %vm224_vm0, %v5224_v2  ;;  %v5341_v15 = vld [vmem:[#allocation2 + $0x81] sm:$0xff]  ;;  %14405 = vmatpush3.bf16.msra.mxu1 %v16015_v54  ;;  %v18487_v48 = vpack.c.bf16 %v5343_v30, %v5342_v12 }
 0x457   : > { %5254 = vst.msk [vmem:[#allocation2 + $0xb1] sm:$0xff] %vm224_vm0, %v5222_v16  ;;  %v14344_v18 = vpop.f32.mrb[16].mxu0  ;;  %v18483_v63 = vpack.c.bf16 %v5341_v15, %v5340_v6  ;;  %14438 = vmatprep.subr.bf16.mxu1 %v18477_v23 }
 0x458   : > { %v5195_v42 = vadd.f32 %v14344_v18, %v18419_v53  ;;  %v5077_v43 = vpop.f32.mrb[17].mxu0 }
 0x459   : > { %v5193_v22 = vadd.f32 %v18419_v53, %v5077_v43  ;;  %v14345_v58 = vpop.f32.mrb[18].mxu0  ;;  %14375 = vmatmul.mubr.msk.bf16.gmra.mrb[20].mxu1 %vm224_vm0, %v18483_v63 }
 0x45a   : > { %v5227_v55 = vmax.f32 %v5195_v42, 0.0  ;;  %v5196_v44 = vadd.f32 %v14345_v58, %v18419_v53  ;;  %v5080_v25 = vpop.f32.mrb[19].mxu0  ;;  %14378 = vmatprep.mubr.msk.bf16.mxu1 %vm224_vm0, %v18487_v48 }
 0x45b   : > { %v5225_v34 = vmax.f32 %v5193_v22, 0.0  ;;  %v5194_v61 = vadd.f32 %v18419_v53, %v5080_v25  ;;  %v5346_v14 = vld [vmem:[#allocation2 + $0xc1] sm:$0xff] }
 0x45c   : > { %5259 = vst.msk [vmem:[#allocation2 + $0xf1] sm:$0xff] %vm224_vm0, %v5227_v55  ;;  %v5228_v45 = vmax.f32 %v5196_v44, 0.0  ;;  %v5344_v19 = vld [vmem:[#allocation2 + $0xa9] sm:$0xff] }
 0x45d   : > { %5257 = vst.msk [vmem:[#allocation2 + $0xd9] sm:$0xff] %vm224_vm0, %v5225_v34  ;;  %v5226_v39 = vmax.f32 %v5194_v61, 0.0  ;;  %v5347_v21 = vld [vmem:[#allocation2 + $0xc9] sm:$0xff] }
 0x45e   : > { %5260 = vst.msk [vmem:[#allocation2 + $0xf9] sm:$0xff] %vm224_vm0, %v5228_v45  ;;  %v5345_v29 = vld [vmem:[#allocation2 + $0xb1] sm:$0xff]  ;;  %v18503_v52 = vpack.c.bf16 %v5347_v21, %v5346_v14 }
 0x45f   : > { %5258 = vst.msk [vmem:[#allocation2 + $0xe1] sm:$0xff] %vm224_vm0, %v5226_v39  ;;  %v14348_v51 = vpop.f32.mrb[20].mxu0  ;;  %v18500_v28 = vpack.c.bf16 %v5345_v29, %v5344_v19 }
 0x460   : > { %v15086_v24 = vadd.f32 %v14348_v51, %v18196_v13  ;;  %v5093_v20 = vpop.f32.mrb[21].mxu0 }
 0x461   : > { %v15087_v59 = vadd.f32 %v5093_v20, %v18198_v57  ;;  %v14349_v9 = vpop.f32.mrb[22].mxu0  ;;  %14379 = vmatmul.mubr.msk.bf16.gmra.mrb[24].mxu1 %vm224_vm0, %v18500_v28 }
 0x462   : > { %v5199_v26 = vadd.f32 %v15086_v24, %v18419_v53  ;;  %v15088_v11 = vadd.f32 %v14349_v9, %v18200_v0  ;;  %v5096_v37 = vpop.f32.mrb[23].mxu0  ;;  %14382 = vmatprep.mubr.msk.bf16.mxu1 %vm224_vm0, %v18503_v52 }
 0x463   : > { %v5197_v40 = vadd.f32 %v15087_v59, %v18419_v53  ;;  %v15089_v13 = vadd.f32 %v5096_v37, %v18202_v7  ;;  %v5350_v50 = vld [vmem:[#allocation2 + $0xf1] sm:$0xff] }
 0x464   : > { %v5231_v17 = vmax.f32 %v5199_v26, 0.0  ;;  %v5200_v54 = vadd.f32 %v15088_v11, %v18419_v53  ;;  %v5348_v56 = vld [vmem:[#allocation2 + $0xd9] sm:$0xff] }
 0x465   : > { %v5229_v57 = vmax.f32 %v5197_v40, 0.0  ;;  %v5198_v31 = vadd.f32 %v15089_v13, %v18419_v53  ;;  %v5351_v1 = vld [vmem:[#allocation2 + $0xf9] sm:$0xff] }
 0x466   : > { %5263 = vst.msk [vmem:[#allocation2 + $0x121] sm:$0xff] %vm224_vm0, %v5231_v17  ;;  %v5232_v4 = vmax.f32 %v5200_v54, 0.0  ;;  %v5349_v0 = vld [vmem:[#allocation2 + $0xe1] sm:$0xff]  ;;  %v18522_v2 = vpack.c.bf16 %v5351_v1, %v5350_v50 }
 0x467   : > { %5261 = vst.msk [vmem:[#allocation2 + $0x109] sm:$0xff] %vm224_vm0, %v5229_v57  ;;  %v5230_v46 = vmax.f32 %v5198_v31, 0.0  ;;  %v14352_v32 = vpop.f32.mrb[24].mxu0  ;;  %v18518_v33 = vpack.c.bf16 %v5349_v0, %v5348_v56  ;;  %v5274_v57 = vld [vmem:[#allocation2 + $0x8] sm:$0xff]  ;;  %v5276_v0 = vld [vmem:[#allocation2 + $0x20] sm:$0xff] }
 0x468   : > { %5264 = vst.msk [vmem:[#allocation2 + $0x129] sm:$0xff] %vm224_vm0, %v5232_v4  ;;  %v15090_v7 = vadd.f32 %v14352_v32, %v18218_v36  ;;  %v5109_v38 = vpop.f32.mrb[25].mxu0  ;;  %v5275_v32 = vld [vmem:[#allocation2 + $0x18] sm:$0xff] }
 0x469   : > { %5262 = vst.msk [vmem:[#allocation2 + $0x111] sm:$0xff] %vm224_vm0, %v5230_v46  ;;  %v15091_v16 = vadd.f32 %v5109_v38, %v18220_v62  ;;  %v14353_v30 = vpop.f32.mrb[26].mxu0  ;;  %14383 = vmatmul.mubr.msk.bf16.gmra.mrb[28].mxu1 %vm224_vm0, %v18518_v33  ;;  %v5278_v46 = vld [vmem:[#allocation2 + $0x38] sm:$0xff]  ;;  %v18573_v50 = vpack.c.bf16 %v5276_v0, %v5275_v32  ;;  %v16017_v38 = vld [vmem:[%s19977_s2 + $0x168] sm:$0xff]  }
 0x46a   : > { %v5203_v6 = vadd.f32 %v15090_v7, %v18419_v53  ;;  %v15092_v15 = vadd.f32 %v14353_v30, %v18222_v5  ;;  %v5112_v18 = vpop.f32.mrb[27].mxu0  ;;  %14386 = vmatprep.mubr.msk.bf16.mxu1 %vm224_vm0, %v18522_v2  ;;  %v5277_v7 = vld [vmem:[#allocation2 + $0x30] sm:$0xff] }
 0x46b   : > { %v5201_v36 = vadd.f32 %v15091_v16, %v18419_v53  ;;  %v15093_v12 = vadd.f32 %v5112_v18, %v18224_v10  ;;  %v18578_v16 = vpack.c.bf16 %v5278_v46, %v5277_v7  ;;  %v16018_v30 = vld [vmem:[%s19977_s2 + $0x170] sm:$0xff]   ;;  %v5279_v18 = vld [vmem:[#allocation2 + $0x48] sm:$0xff]  ;;  %v5855_v7 = vld [vmem:[#allocation2 + $0x1a] sm:$0xff] }
 0x46c   : > { %v5235_v42 = vmax.f32 %v5203_v6, 0.0  ;;  %v5204_v43 = vadd.f32 %v15092_v15, %v18419_v53  ;;  %v5280_v6 = vld [vmem:[#allocation2 + $0x50] sm:$0xff]  ;;  %v5282_v15 = vld [vmem:[#allocation2 + $0x68] sm:$0xff] }
 0x46d   : > { %v5233_v62 = vmax.f32 %v5201_v36, 0.0  ;;  %v5202_v22 = vadd.f32 %v15093_v12, %v18419_v53  ;;  %v5354_v19 = vld [vmem:[#allocation2 + $0x121] sm:$0xff]  ;;  %v18588_v36 = vpack.c.bf16 %v5280_v6, %v5279_v18 }
 0x46e   : > { %5267 = vst.msk [vmem:[#allocation2 + $0x151] sm:$0xff] %vm224_vm0, %v5235_v42  ;;  %v5236_v58 = vmax.f32 %v5204_v43, 0.0  ;;  %v5352_v10 = vld [vmem:[#allocation2 + $0x109] sm:$0xff]  ;;  %v5281_v12 = vld [vmem:[#allocation2 + $0x60] sm:$0xff] }
 0x46f   : > { %5265 = vst.msk [vmem:[#allocation2 + $0x139] sm:$0xff] %vm224_vm0, %v5233_v62  ;;  %v5234_v5 = vmax.f32 %v5202_v22, 0.0  ;;  %v14356_v55 = vpop.f32.mrb[28].mxu0  ;;  %v5355_v44 = vld [vmem:[#allocation2 + $0x129] sm:$0xff]  ;;  %v18593_v42 = vpack.c.bf16 %v5282_v15, %v5281_v12  ;;  %v16020_v43 = vld [vmem:[%s19977_s2 + $0x180] sm:$0xff]   ;;  %v5286_v22 = vld [vmem:[#allocation2 + $0x98] sm:$0xff] }
 0x470   : > { %5268 = vst.msk [vmem:[#allocation2 + $0x159] sm:$0xff] %vm224_vm0, %v5236_v58  ;;  %v15094_v25 = vadd.f32 %v14356_v55, %v18230_v60  ;;  %v5125_v34 = vpop.f32.mrb[29].mxu0  ;;  %v5353_v61 = vld [vmem:[#allocation2 + $0x111] sm:$0xff]  ;;  %v18546_v24 = vpack.c.bf16 %v5355_v44, %v5354_v19  ;;  %v5284_v62 = vld [vmem:[#allocation2 + $0x80] sm:$0xff]  ;;  %v16021_v18 = vld [vmem:[%s19977_s2 + $0x188] sm:$0xff]  }
 0x471   : > { %5266 = vst.msk [vmem:[#allocation2 + $0x141] sm:$0xff] %vm224_vm0, %v5234_v5  ;;  %v15095_v45 = vadd.f32 %v5125_v34, %v18232_v35  ;;  %v14357_v39 = vpop.f32.mrb[30].mxu0  ;;  %v18542_v21 = vpack.c.bf16 %v5353_v61, %v5352_v10  ;;  %v5283_v58 = vld [vmem:[#allocation2 + $0x78] sm:$0xff]  ;;  %v5285_v55 = vld [vmem:[#allocation2 + $0x90] sm:$0xff]  ;;  %v5290_v34 = vld [vmem:[#allocation2 + $0xc8] sm:$0xff] }
 0x472   : > { %v5207_v29 = vadd.f32 %v15094_v25, %v18419_v53  ;;  %v15096_v51 = vadd.f32 %v14357_v39, %v18236_v8  ;;  %v5128_v14 = vpop.f32.mrb[31].mxu0  ;;  %v18602_v5 = vpack.c.bf16 %v5284_v62, %v5283_v58  ;;  %v18604_v44 = vpack.c.bf16 %v5286_v22, %v5285_v55  ;;  %v5288_v25 = vld [vmem:[#allocation2 + $0xb0] sm:$0xff]  ;;  %v5287_v10 = vld [vmem:[#allocation2 + $0xa8] sm:$0xff]  ;;  %v5292_v19 = vld [vmem:[#allocation2 + $0xe0] sm:$0xff] }
 0x473   : > { %v5205_v60 = vadd.f32 %v15095_v45, %v18419_v53  ;;  %v15097_v20 = vadd.f32 %v5128_v14, %v18240_v27  ;;  %14387 = vmatmul.mubr.msk.bf16.gmra.mrb[32].mxu1 %vm224_vm0, %v18542_v21  ;;  %v18610_v61 = vpack.c.bf16 %v5288_v25, %v5287_v10  ;;  %v5289_v45 = vld [vmem:[#allocation2 + $0xc0] sm:$0xff]  ;;  %v5859_v62 = vld [vmem:[#allocation2 + $0x4a] sm:$0xff]  ;;  %v5860_v22 = vld [vmem:[#allocation2 + $0x52] sm:$0xff] }
 0x474   : > { %v5239_v59 = vmax.f32 %v5207_v29, 0.0  ;;  %v5208_v35 = vadd.f32 %v15096_v51, %v18419_v53  ;;  %14390 = vmatprep.mubr.msk.bf16.mxu1 %vm224_vm0, %v18546_v24  ;;  %v18612_v39 = vpack.c.bf16 %v5290_v34, %v5289_v45  ;;  %v5294_v29 = vld [vmem:[#allocation2 + $0xf8] sm:$0xff]  ;;  %v5861_v58 = vld [vmem:[#allocation2 + $0x62] sm:$0xff]  ;;  %v5862_v55 = vld [vmem:[#allocation2 + $0x6a] sm:$0xff]  ;;  %v18661_v25 = vpack.c.bf16 %v5860_v22, %v5859_v62 }
 0x475   : > { %v5237_v9 = vmax.f32 %v5205_v60, 0.0  ;;  %v5206_v26 = vadd.f32 %v15097_v20, %v18419_v53  ;;  %v5358_v17 = vld [vmem:[#allocation2 + $0x151] sm:$0xff]  ;;  %v5273_v53 = vld [vmem:[#allocation2] sm:$0xff]  ;;  %v18666_v34 = vpack.c.bf16 %v5862_v55, %v5861_v58 }
 0x476   : > { %5271 = vst.msk [vmem:[#allocation2 + $0x181] sm:$0xff] %vm224_vm0, %v5239_v59  ;;  %v5240_v8 = vmax.f32 %v5208_v35, 0.0  ;;  %v5356_v27 = vld [vmem:[#allocation2 + $0x139] sm:$0xff]  ;;  %v5305_v4 = vpack.c.bf16 %v5274_v57, %v5273_v53  ;;  %v5293_v60 = vld [vmem:[#allocation2 + $0xf0] sm:$0xff]  ;;  %v5298_v35 = vld [vmem:[#allocation2 + $0x128] sm:$0xff] }
 0x477   : > { %5269 = vst.msk [vmem:[#allocation2 + $0x169] sm:$0xff] %vm224_vm0, %v5237_v9  ;;  %v5238_v11 = vmax.f32 %v5206_v26, 0.0  ;;  %v5359_v37 = vld [vmem:[#allocation2 + $0x159] sm:$0xff]  ;;  %v18620_v20 = vpack.c.bf16 %v5294_v29, %v5293_v60  ;;  %v5296_v59 = vld [vmem:[#allocation2 + $0x110] sm:$0xff]  ;;  %v5295_v9 = vld [vmem:[#allocation2 + $0x108] sm:$0xff] }
 0x478   : > { %5272 = vst.msk [vmem:[#allocation2 + $0x189] sm:$0xff] %vm224_vm0, %v5240_v8  ;;  %v5357_v40 = vld [vmem:[#allocation2 + $0x141] sm:$0xff]  ;;  %v18562_v54 = vpack.c.bf16 %v5359_v37, %v5358_v17  ;;  %v5291_v51 = vld [vmem:[#allocation2 + $0xd8] sm:$0xff]  ;;  %v18626_v26 = vpack.c.bf16 %v5296_v59, %v5295_v9  ;;  %v5301_v53 = vld [vmem:[#allocation2 + $0x150] sm:$0xff] }
 0x479   : > { %5270 = vst.msk [vmem:[#allocation2 + $0x171] sm:$0xff] %vm224_vm0, %v5238_v11  ;;  %v18560_v13 = vpack.c.bf16 %v5357_v40, %v5356_v27  ;;  %v18618_v14 = vpack.c.bf16 %v5292_v19, %v5291_v51  ;;  %v5297_v8 = vld [vmem:[#allocation2 + $0x120] sm:$0xff]  ;;  %v5302_v27 = vld [vmem:[#allocation2 + $0x158] sm:$0xff] }
 0x47a   : > { %v18628_v11 = vpack.c.bf16 %v5298_v35, %v5297_v8  ;;  %v5300_v37 = vld [vmem:[#allocation2 + $0x140] sm:$0xff]  ;;  %v5299_v40 = vld [vmem:[#allocation2 + $0x138] sm:$0xff]  ;;  %v18636_v57 = vpack.c.bf16 %v5302_v27, %v5301_v53  ;;  %v5867_v35 = vld [vmem:[#allocation2 + $0xaa] sm:$0xff] }
 0x47b   : > { %14391 = vmatmul.mubr.msk.bf16.gmra.mrb[36].mxu1 %vm224_vm0, %v18560_v13  ;;  %v18634_v17 = vpack.c.bf16 %v5300_v37, %v5299_v40  ;;  %v5858_v6 = vld [vmem:[#allocation2 + $0x3a] sm:$0xff]  ;;  %v5864_v19 = vld [vmem:[#allocation2 + $0x82] sm:$0xff]  ;;  %v5865_v29 = vld [vmem:[#allocation2 + $0x92] sm:$0xff] }
 0x47c   : > { %14394 = vmatprep.mubr.msk.bf16.mxu1 %vm224_vm0, %v18562_v54  ;;  %v16024_v10 = vld [vmem:[%s19977_s2 + $0x1a0] sm:$0xff]   ;;  %v5868_v9 = vld [vmem:[#allocation2 + $0xb2] sm:$0xff]  ;;  %v5870_v37 = vld [vmem:[#allocation2 + $0xca] sm:$0xff] }
 0x47d   : > { %v5863_v45 = vld [vmem:[#allocation2 + $0x7a] sm:$0xff]  ;;  %v5869_v8 = vld [vmem:[#allocation2 + $0xc2] sm:$0xff]  ;;  %v18683_v27 = vpack.c.bf16 %v5868_v9, %v5867_v35  ;;  %v5881_v58 = vld [vmem:[#allocation2 + $0x152] sm:$0xff] }
 0x47e   : > { %v5360_v31 = vld [vmem:[#allocation2 + $0x169] sm:$0xff]  ;;  %v5866_v51 = vld [vmem:[#allocation2 + $0x9a] sm:$0xff]  ;;  %v18675_v60 = vpack.c.bf16 %v5864_v19, %v5863_v45  ;;  %v18685_v40 = vpack.c.bf16 %v5870_v37, %v5869_v8 }
 0x47f   : > { %v5303_v0 = vld [vmem:[#allocation2 + $0x168] sm:$0xff]  ;;  %v18677_v59 = vpack.c.bf16 %v5866_v51, %v5865_v29  ;;  %v5871_v53 = vld [vmem:[#allocation2 + $0xda] sm:$0xff]  ;;  %v16026_v9 = vld [vmem:[%s19977_s2 + $0x1b0] sm:$0xff]  }
 0x480   : > { %v5361_v1 = vld [vmem:[#allocation2 + $0x171] sm:$0xff]  ;;  %v5879_v62 = vld [vmem:[#allocation2 + $0x13a] sm:$0xff]  ;;  %v5880_v22 = vld [vmem:[#allocation2 + $0x142] sm:$0xff] }
 0x481   : > { %v18568_v56 = vpack.c.bf16 %v5361_v1, %v5360_v31  ;;  %v5853_v31 = vld [vmem:[#allocation2 + $0x2] sm:$0xff]  ;;  %v5854_v1 = vld [vmem:[#allocation2 + $0xa] sm:$0xff]  ;;  %v5882_v55 = vld [vmem:[#allocation2 + $0x15a] sm:$0xff] }
 0x482   : > { %v5885_v46 = vpack.c.bf16 %v5854_v1, %v5853_v31  ;;  %v5872_v31 = vld [vmem:[#allocation2 + $0xe2] sm:$0xff]  ;;  %v5873_v1 = vld [vmem:[#allocation2 + $0xf2] sm:$0xff]  ;;  %v18709_v45 = vpack.c.bf16 %v5882_v55, %v5881_v58  ;;  %v5883_v19 = vld [vmem:[#allocation2 + $0x16a] sm:$0xff] }
 0x483   : > { %14395 = vmatmul.mubr.msk.bf16.gmra.mrb[40].mxu1 %vm224_vm0, %v18568_v56  ;;  %v5884_v29 = vld [vmem:[#allocation2 + $0x172] sm:$0xff]  ;;  %v16025_v35 = vld [vmem:[%s19977_s2 + $0x1a8] sm:$0xff]   ;;  %v6205_v37 = vld [vmem:[#allocation2 + $0x180] sm:$0xff] }
 0x484   : > { %14406 = vmatprep.mubr.msk.bf16.mxu1 %vm224_vm0, %v5305_v4  ;;  %v5304_v4 = vld [vmem:[#allocation2 + $0x170] sm:$0xff]  ;;  %v18715_v51 = vpack.c.bf16 %v5884_v29, %v5883_v19  ;;  %v6206_v8 = vld [vmem:[#allocation2 + $0x188] sm:$0xff]  ;;  %v16043_v55 = vld [vmem:[%s19977_s2 + $0x238] sm:$0xff]  }
 0x485   : > { %v18642_v32 = vpack.c.bf16 %v5304_v4, %v5303_v0  ;;  %v5874_v4 = vld [vmem:[#allocation2 + $0xfa] sm:$0xff]  ;;  %v18691_v0 = vpack.c.bf16 %v5872_v31, %v5871_v53  ;;  %v18761_v53 = vpack.c.bf16 %v6206_v8, %v6205_v37  ;;  %v16029_v31 = vld [vmem:[%s19977_s2 + $0x1c8] sm:$0xff]   ;;  %v7471_v58 = vld [vmem:[#allocation2 + $0x91] sm:$0xff] }
 0x486   : > { %v7474_v29 = vld [vmem:[#allocation2 + $0xb1] sm:$0xff]  ;;  %v7478_v37 = vld [vmem:[#allocation2 + $0xe1] sm:$0xff] }
 0x48b   : > { %14407 = vmatmul.mubr.msk.bf16.vlgmr.msra.gmra.mrb[12].mxu1 %vm224_vm0, %v18573_v50 }
 0x48c   : > { %14439 = vmatpush3.bf16.msra.mxu1 %v18477_v23  ;;  %14410 = vmatprep.mubr.msk.bf16.mxu1 %vm224_vm0, %v18578_v16  ;;  %v16019_v23 = vld [vmem:[%s19977_s2 + $0x178] sm:$0xff]  }
 0x48d   : > { %14440 = vmatprep.subr.bf16.mxu1 %v16017_v38 }
 0x490   : > { %14441 = vmatpush3.bf16.msra.mxu1 %v16017_v38  ;;  %v5856_v38 = vld [vmem:[#allocation2 + $0x22] sm:$0xff] }
 0x491   : > { %14442 = vmatprep.subr.bf16.mxu1 %v16018_v30  ;;  %v18647_v15 = vpack.c.bf16 %v5856_v38, %v5855_v7  ;;  %v5875_v7 = vld [vmem:[#allocation2 + $0x10a] sm:$0xff]  ;;  %v5876_v38 = vld [vmem:[#allocation2 + $0x112] sm:$0xff] }
 0x493   : > { %14411 = vmatmul.mubr.msk.bf16.gmra.mrb[16].mxu1 %vm224_vm0, %v18588_v36 }
 0x494   : > { %14414 = vmatprep.mubr.msk.bf16.mxu1 %vm224_vm0, %v18593_v42  ;;  %14443 = vmatpush3.bf16.msra.mxu1 %v16018_v30  ;;  %v5857_v30 = vld [vmem:[#allocation2 + $0x32] sm:$0xff] }
 0x495   : > { %14444 = vmatprep.subr.bf16.mxu1 %v16019_v23  ;;  %v18652_v12 = vpack.c.bf16 %v5858_v6, %v5857_v30  ;;  %v5877_v30 = vld [vmem:[#allocation2 + $0x122] sm:$0xff]  ;;  %v5878_v6 = vld [vmem:[#allocation2 + $0x12a] sm:$0xff] }
 0x498   : > { %14445 = vmatpush3.bf16.msra.mxu1 %v16019_v23  ;;  %v16022_v23 = vld [vmem:[%s19977_s2 + $0x190] sm:$0xff]  }
 0x499   : > { %14478 = vmatprep.subr.bf16.mxu1 %v16020_v43 }
 0x49b   : > { %14415 = vmatmul.mubr.msk.bf16.gmra.mrb[20].mxu1 %vm224_vm0, %v18602_v5 }
 0x49c   : > { %14418 = vmatprep.mubr.msk.bf16.mxu1 %vm224_vm0, %v18604_v44 }
 0x4a3   : > { %14419 = vmatmul.mubr.msk.bf16.gmra.mrb[24].mxu1 %vm224_vm0, %v18610_v61 }
 0x4a4   : > { %14422 = vmatprep.mubr.msk.bf16.mxu1 %vm224_vm0, %v18612_v39 }
 0x4ab   : > { %14423 = vmatmul.mubr.msk.bf16.gmra.mrb[28].mxu1 %vm224_vm0, %v18618_v14 }
 0x4ac   : > { %14426 = vmatprep.mubr.msk.bf16.mxu1 %vm224_vm0, %v18620_v20 }
 0x4b3   : > { %14427 = vmatmul.mubr.msk.bf16.gmra.mrb[32].mxu1 %vm224_vm0, %v18626_v26 }
 0x4b4   : > { %14430 = vmatprep.mubr.msk.bf16.mxu1 %vm224_vm0, %v18628_v11 }
 0x4bb   : > { %14431 = vmatmul.mubr.msk.bf16.gmra.mrb[36].mxu1 %vm224_vm0, %v18634_v17 }
 0x4bc   : > { %14434 = vmatprep.mubr.msk.bf16.mxu1 %vm224_vm0, %v18636_v57 }
 0x4c3   : > { %14435 = vmatmul.mubr.msk.bf16.gmra.mrb[40].mxu1 %vm224_vm0, %v18642_v32 }
 0x4c4   : > { %14446 = vmatprep.mubr.msk.bf16.mxu1 %vm224_vm0, %v5885_v46  ;;  %v18693_v46 = vpack.c.bf16 %v5874_v4, %v5873_v1  ;;  %v16030_v1 = vld [vmem:[%s19977_s2 + $0x1d0] sm:$0xff]   ;;  %v16041_v4 = vld [vmem:[%s19977_s2 + $0x228] sm:$0xff]  }
 0x4cb   : > { %14447 = vmatmul.mubr.msk.bf16.vlgmr.msra.gmra.mrb[12].mxu1 %vm224_vm0, %v18647_v15 }
 0x4cc   : > { %14479 = vmatpush3.bf16.msra.mxu1 %v16020_v43  ;;  %14450 = vmatprep.mubr.msk.bf16.mxu1 %vm224_vm0, %v18652_v12  ;;  %v16023_v43 = vld [vmem:[%s19977_s2 + $0x198] sm:$0xff]  }
 0x4cd   : > { %14480 = vmatprep.subr.bf16.mxu1 %v16021_v18 }
 0x4d0   : > { %14481 = vmatpush3.bf16.msra.mxu1 %v16021_v18  ;;  %v18699_v18 = vpack.c.bf16 %v5876_v38, %v5875_v7  ;;  %v16042_v38 = vld [vmem:[%s19977_s2 + $0x230] sm:$0xff]  }
 0x4d1   : > { %14482 = vmatprep.subr.bf16.mxu1 %v16022_v23 }
 0x4d3   : > { %14451 = vmatmul.mubr.msk.bf16.gmra.mrb[16].mxu1 %vm224_vm0, %v18661_v25 }
 0x4d4   : > { %14454 = vmatprep.mubr.msk.bf16.mxu1 %vm224_vm0, %v18666_v34  ;;  %14483 = vmatpush3.bf16.msra.mxu1 %v16022_v23  ;;  %v18701_v23 = vpack.c.bf16 %v5878_v6, %v5877_v30  ;;  %v7470_v30 = vld [vmem:[#allocation2 + $0x81] sm:$0xff]  ;;  %v7472_v6 = vld [vmem:[#allocation2 + $0x99] sm:$0xff] }
 0x4d5   : > { %14484 = vmatprep.subr.bf16.mxu1 %v16023_v43  ;;  %v7499_v19 = vpack.c.bf16 %v7472_v6, %v7471_v58 }
 0x4d8   : > { %14485 = vmatpush3.bf16.msra.mxu1 %v16023_v43  ;;  %v18707_v43 = vpack.c.bf16 %v5880_v22, %v5879_v62  ;;  %v7469_v62 = vld [vmem:[#allocation2 + $0x79] sm:$0xff] }
 0x4d9   : > { %14518 = vmatprep.subr.bf16.mxu1 %v16024_v10  ;;  %v7498_v22 = vpack.c.bf16 %v7470_v30, %v7469_v62 }
 0x4db   : > { %14455 = vmatmul.mubr.msk.bf16.gmra.mrb[20].mxu1 %vm224_vm0, %v18675_v60 }
 0x4dc   : > { %14458 = vmatprep.mubr.msk.bf16.mxu1 %vm224_vm0, %v18677_v59 }
 0x4e3   : > { %14459 = vmatmul.mubr.msk.bf16.gmra.mrb[24].mxu1 %vm224_vm0, %v18683_v27 }
 0x4e4   : > { %14462 = vmatprep.mubr.msk.bf16.mxu1 %vm224_vm0, %v18685_v40 }
 0x4eb   : > { %14463 = vmatmul.mubr.msk.bf16.gmra.mrb[28].mxu1 %vm224_vm0, %v18691_v0 }
 0x4ec   : > { %14466 = vmatprep.mubr.msk.bf16.mxu1 %vm224_vm0, %v18693_v46 }
 0x4f3   : > { %14467 = vmatmul.mubr.msk.bf16.gmra.mrb[32].mxu1 %vm224_vm0, %v18699_v18 }
 0x4f4   : > { %14470 = vmatprep.mubr.msk.bf16.mxu1 %vm224_vm0, %v18701_v23 }
 0x4fb   : > { %14471 = vmatmul.mubr.msk.bf16.gmra.mrb[36].mxu1 %vm224_vm0, %v18707_v43 }
 0x4fc   : > { %14474 = vmatprep.mubr.msk.bf16.mxu1 %vm224_vm0, %v18709_v45 }
 0x503   : > { %14475 = vmatmul.mubr.msk.bf16.gmra.mrb[40].mxu1 %vm224_vm0, %v18715_v51 }
 0x504   : > { %14486 = vmatprep.mubr.msk.bf16.mxu1 %vm224_vm0, %v18573_v50  ;;  %v16027_v50 = vld [vmem:[%s19977_s2 + $0x1b8] sm:$0xff]  }
 0x50b   : > { %14487 = vmatmul.mubr.msk.bf16.vlgmr.msra.gmra.mrb[12].mxu1 %vm224_vm0, %v18578_v16 }
 0x50c   : > { %14519 = vmatpush3.bf16.msra.mxu1 %v16024_v10  ;;  %14490 = vmatprep.mubr.msk.bf16.mxu1 %vm224_vm0, %v18588_v36  ;;  %v16028_v10 = vld [vmem:[%s19977_s2 + $0x1c0] sm:$0xff]  }
 0x50d   : > { %14520 = vmatprep.subr.bf16.mxu1 %v16025_v35 }
 0x510   : > { %14521 = vmatpush3.bf16.msra.mxu1 %v16025_v35  ;;  %v7476_v35 = vld [vmem:[#allocation2 + $0xc9] sm:$0xff] }
 0x511   : > { %14522 = vmatprep.subr.bf16.mxu1 %v16026_v9 }
 0x513   : > { %14491 = vmatmul.mubr.msk.bf16.gmra.mrb[16].mxu1 %vm224_vm0, %v18593_v42 }
 0x514   : > { %14494 = vmatprep.mubr.msk.bf16.mxu1 %vm224_vm0, %v18602_v5  ;;  %14523 = vmatpush3.bf16.msra.mxu1 %v16026_v9  ;;  %v7473_v9 = vld [vmem:[#allocation2 + $0xa9] sm:$0xff] }
 0x515   : > { %14524 = vmatprep.subr.bf16.mxu1 %v16027_v50 }
 0x518   : > { %14525 = vmatpush3.bf16.msra.mxu1 %v16027_v50  ;;  %v7500_v50 = vpack.c.bf16 %v7474_v29, %v7473_v9 }
 0x519   : > { %14558 = vmatprep.subr.bf16.mxu1 %v16028_v10 }
 0x51b   : > { %14495 = vmatmul.mubr.msk.bf16.gmra.mrb[20].mxu1 %vm224_vm0, %v18604_v44 }
 0x51c   : > { %14498 = vmatprep.mubr.msk.bf16.mxu1 %vm224_vm0, %v18610_v61 }
 0x523   : > { %14499 = vmatmul.mubr.msk.bf16.gmra.mrb[24].mxu1 %vm224_vm0, %v18612_v39 }
 0x524   : > { %14502 = vmatprep.mubr.msk.bf16.mxu1 %vm224_vm0, %v18618_v14 }
 0x52b   : > { %14503 = vmatmul.mubr.msk.bf16.gmra.mrb[28].mxu1 %vm224_vm0, %v18620_v20 }
 0x52c   : > { %14506 = vmatprep.mubr.msk.bf16.mxu1 %vm224_vm0, %v18626_v26 }
 0x533   : > { %14507 = vmatmul.mubr.msk.bf16.gmra.mrb[32].mxu1 %vm224_vm0, %v18628_v11 }
 0x534   : > { %14510 = vmatprep.mubr.msk.bf16.mxu1 %vm224_vm0, %v18634_v17 }
 0x53b   : > { %14511 = vmatmul.mubr.msk.bf16.gmra.mrb[36].mxu1 %vm224_vm0, %v18636_v57 }
 0x53c   : > { %14514 = vmatprep.mubr.msk.bf16.mxu1 %vm224_vm0, %v18642_v32 }
 0x543   : > { %14515 = vmatmul.mubr.msk.bf16.gmra.mrb[40].mxu1 %vm224_vm0, %v18761_v53 }
 0x544   : > { %14526 = vmatprep.mubr.msk.bf16.mxu1 %vm224_vm0, %v18437_v41  ;;  %v16031_v41 = vld [vmem:[%s19977_s2 + $0x1d8] sm:$0xff]  }
 0x54b   : > { %14527 = vmatmul.mubr.msk.bf16.vlgmr.msra.gmra.mrb[12].mxu1 %vm224_vm0, %v18443_v49  ;;  %v16032_v49 = vld [vmem:[%s19977_s2 + $0x1e0] sm:$0xff]  }
 0x54c   : > { %14559 = vmatpush3.bf16.msra.mxu1 %v16028_v10  ;;  %14530 = vmatprep.mubr.msk.bf16.mxu1 %vm224_vm0, %v18459_v3  ;;  %v6528_v3 = vld [vmem:[#allocation2 + $0x189] sm:$0xff]  ;;  %v7475_v10 = vld [vmem:[#allocation2 + $0xc1] sm:$0xff] }
 0x54d   : > { %14560 = vmatprep.subr.bf16.mxu1 %v16029_v31  ;;  %v7501_v8 = vpack.c.bf16 %v7476_v35, %v7475_v10 }
 0x550   : > { %14561 = vmatpush3.bf16.msra.mxu1 %v16029_v31  ;;  %v7477_v31 = vld [vmem:[#allocation2 + $0xd9] sm:$0xff] }
 0x551   : > { %14562 = vmatprep.subr.bf16.mxu1 %v16030_v1 }
 0x553   : > { %14531 = vmatmul.mubr.msk.bf16.gmra.mrb[16].mxu1 %vm224_vm0, %v18465_v47  ;;  %v6527_v47 = vld [vmem:[#allocation2 + $0x181] sm:$0xff] }
 0x554   : > { %14534 = vmatprep.mubr.msk.bf16.mxu1 %vm224_vm0, %v18483_v63  ;;  %14563 = vmatpush3.bf16.msra.mxu1 %v16030_v1  ;;  %v18807_v63 = vpack.c.bf16 %v6528_v3, %v6527_v47  ;;  %v7502_v1 = vpack.c.bf16 %v7478_v37, %v7477_v31  ;;  %v7482_v3 = vld [vmem:[#allocation2 + $0x111] sm:$0xff]  ;;  %v7484_v47 = vld [vmem:[#allocation2 + $0x129] sm:$0xff] }
 0x555   : > { %14564 = vmatprep.subr.bf16.mxu1 %v16031_v41 }
 0x558   : > { %14565 = vmatpush3.bf16.msra.mxu1 %v16031_v41  ;;  %v7479_v41 = vld [vmem:[#allocation2 + $0xf1] sm:$0xff] }
 0x559   : > { %14598 = vmatprep.subr.bf16.mxu1 %v16032_v49 }
 0x55b   : > { %14535 = vmatmul.mubr.msk.bf16.gmra.mrb[20].mxu1 %vm224_vm0, %v18487_v48  ;;  %v16033_v48 = vld [vmem:[%s19977_s2 + $0x1e8] sm:$0xff]  }
 0x55c   : > { %14538 = vmatprep.mubr.msk.bf16.mxu1 %vm224_vm0, %v18500_v28  ;;  %v16034_v28 = vld [vmem:[%s19977_s2 + $0x1f0] sm:$0xff]  }
 0x563   : > { %14539 = vmatmul.mubr.msk.bf16.gmra.mrb[24].mxu1 %vm224_vm0, %v18503_v52  ;;  %v16035_v52 = vld [vmem:[%s19977_s2 + $0x1f8] sm:$0xff]  }
 0x564   : > { %14542 = vmatprep.mubr.msk.bf16.mxu1 %vm224_vm0, %v18518_v33  ;;  %v16036_v33 = vld [vmem:[%s19977_s2 + $0x200] sm:$0xff]  }
 0x56b   : > { %14543 = vmatmul.mubr.msk.bf16.gmra.mrb[28].mxu1 %vm224_vm0, %v18522_v2  ;;  %v6849_v2 = vld [vmem:[#allocation2 + $0x182] sm:$0xff] }
 0x56c   : > { %14546 = vmatprep.mubr.msk.bf16.mxu1 %vm224_vm0, %v18542_v21  ;;  %v6850_v21 = vld [vmem:[#allocation2 + $0x18a] sm:$0xff] }
 0x573   : > { %14547 = vmatmul.mubr.msk.bf16.gmra.mrb[32].mxu1 %vm224_vm0, %v18546_v24  ;;  %v18853_v24 = vpack.c.bf16 %v6850_v21, %v6849_v2  ;;  %v7486_v2 = vld [vmem:[#allocation2 + $0x141] sm:$0xff]  ;;  %v7488_v21 = vld [vmem:[#allocation2 + $0x159] sm:$0xff] }
 0x574   : > { %14550 = vmatprep.mubr.msk.bf16.mxu1 %vm224_vm0, %v18560_v13  ;;  %v16037_v13 = vld [vmem:[%s19977_s2 + $0x208] sm:$0xff]  }
 0x57b   : > { %14551 = vmatmul.mubr.msk.bf16.gmra.mrb[36].mxu1 %vm224_vm0, %v18562_v54  ;;  %v16038_v54 = vld [vmem:[%s19977_s2 + $0x210] sm:$0xff]  }
 0x57c   : > { %14554 = vmatprep.mubr.msk.bf16.mxu1 %vm224_vm0, %v18568_v56  ;;  %v16039_v56 = vld [vmem:[%s19977_s2 + $0x218] sm:$0xff]  }
 0x583   : > { %14555 = vmatmul.mubr.msk.bf16.gmra.mrb[40].mxu1 %vm224_vm0, %v18807_v63 }
 0x584   : > { %14566 = vmatprep.mubr.msk.bf16.mxu1 %vm224_vm0, %v18647_v15  ;;  %v7467_v15 = vld [vmem:[#allocation2 + $0x61] sm:$0xff] }
 0x58b   : > { %14567 = vmatmul.mubr.msk.bf16.vlgmr.msra.gmra.mrb[12].mxu1 %vm224_vm0, %v18652_v12 }
 0x58c   : > { %14599 = vmatpush3.bf16.msra.mxu1 %v16032_v49  ;;  %14570 = vmatprep.mubr.msk.bf16.mxu1 %vm224_vm0, %v18661_v25 }
 0x58d   : > { %14600 = vmatprep.subr.bf16.mxu1 %v16033_v48 }
 0x590   : > { %14601 = vmatpush3.bf16.msra.mxu1 %v16033_v48  ;;  %v7481_v48 = vld [vmem:[#allocation2 + $0x109] sm:$0xff] }
 0x591   : > { %14602 = vmatprep.subr.bf16.mxu1 %v16034_v28 }
 0x593   : > { %14571 = vmatmul.mubr.msk.bf16.gmra.mrb[16].mxu1 %vm224_vm0, %v18666_v34 }
 0x594   : > { %14574 = vmatprep.mubr.msk.bf16.mxu1 %vm224_vm0, %v18675_v60  ;;  %14603 = vmatpush3.bf16.msra.mxu1 %v16034_v28  ;;  %v7504_v28 = vpack.c.bf16 %v7482_v3, %v7481_v48 }
 0x595   : > { %14604 = vmatprep.subr.bf16.mxu1 %v16035_v52 }
 0x598   : > { %14605 = vmatpush3.bf16.msra.mxu1 %v16035_v52  ;;  %v7483_v52 = vld [vmem:[#allocation2 + $0x121] sm:$0xff] }
 0x599   : > { %14638 = vmatprep.subr.bf16.mxu1 %v16036_v33 }
 0x59b   : > { %14575 = vmatmul.mubr.msk.bf16.gmra.mrb[20].mxu1 %vm224_vm0, %v18677_v59 }
 0x59c   : > { %14578 = vmatprep.mubr.msk.bf16.mxu1 %vm224_vm0, %v18683_v27 }
 0x5a3   : > { %14579 = vmatmul.mubr.msk.bf16.gmra.mrb[24].mxu1 %vm224_vm0, %v18685_v40 }
 0x5a4   : > { %14582 = vmatprep.mubr.msk.bf16.mxu1 %vm224_vm0, %v18691_v0 }
 0x5ab   : > { %14583 = vmatmul.mubr.msk.bf16.gmra.mrb[28].mxu1 %vm224_vm0, %v18693_v46 }
 0x5ac   : > { %14586 = vmatprep.mubr.msk.bf16.mxu1 %vm224_vm0, %v18699_v18 }
 0x5b3   : > { %14587 = vmatmul.mubr.msk.bf16.gmra.mrb[32].mxu1 %vm224_vm0, %v18701_v23 }
 0x5b4   : > { %14590 = vmatprep.mubr.msk.bf16.mxu1 %vm224_vm0, %v18707_v43 }
 0x5bb   : > { %14591 = vmatmul.mubr.msk.bf16.gmra.mrb[36].mxu1 %vm224_vm0, %v18709_v45 }
 0x5bc   : > { %14594 = vmatprep.mubr.msk.bf16.mxu1 %vm224_vm0, %v18715_v51 }
 0x5c3   : > { %14595 = vmatmul.mubr.msk.bf16.gmra.mrb[40].mxu1 %vm224_vm0, %v18853_v24 }
 0x5c4   : > { %14606 = vmatprep.mubr.msk.bf16.mxu1 %vm224_vm0, %v18578_v16  ;;  %v16040_v16 = vld [vmem:[%s19977_s2 + $0x220] sm:$0xff]  }
 0x5cb   : > { %14607 = vmatmul.mubr.msk.bf16.vlgmr.msra.gmra.mrb[12].mxu1 %vm224_vm0, %v18588_v36  ;;  %v7171_v36 = vld [vmem:[#allocation2 + $0x198] sm:$0xff] }
 0x5cc   : > { %14639 = vmatpush3.bf16.msra.mxu1 %v16036_v33  ;;  %14610 = vmatprep.mubr.msk.bf16.mxu1 %vm224_vm0, %v18593_v42  ;;  %v7172_v42 = vld [vmem:[#allocation2 + $0x1a0] sm:$0xff]  ;;  %v7505_v33 = vpack.c.bf16 %v7484_v47, %v7483_v52  ;;  %v16050_v52 = vld [vmem:[%s19977_s2 + $0x250] sm:$0xff]  }
 0x5cd   : > { %14640 = vmatprep.subr.bf16.mxu1 %v16037_v13 }
 0x5d0   : > { %14641 = vmatpush3.bf16.msra.mxu1 %v16037_v13  ;;  %v7485_v13 = vld [vmem:[#allocation2 + $0x139] sm:$0xff] }
 0x5d1   : > { %14642 = vmatprep.subr.bf16.mxu1 %v16038_v54 }
 0x5d3   : > { %14611 = vmatmul.mubr.msk.bf16.gmra.mrb[16].mxu1 %vm224_vm0, %v18602_v5  ;;  %v7188_v5 = vpack.c.bf16 %v7172_v42, %v7171_v36  ;;  %v7490_v36 = vld [vmem:[#allocation2 + $0x171] sm:$0xff]  ;;  %v7489_v42 = vld [vmem:[#allocation2 + $0x169] sm:$0xff] }
 0x5d4   : > { %14614 = vmatprep.mubr.msk.bf16.mxu1 %vm224_vm0, %v18604_v44  ;;  %14643 = vmatpush3.bf16.msra.mxu1 %v16038_v54  ;;  %v7464_v44 = vld [vmem:[#allocation2 + $0x39] sm:$0xff]  ;;  %v7506_v54 = vpack.c.bf16 %v7486_v2, %v7485_v13 }
 0x5d5   : > { %14644 = vmatprep.subr.bf16.mxu1 %v16039_v56 }
 0x5d8   : > { %14645 = vmatpush3.bf16.msra.mxu1 %v16039_v56  ;;  %v7487_v56 = vld [vmem:[#allocation2 + $0x151] sm:$0xff] }
 0x5d9   : > { %14678 = vmatprep.subr.bf16.mxu1 %v16040_v16 }
 0x5db   : > { %14615 = vmatmul.mubr.msk.bf16.gmra.mrb[20].mxu1 %vm224_vm0, %v18610_v61  ;;  %v7463_v61 = vld [vmem:[#allocation2 + $0x31] sm:$0xff] }
 0x5dc   : > { %14618 = vmatprep.mubr.msk.bf16.mxu1 %vm224_vm0, %v18612_v39  ;;  %v7495_v39 = vpack.c.bf16 %v7464_v44, %v7463_v61  ;;  %v7493_v44 = vld [vmem:[#allocation2 + $0x199] sm:$0xff]  ;;  %v7494_v61 = vld [vmem:[#allocation2 + $0x1a1] sm:$0xff] }
 0x5e3   : > { %14619 = vmatmul.mubr.msk.bf16.gmra.mrb[24].mxu1 %vm224_vm0, %v18618_v14  ;;  %v16044_v14 = vld [vmem:[%s19977_s2 + $0x260] sm:$0xff]  }
 0x5e4   : > { %14622 = vmatprep.mubr.msk.bf16.mxu1 %vm224_vm0, %v18620_v20  ;;  %v16045_v20 = vld [vmem:[%s19977_s2 + $0x268] sm:$0xff]   ;;  %14718 = vmatprep.subr.bf16.mxu0 %v16044_v14 }
 0x5e5   : > { %14719 = vmatpush3.bf16.msra.mxu0 %v16044_v14 }
 0x5e6   : > { %14720 = vmatprep.subr.bf16.mxu0 %v16045_v20 }
 0x5e9   : > { %14721 = vmatpush3.bf16.msra.mxu0 %v16045_v20 }
 0x5eb   : > { %14623 = vmatmul.mubr.msk.bf16.gmra.mrb[28].mxu1 %vm224_vm0, %v18626_v26  ;;  %v7466_v26 = vld [vmem:[#allocation2 + $0x51] sm:$0xff] }
 0x5ec   : > { %14626 = vmatprep.mubr.msk.bf16.mxu1 %vm224_vm0, %v18628_v11  ;;  %v7468_v11 = vld [vmem:[#allocation2 + $0x69] sm:$0xff] }
 0x5ed   : > { %v7497_v7 = vpack.c.bf16 %v7468_v11, %v7467_v15 }
 0x5f3   : > { %14627 = vmatmul.mubr.msk.bf16.gmra.mrb[32].mxu1 %vm224_vm0, %v18634_v17  ;;  %v16046_v17 = vld [vmem:[%s19977_s2 + $0x270] sm:$0xff]  }
 0x5f4   : > { %14630 = vmatprep.mubr.msk.bf16.mxu1 %vm224_vm0, %v18636_v57  ;;  %v7465_v57 = vld [vmem:[#allocation2 + $0x49] sm:$0xff]  ;;  %14722 = vmatprep.subr.bf16.mxu0 %v16046_v17 }
 0x5f5   : > { %14723 = vmatpush3.bf16.msra.mxu0 %v16046_v17 }
 0x5fb   : > { %14631 = vmatmul.mubr.msk.bf16.gmra.mrb[36].mxu1 %vm224_vm0, %v18642_v32  ;;  %v7496_v32 = vpack.c.bf16 %v7466_v26, %v7465_v57 }
 0x5fc   : > { %14634 = vmatprep.mubr.msk.bf16.mxu1 %vm224_vm0, %v18761_v53  ;;  %v7480_v53 = vld [vmem:[#allocation2 + $0xf9] sm:$0xff] }
 0x5fd   : > { %v7503_v49 = vpack.c.bf16 %v7480_v53, %v7479_v41 }
 0x603   : > { %14635 = vmatmul.mubr.msk.bf16.gmra.mrb[40].mxu1 %vm224_vm0, %v7188_v5  ;;  %v7508_v5 = vpack.c.bf16 %v7490_v36, %v7489_v42  ;;  %v16051_v42 = vld [vmem:[%s19977_s2 + $0x258] sm:$0xff]  }
 0x604   : > { %14646 = vmatprep.mubr.msk.bf16.mxu1 %vm224_vm0, %v7495_v39  ;;  %v7510_v39 = vpack.c.bf16 %v7494_v61, %v7493_v44 }
 0x60b   : > { %14647 = vmatmul.mubr.msk.bf16.vlgmr.msra.gmra.mrb[12].mxu1 %vm224_vm0, %v7496_v32 }
 0x60c   : > { %14679 = vmatpush3.bf16.msra.mxu1 %v16040_v16  ;;  %14650 = vmatprep.mubr.msk.bf16.mxu1 %vm224_vm0, %v7497_v7  ;;  %v7507_v16 = vpack.c.bf16 %v7488_v21, %v7487_v56 }
 0x60d   : > { %14680 = vmatprep.subr.bf16.mxu1 %v16041_v4 }
 0x610   : > { %14681 = vmatpush3.bf16.msra.mxu1 %v16041_v4 }
 0x611   : > { %14682 = vmatprep.subr.bf16.mxu1 %v16042_v38 }
 0x613   : > { %14651 = vmatmul.mubr.msk.bf16.gmra.mrb[16].mxu1 %vm224_vm0, %v7498_v22 }
 0x614   : > { %14654 = vmatprep.mubr.msk.bf16.mxu1 %vm224_vm0, %v7499_v19  ;;  %14683 = vmatpush3.bf16.msra.mxu1 %v16042_v38 }
 0x615   : > { %14684 = vmatprep.subr.bf16.mxu1 %v16043_v55 }
 0x618   : > { %14685 = vmatpush3.bf16.msra.mxu1 %v16043_v55 }
 0x61b   : > { %14655 = vmatmul.mubr.msk.bf16.gmra.mrb[20].mxu1 %vm224_vm0, %v7500_v50 }
 0x61c   : > { %14658 = vmatprep.mubr.msk.bf16.mxu1 %vm224_vm0, %v7501_v8  ;;  %v16049_v8 = vld [vmem:[%s19977_s2 + $0x248] sm:$0xff]  }
 0x623   : > { %14659 = vmatmul.mubr.msk.bf16.gmra.mrb[24].mxu1 %vm224_vm0, %v7502_v1 }
 0x624   : > { %14662 = vmatprep.mubr.msk.bf16.mxu1 %vm224_vm0, %v7503_v49 }
 0x62b   : > { %14663 = vmatmul.mubr.msk.bf16.gmra.mrb[28].mxu1 %vm224_vm0, %v7504_v28 }
 0x62c   : > { %14666 = vmatprep.mubr.msk.bf16.mxu1 %vm224_vm0, %v7505_v33 }
 0x633   : > { %14667 = vmatmul.mubr.msk.bf16.gmra.mrb[32].mxu1 %vm224_vm0, %v7506_v54 }
 0x634   : > { %14670 = vmatprep.mubr.msk.bf16.mxu1 %vm224_vm0, %v7507_v16 }
 0x63b   : > { %14671 = vmatmul.mubr.msk.bf16.gmra.mrb[36].mxu1 %vm224_vm0, %v7508_v5 }
 0x63c   : > { %14674 = vmatprep.mubr.msk.bf16.mxu1 %vm224_vm0, %v18807_v63 }
 0x643   : > { %14675 = vmatmul.mubr.msk.bf16.gmra.mrb[40].mxu1 %vm224_vm0, %v7510_v39 }
 0x644   : > { %14686 = vmatprep.mubr.msk.bf16.mxu1 %vm224_vm0, %v18652_v12  ;;  %v7815_v12 = vld [vmem:[#allocation2 + $0x19a] sm:$0xff] }
 0x64b   : > { %14687 = vmatmul.mubr.msk.bf16.vlgmr.msra.gmra.mrb[12].mxu1 %vm224_vm0, %v18661_v25  ;;  %v7816_v25 = vld [vmem:[#allocation2 + $0x1a2] sm:$0xff] }
 0x64c   : > { %14690 = vmatprep.mubr.msk.bf16.mxu1 %vm224_vm0, %v18666_v34  ;;  %v7832_v34 = vpack.c.bf16 %v7816_v25, %v7815_v12 }
 0x653   : > { %14691 = vmatmul.mubr.msk.bf16.gmra.mrb[16].mxu1 %vm224_vm0, %v18675_v60  ;;  %v16047_v60 = vld [vmem:[%s19977_s2 + $0x278] sm:$0xff]  }
 0x654   : > { %14694 = vmatprep.mubr.msk.bf16.mxu1 %vm224_vm0, %v18677_v59  ;;  %14724 = vmatprep.subr.bf16.mxu0 %v16047_v60  ;;  %v8265_v59 = vld [vmem:[#allocation2 + $0x1] sm:$0xff] }
 0x655   : > { %14725 = vmatpush3.bf16.msra.mxu0 %v16047_v60 }
 0x65b   : > { %14695 = vmatmul.mubr.msk.bf16.gmra.mrb[20].mxu1 %vm224_vm0, %v18683_v27  ;;  %v8266_v27 = vld [vmem:[#allocation2 + $0x9] sm:$0xff] }
 0x65c   : > { %14698 = vmatprep.mubr.msk.bf16.mxu1 %vm224_vm0, %v18685_v40  ;;  %v16048_v40 = vld [vmem:[%s19977_s2 + $0x240] sm:$0xff]  }
 0x65d   : > { %14758 = vmatprep.subr.bf16.mxu0 %v16048_v40 }
 0x663   : > { %14699 = vmatmul.mubr.msk.bf16.gmra.mrb[24].mxu1 %vm224_vm0, %v18691_v0  ;;  %v8297_v0 = vpack.c.bf16 %v8266_v27, %v8265_v59 }
 0x664   : > { %14702 = vmatprep.mubr.msk.bf16.mxu1 %vm224_vm0, %v18693_v46  ;;  %v18976_v46 = vld [vmem:[%s19978_s3 + $0x1] ss:$0 sm:$0xff] }
 0x665   : > { %14726 = vmatprep.mubr.msk.bf16.mxu0 %vm224_vm0, %v8297_v0 }
 0x66b   : > { %14703 = vmatmul.mubr.msk.bf16.gmra.mrb[28].mxu1 %vm224_vm0, %v18699_v18 }
 0x66c   : > { %14706 = vmatprep.mubr.msk.bf16.mxu1 %vm224_vm0, %v18701_v23 }
 0x673   : > { %14707 = vmatmul.mubr.msk.bf16.gmra.mrb[32].mxu1 %vm224_vm0, %v18707_v43 }
 0x674   : > { %14710 = vmatprep.mubr.msk.bf16.mxu1 %vm224_vm0, %v18709_v45 }
 0x67b   : > { %14711 = vmatmul.mubr.msk.bf16.gmra.mrb[36].mxu1 %vm224_vm0, %v18715_v51 }
 0x67c   : > { %14714 = vmatprep.mubr.msk.bf16.mxu1 %vm224_vm0, %v18853_v24 }
 0x683   : > { %14715 = vmatmul.mubr.msk.bf16.gmra.mrb[40].mxu1 %vm224_vm0, %v7832_v34 }
 0x71e   : > { %v14688_v18 = vpop.f32.mrb[12].mxu1 }
 0x71f   : > { %v8114_v23 = vadd.f32 %v14688_v18, %v18976_v46  ;;  %v7948_v43 = vpop.f32.mrb[13].mxu1 }
 0x720   : > { %v8112_v45 = vadd.f32 %v18976_v46, %v7948_v43  ;;  %v14689_v51 = vpop.f32.mrb[14].mxu1 }
 0x721   : > { %v8146_v63 = vmax.f32 %v8114_v23, 0.0  ;;  %v8115_v24 = vadd.f32 %v14689_v51, %v18976_v46  ;;  %v7951_v14 = vpop.f32.mrb[15].mxu1 }
 0x722   : > { %v8144_v20 = vmax.f32 %v8112_v45, 0.0  ;;  %v8113_v26 = vadd.f32 %v18976_v46, %v7951_v14 }
 0x723   : > { %8178 = vst.msk [vmem:[#allocation2 + $0x31] sm:$0xff] %vm224_vm0, %v8146_v63  ;;  %v8147_v11 = vmax.f32 %v8115_v24, 0.0 }
 0x724   : > { %8176 = vst.msk [vmem:[#allocation2 + $0x19] sm:$0xff] %vm224_vm0, %v8144_v20  ;;  %v8145_v17 = vmax.f32 %v8113_v26, 0.0 }
 0x725   : > { %8179 = vst.msk [vmem:[#allocation2 + $0x39] sm:$0xff] %vm224_vm0, %v8147_v11 }
 0x726   : > { %8177 = vst.msk [vmem:[#allocation2 + $0x21] sm:$0xff] %vm224_vm0, %v8145_v17  ;;  %v14692_v57 = vpop.f32.mrb[16].mxu1 }
 0x727   : > { %v8118_v32 = vadd.f32 %v14692_v57, %v18976_v46  ;;  %v7964_v15 = vpop.f32.mrb[17].mxu1 }
 0x728   : > { %v8116_v4 = vadd.f32 %v18976_v46, %v7964_v15  ;;  %v14693_v7 = vpop.f32.mrb[18].mxu1 }
 0x729   : > { %v8150_v38 = vmax.f32 %v8118_v32, 0.0  ;;  %v8119_v30 = vadd.f32 %v14693_v7, %v18976_v46  ;;  %v7967_v6 = vpop.f32.mrb[19].mxu1 }
 0x72a   : > { %v8148_v62 = vmax.f32 %v8116_v4, 0.0  ;;  %v8117_v22 = vadd.f32 %v18976_v46, %v7967_v6  ;;  %v8269_v10 = vld [vmem:[#allocation2 + $0x31] sm:$0xff] }
 0x72b   : > { %8182 = vst.msk [vmem:[#allocation2 + $0x61] sm:$0xff] %vm224_vm0, %v8150_v38  ;;  %v8151_v58 = vmax.f32 %v8119_v30, 0.0  ;;  %v8267_v29 = vld [vmem:[#allocation2 + $0x19] sm:$0xff] }
 0x72c   : > { %8180 = vst.msk [vmem:[#allocation2 + $0x49] sm:$0xff] %vm224_vm0, %v8148_v62  ;;  %v8149_v55 = vmax.f32 %v8117_v22, 0.0  ;;  %v8270_v19 = vld [vmem:[#allocation2 + $0x39] sm:$0xff] }
 0x72d   : > { %8183 = vst.msk [vmem:[#allocation2 + $0x69] sm:$0xff] %vm224_vm0, %v8151_v58  ;;  %v8268_v35 = vld [vmem:[#allocation2 + $0x21] sm:$0xff]  ;;  %v19000_v31 = vpack.c.bf16 %v8270_v19, %v8269_v10 }
 0x72e   : > { %8181 = vst.msk [vmem:[#allocation2 + $0x51] sm:$0xff] %vm224_vm0, %v8149_v55  ;;  %v14696_v9 = vpop.f32.mrb[20].mxu1  ;;  %v18994_v50 = vpack.c.bf16 %v8268_v35, %v8267_v29 }
 0x72f   : > { %v8122_v37 = vadd.f32 %v14696_v9, %v18976_v46  ;;  %v7980_v53 = vpop.f32.mrb[21].mxu1 }
 0x730   : > { %v8120_v1 = vadd.f32 %v18976_v46, %v7980_v53  ;;  %v14697_v41 = vpop.f32.mrb[22].mxu1  ;;  %14727 = vmatmul.mubr.msk.bf16.vlgmr.msra.gmra.mrb[32].mxu0 %vm224_vm0, %v18994_v50 }
 0x731   : > { %v8154_v49 = vmax.f32 %v8122_v37, 0.0  ;;  %v8123_v3 = vadd.f32 %v14697_v41, %v18976_v46  ;;  %14759 = vmatpush3.bf16.msra.mxu0 %v16048_v40  ;;  %v7983_v47 = vpop.f32.mrb[23].mxu1  ;;  %14730 = vmatprep.mubr.msk.bf16.mxu0 %vm224_vm0, %v19000_v31  ;;  %v19034_v40 = vld [vmem:[%s19977_s2 + $0x280] sm:$0xff]  }
 0x732   : > { %v8152_v48 = vmax.f32 %v8120_v1, 0.0  ;;  %v8121_v28 = vadd.f32 %v18976_v46, %v7983_v47  ;;  %14760 = vmatprep.subr.bf16.mxu0 %v16049_v8  ;;  %v8273_v36 = vld [vmem:[#allocation2 + $0x61] sm:$0xff] }
 0x733   : > { %8186 = vst.msk [vmem:[#allocation2 + $0x91] sm:$0xff] %vm224_vm0, %v8154_v49  ;;  %v8155_v33 = vmax.f32 %v8123_v3, 0.0  ;;  %v8271_v13 = vld [vmem:[#allocation2 + $0x49] sm:$0xff] }
 0x734   : > { %8184 = vst.msk [vmem:[#allocation2 + $0x79] sm:$0xff] %vm224_vm0, %v8152_v48  ;;  %v8153_v2 = vmax.f32 %v8121_v28, 0.0  ;;  %v8274_v21 = vld [vmem:[#allocation2 + $0x69] sm:$0xff] }
 0x735   : > { %8187 = vst.msk [vmem:[#allocation2 + $0x99] sm:$0xff] %vm224_vm0, %v8155_v33  ;;  %v8272_v54 = vld [vmem:[#allocation2 + $0x51] sm:$0xff]  ;;  %14761 = vmatpush3.bf16.msra.mxu0 %v16049_v8  ;;  %v19022_v61 = vpack.c.bf16 %v8274_v21, %v8273_v36 }
 0x736   : > { %8185 = vst.msk [vmem:[#allocation2 + $0x81] sm:$0xff] %vm224_vm0, %v8153_v2  ;;  %v14700_v56 = vpop.f32.mrb[24].mxu1  ;;  %v19016_v16 = vpack.c.bf16 %v8272_v54, %v8271_v13  ;;  %14762 = vmatprep.subr.bf16.mxu0 %v16050_v52 }
 0x737   : > { %v8126_v5 = vadd.f32 %v14700_v56, %v18976_v46  ;;  %v7996_v44 = vpop.f32.mrb[25].mxu1 }
 0x738   : > { %v8124_v39 = vadd.f32 %v18976_v46, %v7996_v44  ;;  %v14701_v12 = vpop.f32.mrb[26].mxu1  ;;  %14731 = vmatmul.mubr.msk.bf16.gmra.mrb[36].mxu0 %vm224_vm0, %v19016_v16 }
 0x739   : > { %v8158_v25 = vmax.f32 %v8126_v5, 0.0  ;;  %v8127_v34 = vadd.f32 %v14701_v12, %v18976_v46  ;;  %v7999_v60 = vpop.f32.mrb[27].mxu1  ;;  %14734 = vmatprep.mubr.msk.bf16.mxu0 %vm224_vm0, %v19022_v61  ;;  %14763 = vmatpush3.bf16.msra.mxu0 %v16050_v52 }
 0x73a   : > { %v8156_v59 = vmax.f32 %v8124_v39, 0.0  ;;  %v8125_v27 = vadd.f32 %v18976_v46, %v7999_v60  ;;  %14764 = vmatprep.subr.bf16.mxu0 %v16051_v42  ;;  %v8277_v24 = vld [vmem:[#allocation2 + $0x91] sm:$0xff] }
 0x73b   : > { %8190 = vst.msk [vmem:[#allocation2 + $0xc1] sm:$0xff] %vm224_vm0, %v8158_v25  ;;  %v8159_v0 = vmax.f32 %v8127_v34, 0.0  ;;  %v8275_v43 = vld [vmem:[#allocation2 + $0x79] sm:$0xff] }
 0x73c   : > { %8188 = vst.msk [vmem:[#allocation2 + $0xa9] sm:$0xff] %vm224_vm0, %v8156_v59  ;;  %v8157_v18 = vmax.f32 %v8125_v27, 0.0  ;;  %v8278_v23 = vld [vmem:[#allocation2 + $0x99] sm:$0xff] }
 0x73d   : > { %8191 = vst.msk [vmem:[#allocation2 + $0xc9] sm:$0xff] %vm224_vm0, %v8159_v0  ;;  %v8276_v45 = vld [vmem:[#allocation2 + $0x81] sm:$0xff]  ;;  %14765 = vmatpush3.bf16.msra.mxu0 %v16051_v42  ;;  %v19044_v26 = vpack.c.bf16 %v8278_v23, %v8277_v24 }
 0x73e   : > { %8189 = vst.msk [vmem:[#allocation2 + $0xb1] sm:$0xff] %vm224_vm0, %v8157_v18  ;;  %v14704_v51 = vpop.f32.mrb[28].mxu1  ;;  %v19040_v63 = vpack.c.bf16 %v8276_v45, %v8275_v43  ;;  %14798 = vmatprep.subr.bf16.mxu0 %v19034_v40 }
 0x73f   : > { %v8130_v14 = vadd.f32 %v14704_v51, %v18976_v46  ;;  %v8012_v20 = vpop.f32.mrb[29].mxu1 }
 0x740   : > { %v8128_v11 = vadd.f32 %v18976_v46, %v8012_v20  ;;  %v14705_v17 = vpop.f32.mrb[30].mxu1  ;;  %14735 = vmatmul.mubr.msk.bf16.gmra.mrb[40].mxu0 %vm224_vm0, %v19040_v63 }
 0x741   : > { %v8162_v57 = vmax.f32 %v8130_v14, 0.0  ;;  %v8131_v32 = vadd.f32 %v14705_v17, %v18976_v46  ;;  %v8015_v15 = vpop.f32.mrb[31].mxu1  ;;  %14738 = vmatprep.mubr.msk.bf16.mxu0 %vm224_vm0, %v19044_v26 }
 0x742   : > { %v8160_v4 = vmax.f32 %v8128_v11, 0.0  ;;  %v8129_v7 = vadd.f32 %v18976_v46, %v8015_v15  ;;  %v8281_v19 = vld [vmem:[#allocation2 + $0xc1] sm:$0xff] }
 0x743   : > { %8194 = vst.msk [vmem:[#allocation2 + $0xf1] sm:$0xff] %vm224_vm0, %v8162_v57  ;;  %v8163_v38 = vmax.f32 %v8131_v32, 0.0  ;;  %v8279_v62 = vld [vmem:[#allocation2 + $0xa9] sm:$0xff] }
 0x744   : > { %8192 = vst.msk [vmem:[#allocation2 + $0xd9] sm:$0xff] %vm224_vm0, %v8160_v4  ;;  %v8161_v30 = vmax.f32 %v8129_v7, 0.0  ;;  %v8282_v6 = vld [vmem:[#allocation2 + $0xc9] sm:$0xff] }
 0x745   : > { %8195 = vst.msk [vmem:[#allocation2 + $0xf9] sm:$0xff] %vm224_vm0, %v8163_v38  ;;  %v8280_v22 = vld [vmem:[#allocation2 + $0xb1] sm:$0xff]  ;;  %v19060_v9 = vpack.c.bf16 %v8282_v6, %v8281_v19  ;;  %v8209_v19 = vld [vmem:[#allocation2 + $0x8] sm:$0xff] }
 0x746   : > { %8193 = vst.msk [vmem:[#allocation2 + $0xe1] sm:$0xff] %vm224_vm0, %v8161_v30  ;;  %v14708_v58 = vpop.f32.mrb[32].mxu1  ;;  %v19057_v55 = vpack.c.bf16 %v8280_v22, %v8279_v62 }
 0x747   : > { %v8134_v29 = vadd.f32 %v14708_v58, %v18976_v46  ;;  %v8028_v35 = vpop.f32.mrb[33].mxu1 }
 0x748   : > { %v8132_v10 = vadd.f32 %v18976_v46, %v8028_v35  ;;  %v14709_v8 = vpop.f32.mrb[34].mxu1  ;;  %14739 = vmatmul.mubr.msk.bf16.gmra.mrb[44].mxu0 %vm224_vm0, %v19057_v55 }
 0x749   : > { %v8166_v37 = vmax.f32 %v8134_v29, 0.0  ;;  %v8135_v53 = vadd.f32 %v14709_v8, %v18976_v46  ;;  %v8031_v1 = vpop.f32.mrb[35].mxu1  ;;  %14742 = vmatprep.mubr.msk.bf16.mxu0 %vm224_vm0, %v19060_v9 }
 0x74a   : > { %v8164_v41 = vmax.f32 %v8132_v10, 0.0  ;;  %v8133_v49 = vadd.f32 %v18976_v46, %v8031_v1  ;;  %v8285_v21 = vld [vmem:[#allocation2 + $0xf1] sm:$0xff] }
 0x74b   : > { %8198 = vst.msk [vmem:[#allocation2 + $0x121] sm:$0xff] %vm224_vm0, %v8166_v37  ;;  %v8167_v3 = vmax.f32 %v8135_v53, 0.0  ;;  %v8283_v28 = vld [vmem:[#allocation2 + $0xd9] sm:$0xff] }
 0x74c   : > { %8196 = vst.msk [vmem:[#allocation2 + $0x109] sm:$0xff] %vm224_vm0, %v8164_v41  ;;  %v8165_v47 = vmax.f32 %v8133_v49, 0.0  ;;  %v8286_v48 = vld [vmem:[#allocation2 + $0xf9] sm:$0xff]  ;;  %v8212_v49 = vld [vmem:[#allocation2 + $0x30] sm:$0xff] }
 0x74d   : > { %8199 = vst.msk [vmem:[#allocation2 + $0x129] sm:$0xff] %vm224_vm0, %v8167_v3  ;;  %v8284_v52 = vld [vmem:[#allocation2 + $0xe1] sm:$0xff]  ;;  %v19076_v56 = vpack.c.bf16 %v8286_v48, %v8285_v21  ;;  %v8213_v53 = vld [vmem:[#allocation2 + $0x38] sm:$0xff]  ;;  %v16054_v48 = vld [vmem:[%s19977_s2 + $0x290] sm:$0xff]  }
 0x74e   : > { %8197 = vst.msk [vmem:[#allocation2 + $0x111] sm:$0xff] %vm224_vm0, %v8165_v47  ;;  %v14712_v33 = vpop.f32.mrb[36].mxu1  ;;  %v19073_v2 = vpack.c.bf16 %v8284_v52, %v8283_v28  ;;  %v8211_v37 = vld [vmem:[#allocation2 + $0x20] sm:$0xff]  ;;  %v8210_v1 = vld [vmem:[#allocation2 + $0x18] sm:$0xff]  ;;  %v16053_v3 = vld [vmem:[%s19977_s2 + $0x288] sm:$0xff]   ;;  %v19123_v47 = vpack.c.bf16 %v8213_v53, %v8212_v49 }
 0x74f   : > { %v8138_v13 = vadd.f32 %v14712_v33, %v18976_v46  ;;  %v8044_v54 = vpop.f32.mrb[37].mxu1  ;;  %v19118_v41 = vpack.c.bf16 %v8211_v37, %v8210_v1  ;;  %v8215_v28 = vld [vmem:[#allocation2 + $0x50] sm:$0xff]  ;;  %v8217_v52 = vld [vmem:[#allocation2 + $0x68] sm:$0xff]  ;;  %v8790_v49 = vld [vmem:[#allocation2 + $0x1a] sm:$0xff] }
 0x750   : > { %v8136_v36 = vadd.f32 %v18976_v46, %v8044_v54  ;;  %v14713_v42 = vpop.f32.mrb[38].mxu1  ;;  %14743 = vmatmul.mubr.msk.bf16.gmra.mrb[48].mxu0 %vm224_vm0, %v19073_v2  ;;  %v8214_v33 = vld [vmem:[#allocation2 + $0x48] sm:$0xff] }
 0x751   : > { %v8170_v5 = vmax.f32 %v8138_v13, 0.0  ;;  %v8139_v44 = vadd.f32 %v14713_v42, %v18976_v46  ;;  %v8047_v39 = vpop.f32.mrb[39].mxu1  ;;  %14746 = vmatprep.mubr.msk.bf16.mxu0 %vm224_vm0, %v19076_v56  ;;  %v19133_v21 = vpack.c.bf16 %v8215_v28, %v8214_v33  ;;  %v8216_v13 = vld [vmem:[#allocation2 + $0x60] sm:$0xff]  ;;  %v16057_v33 = vld [vmem:[%s19977_s2 + $0x2a8] sm:$0xff]  }
 0x752   : > { %v8168_v12 = vmax.f32 %v8136_v36, 0.0  ;;  %v8137_v25 = vadd.f32 %v18976_v46, %v8047_v39  ;;  %v8289_v43 = vld [vmem:[#allocation2 + $0x121] sm:$0xff]  ;;  %v19138_v54 = vpack.c.bf16 %v8217_v52, %v8216_v13 }
 0x753   : > { %8202 = vst.msk [vmem:[#allocation2 + $0x151] sm:$0xff] %vm224_vm0, %v8170_v5  ;;  %v8171_v34 = vmax.f32 %v8139_v44, 0.0  ;;  %v8287_v27 = vld [vmem:[#allocation2 + $0x109] sm:$0xff]  ;;  %v16056_v36 = vld [vmem:[%s19977_s2 + $0x2a0] sm:$0xff]   ;;  %v8221_v5 = vld [vmem:[#allocation2 + $0x98] sm:$0xff] }
 0x754   : > { %8200 = vst.msk [vmem:[#allocation2 + $0x139] sm:$0xff] %vm224_vm0, %v8168_v12  ;;  %v8169_v60 = vmax.f32 %v8137_v25, 0.0  ;;  %v8290_v59 = vld [vmem:[#allocation2 + $0x129] sm:$0xff]  ;;  %v8219_v42 = vld [vmem:[#allocation2 + $0x80] sm:$0xff]  ;;  %v8218_v44 = vld [vmem:[#allocation2 + $0x78] sm:$0xff] }
 0x755   : > { %8203 = vst.msk [vmem:[#allocation2 + $0x159] sm:$0xff] %vm224_vm0, %v8171_v34  ;;  %v8288_v0 = vld [vmem:[#allocation2 + $0x111] sm:$0xff]  ;;  %v19092_v24 = vpack.c.bf16 %v8290_v59, %v8289_v43  ;;  %v19147_v39 = vpack.c.bf16 %v8219_v42, %v8218_v44  ;;  %v8222_v59 = vld [vmem:[#allocation2 + $0xa8] sm:$0xff]  ;;  %v8227_v43 = vld [vmem:[#allocation2 + $0xe0] sm:$0xff] }
 0x756   : > { %8201 = vst.msk [vmem:[#allocation2 + $0x141] sm:$0xff] %vm224_vm0, %v8169_v60  ;;  %v14716_v18 = vpop.f32.mrb[40].mxu1  ;;  %v19089_v23 = vpack.c.bf16 %v8288_v0, %v8287_v27  ;;  %v8220_v12 = vld [vmem:[#allocation2 + $0x90] sm:$0xff]  ;;  %v8225_v60 = vld [vmem:[#allocation2 + $0xc8] sm:$0xff]  ;;  %v8224_v0 = vld [vmem:[#allocation2 + $0xc0] sm:$0xff] }
 0x757   : > { %v8142_v45 = vadd.f32 %v14716_v18, %v18976_v46  ;;  %v8060_v51 = vpop.f32.mrb[41].mxu1  ;;  %v19149_v25 = vpack.c.bf16 %v8221_v5, %v8220_v12  ;;  %v8223_v34 = vld [vmem:[#allocation2 + $0xb0] sm:$0xff]  ;;  %v19157_v18 = vpack.c.bf16 %v8225_v60, %v8224_v0  ;;  %v8793_v28 = vld [vmem:[#allocation2 + $0x3a] sm:$0xff]  ;;  %v8796_v44 = vld [vmem:[#allocation2 + $0x62] sm:$0xff] }
 0x758   : > { %v8140_v14 = vadd.f32 %v18976_v46, %v8060_v51  ;;  %v14717_v20 = vpop.f32.mrb[42].mxu1  ;;  %14747 = vmatmul.mubr.msk.bf16.gmra.mrb[52].mxu0 %vm224_vm0, %v19089_v23  ;;  %v19155_v27 = vpack.c.bf16 %v8223_v34, %v8222_v59  ;;  %v8226_v51 = vld [vmem:[#allocation2 + $0xd8] sm:$0xff]  ;;  %v8794_v42 = vld [vmem:[#allocation2 + $0x4a] sm:$0xff]  ;;  %v16060_v59 = vld [vmem:[%s19977_s2 + $0x2c0] sm:$0xff]  }
 0x759   : > { %v8174_v11 = vmax.f32 %v8142_v45, 0.0  ;;  %v8143_v17 = vadd.f32 %v14717_v20, %v18976_v46  ;;  %v8063_v57 = vpop.f32.mrb[43].mxu1  ;;  %14750 = vmatprep.mubr.msk.bf16.mxu0 %vm224_vm0, %v19092_v24  ;;  %v8229_v45 = vld [vmem:[#allocation2 + $0xf8] sm:$0xff]  ;;  %v8228_v20 = vld [vmem:[#allocation2 + $0xf0] sm:$0xff] }
 0x75a   : > { %v8172_v32 = vmax.f32 %v8140_v14, 0.0  ;;  %v8141_v15 = vadd.f32 %v18976_v46, %v8063_v57  ;;  %v8293_v22 = vld [vmem:[#allocation2 + $0x151] sm:$0xff]  ;;  %v8208_v46 = vld [vmem:[#allocation2] sm:$0xff]  ;;  %v19163_v14 = vpack.c.bf16 %v8227_v43, %v8226_v51  ;;  %v8233_v57 = vld [vmem:[#allocation2 + $0x128] sm:$0xff] }
 0x75b   : > { %8206 = vst.msk [vmem:[#allocation2 + $0x181] sm:$0xff] %vm224_vm0, %v8174_v11  ;;  %v8175_v4 = vmax.f32 %v8143_v17, 0.0  ;;  %v8291_v30 = vld [vmem:[#allocation2 + $0x139] sm:$0xff]  ;;  %v8240_v10 = vpack.c.bf16 %v8209_v19, %v8208_v46  ;;  %v19165_v11 = vpack.c.bf16 %v8229_v45, %v8228_v20  ;;  %v8231_v17 = vld [vmem:[#allocation2 + $0x110] sm:$0xff]  ;;  %v8799_v43 = vld [vmem:[#allocation2 + $0x82] sm:$0xff] }
 0x75c   : > { %8204 = vst.msk [vmem:[#allocation2 + $0x169] sm:$0xff] %vm224_vm0, %v8172_v32  ;;  %v8173_v7 = vmax.f32 %v8141_v15, 0.0  ;;  %v8294_v38 = vld [vmem:[#allocation2 + $0x159] sm:$0xff]  ;;  %v8230_v32 = vld [vmem:[#allocation2 + $0x108] sm:$0xff]  ;;  %v8236_v46 = vld [vmem:[#allocation2 + $0x150] sm:$0xff] }
 0x75d   : > { %8207 = vst.msk [vmem:[#allocation2 + $0x189] sm:$0xff] %vm224_vm0, %v8175_v4  ;;  %v8292_v6 = vld [vmem:[#allocation2 + $0x141] sm:$0xff]  ;;  %v19107_v58 = vpack.c.bf16 %v8294_v38, %v8293_v22  ;;  %v19171_v15 = vpack.c.bf16 %v8231_v17, %v8230_v32  ;;  %v8795_v5 = vld [vmem:[#allocation2 + $0x52] sm:$0xff]  ;;  %v8797_v12 = vld [vmem:[#allocation2 + $0x6a] sm:$0xff] }
 0x75e   : > { %8205 = vst.msk [vmem:[#allocation2 + $0x171] sm:$0xff] %vm224_vm0, %v8173_v7  ;;  %v19105_v62 = vpack.c.bf16 %v8292_v6, %v8291_v30  ;;  %v8232_v4 = vld [vmem:[#allocation2 + $0x120] sm:$0xff]  ;;  %v8237_v30 = vld [vmem:[#allocation2 + $0x158] sm:$0xff]  ;;  %v19206_v34 = vpack.c.bf16 %v8795_v5, %v8794_v42  ;;  %v19211_v60 = vpack.c.bf16 %v8797_v12, %v8796_v44 }
 0x75f   : > { %v19173_v7 = vpack.c.bf16 %v8233_v57, %v8232_v4  ;;  %v8235_v38 = vld [vmem:[#allocation2 + $0x140] sm:$0xff]  ;;  %v8234_v6 = vld [vmem:[#allocation2 + $0x138] sm:$0xff]  ;;  %v19181_v19 = vpack.c.bf16 %v8237_v30, %v8236_v46  ;;  %v8802_v57 = vld [vmem:[#allocation2 + $0xaa] sm:$0xff] }
 0x760   : > { %14751 = vmatmul.mubr.msk.bf16.gmra.mrb[56].mxu0 %vm224_vm0, %v19105_v62  ;;  %v19179_v22 = vpack.c.bf16 %v8235_v38, %v8234_v6  ;;  %v8798_v0 = vld [vmem:[#allocation2 + $0x7a] sm:$0xff]  ;;  %v8800_v45 = vld [vmem:[#allocation2 + $0x92] sm:$0xff]  ;;  %v8804_v4 = vld [vmem:[#allocation2 + $0xc2] sm:$0xff] }
 0x761   : > { %14754 = vmatprep.mubr.msk.bf16.mxu0 %vm224_vm0, %v19107_v58  ;;  %v8801_v51 = vld [vmem:[#allocation2 + $0x9a] sm:$0xff]  ;;  %v19220_v20 = vpack.c.bf16 %v8799_v43, %v8798_v0  ;;  %v8803_v32 = vld [vmem:[#allocation2 + $0xb2] sm:$0xff]  ;;  %v8805_v38 = vld [vmem:[#allocation2 + $0xca] sm:$0xff] }
 0x762   : > { %v19222_v17 = vpack.c.bf16 %v8801_v51, %v8800_v45  ;;  %v19228_v30 = vpack.c.bf16 %v8803_v32, %v8802_v57  ;;  %v19230_v6 = vpack.c.bf16 %v8805_v38, %v8804_v4  ;;  %v8806_v46 = vld [vmem:[#allocation2 + $0xda] sm:$0xff]  ;;  %v8815_v5 = vld [vmem:[#allocation2 + $0x142] sm:$0xff]  ;;  %v8816_v44 = vld [vmem:[#allocation2 + $0x152] sm:$0xff] }
 0x763   : > { %v8295_v29 = vld [vmem:[#allocation2 + $0x169] sm:$0xff]  ;;  %v8814_v42 = vld [vmem:[#allocation2 + $0x13a] sm:$0xff] }
 0x764   : > { %v8238_v37 = vld [vmem:[#allocation2 + $0x168] sm:$0xff]  ;;  %v8817_v12 = vld [vmem:[#allocation2 + $0x15a] sm:$0xff]  ;;  %v16062_v32 = vld [vmem:[%s19977_s2 + $0x2d0] sm:$0xff]  }
 0x765   : > { %v8296_v35 = vld [vmem:[#allocation2 + $0x171] sm:$0xff]  ;;  %v19254_v0 = vpack.c.bf16 %v8817_v12, %v8816_v44  ;;  %v16061_v57 = vld [vmem:[%s19977_s2 + $0x2c8] sm:$0xff]   ;;  %v9140_v38 = vld [vmem:[#allocation2 + $0x180] sm:$0xff] }
 0x766   : > { %v19113_v8 = vpack.c.bf16 %v8296_v35, %v8295_v29  ;;  %v8788_v29 = vld [vmem:[#allocation2 + $0x2] sm:$0xff]  ;;  %v8789_v35 = vld [vmem:[#allocation2 + $0xa] sm:$0xff]  ;;  %v8819_v45 = vld [vmem:[#allocation2 + $0x172] sm:$0xff] }
 0x767   : > { %v8820_v53 = vpack.c.bf16 %v8789_v35, %v8788_v29  ;;  %v8807_v29 = vld [vmem:[#allocation2 + $0xe2] sm:$0xff]  ;;  %v8808_v35 = vld [vmem:[#allocation2 + $0xf2] sm:$0xff]  ;;  %v8818_v43 = vld [vmem:[#allocation2 + $0x16a] sm:$0xff] }
 0x768   : > { %14755 = vmatmul.mubr.msk.bf16.gmra.mrb[60].mxu0 %vm224_vm0, %v19113_v8  ;;  %v19260_v51 = vpack.c.bf16 %v8819_v45, %v8818_v43  ;;  %v9141_v4 = vld [vmem:[#allocation2 + $0x188] sm:$0xff]  ;;  %v10409_v44 = vld [vmem:[#allocation2 + $0xb1] sm:$0xff] }
 0x769   : > { %14766 = vmatprep.mubr.msk.bf16.mxu0 %vm224_vm0, %v8240_v10  ;;  %v8239_v10 = vld [vmem:[#allocation2 + $0x170] sm:$0xff] }
 0x76a   : > { %v19187_v1 = vpack.c.bf16 %v8239_v10, %v8238_v37  ;;  %v8809_v10 = vld [vmem:[#allocation2 + $0xfa] sm:$0xff]  ;;  %v19236_v37 = vpack.c.bf16 %v8807_v29, %v8806_v46  ;;  %v19306_v46 = vpack.c.bf16 %v9141_v4, %v9140_v38  ;;  %v16065_v29 = vld [vmem:[%s19977_s2 + $0x2e8] sm:$0xff]  }
 0x76b   : > { %v10411_v12 = vld [vmem:[#allocation2 + $0xc9] sm:$0xff]  ;;  %v10412_v4 = vld [vmem:[#allocation2 + $0xd9] sm:$0xff] }
 0x76c   : > { %v10408_v43 = vld [vmem:[#allocation2 + $0xa9] sm:$0xff] }
 0x76d   : > { %v10435_v45 = vpack.c.bf16 %v10409_v44, %v10408_v43 }
 0x770   : > { %14767 = vmatmul.mubr.msk.bf16.vlgmr.msra.gmra.mrb[32].mxu0 %vm224_vm0, %v19118_v41 }
 0x771   : > { %14799 = vmatpush3.bf16.msra.mxu0 %v19034_v40  ;;  %14770 = vmatprep.mubr.msk.bf16.mxu0 %vm224_vm0, %v19123_v47  ;;  %v16055_v40 = vld [vmem:[%s19977_s2 + $0x298] sm:$0xff]  }
 0x772   : > { %14800 = vmatprep.subr.bf16.mxu0 %v16053_v3 }
 0x775   : > { %14801 = vmatpush3.bf16.msra.mxu0 %v16053_v3  ;;  %v8791_v3 = vld [vmem:[#allocation2 + $0x22] sm:$0xff] }
 0x776   : > { %14802 = vmatprep.subr.bf16.mxu0 %v16054_v48  ;;  %v19192_v52 = vpack.c.bf16 %v8791_v3, %v8790_v49  ;;  %v8810_v49 = vld [vmem:[#allocation2 + $0x10a] sm:$0xff]  ;;  %v8811_v3 = vld [vmem:[#allocation2 + $0x112] sm:$0xff] }
 0x778   : > { %14771 = vmatmul.mubr.msk.bf16.gmra.mrb[36].mxu0 %vm224_vm0, %v19133_v21 }
 0x779   : > { %14774 = vmatprep.mubr.msk.bf16.mxu0 %vm224_vm0, %v19138_v54  ;;  %14803 = vmatpush3.bf16.msra.mxu0 %v16054_v48  ;;  %v8792_v48 = vld [vmem:[#allocation2 + $0x32] sm:$0xff] }
 0x77a   : > { %14804 = vmatprep.subr.bf16.mxu0 %v16055_v40  ;;  %v19197_v13 = vpack.c.bf16 %v8793_v28, %v8792_v48  ;;  %v8812_v48 = vld [vmem:[#allocation2 + $0x122] sm:$0xff]  ;;  %v8813_v28 = vld [vmem:[#allocation2 + $0x12a] sm:$0xff] }
 0x77d   : > { %14805 = vmatpush3.bf16.msra.mxu0 %v16055_v40  ;;  %v16058_v40 = vld [vmem:[%s19977_s2 + $0x2b0] sm:$0xff]  }
 0x77e   : > { %14838 = vmatprep.subr.bf16.mxu0 %v16056_v36 }
 0x780   : > { %14775 = vmatmul.mubr.msk.bf16.gmra.mrb[40].mxu0 %vm224_vm0, %v19147_v39 }
 0x781   : > { %14778 = vmatprep.mubr.msk.bf16.mxu0 %vm224_vm0, %v19149_v25 }
 0x788   : > { %14779 = vmatmul.mubr.msk.bf16.gmra.mrb[44].mxu0 %vm224_vm0, %v19155_v27 }
 0x789   : > { %14782 = vmatprep.mubr.msk.bf16.mxu0 %vm224_vm0, %v19157_v18 }
 0x790   : > { %14783 = vmatmul.mubr.msk.bf16.gmra.mrb[48].mxu0 %vm224_vm0, %v19163_v14 }
 0x791   : > { %14786 = vmatprep.mubr.msk.bf16.mxu0 %vm224_vm0, %v19165_v11 }
 0x798   : > { %14787 = vmatmul.mubr.msk.bf16.gmra.mrb[52].mxu0 %vm224_vm0, %v19171_v15 }
 0x799   : > { %14790 = vmatprep.mubr.msk.bf16.mxu0 %vm224_vm0, %v19173_v7 }
 0x7a0   : > { %14791 = vmatmul.mubr.msk.bf16.gmra.mrb[56].mxu0 %vm224_vm0, %v19179_v22 }
 0x7a1   : > { %14794 = vmatprep.mubr.msk.bf16.mxu0 %vm224_vm0, %v19181_v19 }
 0x7a8   : > { %14795 = vmatmul.mubr.msk.bf16.gmra.mrb[60].mxu0 %vm224_vm0, %v19187_v1 }
 0x7a9   : > { %14806 = vmatprep.mubr.msk.bf16.mxu0 %vm224_vm0, %v8820_v53  ;;  %v19238_v53 = vpack.c.bf16 %v8809_v10, %v8808_v35  ;;  %v16066_v35 = vld [vmem:[%s19977_s2 + $0x2f0] sm:$0xff]   ;;  %v10405_v10 = vld [vmem:[#allocation2 + $0x81] sm:$0xff] }
 0x7b0   : > { %14807 = vmatmul.mubr.msk.bf16.vlgmr.msra.gmra.mrb[32].mxu0 %vm224_vm0, %v19192_v52 }
 0x7b1   : > { %14839 = vmatpush3.bf16.msra.mxu0 %v16056_v36  ;;  %14810 = vmatprep.mubr.msk.bf16.mxu0 %vm224_vm0, %v19197_v13  ;;  %v16059_v36 = vld [vmem:[%s19977_s2 + $0x2b8] sm:$0xff]  }
 0x7b2   : > { %14840 = vmatprep.subr.bf16.mxu0 %v16057_v33 }
 0x7b5   : > { %14841 = vmatpush3.bf16.msra.mxu0 %v16057_v33  ;;  %v19244_v33 = vpack.c.bf16 %v8811_v3, %v8810_v49  ;;  %v10407_v49 = vld [vmem:[#allocation2 + $0x99] sm:$0xff] }
 0x7b6   : > { %14842 = vmatprep.subr.bf16.mxu0 %v16058_v40  ;;  %v10404_v3 = vld [vmem:[#allocation2 + $0x79] sm:$0xff] }
 0x7b8   : > { %14811 = vmatmul.mubr.msk.bf16.gmra.mrb[36].mxu0 %vm224_vm0, %v19206_v34 }
 0x7b9   : > { %14814 = vmatprep.mubr.msk.bf16.mxu0 %vm224_vm0, %v19211_v60  ;;  %14843 = vmatpush3.bf16.msra.mxu0 %v16058_v40  ;;  %v19246_v40 = vpack.c.bf16 %v8813_v28, %v8812_v48  ;;  %v10433_v48 = vpack.c.bf16 %v10405_v10, %v10404_v3  ;;  %v10406_v28 = vld [vmem:[#allocation2 + $0x91] sm:$0xff] }
 0x7ba   : > { %14844 = vmatprep.subr.bf16.mxu0 %v16059_v36 }
 0x7bd   : > { %14845 = vmatpush3.bf16.msra.mxu0 %v16059_v36  ;;  %v19252_v36 = vpack.c.bf16 %v8815_v5, %v8814_v42  ;;  %v16079_v42 = vld [vmem:[%s19977_s2 + $0x358] sm:$0xff]   ;;  %v10434_v5 = vpack.c.bf16 %v10407_v49, %v10406_v28 }
 0x7be   : > { %14878 = vmatprep.subr.bf16.mxu0 %v16060_v59 }
 0x7c0   : > { %14815 = vmatmul.mubr.msk.bf16.gmra.mrb[40].mxu0 %vm224_vm0, %v19220_v20 }
 0x7c1   : > { %14818 = vmatprep.mubr.msk.bf16.mxu0 %vm224_vm0, %v19222_v17 }
 0x7c8   : > { %14819 = vmatmul.mubr.msk.bf16.gmra.mrb[44].mxu0 %vm224_vm0, %v19228_v30 }
 0x7c9   : > { %14822 = vmatprep.mubr.msk.bf16.mxu0 %vm224_vm0, %v19230_v6 }
 0x7d0   : > { %14823 = vmatmul.mubr.msk.bf16.gmra.mrb[48].mxu0 %vm224_vm0, %v19236_v37 }
 0x7d1   : > { %14826 = vmatprep.mubr.msk.bf16.mxu0 %vm224_vm0, %v19238_v53 }
 0x7d8   : > { %14827 = vmatmul.mubr.msk.bf16.gmra.mrb[52].mxu0 %vm224_vm0, %v19244_v33 }
 0x7d9   : > { %14830 = vmatprep.mubr.msk.bf16.mxu0 %vm224_vm0, %v19246_v40 }
 0x7e0   : > { %14831 = vmatmul.mubr.msk.bf16.gmra.mrb[56].mxu0 %vm224_vm0, %v19252_v36 }
 0x7e1   : > { %14834 = vmatprep.mubr.msk.bf16.mxu0 %vm224_vm0, %v19254_v0 }
 0x7e8   : > { %14835 = vmatmul.mubr.msk.bf16.gmra.mrb[60].mxu0 %vm224_vm0, %v19260_v51 }
 0x7e9   : > { %14846 = vmatprep.mubr.msk.bf16.mxu0 %vm224_vm0, %v19118_v41  ;;  %v16063_v41 = vld [vmem:[%s19977_s2 + $0x2d8] sm:$0xff]  }
 0x7f0   : > { %14847 = vmatmul.mubr.msk.bf16.vlgmr.msra.gmra.mrb[32].mxu0 %vm224_vm0, %v19123_v47 }
 0x7f1   : > { %14879 = vmatpush3.bf16.msra.mxu0 %v16060_v59  ;;  %14850 = vmatprep.mubr.msk.bf16.mxu0 %vm224_vm0, %v19133_v21  ;;  %v16064_v59 = vld [vmem:[%s19977_s2 + $0x2e0] sm:$0xff]  }
 0x7f2   : > { %14880 = vmatprep.subr.bf16.mxu0 %v16061_v57 }
 0x7f5   : > { %14881 = vmatpush3.bf16.msra.mxu0 %v16061_v57  ;;  %v10410_v57 = vld [vmem:[#allocation2 + $0xc1] sm:$0xff] }
 0x7f6   : > { %14882 = vmatprep.subr.bf16.mxu0 %v16062_v32 }
 0x7f8   : > { %14851 = vmatmul.mubr.msk.bf16.gmra.mrb[36].mxu0 %vm224_vm0, %v19138_v54 }
 0x7f9   : > { %14854 = vmatprep.mubr.msk.bf16.mxu0 %vm224_vm0, %v19147_v39  ;;  %14883 = vmatpush3.bf16.msra.mxu0 %v16062_v32  ;;  %v10436_v32 = vpack.c.bf16 %v10411_v12, %v10410_v57 }
 0x7fa   : > { %14884 = vmatprep.subr.bf16.mxu0 %v16063_v41 }
 0x7fd   : > { %14885 = vmatpush3.bf16.msra.mxu0 %v16063_v41  ;;  %v10413_v41 = vld [vmem:[#allocation2 + $0xe1] sm:$0xff] }
 0x7fe   : > { %14918 = vmatprep.subr.bf16.mxu0 %v16064_v59  ;;  %v10437_v38 = vpack.c.bf16 %v10413_v41, %v10412_v4 }
 0x800   : > { %14855 = vmatmul.mubr.msk.bf16.gmra.mrb[40].mxu0 %vm224_vm0, %v19149_v25 }
 0x801   : > { %14858 = vmatprep.mubr.msk.bf16.mxu0 %vm224_vm0, %v19155_v27 }
 0x808   : > { %14859 = vmatmul.mubr.msk.bf16.gmra.mrb[44].mxu0 %vm224_vm0, %v19157_v18 }
 0x809   : > { %14862 = vmatprep.mubr.msk.bf16.mxu0 %vm224_vm0, %v19163_v14 }
 0x810   : > { %14863 = vmatmul.mubr.msk.bf16.gmra.mrb[48].mxu0 %vm224_vm0, %v19165_v11 }
 0x811   : > { %14866 = vmatprep.mubr.msk.bf16.mxu0 %vm224_vm0, %v19171_v15 }
 0x818   : > { %14867 = vmatmul.mubr.msk.bf16.gmra.mrb[52].mxu0 %vm224_vm0, %v19173_v7 }
 0x819   : > { %14870 = vmatprep.mubr.msk.bf16.mxu0 %vm224_vm0, %v19179_v22 }
 0x820   : > { %14871 = vmatmul.mubr.msk.bf16.gmra.mrb[56].mxu0 %vm224_vm0, %v19181_v19 }
 0x821   : > { %14874 = vmatprep.mubr.msk.bf16.mxu0 %vm224_vm0, %v19187_v1 }
 0x828   : > { %14875 = vmatmul.mubr.msk.bf16.gmra.mrb[60].mxu0 %vm224_vm0, %v19306_v46 }
 0x829   : > { %14886 = vmatprep.mubr.msk.bf16.mxu0 %vm224_vm0, %v18994_v50  ;;  %v16067_v50 = vld [vmem:[%s19977_s2 + $0x2f8] sm:$0xff]  }
 0x830   : > { %14887 = vmatmul.mubr.msk.bf16.vlgmr.msra.gmra.mrb[32].mxu0 %vm224_vm0, %v19000_v31  ;;  %v16068_v31 = vld [vmem:[%s19977_s2 + $0x300] sm:$0xff]  }
 0x831   : > { %14919 = vmatpush3.bf16.msra.mxu0 %v16064_v59  ;;  %14890 = vmatprep.mubr.msk.bf16.mxu0 %vm224_vm0, %v19016_v16  ;;  %v9463_v16 = vld [vmem:[#allocation2 + $0x189] sm:$0xff]  ;;  %v10415_v59 = vld [vmem:[#allocation2 + $0xf9] sm:$0xff] }
 0x832   : > { %14920 = vmatprep.subr.bf16.mxu0 %v16065_v29 }
 0x835   : > { %14921 = vmatpush3.bf16.msra.mxu0 %v16065_v29 }
 0x836   : > { %14922 = vmatprep.subr.bf16.mxu0 %v16066_v35 }
 0x838   : > { %14891 = vmatmul.mubr.msk.bf16.gmra.mrb[36].mxu0 %vm224_vm0, %v19022_v61  ;;  %v9462_v61 = vld [vmem:[#allocation2 + $0x181] sm:$0xff] }
 0x839   : > { %14894 = vmatprep.mubr.msk.bf16.mxu0 %vm224_vm0, %v19040_v63  ;;  %14923 = vmatpush3.bf16.msra.mxu0 %v16066_v35  ;;  %v19352_v63 = vpack.c.bf16 %v9463_v16, %v9462_v61  ;;  %v10417_v35 = vld [vmem:[#allocation2 + $0x111] sm:$0xff]  ;;  %v10418_v61 = vld [vmem:[#allocation2 + $0x121] sm:$0xff] }
 0x83a   : > { %14924 = vmatprep.subr.bf16.mxu0 %v16067_v50 }
 0x83d   : > { %14925 = vmatpush3.bf16.msra.mxu0 %v16067_v50  ;;  %v10419_v50 = vld [vmem:[#allocation2 + $0x129] sm:$0xff] }
 0x83e   : > { %14958 = vmatprep.subr.bf16.mxu0 %v16068_v31 }
 0x840   : > { %14895 = vmatmul.mubr.msk.bf16.gmra.mrb[40].mxu0 %vm224_vm0, %v19044_v26  ;;  %v16069_v26 = vld [vmem:[%s19977_s2 + $0x308] sm:$0xff]  }
 0x841   : > { %14898 = vmatprep.mubr.msk.bf16.mxu0 %vm224_vm0, %v19057_v55  ;;  %v16070_v55 = vld [vmem:[%s19977_s2 + $0x310] sm:$0xff]  }
 0x848   : > { %14899 = vmatmul.mubr.msk.bf16.gmra.mrb[44].mxu0 %vm224_vm0, %v19060_v9  ;;  %v16071_v9 = vld [vmem:[%s19977_s2 + $0x318] sm:$0xff]  }
 0x849   : > { %14902 = vmatprep.mubr.msk.bf16.mxu0 %vm224_vm0, %v19073_v2  ;;  %v16072_v2 = vld [vmem:[%s19977_s2 + $0x320] sm:$0xff]  }
 0x850   : > { %14903 = vmatmul.mubr.msk.bf16.gmra.mrb[48].mxu0 %vm224_vm0, %v19076_v56  ;;  %v9784_v56 = vld [vmem:[#allocation2 + $0x182] sm:$0xff] }
 0x851   : > { %14906 = vmatprep.mubr.msk.bf16.mxu0 %vm224_vm0, %v19089_v23  ;;  %v9785_v23 = vld [vmem:[#allocation2 + $0x18a] sm:$0xff] }
 0x858   : > { %14907 = vmatmul.mubr.msk.bf16.gmra.mrb[52].mxu0 %vm224_vm0, %v19092_v24  ;;  %v19398_v24 = vpack.c.bf16 %v9785_v23, %v9784_v56  ;;  %v10422_v23 = vld [vmem:[#allocation2 + $0x151] sm:$0xff] }
 0x859   : > { %14910 = vmatprep.mubr.msk.bf16.mxu0 %vm224_vm0, %v19105_v62  ;;  %v16073_v62 = vld [vmem:[%s19977_s2 + $0x328] sm:$0xff]  }
 0x860   : > { %14911 = vmatmul.mubr.msk.bf16.gmra.mrb[56].mxu0 %vm224_vm0, %v19107_v58  ;;  %v16074_v58 = vld [vmem:[%s19977_s2 + $0x330] sm:$0xff]  }
 0x861   : > { %14914 = vmatprep.mubr.msk.bf16.mxu0 %vm224_vm0, %v19113_v8  ;;  %v16075_v8 = vld [vmem:[%s19977_s2 + $0x338] sm:$0xff]  }
 0x868   : > { %14915 = vmatmul.mubr.msk.bf16.gmra.mrb[60].mxu0 %vm224_vm0, %v19352_v63 }
 0x869   : > { %14926 = vmatprep.mubr.msk.bf16.mxu0 %vm224_vm0, %v19192_v52  ;;  %v16078_v52 = vld [vmem:[%s19977_s2 + $0x350] sm:$0xff]  }
 0x870   : > { %14927 = vmatmul.mubr.msk.bf16.vlgmr.msra.gmra.mrb[32].mxu0 %vm224_vm0, %v19197_v13 }
 0x871   : > { %14959 = vmatpush3.bf16.msra.mxu0 %v16068_v31  ;;  %14930 = vmatprep.mubr.msk.bf16.mxu0 %vm224_vm0, %v19206_v34  ;;  %v10416_v31 = vld [vmem:[#allocation2 + $0x109] sm:$0xff] }
 0x872   : > { %14960 = vmatprep.subr.bf16.mxu0 %v16069_v26  ;;  %v10439_v16 = vpack.c.bf16 %v10417_v35, %v10416_v31 }
 0x875   : > { %14961 = vmatpush3.bf16.msra.mxu0 %v16069_v26  ;;  %v10440_v26 = vpack.c.bf16 %v10419_v50, %v10418_v61 }
 0x876   : > { %14962 = vmatprep.subr.bf16.mxu0 %v16070_v55 }
 0x878   : > { %14931 = vmatmul.mubr.msk.bf16.gmra.mrb[36].mxu0 %vm224_vm0, %v19211_v60 }
 0x879   : > { %14934 = vmatprep.mubr.msk.bf16.mxu0 %vm224_vm0, %v19220_v20  ;;  %14963 = vmatpush3.bf16.msra.mxu0 %v16070_v55  ;;  %v10421_v55 = vld [vmem:[#allocation2 + $0x141] sm:$0xff] }
 0x87a   : > { %14964 = vmatprep.subr.bf16.mxu0 %v16071_v9 }
 0x87d   : > { %14965 = vmatpush3.bf16.msra.mxu0 %v16071_v9  ;;  %v10423_v9 = vld [vmem:[#allocation2 + $0x159] sm:$0xff] }
 0x87e   : > { %14998 = vmatprep.subr.bf16.mxu0 %v16072_v2 }
 0x880   : > { %14935 = vmatmul.mubr.msk.bf16.gmra.mrb[40].mxu0 %vm224_vm0, %v19222_v17 }
 0x881   : > { %14938 = vmatprep.mubr.msk.bf16.mxu0 %vm224_vm0, %v19228_v30 }
 0x888   : > { %14939 = vmatmul.mubr.msk.bf16.gmra.mrb[44].mxu0 %vm224_vm0, %v19230_v6 }
 0x889   : > { %14942 = vmatprep.mubr.msk.bf16.mxu0 %vm224_vm0, %v19236_v37 }
 0x890   : > { %14943 = vmatmul.mubr.msk.bf16.gmra.mrb[48].mxu0 %vm224_vm0, %v19238_v53 }
 0x891   : > { %14946 = vmatprep.mubr.msk.bf16.mxu0 %vm224_vm0, %v19244_v33 }
 0x898   : > { %14947 = vmatmul.mubr.msk.bf16.gmra.mrb[52].mxu0 %vm224_vm0, %v19246_v40 }
 0x899   : > { %14950 = vmatprep.mubr.msk.bf16.mxu0 %vm224_vm0, %v19252_v36 }
 0x8a0   : > { %14951 = vmatmul.mubr.msk.bf16.gmra.mrb[56].mxu0 %vm224_vm0, %v19254_v0 }
 0x8a1   : > { %14954 = vmatprep.mubr.msk.bf16.mxu0 %vm224_vm0, %v19260_v51 }
 0x8a8   : > { %14955 = vmatmul.mubr.msk.bf16.gmra.mrb[60].mxu0 %vm224_vm0, %v19398_v24 }
 0x8a9   : > { %14966 = vmatprep.mubr.msk.bf16.mxu0 %vm224_vm0, %v19123_v47  ;;  %v16076_v47 = vld [vmem:[%s19977_s2 + $0x340] sm:$0xff]  }
 0x8b0   : > { %14967 = vmatmul.mubr.msk.bf16.vlgmr.msra.gmra.mrb[32].mxu0 %vm224_vm0, %v19133_v21  ;;  %v10106_v21 = vld [vmem:[#allocation2 + $0x198] sm:$0xff] }
 0x8b1   : > { %14999 = vmatpush3.bf16.msra.mxu0 %v16072_v2  ;;  %14970 = vmatprep.mubr.msk.bf16.mxu0 %vm224_vm0, %v19138_v54  ;;  %v10107_v54 = vld [vmem:[#allocation2 + $0x1a0] sm:$0xff] }
 0x8b2   : > { %15000 = vmatprep.subr.bf16.mxu0 %v16073_v62  ;;  %v10420_v2 = vld [vmem:[#allocation2 + $0x139] sm:$0xff] }
 0x8b3   : > { %v10441_v56 = vpack.c.bf16 %v10421_v55, %v10420_v2  ;;  %v11194_v2 = vld [vmem:[#allocation2 + $0x1] sm:$0xff] }
 0x8b5   : > { %15001 = vmatpush3.bf16.msra.mxu0 %v16073_v62  ;;  %v10442_v62 = vpack.c.bf16 %v10423_v9, %v10422_v23 }
 0x8b6   : > { %15002 = vmatprep.subr.bf16.mxu0 %v16074_v58 }
 0x8b8   : > { %14971 = vmatmul.mubr.msk.bf16.gmra.mrb[36].mxu0 %vm224_vm0, %v19147_v39  ;;  %v10123_v39 = vpack.c.bf16 %v10107_v54, %v10106_v21  ;;  %v10428_v21 = vld [vmem:[#allocation2 + $0x199] sm:$0xff]  ;;  %v10429_v54 = vld [vmem:[#allocation2 + $0x1a1] sm:$0xff] }
 0x8b9   : > { %14974 = vmatprep.mubr.msk.bf16.mxu0 %vm224_vm0, %v19149_v25  ;;  %15003 = vmatpush3.bf16.msra.mxu0 %v16074_v58  ;;  %v10399_v25 = vld [vmem:[#allocation2 + $0x39] sm:$0xff]  ;;  %v10425_v58 = vld [vmem:[#allocation2 + $0x171] sm:$0xff] }
 0x8ba   : > { %15004 = vmatprep.subr.bf16.mxu0 %v16075_v8 }
 0x8bd   : > { %15005 = vmatpush3.bf16.msra.mxu0 %v16075_v8  ;;  %v10424_v8 = vld [vmem:[#allocation2 + $0x169] sm:$0xff] }
 0x8be   : > { %15038 = vmatprep.subr.bf16.mxu0 %v16076_v47 }
 0x8c0   : > { %14975 = vmatmul.mubr.msk.bf16.gmra.mrb[40].mxu0 %vm224_vm0, %v19155_v27  ;;  %v10398_v27 = vld [vmem:[#allocation2 + $0x31] sm:$0xff] }
 0x8c1   : > { %14978 = vmatprep.mubr.msk.bf16.mxu0 %vm224_vm0, %v19157_v18  ;;  %v10430_v18 = vpack.c.bf16 %v10399_v25, %v10398_v27 }
 0x8c8   : > { %14979 = vmatmul.mubr.msk.bf16.gmra.mrb[44].mxu0 %vm224_vm0, %v19163_v14  ;;  %v10401_v14 = vld [vmem:[#allocation2 + $0x51] sm:$0xff] }
 0x8c9   : > { %14982 = vmatprep.mubr.msk.bf16.mxu0 %vm224_vm0, %v19165_v11  ;;  %v10403_v11 = vld [vmem:[#allocation2 + $0x69] sm:$0xff] }
 0x8d0   : > { %14983 = vmatmul.mubr.msk.bf16.gmra.mrb[48].mxu0 %vm224_vm0, %v19171_v15  ;;  %v10400_v15 = vld [vmem:[#allocation2 + $0x49] sm:$0xff] }
 0x8d1   : > { %14986 = vmatprep.mubr.msk.bf16.mxu0 %vm224_vm0, %v19173_v7  ;;  %v10431_v7 = vpack.c.bf16 %v10401_v14, %v10400_v15 }
 0x8d8   : > { %14987 = vmatmul.mubr.msk.bf16.gmra.mrb[52].mxu0 %vm224_vm0, %v19179_v22  ;;  %v10402_v22 = vld [vmem:[#allocation2 + $0x61] sm:$0xff] }
 0x8d9   : > { %14990 = vmatprep.mubr.msk.bf16.mxu0 %vm224_vm0, %v19181_v19  ;;  %v16077_v19 = vld [vmem:[%s19977_s2 + $0x348] sm:$0xff]  }
 0x8e0   : > { %14991 = vmatmul.mubr.msk.bf16.gmra.mrb[56].mxu0 %vm224_vm0, %v19187_v1  ;;  %v10432_v1 = vpack.c.bf16 %v10403_v11, %v10402_v22 }
 0x8e1   : > { %14994 = vmatprep.mubr.msk.bf16.mxu0 %vm224_vm0, %v19306_v46  ;;  %v10414_v46 = vld [vmem:[#allocation2 + $0xf1] sm:$0xff] }
 0x8e2   : > { %v10438_v29 = vpack.c.bf16 %v10415_v59, %v10414_v46 }
 0x8e8   : > { %14995 = vmatmul.mubr.msk.bf16.gmra.mrb[60].mxu0 %vm224_vm0, %v10123_v39  ;;  %v10445_v39 = vpack.c.bf16 %v10429_v54, %v10428_v21 }
 0x8e9   : > { %15006 = vmatprep.mubr.msk.bf16.mxu0 %vm224_vm0, %v10430_v18 }
 0x8f0   : > { %15007 = vmatmul.mubr.msk.bf16.vlgmr.msra.gmra.mrb[32].mxu0 %vm224_vm0, %v10431_v7 }
 0x8f1   : > { %15039 = vmatpush3.bf16.msra.mxu0 %v16076_v47  ;;  %15010 = vmatprep.mubr.msk.bf16.mxu0 %vm224_vm0, %v10432_v1  ;;  %v10443_v47 = vpack.c.bf16 %v10425_v58, %v10424_v8 }
 0x8f2   : > { %15040 = vmatprep.subr.bf16.mxu0 %v16077_v19 }
 0x8f5   : > { %15041 = vmatpush3.bf16.msra.mxu0 %v16077_v19 }
 0x8f6   : > { %15042 = vmatprep.subr.bf16.mxu0 %v16078_v52 }
 0x8f8   : > { %15011 = vmatmul.mubr.msk.bf16.gmra.mrb[36].mxu0 %vm224_vm0, %v10433_v48 }
 0x8f9   : > { %15014 = vmatprep.mubr.msk.bf16.mxu0 %vm224_vm0, %v10434_v5  ;;  %15043 = vmatpush3.bf16.msra.mxu0 %v16078_v52 }
 0x8fa   : > { %15044 = vmatprep.subr.bf16.mxu0 %v16079_v42 }
 0x8fd   : > { %15045 = vmatpush3.bf16.msra.mxu0 %v16079_v42 }
 0x900   : > { %15015 = vmatmul.mubr.msk.bf16.gmra.mrb[40].mxu0 %vm224_vm0, %v10435_v45 }
 0x901   : > { %15018 = vmatprep.mubr.msk.bf16.mxu0 %vm224_vm0, %v10436_v32 }
 0x908   : > { %15019 = vmatmul.mubr.msk.bf16.gmra.mrb[44].mxu0 %vm224_vm0, %v10437_v38 }
 0x909   : > { %15022 = vmatprep.mubr.msk.bf16.mxu0 %vm224_vm0, %v10438_v29 }
 0x910   : > { %15023 = vmatmul.mubr.msk.bf16.gmra.mrb[48].mxu0 %vm224_vm0, %v10439_v16 }
 0x911   : > { %15026 = vmatprep.mubr.msk.bf16.mxu0 %vm224_vm0, %v10440_v26 }
 0x918   : > { %15027 = vmatmul.mubr.msk.bf16.gmra.mrb[52].mxu0 %vm224_vm0, %v10441_v56  ;;  %v11195_v56 = vld [vmem:[#allocation2 + $0x9] sm:$0xff] }
 0x919   : > { %15030 = vmatprep.mubr.msk.bf16.mxu0 %vm224_vm0, %v10442_v62 }
 0x920   : > { %15031 = vmatmul.mubr.msk.bf16.gmra.mrb[56].mxu0 %vm224_vm0, %v10443_v47 }
 0x921   : > { %15034 = vmatprep.mubr.msk.bf16.mxu0 %vm224_vm0, %v19352_v63 }
 0x928   : > { %15035 = vmatmul.mubr.msk.bf16.gmra.mrb[60].mxu0 %vm224_vm0, %v10445_v39  ;;  %v11226_v39 = vpack.c.bf16 %v11195_v56, %v11194_v2 }
 0x929   : > { %15046 = vmatprep.mubr.msk.bf16.mxu0 %vm224_vm0, %v19197_v13  ;;  %v10750_v13 = vld [vmem:[#allocation2 + $0x19a] sm:$0xff] }
 0x930   : > { %15047 = vmatmul.mubr.msk.bf16.vlgmr.msra.gmra.mrb[32].mxu0 %vm224_vm0, %v19206_v34  ;;  %v10751_v34 = vld [vmem:[#allocation2 + $0x1a2] sm:$0xff] }
 0x931   : > { %15050 = vmatprep.mubr.msk.bf16.mxu0 %vm224_vm0, %v19211_v60  ;;  %v10767_v60 = vpack.c.bf16 %v10751_v34, %v10750_v13 }
 0x938   : > { %15051 = vmatmul.mubr.msk.bf16.gmra.mrb[36].mxu0 %vm224_vm0, %v19220_v20  ;;  %v19505_v20 = vld [vmem:[%s19979_s4 + $0x4] sm:$0xf] }
 0x939   : > { %15054 = vmatprep.mubr.msk.bf16.mxu0 %vm224_vm0, %v19222_v17  ;;  %13852 = vmatprep.mubr.msk.bf16.mxu1 %vm224_vm0, %v19505_v20  ;;  %v19512_v17 = vld [vmem:[%s19978_s3 + $0x2] ss:$0 sm:$0xff] }
 0x940   : > { %15055 = vmatmul.mubr.msk.bf16.gmra.mrb[40].mxu0 %vm224_vm0, %v19228_v30 }
 0x941   : > { %15058 = vmatprep.mubr.msk.bf16.mxu0 %vm224_vm0, %v19230_v6 }
 0x948   : > { %15059 = vmatmul.mubr.msk.bf16.gmra.mrb[44].mxu0 %vm224_vm0, %v19236_v37 }
 0x949   : > { %15062 = vmatprep.mubr.msk.bf16.mxu0 %vm224_vm0, %v19238_v53 }
 0x950   : > { %15063 = vmatmul.mubr.msk.bf16.gmra.mrb[48].mxu0 %vm224_vm0, %v19244_v33 }
 0x951   : > { %15066 = vmatprep.mubr.msk.bf16.mxu0 %vm224_vm0, %v19246_v40 }
 0x958   : > { %15067 = vmatmul.mubr.msk.bf16.gmra.mrb[52].mxu0 %vm224_vm0, %v19252_v36 }
 0x959   : > { %15070 = vmatprep.mubr.msk.bf16.mxu0 %vm224_vm0, %v19254_v0 }
 0x960   : > { %15071 = vmatmul.mubr.msk.bf16.gmra.mrb[56].mxu0 %vm224_vm0, %v19260_v51 }
 0x961   : > { %15074 = vmatprep.mubr.msk.bf16.mxu0 %vm224_vm0, %v19398_v24 }
 0x968   : > { %15075 = vmatmul.mubr.msk.bf16.gmra.mrb[60].mxu0 %vm224_vm0, %v10767_v60 }
 0xa03   : > { %v15048_v30 = vpop.f32.mrb[32].mxu0 }
 0xa04   : > { %v11049_v6 = vadd.f32 %v15048_v30, %v19512_v17  ;;  %v10883_v37 = vpop.f32.mrb[33].mxu0 }
 0xa05   : > { %v11047_v53 = vadd.f32 %v19512_v17, %v10883_v37  ;;  %v15049_v33 = vpop.f32.mrb[34].mxu0 }
 0xa06   : > { %v11081_v40 = vmax.f32 %v11049_v6, 0.0  ;;  %v11050_v36 = vadd.f32 %v15049_v33, %v19512_v17  ;;  %v10886_v0 = vpop.f32.mrb[35].mxu0  ;;  %v11246_v33 = vsel %vm224_vm0, %v11226_v39, 0 }
 0xa07   : > { %v11079_v51 = vmax.f32 %v11047_v53, 0.0  ;;  %v11048_v63 = vadd.f32 %v19512_v17, %v10886_v0 }
 0xa08   : > { %11113 = vst.msk [vmem:[#allocation2 + $0x31] sm:$0xff] %vm224_vm0, %v11081_v40  ;;  %v11082_v24 = vmax.f32 %v11050_v36, 0.0 }
 0xa09   : > { %11111 = vst.msk [vmem:[#allocation2 + $0x19] sm:$0xff] %vm224_vm0, %v11079_v51  ;;  %v11080_v25 = vmax.f32 %v11048_v63, 0.0 }
 0xa0a   : > { %11114 = vst.msk [vmem:[#allocation2 + $0x39] sm:$0xff] %vm224_vm0, %v11082_v24 }
 0xa0b   : > { %11112 = vst.msk [vmem:[#allocation2 + $0x21] sm:$0xff] %vm224_vm0, %v11080_v25  ;;  %v15052_v27 = vpop.f32.mrb[36].mxu0 }
 0xa0c   : > { %v11053_v18 = vadd.f32 %v15052_v27, %v19512_v17  ;;  %v10899_v14 = vpop.f32.mrb[37].mxu0 }
 0xa0d   : > { %v11051_v11 = vadd.f32 %v19512_v17, %v10899_v14  ;;  %v15053_v15 = vpop.f32.mrb[38].mxu0 }
 0xa0e   : > { %v11085_v7 = vmax.f32 %v11053_v18, 0.0  ;;  %v11054_v22 = vadd.f32 %v15053_v15, %v19512_v17  ;;  %v10902_v19 = vpop.f32.mrb[39].mxu0 }
 0xa0f   : > { %v11083_v1 = vmax.f32 %v11051_v11, 0.0  ;;  %v11052_v52 = vadd.f32 %v19512_v17, %v10902_v19 }
 0xa10   : > { %11117 = vst.msk [vmem:[#allocation2 + $0x61] sm:$0xff] %vm224_vm0, %v11085_v7  ;;  %v11086_v10 = vmax.f32 %v11054_v22, 0.0  ;;  %v11196_v7 = vld [vmem:[#allocation2 + $0x19] sm:$0xff] }
 0xa11   : > { %11115 = vst.msk [vmem:[#allocation2 + $0x49] sm:$0xff] %vm224_vm0, %v11083_v1  ;;  %v11084_v49 = vmax.f32 %v11052_v52, 0.0 }
 0xa12   : > { %11118 = vst.msk [vmem:[#allocation2 + $0x69] sm:$0xff] %vm224_vm0, %v11086_v10  ;;  %v11197_v18 = vld [vmem:[#allocation2 + $0x21] sm:$0xff] }
 0xa13   : > { %11116 = vst.msk [vmem:[#allocation2 + $0x51] sm:$0xff] %vm224_vm0, %v11084_v49  ;;  %v15056_v3 = vpop.f32.mrb[40].mxu0  ;;  %v11227_v19 = vpack.c.bf16 %v11197_v18, %v11196_v7 }
 0xa14   : > { %v11057_v48 = vadd.f32 %v15056_v3, %v19512_v17  ;;  %v10915_v28 = vpop.f32.mrb[41].mxu0 }
 0xa15   : > { %v11055_v42 = vadd.f32 %v19512_v17, %v10915_v28  ;;  %v15057_v5 = vpop.f32.mrb[42].mxu0 }
 0xa16   : > { %v11089_v44 = vmax.f32 %v11057_v48, 0.0  ;;  %v11058_v12 = vadd.f32 %v15057_v5, %v19512_v17  ;;  %v10918_v43 = vpop.f32.mrb[43].mxu0 }
 0xa17   : > { %v11087_v45 = vmax.f32 %v11055_v42, 0.0  ;;  %v11056_v57 = vadd.f32 %v19512_v17, %v10918_v43 }
 0xa18   : > { %11121 = vst.msk [vmem:[#allocation2 + $0x91] sm:$0xff] %vm224_vm0, %v11089_v44  ;;  %v11090_v32 = vmax.f32 %v11058_v12, 0.0  ;;  %v19574_v12 = vsel %vm224_vm0, %v11227_v19, 0  ;;  %v11200_v39 = vld [vmem:[#allocation2 + $0x49] sm:$0xff] }
 0xa19   : > { %11119 = vst.msk [vmem:[#allocation2 + $0x79] sm:$0xff] %vm224_vm0, %v11087_v45  ;;  %v11088_v41 = vmax.f32 %v11056_v57, 0.0 }
 0xa1a   : > { %11122 = vst.msk [vmem:[#allocation2 + $0x99] sm:$0xff] %vm224_vm0, %v11090_v32 }
 0xa1b   : > { %11120 = vst.msk [vmem:[#allocation2 + $0x81] sm:$0xff] %vm224_vm0, %v11088_v41  ;;  %v15060_v59 = vpop.f32.mrb[44].mxu0  ;;  %v11199_v41 = vld [vmem:[#allocation2 + $0x39] sm:$0xff] }
 0xa1c   : > { %v11061_v4 = vadd.f32 %v15060_v59, %v19512_v17  ;;  %v10931_v38 = vpop.f32.mrb[45].mxu0 }
 0xa1d   : > { %v11059_v46 = vadd.f32 %v19512_v17, %v10931_v38  ;;  %v15061_v29 = vpop.f32.mrb[46].mxu0 }
 0xa1e   : > { %v11093_v35 = vmax.f32 %v11061_v4, 0.0  ;;  %v11062_v50 = vadd.f32 %v15061_v29, %v19512_v17  ;;  %v10934_v31 = vpop.f32.mrb[47].mxu0 }
 0xa1f   : > { %v11091_v16 = vmax.f32 %v11059_v46, 0.0  ;;  %v11060_v61 = vadd.f32 %v19512_v17, %v10934_v31  ;;  %v11198_v46 = vld [vmem:[#allocation2 + $0x31] sm:$0xff] }
 0xa20   : > { %11125 = vst.msk [vmem:[#allocation2 + $0xc1] sm:$0xff] %vm224_vm0, %v11093_v35  ;;  %v11094_v26 = vmax.f32 %v11062_v50, 0.0  ;;  %v11228_v35 = vpack.c.bf16 %v11199_v41, %v11198_v46  ;;  %v19647_v46 = vld [vmem:[%s19979_s4] sm:$0xf] }
 0xa21   : > { %11123 = vst.msk [vmem:[#allocation2 + $0xa9] sm:$0xff] %vm224_vm0, %v11091_v16  ;;  %v11092_v55 = vmax.f32 %v11060_v61, 0.0  ;;  %v11207_v7 = vld [vmem:[#allocation2 + $0x99] sm:$0xff] }
 0xa22   : > { %11126 = vst.msk [vmem:[#allocation2 + $0xc9] sm:$0xff] %vm224_vm0, %v11094_v26  ;;  %v19590_v2 = vsel %vm224_vm0, %v11228_v35, 0 }
 0xa23   : > { %11124 = vst.msk [vmem:[#allocation2 + $0xb1] sm:$0xff] %vm224_vm0, %v11092_v55  ;;  %v15064_v9 = vpop.f32.mrb[48].mxu0 }
 0xa24   : > { %v11065_v23 = vadd.f32 %v15064_v9, %v19512_v17  ;;  %v10947_v62 = vpop.f32.mrb[49].mxu0 }
 0xa25   : > { %v11063_v58 = vadd.f32 %v19512_v17, %v10947_v62  ;;  %v15065_v8 = vpop.f32.mrb[50].mxu0 }
 0xa26   : > { %v11097_v47 = vmax.f32 %v11065_v23, 0.0  ;;  %v11066_v21 = vadd.f32 %v15065_v8, %v19512_v17  ;;  %v10950_v54 = vpop.f32.mrb[51].mxu0  ;;  %v11201_v8 = vld [vmem:[#allocation2 + $0x51] sm:$0xff] }
 0xa27   : > { %v11095_v13 = vmax.f32 %v11063_v58, 0.0  ;;  %v11064_v34 = vadd.f32 %v19512_v17, %v10950_v54  ;;  %v11210_v6 = vld [vmem:[#allocation2 + $0xc1] sm:$0xff] }
 0xa28   : > { %11129 = vst.msk [vmem:[#allocation2 + $0xf1] sm:$0xff] %vm224_vm0, %v11097_v47  ;;  %v11098_v60 = vmax.f32 %v11066_v21, 0.0 }
 0xa29   : > { %11127 = vst.msk [vmem:[#allocation2 + $0xd9] sm:$0xff] %vm224_vm0, %v11095_v13  ;;  %v11096_v30 = vmax.f32 %v11064_v34, 0.0  ;;  %v11211_v37 = vld [vmem:[#allocation2 + $0xc9] sm:$0xff]  ;;  %v11229_v34 = vpack.c.bf16 %v11201_v8, %v11200_v39 }
 0xa2a   : > { %11130 = vst.msk [vmem:[#allocation2 + $0xf9] sm:$0xff] %vm224_vm0, %v11098_v60  ;;  %v19553_v53 = vpack.c.bf16 %v11211_v37, %v11210_v6  ;;  %v11203_v37 = vld [vmem:[#allocation2 + $0x69] sm:$0xff] }
 0xa2b   : > { %11128 = vst.msk [vmem:[#allocation2 + $0xe1] sm:$0xff] %vm224_vm0, %v11096_v30  ;;  %v15068_v40 = vpop.f32.mrb[52].mxu0  ;;  %v19604_v6 = vsel %vm224_vm0, %v11229_v34, 0  ;;  %v11150_v39 = vld [vmem:[#allocation2 + $0x48] sm:$0xff] }
 0xa2c   : > { %v11069_v36 = vadd.f32 %v15068_v40, %v19512_v17  ;;  %v10963_v0 = vpop.f32.mrb[53].mxu0  ;;  %15886 = vmatprep.subr.msk.bf16.mxu1 %vm224_vm0, %v19553_v53 }
 0xa2d   : > { %v11067_v51 = vadd.f32 %v19512_v17, %v10963_v0  ;;  %v15069_v63 = vpop.f32.mrb[54].mxu0  ;;  %13837 = vmatpush3.bf16.xpose.msra.mxu1 %v11246_v33  ;;  %v11202_v33 = vld [vmem:[#allocation2 + $0x61] sm:$0xff] }
 0xa2e   : > { %v11101_v24 = vmax.f32 %v11069_v36, 0.0  ;;  %v11070_v25 = vadd.f32 %v15069_v63, %v19512_v17  ;;  %v10966_v27 = vpop.f32.mrb[55].mxu0  ;;  %v11230_v40 = vpack.c.bf16 %v11203_v37, %v11202_v33  ;;  %v11153_v33 = vld [vmem:[#allocation2 + $0x68] sm:$0xff] }
 0xa2f   : > { %v11099_v14 = vmax.f32 %v11067_v51, 0.0  ;;  %v11068_v11 = vadd.f32 %v19512_v17, %v10966_v27  ;;  %v11214_v42 = vld [vmem:[#allocation2 + $0xf1] sm:$0xff] }
 0xa30   : > { %11133 = vst.msk [vmem:[#allocation2 + $0x121] sm:$0xff] %vm224_vm0, %v11101_v24  ;;  %v11102_v15 = vmax.f32 %v11070_v25, 0.0  ;;  %v11212_v1 = vld [vmem:[#allocation2 + $0xd9] sm:$0xff]  ;;  %v19612_v51 = vsel %vm224_vm0, %v11230_v40, 0  ;;  %v11205_v24 = vld [vmem:[#allocation2 + $0x81] sm:$0xff] }
 0xa31   : > { %11131 = vst.msk [vmem:[#allocation2 + $0x109] sm:$0xff] %vm224_vm0, %v11099_v14  ;;  %v11100_v22 = vmax.f32 %v11068_v11, 0.0  ;;  %v11215_v10 = vld [vmem:[#allocation2 + $0xf9] sm:$0xff] }
 0xa32   : > { %11134 = vst.msk [vmem:[#allocation2 + $0x129] sm:$0xff] %vm224_vm0, %v11102_v15  ;;  %v11213_v52 = vld [vmem:[#allocation2 + $0xe1] sm:$0xff]  ;;  %v19576_v43 = vpack.c.bf16 %v11215_v10, %v11214_v42  ;;  %v11204_v25 = vld [vmem:[#allocation2 + $0x79] sm:$0xff] }
 0xa33   : > { %11132 = vst.msk [vmem:[#allocation2 + $0x111] sm:$0xff] %vm224_vm0, %v11100_v22  ;;  %v15072_v49 = vpop.f32.mrb[56].mxu0  ;;  %v19567_v3 = vpack.c.bf16 %v11213_v52, %v11212_v1  ;;  %v11231_v27 = vpack.c.bf16 %v11205_v24, %v11204_v25  ;;  %v11206_v22 = vld [vmem:[#allocation2 + $0x91] sm:$0xff]  ;;  %v11152_v40 = vld [vmem:[#allocation2 + $0x60] sm:$0xff] }
 0xa34   : > { %v11073_v48 = vadd.f32 %v15072_v49, %v19512_v17  ;;  %v10979_v28 = vpop.f32.mrb[57].mxu0  ;;  %v11232_v19 = vpack.c.bf16 %v11207_v7, %v11206_v22 }
 0xa35   : > { %v11071_v5 = vadd.f32 %v19512_v17, %v10979_v28  ;;  %v15073_v44 = vpop.f32.mrb[58].mxu0  ;;  %15887 = vmatprep.subr.msk.bf16.mxu1 %vm224_vm0, %v19567_v3  ;;  %v19620_v11 = vsel %vm224_vm0, %v11231_v27, 0  ;;  %v11208_v28 = vld [vmem:[#allocation2 + $0xa9] sm:$0xff] }
 0xa36   : > { %v11105_v45 = vmax.f32 %v11073_v48, 0.0  ;;  %v11074_v57 = vadd.f32 %v15073_v44, %v19512_v17  ;;  %v10982_v32 = vpop.f32.mrb[59].mxu0  ;;  %13839 = vmatpush3.bf16.xpose.msra.mxu1 %v19574_v12  ;;  %v19628_v10 = vsel %vm224_vm0, %v11232_v19, 0  ;;  %v11209_v48 = vld [vmem:[#allocation2 + $0xb1] sm:$0xff]  ;;  %v11160_v44 = vld [vmem:[#allocation2 + $0xc0] sm:$0xff] }
 0xa37   : > { %v11103_v59 = vmax.f32 %v11071_v5, 0.0  ;;  %v11072_v4 = vadd.f32 %v19512_v17, %v10982_v32  ;;  %15888 = vmatprep.subr.msk.bf16.mxu1 %vm224_vm0, %v19576_v43  ;;  %v11218_v30 = vld [vmem:[#allocation2 + $0x121] sm:$0xff]  ;;  %v11233_v42 = vpack.c.bf16 %v11209_v48, %v11208_v28  ;;  %v11157_v48 = vld [vmem:[#allocation2 + $0x98] sm:$0xff]  ;;  %v11156_v28 = vld [vmem:[#allocation2 + $0x90] sm:$0xff] }
 0xa38   : > { %11137 = vst.msk [vmem:[#allocation2 + $0x151] sm:$0xff] %vm224_vm0, %v11105_v45  ;;  %v11106_v38 = vmax.f32 %v11074_v57, 0.0  ;;  %v11216_v26 = vld [vmem:[#allocation2 + $0x109] sm:$0xff]  ;;  %v11144_v45 = vld [vmem:[#allocation2] sm:$0xff] }
 0xa39   : > { %11135 = vst.msk [vmem:[#allocation2 + $0x139] sm:$0xff] %vm224_vm0, %v11103_v59  ;;  %v11104_v29 = vmax.f32 %v11072_v4, 0.0  ;;  %v11219_v60 = vld [vmem:[#allocation2 + $0x129] sm:$0xff]  ;;  %v19636_v32 = vsel %vm224_vm0, %v11233_v42, 0  ;;  %v11163_v4 = vld [vmem:[#allocation2 + $0xe0] sm:$0xff]  ;;  %v11182_v42 = vpack.c.bf16 %v11157_v48, %v11156_v28  ;;  %v11435_v48 = vld [vmem:[#allocation2 + $0x52] sm:$0xff] }
 0xa3a   : > { %11138 = vst.msk [vmem:[#allocation2 + $0x159] sm:$0xff] %vm224_vm0, %v11106_v38  ;;  %v11217_v50 = vld [vmem:[#allocation2 + $0x111] sm:$0xff]  ;;  %v11161_v5 = vld [vmem:[#allocation2 + $0xc8] sm:$0xff] }
 0xa3b   : > { %11136 = vst.msk [vmem:[#allocation2 + $0x141] sm:$0xff] %vm224_vm0, %v11104_v29  ;;  %v15076_v31 = vpop.f32.mrb[60].mxu0  ;;  %v19592_v56 = vpack.c.bf16 %v11217_v50, %v11216_v26  ;;  %v11145_v57 = vld [vmem:[#allocation2 + $0x8] sm:$0xff]  ;;  %v19638_v41 = vpack.c.bf16 %v11161_v5, %v11160_v44  ;;  %v11162_v29 = vld [vmem:[#allocation2 + $0xd8] sm:$0xff]  ;;  %v11147_v50 = vld [vmem:[#allocation2 + $0x20] sm:$0xff] }
 0xa3c   : > { %v11077_v16 = vadd.f32 %v15076_v31, %v19512_v17  ;;  %v10995_v61 = vpop.f32.mrb[61].mxu0  ;;  %v11176_v59 = vpack.c.bf16 %v11145_v57, %v11144_v45  ;;  %v19651_v35 = vpack.c.bf16 %v11163_v4, %v11162_v29  ;;  %v11146_v31 = vld [vmem:[#allocation2 + $0x18] sm:$0xff]  ;;  %v11164_v26 = vld [vmem:[#allocation2 + $0xf0] sm:$0xff]  ;;  %v11166_v8 = vld [vmem:[#allocation2 + $0x108] sm:$0xff]  ;;  %v19698_v45 = vsel %vm224_vm0, %v11182_v42, 0 }
 0xa3d   : > { %v11075_v55 = vadd.f32 %v19512_v17, %v10995_v61  ;;  %v15077_v9 = vpop.f32.mrb[62].mxu0  ;;  %v11165_v61 = vld [vmem:[#allocation2 + $0xf8] sm:$0xff]  ;;  %v11169_v34 = vld [vmem:[#allocation2 + $0x128] sm:$0xff] }
 0xa3e   : > { %v11109_v23 = vmax.f32 %v11077_v16, 0.0  ;;  %v11078_v62 = vadd.f32 %v15077_v9, %v19512_v17  ;;  %v10998_v58 = vpop.f32.mrb[63].mxu0  ;;  %13841 = vmatpush3.bf16.xpose.msra.mxu1 %v19590_v2  ;;  %v11338_v38 = vsel %vm224_vm0, %v11176_v59, 0  ;;  %v11177_v16 = vpack.c.bf16 %v11147_v50, %v11146_v31  ;;  %v11159_v59 = vld [vmem:[#allocation2 + $0xb0] sm:$0xff]  ;;  %v11158_v4 = vld [vmem:[#allocation2 + $0xa8] sm:$0xff] }
 0xa3f   : > { %v11107_v47 = vmax.f32 %v11075_v55, 0.0  ;;  %v11076_v21 = vadd.f32 %v19512_v17, %v10998_v58  ;;  %15889 = vmatprep.subr.msk.bf16.mxu1 %vm224_vm0, %v19592_v56  ;;  %v19606_v17 = vpack.c.bf16 %v11219_v60, %v11218_v30  ;;  %v11222_v14 = vld [vmem:[#allocation2 + $0x151] sm:$0xff]  ;;  %v19660_v9 = vpack.c.bf16 %v11165_v61, %v11164_v26  ;;  %v11168_v60 = vld [vmem:[#allocation2 + $0x120] sm:$0xff] }
 0xa40   : > { %11141 = vst.msk [vmem:[#allocation2 + $0x181] sm:$0xff] %vm224_vm0, %v11109_v23  ;;  %v11110_v54 = vmax.f32 %v11078_v62, 0.0  ;;  %v11220_v0 = vld [vmem:[#allocation2 + $0x139] sm:$0xff]  ;;  %v19658_v55 = vsel %vm224_vm0, %v11177_v16, 0  ;;  %v11148_v23 = vld [vmem:[#allocation2 + $0x30] sm:$0xff]  ;;  %v19676_v37 = vpack.c.bf16 %v11169_v34, %v11168_v60  ;;  %v11444_v29 = vld [vmem:[#allocation2 + $0xc2] sm:$0xff] }
 0xa41   : > { %11139 = vst.msk [vmem:[#allocation2 + $0x169] sm:$0xff] %vm224_vm0, %v11107_v47  ;;  %v11108_v13 = vmax.f32 %v11076_v21, 0.0  ;;  %v11223_v18 = vld [vmem:[#allocation2 + $0x159] sm:$0xff]  ;;  %v11167_v58 = vld [vmem:[#allocation2 + $0x110] sm:$0xff]  ;;  %v11428_v31 = vld [vmem:[#allocation2 + $0x2] sm:$0xff] }
 0xa42   : > { %11142 = vst.msk [vmem:[#allocation2 + $0x189] sm:$0xff] %vm224_vm0, %v11110_v54  ;;  %v11221_v36 = vld [vmem:[#allocation2 + $0x141] sm:$0xff]  ;;  %v19622_v15 = vpack.c.bf16 %v11223_v18, %v11222_v14  ;;  %v19668_v21 = vpack.c.bf16 %v11167_v58, %v11166_v8  ;;  %v11151_v54 = vld [vmem:[#allocation2 + $0x50] sm:$0xff]  ;;  %v11170_v24 = vld [vmem:[#allocation2 + $0x138] sm:$0xff] }
 0xa43   : > { %11140 = vst.msk [vmem:[#allocation2 + $0x171] sm:$0xff] %vm224_vm0, %v11108_v13  ;;  %v19614_v63 = vpack.c.bf16 %v11221_v36, %v11220_v0  ;;  %v11179_v13 = vpack.c.bf16 %v11151_v54, %v11150_v39  ;;  %v11180_v36 = vpack.c.bf16 %v11153_v33, %v11152_v40  ;;  %v11171_v0 = vld [vmem:[#allocation2 + $0x140] sm:$0xff]  ;;  %v11154_v14 = vld [vmem:[#allocation2 + $0x78] sm:$0xff]  ;;  %v11172_v19 = vld [vmem:[#allocation2 + $0x150] sm:$0xff] }
 0xa44   : > { %v19684_v27 = vpack.c.bf16 %v11171_v0, %v11170_v24  ;;  %v11155_v18 = vld [vmem:[#allocation2 + $0x80] sm:$0xff]  ;;  %v11173_v22 = vld [vmem:[#allocation2 + $0x158] sm:$0xff]  ;;  %v11445_v50 = vld [vmem:[#allocation2 + $0xca] sm:$0xff] }
 0xa45   : > { %v19674_v30 = vsel %vm224_vm0, %v11179_v13, 0  ;;  %v19682_v25 = vsel %vm224_vm0, %v11180_v36, 0  ;;  %v11181_v7 = vpack.c.bf16 %v11155_v18, %v11154_v14  ;;  %v11429_v16 = vld [vmem:[#allocation2 + $0xa] sm:$0xff]  ;;  %v19708_v26 = vpack.c.bf16 %v11445_v50, %v11444_v29  ;;  %v11430_v39 = vld [vmem:[#allocation2 + $0x1a] sm:$0xff]  ;;  %v11431_v13 = vld [vmem:[#allocation2 + $0x22] sm:$0xff] }
 0xa46   : > { %13843 = vmatpush3.bf16.xpose.msra.mxu1 %v19604_v6  ;;  %v19717_v8 = vld [vmem:[%s19979_s4 + $0x8] sm:$0xf]  ;;  %v11461_v34 = vpack.c.bf16 %v11431_v13, %v11430_v39  ;;  %v11448_v60 = vld [vmem:[#allocation2 + $0xf2] sm:$0xff]  ;;  %v11449_v33 = vld [vmem:[#allocation2 + $0xfa] sm:$0xff] }
 0xa47   : > { %15890 = vmatprep.subr.msk.bf16.mxu1 %vm224_vm0, %v19606_v17  ;;  %v19730_v36 = vpack.c.bf16 %v11449_v33, %v11448_v60  ;;  %v11433_v0 = vld [vmem:[#allocation2 + $0x3a] sm:$0xff]  ;;  %v11450_v18 = vld [vmem:[#allocation2 + $0x10a] sm:$0xff]  ;;  %v11451_v14 = vld [vmem:[#allocation2 + $0x112] sm:$0xff] }
 0xa48   : > { %v11224_v52 = vld [vmem:[#allocation2 + $0x169] sm:$0xff]  ;;  %v19728_v40 = vsel %vm224_vm0, %v11461_v34, 0  ;;  %v11454_v50 = vld [vmem:[#allocation2 + $0x13a] sm:$0xff]  ;;  %v11456_v39 = vld [vmem:[#allocation2 + $0x152] sm:$0xff] }
 0xa49   : > { %v11174_v44 = vld [vmem:[#allocation2 + $0x168] sm:$0xff]  ;;  %v11457_v13 = vld [vmem:[#allocation2 + $0x15a] sm:$0xff]  ;;  %v11440_v33 = vld [vmem:[#allocation2 + $0x92] sm:$0xff] }
 0xa4a   : > { %v11225_v1 = vld [vmem:[#allocation2 + $0x171] sm:$0xff]  ;;  %v11452_v42 = vld [vmem:[#allocation2 + $0x122] sm:$0xff]  ;;  %v19762_v60 = vpack.c.bf16 %v11457_v13, %v11456_v39 }
 0xa4b   : > { %v19630_v49 = vpack.c.bf16 %v11225_v1, %v11224_v52  ;;  %v19690_v1 = vsel %vm224_vm0, %v11181_v7, 0  ;;  %v19692_v52 = vpack.c.bf16 %v11173_v22, %v11172_v19  ;;  %v11175_v5 = vld [vmem:[#allocation2 + $0x170] sm:$0xff]  ;;  %v19738_v22 = vpack.c.bf16 %v11451_v14, %v11450_v18 }
 0xa4c   : > { %v19700_v57 = vpack.c.bf16 %v11175_v5, %v11174_v44  ;;  %v11434_v19 = vld [vmem:[#allocation2 + $0x4a] sm:$0xff]  ;;  %v11459_v18 = vld [vmem:[#allocation2 + $0x172] sm:$0xff] }
 0xa4d   : > { %v11463_v28 = vpack.c.bf16 %v11435_v48, %v11434_v19  ;;  %v11453_v5 = vld [vmem:[#allocation2 + $0x12a] sm:$0xff] }
 0xa4e   : > { %13845 = vmatpush3.bf16.xpose.msra.mxu1 %v19612_v51  ;;  %v11442_v48 = vld [vmem:[#allocation2 + $0xaa] sm:$0xff] }
 0xa4f   : > { %15891 = vmatprep.subr.msk.bf16.mxu1 %vm224_vm0, %v19614_v63  ;;  %v19744_v44 = vsel %vm224_vm0, %v11463_v28, 0  ;;  %v11443_v28 = vld [vmem:[#allocation2 + $0xb2] sm:$0xff] }
 0xa56   : > { %13847 = vmatpush3.bf16.xpose.msra.mxu1 %v19620_v11 }
 0xa57   : > { %15892 = vmatprep.subr.msk.bf16.mxu1 %vm224_vm0, %v19622_v15 }
 0xa5e   : > { %13849 = vmatpush3.bf16.xpose.msra.mxu1 %v19628_v10 }
 0xa5f   : > { %15893 = vmatprep.subr.msk.bf16.mxu1 %vm224_vm0, %v19630_v49 }
 0xa66   : > { %13851 = vmatpush3.bf16.xpose.msra.mxu1 %v19636_v32 }
 0xa67   : > { %15894 = vmatprep.subr.msk.bf16.mxu1 %vm224_vm0, %v19638_v41 }
 0xa6d   : > { %13853 = vmatmul.mubr.msk.bf16.vlgmr.msra.gmra.mrb[44].mxu1 %vm224_vm0, %v19505_v20  ;;  %v11149_v20 = vld [vmem:[#allocation2 + $0x38] sm:$0xff] }
 0xa6e   : > { %13855 = vmatpush3.bf16.xpose.msra.mxu1 %v11338_v38  ;;  %13870 = vmatprep.mubr.msk.bf16.mxu1 %vm224_vm0, %v19647_v46  ;;  %v11178_v62 = vpack.c.bf16 %v11149_v20, %v11148_v23  ;;  %v11183_v38 = vpack.c.bf16 %v11159_v59, %v11158_v4  ;;  %v11460_v20 = vpack.c.bf16 %v11429_v16, %v11428_v31  ;;  %v11446_v23 = vld [vmem:[#allocation2 + $0xda] sm:$0xff]  ;;  %v11436_v4 = vld [vmem:[#allocation2 + $0x62] sm:$0xff] }
 0xa6f   : > { %15895 = vmatprep.subr.msk.bf16.mxu1 %vm224_vm0, %v19651_v35  ;;  %v19746_v59 = vpack.c.bf16 %v11453_v5, %v11452_v42  ;;  %v11455_v31 = vld [vmem:[#allocation2 + $0x142] sm:$0xff]  ;;  %v11467_v42 = vpack.c.bf16 %v11443_v28, %v11442_v48 }
 0xa70   : > { %v19666_v47 = vsel %vm224_vm0, %v11178_v62, 0  ;;  %v19706_v61 = vsel %vm224_vm0, %v11183_v38, 0  ;;  %v11447_v62 = vld [vmem:[#allocation2 + $0xe2] sm:$0xff]  ;;  %v11480_v58 = vsel %vm224_vm0, %v11460_v20, 0  ;;  %v11437_v38 = vld [vmem:[#allocation2 + $0x6a] sm:$0xff]  ;;  %v19754_v20 = vpack.c.bf16 %v11455_v31, %v11454_v50 }
 0xa71   : > { %v19721_v54 = vpack.c.bf16 %v11447_v62, %v11446_v23  ;;  %v11464_v29 = vpack.c.bf16 %v11437_v38, %v11436_v4  ;;  %v11438_v23 = vld [vmem:[#allocation2 + $0x7a] sm:$0xff]  ;;  %v11439_v62 = vld [vmem:[#allocation2 + $0x82] sm:$0xff]  ;;  %v19776_v5 = vsel %vm224_vm0, %v11467_v42, 0  ;;  %v13282_v4 = vld [vmem:[%s19979_s4 + $0xc] sm:$0xf] }
 0xa72   : > { %v13284_v50 = vld [vmem:[%s19979_s4 + $0x10] sm:$0xf]  ;;  %v13286_v31 = vld [vmem:[%s19979_s4 + $0x14] sm:$0xf] }
 0xa73   : > { %v19752_v16 = vsel %vm224_vm0, %v11464_v29, 0  ;;  %v19812_v29 = vsel %vm224_vm0, %v19638_v41, 0  ;;  %v11789_v41 = vsel %vm224_vm0, %v19553_v53, 0  ;;  %v11890_v53 = vld [vmem:[#allocation2 + $0x182] sm:$0xff] }
 0xa76   : > { %13857 = vmatpush3.bf16.xpose.msra.mxu1 %v19658_v55 }
 0xa77   : > { %15896 = vmatprep.subr.msk.bf16.mxu1 %vm224_vm0, %v19660_v9 }
 0xa7e   : > { %13859 = vmatpush3.bf16.xpose.msra.mxu1 %v19666_v47 }
 0xa7f   : > { %15897 = vmatprep.subr.msk.bf16.mxu1 %vm224_vm0, %v19668_v21 }
 0xa86   : > { %13861 = vmatpush3.bf16.xpose.msra.mxu1 %v19674_v30 }
 0xa87   : > { %15898 = vmatprep.subr.msk.bf16.mxu1 %vm224_vm0, %v19676_v37 }
 0xa8e   : > { %13863 = vmatpush3.bf16.xpose.msra.mxu1 %v19682_v25 }
 0xa8f   : > { %15899 = vmatprep.subr.msk.bf16.mxu1 %vm224_vm0, %v19684_v27 }
 0xa96   : > { %13865 = vmatpush3.bf16.xpose.msra.mxu1 %v19690_v1 }
 0xa97   : > { %15900 = vmatprep.subr.msk.bf16.mxu1 %vm224_vm0, %v19692_v52 }
 0xa9e   : > { %13867 = vmatpush3.bf16.xpose.msra.mxu1 %v19698_v45 }
 0xa9f   : > { %15901 = vmatprep.subr.msk.bf16.mxu1 %vm224_vm0, %v19700_v57 }
 0xaa6   : > { %13869 = vmatpush3.bf16.xpose.msra.mxu1 %v19706_v61 }
 0xaa7   : > { %15902 = vmatprep.subr.msk.bf16.mxu1 %vm224_vm0, %v19708_v26 }
 0xaad   : > { %13871 = vmatmul.mubr.msk.bf16.vlgmr.msra.gmra.mrb[44].mxu1 %vm224_vm0, %v19647_v46  ;;  %v11432_v46 = vld [vmem:[#allocation2 + $0x32] sm:$0xff] }
 0xaae   : > { %13873 = vmatpush3.bf16.xpose.msra.mxu1 %v11480_v58  ;;  %13888 = vmatprep.mubr.msk.bf16.mxu1 %vm224_vm0, %v19717_v8  ;;  %v11462_v24 = vpack.c.bf16 %v11433_v0, %v11432_v46  ;;  %v11465_v58 = vpack.c.bf16 %v11439_v62, %v11438_v23  ;;  %v11441_v46 = vld [vmem:[#allocation2 + $0x9a] sm:$0xff]  ;;  %v19879_v62 = vsel %vm224_vm0, %v19708_v26, 0  ;;  %v16109_v26 = vmov 1966171168  }
 0xaaf   : > { %15903 = vmatprep.subr.msk.bf16.mxu1 %vm224_vm0, %v19721_v54  ;;  %v11466_v0 = vpack.c.bf16 %v11441_v46, %v11440_v33 }
 0xab0   : > { %v19736_v7 = vsel %vm224_vm0, %v11462_v24, 0  ;;  %v19760_v34 = vsel %vm224_vm0, %v11465_v58, 0  ;;  %v11458_v24 = vld [vmem:[#allocation2 + $0x16a] sm:$0xff]  ;;  %v13288_v58 = vld [vmem:[%s19979_s4 + $0x18] sm:$0xf] }
 0xab1   : > { %v19768_v14 = vsel %vm224_vm0, %v11466_v0, 0  ;;  %v19770_v19 = vpack.c.bf16 %v11459_v18, %v11458_v24 }
 0xab6   : > { %13875 = vmatpush3.bf16.xpose.msra.mxu1 %v19728_v40 }
 0xab7   : > { %15904 = vmatprep.subr.msk.bf16.mxu1 %vm224_vm0, %v19730_v36 }
 0xabe   : > { %13877 = vmatpush3.bf16.xpose.msra.mxu1 %v19736_v7 }
 0xabf   : > { %15905 = vmatprep.subr.msk.bf16.mxu1 %vm224_vm0, %v19738_v22 }
 0xac6   : > { %13879 = vmatpush3.bf16.xpose.msra.mxu1 %v19744_v44 }
 0xac7   : > { %15906 = vmatprep.subr.msk.bf16.mxu1 %vm224_vm0, %v19746_v59 }
 0xace   : > { %13881 = vmatpush3.bf16.xpose.msra.mxu1 %v19752_v16 }
 0xacf   : > { %15907 = vmatprep.subr.msk.bf16.mxu1 %vm224_vm0, %v19754_v20 }
 0xad6   : > { %13883 = vmatpush3.bf16.xpose.msra.mxu1 %v19760_v34 }
 0xad7   : > { %15908 = vmatprep.subr.msk.bf16.mxu1 %vm224_vm0, %v19762_v60 }
 0xade   : > { %13885 = vmatpush3.bf16.xpose.msra.mxu1 %v19768_v14 }
 0xadf   : > { %15909 = vmatprep.subr.msk.bf16.mxu1 %vm224_vm0, %v19770_v19 }
 0xae6   : > { %13887 = vmatpush3.bf16.xpose.msra.mxu1 %v19776_v5 }
 0xae7   : > { %15910 = vmatprep.subr.msk.bf16.mxu1 %vm224_vm0, %v19651_v35 }
 0xaed   : > { %13889 = vmatmul.mubr.msk.bf16.vlgmr.msra.gmra.mrb[44].mxu1 %vm224_vm0, %v19717_v8  ;;  %v11602_v8 = vld [vmem:[#allocation2 + $0x180] sm:$0xff] }
 0xaee   : > { %13891 = vmatpush3.bf16.xpose.msra.mxu1 %v19658_v55  ;;  %13906 = vmatprep.mubr.msk.bf16.mxu1 %vm224_vm0, %v13282_v4  ;;  %v11603_v55 = vld [vmem:[#allocation2 + $0x188] sm:$0xff] }
 0xaef   : > { %15911 = vmatprep.subr.msk.bf16.mxu1 %vm224_vm0, %v19660_v9  ;;  %v19805_v38 = vpack.c.bf16 %v11603_v55, %v11602_v8 }
 0xaf6   : > { %13893 = vmatpush3.bf16.xpose.msra.mxu1 %v19666_v47 }
 0xaf7   : > { %15912 = vmatprep.subr.msk.bf16.mxu1 %vm224_vm0, %v19668_v21 }
 0xafe   : > { %13895 = vmatpush3.bf16.xpose.msra.mxu1 %v19674_v30 }
 0xaff   : > { %15913 = vmatprep.subr.msk.bf16.mxu1 %vm224_vm0, %v19676_v37 }
 0xb06   : > { %13897 = vmatpush3.bf16.xpose.msra.mxu1 %v19682_v25 }
 0xb07   : > { %15914 = vmatprep.subr.msk.bf16.mxu1 %vm224_vm0, %v19684_v27 }
 0xb0e   : > { %13899 = vmatpush3.bf16.xpose.msra.mxu1 %v19690_v1 }
 0xb0f   : > { %15915 = vmatprep.subr.msk.bf16.mxu1 %vm224_vm0, %v19692_v52 }
 0xb16   : > { %13901 = vmatpush3.bf16.xpose.msra.mxu1 %v19698_v45 }
 0xb17   : > { %15916 = vmatprep.subr.msk.bf16.mxu1 %vm224_vm0, %v19700_v57 }
 0xb1e   : > { %13903 = vmatpush3.bf16.xpose.msra.mxu1 %v19706_v61 }
 0xb1f   : > { %15917 = vmatprep.subr.msk.bf16.mxu1 %vm224_vm0, %v19805_v38 }
 0xb26   : > { %13905 = vmatpush3.bf16.xpose.msra.mxu1 %v19812_v29 }
 0xb27   : > { %15918 = vmatprep.subr.msk.bf16.mxu1 %vm224_vm0, %v19567_v3  ;;  %v11747_v3 = vld [vmem:[#allocation2 + $0x189] sm:$0xff] }
 0xb2d   : > { %13907 = vmatmul.mubr.msk.bf16.vlgmr.msra.gmra.mrb[44].mxu1 %vm224_vm0, %v13282_v4 }
 0xb2e   : > { %13909 = vmatpush3.bf16.xpose.msra.mxu1 %v19574_v12  ;;  %13924 = vmatprep.mubr.msk.bf16.mxu1 %vm224_vm0, %v13284_v50  ;;  %v11746_v12 = vld [vmem:[#allocation2 + $0x181] sm:$0xff] }
 0xb2f   : > { %15919 = vmatprep.subr.msk.bf16.mxu1 %vm224_vm0, %v19576_v43  ;;  %v19840_v43 = vpack.c.bf16 %v11747_v3, %v11746_v12 }
 0xb36   : > { %13911 = vmatpush3.bf16.xpose.msra.mxu1 %v19590_v2 }
 0xb37   : > { %15920 = vmatprep.subr.msk.bf16.mxu1 %vm224_vm0, %v19592_v56 }
 0xb3e   : > { %13913 = vmatpush3.bf16.xpose.msra.mxu1 %v19604_v6 }
 0xb3f   : > { %15921 = vmatprep.subr.msk.bf16.mxu1 %vm224_vm0, %v19606_v17 }
 0xb46   : > { %13915 = vmatpush3.bf16.xpose.msra.mxu1 %v19612_v51 }
 0xb47   : > { %15922 = vmatprep.subr.msk.bf16.mxu1 %vm224_vm0, %v19614_v63 }
 0xb4e   : > { %13917 = vmatpush3.bf16.xpose.msra.mxu1 %v19620_v11 }
 0xb4f   : > { %15923 = vmatprep.subr.msk.bf16.mxu1 %vm224_vm0, %v19622_v15 }
 0xb56   : > { %13919 = vmatpush3.bf16.xpose.msra.mxu1 %v19628_v10 }
 0xb57   : > { %15924 = vmatprep.subr.msk.bf16.mxu1 %vm224_vm0, %v19630_v49 }
 0xb5e   : > { %13921 = vmatpush3.bf16.xpose.msra.mxu1 %v19636_v32 }
 0xb5f   : > { %15925 = vmatprep.subr.msk.bf16.mxu1 %vm224_vm0, %v19840_v43 }
 0xb66   : > { %13923 = vmatpush3.bf16.xpose.msra.mxu1 %v11789_v41 }
 0xb67   : > { %15926 = vmatprep.subr.msk.bf16.mxu1 %vm224_vm0, %v19721_v54 }
 0xb6d   : > { %13925 = vmatmul.mubr.msk.bf16.vlgmr.msra.gmra.mrb[44].mxu1 %vm224_vm0, %v13284_v50 }
 0xb6e   : > { %13927 = vmatpush3.bf16.xpose.msra.mxu1 %v19728_v40  ;;  %13942 = vmatprep.mubr.msk.bf16.mxu1 %vm224_vm0, %v13286_v31  ;;  %v11891_v40 = vld [vmem:[#allocation2 + $0x18a] sm:$0xff] }
 0xb6f   : > { %15927 = vmatprep.subr.msk.bf16.mxu1 %vm224_vm0, %v19730_v36  ;;  %v19872_v23 = vpack.c.bf16 %v11891_v40, %v11890_v53 }
 0xb76   : > { %13929 = vmatpush3.bf16.xpose.msra.mxu1 %v19736_v7 }
 0xb77   : > { %15928 = vmatprep.subr.msk.bf16.mxu1 %vm224_vm0, %v19738_v22 }
 0xb7e   : > { %13931 = vmatpush3.bf16.xpose.msra.mxu1 %v19744_v44 }
 0xb7f   : > { %15929 = vmatprep.subr.msk.bf16.mxu1 %vm224_vm0, %v19746_v59 }
 0xb86   : > { %13933 = vmatpush3.bf16.xpose.msra.mxu1 %v19752_v16 }
 0xb87   : > { %15930 = vmatprep.subr.msk.bf16.mxu1 %vm224_vm0, %v19754_v20 }
 0xb8e   : > { %13935 = vmatpush3.bf16.xpose.msra.mxu1 %v19760_v34 }
 0xb8f   : > { %15931 = vmatprep.subr.msk.bf16.mxu1 %vm224_vm0, %v19762_v60 }
 0xb96   : > { %13937 = vmatpush3.bf16.xpose.msra.mxu1 %v19768_v14 }
 0xb97   : > { %15932 = vmatprep.subr.msk.bf16.mxu1 %vm224_vm0, %v19770_v19 }
 0xb9e   : > { %13939 = vmatpush3.bf16.xpose.msra.mxu1 %v19776_v5 }
 0xb9f   : > { %15933 = vmatprep.subr.msk.bf16.mxu1 %vm224_vm0, %v19872_v23 }
 0xba6   : > { %13941 = vmatpush3.bf16.xpose.msra.mxu1 %v19879_v62 }
 0xba7   : > { %15934 = vmatprep.subr.msk.bf16.mxu1 %vm224_vm0, %v19660_v9  ;;  %v12034_v9 = vld [vmem:[#allocation2 + $0x198] sm:$0xff] }
 0xbad   : > { %13943 = vmatmul.mubr.msk.bf16.vlgmr.msra.gmra.mrb[44].mxu1 %vm224_vm0, %v13286_v31 }
 0xbae   : > { %13945 = vmatpush3.bf16.xpose.msra.mxu1 %v19666_v47  ;;  %13960 = vmatprep.mubr.msk.bf16.mxu1 %vm224_vm0, %v13288_v58  ;;  %v12035_v47 = vld [vmem:[#allocation2 + $0x1a0] sm:$0xff] }
 0xbaf   : > { %15935 = vmatprep.subr.msk.bf16.mxu1 %vm224_vm0, %v19668_v21  ;;  %v12051_v21 = vpack.c.bf16 %v12035_v47, %v12034_v9 }
 0xbb6   : > { %13947 = vmatpush3.bf16.xpose.msra.mxu1 %v19674_v30  ;;  %v12165_v30 = vld [vmem:[#allocation2 + $0xf9] sm:$0xff] }
 0xbb7   : > { %15936 = vmatprep.subr.msk.bf16.mxu1 %vm224_vm0, %v19676_v37  ;;  %v12164_v37 = vld [vmem:[#allocation2 + $0xf1] sm:$0xff] }
 0xbbe   : > { %13949 = vmatpush3.bf16.xpose.msra.mxu1 %v19682_v25  ;;  %v12077_v25 = vsel %vm224_vm0, %v19651_v35, 0 }
 0xbbf   : > { %15937 = vmatprep.subr.msk.bf16.mxu1 %vm224_vm0, %v19684_v27  ;;  %v12188_v27 = vpack.c.bf16 %v12165_v30, %v12164_v37 }
 0xbc6   : > { %13951 = vmatpush3.bf16.xpose.msra.mxu1 %v19690_v1  ;;  %v13290_v1 = vld [vmem:[%s19979_s4 + $0x1c] sm:$0xf] }
 0xbc7   : > { %15938 = vmatprep.subr.msk.bf16.mxu1 %vm224_vm0, %v19692_v52  ;;  %v12322_v52 = vld [vmem:[#allocation2 + $0x19a] sm:$0xff] }
 0xbce   : > { %13953 = vmatpush3.bf16.xpose.msra.mxu1 %v19698_v45  ;;  %v12323_v45 = vld [vmem:[#allocation2 + $0x1a2] sm:$0xff] }
 0xbcf   : > { %15939 = vmatprep.subr.msk.bf16.mxu1 %vm224_vm0, %v19700_v57  ;;  %v12339_v57 = vpack.c.bf16 %v12323_v45, %v12322_v52 }
 0xbd6   : > { %13955 = vmatpush3.bf16.xpose.msra.mxu1 %v19706_v61  ;;  %v12365_v61 = vsel %vm224_vm0, %v19721_v54, 0 }
 0xbd7   : > { %15940 = vmatprep.subr.msk.bf16.mxu1 %vm224_vm0, %v19805_v38 }
 0xbde   : > { %13957 = vmatpush3.bf16.xpose.msra.mxu1 %v19812_v29 }
 0xbdf   : > { %15941 = vmatprep.subr.msk.bf16.mxu1 %vm224_vm0, %v12051_v21 }
 0xbe6   : > { %13959 = vmatpush3.bf16.xpose.msra.mxu1 %v12077_v25 }
 0xbe7   : > { %15942 = vmatprep.subr.msk.bf16.mxu1 %vm224_vm0, %v12188_v27 }
 0xbed   : > { %13961 = vmatmul.mubr.msk.bf16.vlgmr.msra.gmra.mrb[44].mxu1 %vm224_vm0, %v13288_v58 }
 0xbee   : > { %13963 = vmatpush3.bf16.xpose.msra.mxu1 %v19590_v2  ;;  %13978 = vmatprep.mubr.msk.bf16.mxu1 %vm224_vm0, %v13290_v1  ;;  %v12161_v2 = vld [vmem:[#allocation2 + $0xc9] sm:$0xff] }
 0xbef   : > { %15943 = vmatprep.subr.msk.bf16.mxu1 %vm224_vm0, %v19592_v56  ;;  %v12160_v56 = vld [vmem:[#allocation2 + $0xc1] sm:$0xff] }
 0xbf6   : > { %13965 = vmatpush3.bf16.xpose.msra.mxu1 %v19604_v6  ;;  %v12178_v6 = vld [vmem:[#allocation2 + $0x199] sm:$0xff] }
 0xbf7   : > { %15944 = vmatprep.subr.msk.bf16.mxu1 %vm224_vm0, %v19606_v17  ;;  %v12179_v17 = vld [vmem:[#allocation2 + $0x1a1] sm:$0xff] }
 0xbfe   : > { %13967 = vmatpush3.bf16.xpose.msra.mxu1 %v19612_v51  ;;  %v12186_v51 = vpack.c.bf16 %v12161_v2, %v12160_v56 }
 0xbff   : > { %15945 = vmatprep.subr.msk.bf16.mxu1 %vm224_vm0, %v19614_v63  ;;  %v12195_v63 = vpack.c.bf16 %v12179_v17, %v12178_v6 }
 0xc06   : > { %13969 = vmatpush3.bf16.xpose.msra.mxu1 %v19620_v11  ;;  %v12218_v11 = vsel %vm224_vm0, %v12186_v51, 0 }
 0xc07   : > { %15946 = vmatprep.subr.msk.bf16.mxu1 %vm224_vm0, %v19622_v15  ;;  %v12163_v15 = vld [vmem:[#allocation2 + $0xe1] sm:$0xff] }
 0xc0e   : > { %13971 = vmatpush3.bf16.xpose.msra.mxu1 %v19628_v10  ;;  %v12162_v10 = vld [vmem:[#allocation2 + $0xd9] sm:$0xff] }
 0xc0f   : > { %15947 = vmatprep.subr.msk.bf16.mxu1 %vm224_vm0, %v19630_v49  ;;  %v12187_v35 = vpack.c.bf16 %v12163_v15, %v12162_v10 }
 0xc11   : > { %v12221_v49 = vsel %vm224_vm0, %v12187_v35, 0 }
 0xc16   : > { %13973 = vmatpush3.bf16.xpose.msra.mxu1 %v19636_v32  ;;  %v13292_v32 = vld [vmem:[%s19979_s4 + $0x20] sm:$0xf] }
 0xc17   : > { %15948 = vmatprep.subr.msk.bf16.mxu1 %vm224_vm0, %v19840_v43 }
 0xc1e   : > { %13975 = vmatpush3.bf16.xpose.msra.mxu1 %v12218_v11 }
 0xc1f   : > { %15949 = vmatprep.subr.msk.bf16.mxu1 %vm224_vm0, %v12195_v63 }
 0xc26   : > { %13977 = vmatpush3.bf16.xpose.msra.mxu1 %v12221_v49 }
 0xc27   : > { %15950 = vmatprep.subr.msk.bf16.mxu1 %vm224_vm0, %v19730_v36  ;;  %v12438_v36 = vunpack.c.l.s4 %v16109_v26 }
 0xc2d   : > { %13979 = vmatmul.mubr.msk.bf16.vlgmr.msra.gmra.mrb[44].mxu1 %vm224_vm0, %v13290_v1 }
 0xc2e   : > { %13981 = vmatpush3.bf16.xpose.msra.mxu1 %v19736_v7  ;;  %13996 = vmatprep.mubr.msk.bf16.mxu1 %vm224_vm0, %v13292_v32  ;;  %v12440_v7 = vlaneseq }
 0xc2f   : > { %15951 = vmatprep.subr.msk.bf16.mxu1 %vm224_vm0, %v19738_v22  ;;  %v12439_v22 = vunpack.c.0.s8 %v12438_v36 }
 0xc30   : > { %vm12454_vm5 = vcmp.lt.s32.totalorder %v12440_v7, 256 }
 0xc36   : > { %13983 = vmatpush3.bf16.xpose.msra.mxu1 %v19744_v44  ;;  %v12441_v44 = vshrl.u32 %v12440_v7, 7 }
 0xc37   : > { %15952 = vmatprep.subr.msk.bf16.mxu1 %vm224_vm0, %v19746_v59 }
 0xc3e   : > { %13985 = vmatpush3.bf16.xpose.msra.mxu1 %v19752_v16  ;;  %v12442_v16 = vsub.s32 %v12439_v22, %v12441_v44 }
 0xc3f   : > { %15953 = vmatprep.subr.msk.bf16.mxu1 %vm224_vm0, %v19754_v20 }
 0xc46   : > { %13987 = vmatpush3.bf16.xpose.msra.mxu1 %v19760_v34 }
 0xc47   : > { %15954 = vmatprep.subr.msk.bf16.mxu1 %vm224_vm0, %v19762_v60 }
 0xc4e   : > { %13989 = vmatpush3.bf16.xpose.msra.mxu1 %v19768_v14 }
 0xc4f   : > { %15955 = vmatprep.subr.msk.bf16.mxu1 %vm224_vm0, %v19770_v19 }
 0xc56   : > { %13991 = vmatpush3.bf16.xpose.msra.mxu1 %v19776_v5 }
 0xc57   : > { %15956 = vmatprep.subr.msk.bf16.mxu1 %vm224_vm0, %v19872_v23 }
 0xc5e   : > { %13993 = vmatpush3.bf16.xpose.msra.mxu1 %v19879_v62 }
 0xc5f   : > { %15957 = vmatprep.subr.msk.bf16.mxu1 %vm224_vm0, %v12339_v57 }
 0xc66   : > { %13995 = vmatpush3.bf16.xpose.msra.mxu1 %v12365_v61 }
 0xc6d   : > { %13997 = vmatmul.mubr.msk.bf16.vlgmr.msra.gmra.mrb[44].mxu1 %vm224_vm0, %v13292_v32 }
 0xd40   : > { %v12425_v59 = vpop.f32.mrb[44].mxu1 }
 0xd41   : > { %v12427_v20 = vpop.f32.mrb[45].mxu1 }
 0xd42   : > { %v12436_v39 = vcombine.low %v12425_v59, %v12427_v20  ;;  %v12429_v13 = vpop.f32.mrb[46].mxu1 }
 0xd43   : > { %v12430_v34 = vpop.f32.mrb[47].mxu1 }
 0xd44   : > { %v12443_v60 = vrot.slane %v12436_v39, %v12442_v16 }
 0xd46   : > { %v12450_v54 = vrot.slane %v12443_v60, %v12442_v16 }
 0xd48   : > { %12456 = vst.msk [vmem:[%s222_s24] sm:$0x3] %vm12454_vm5, %v12450_v54 }
 0xd49 PF: > { %s15_s18 = sadd.s32 1, %s16105_s18  }
 0xd4a   : > { %p12_p4 = scmp.ge.s32.totalorder %s15_s18, 4  }
 0xd4c   :  { %14 = sbr.rel (!%p12_p4) target bundleno = 1 (0x1), region = 107 }

</bundles_post_ra>
